<compile_context>
chip_gen: v6e
topology: v6e:2x2x1
jax: 0.10.0
libtpu: 0.0.40
codegen_flags: <defaults>
</compile_context>

<pallas_src>
import functools

import jax
import jax.numpy as jnp
from jax.experimental import pallas as pl
from jax.experimental.pallas import tpu as pltpu


def _round_up(x, m):
    return -(-x // m) * m


# ----------------------------------------------------------------------------
# Pallas kernel: fused (patches @ weight) + bias (+ ReLU)
# ----------------------------------------------------------------------------
def _mm_bias_kernel(a_ref, w_ref, b_ref, o_ref, *, relu):
    acc = jnp.dot(a_ref[...], w_ref[...], preferred_element_type=jnp.float32)
    acc = acc + b_ref[...]
    if relu:
        acc = jnp.maximum(acc, 0.0)
    o_ref[...] = acc.astype(o_ref.dtype)


def matmul_bias(a, w, b, *, relu, m_tile_cap=1024):
    """a: (M, K), w: (K, N), b: (N,) -> (M, N), float32.

    N is padded to a multiple of 128 for lane-dense stores; M is tiled with
    tm = min(M, m_tile_cap), ragged last tile handled by Pallas masking.
    """
    m, k = a.shape
    k2, n = w.shape
    assert k == k2
    n_pad = _round_up(n, 128)
    if n_pad != n:
        w = jnp.pad(w, ((0, 0), (0, n_pad - n)))
        b = jnp.pad(b, (0, n_pad - n))

    if m <= m_tile_cap:
        tm = m                 # single full-M block (legal for any M)
    else:
        tm = m_tile_cap        # multiple of 8; last block ragged -> masked
    grid_m = pl.cdiv(m, tm)

    out = pl.pallas_call(
        functools.partial(_mm_bias_kernel, relu=relu),
        out_shape=jax.ShapeDtypeStruct((m, n_pad), jnp.float32),
        grid=(grid_m,),
        in_specs=[
            pl.BlockSpec((tm, k), lambda i: (i, 0)),
            pl.BlockSpec((k, n_pad), lambda i: (0, 0)),
            pl.BlockSpec((1, n_pad), lambda i: (0, 0)),
        ],
        out_specs=pl.BlockSpec((tm, n_pad), lambda i: (i, 0)),
        compiler_params=pltpu.CompilerParams(
            dimension_semantics=("parallel",),
            vmem_limit_bytes=32 << 20,
        ),
    )(a.astype(jnp.float32), w.astype(jnp.float32),
      b.reshape(1, n_pad).astype(jnp.float32))

    if n_pad != n:
        out = out[:, :n]
    return out


# ----------------------------------------------------------------------------
# Plain-JAX glue: patch extraction (im2col), dilation for d3 transposed conv.
# ----------------------------------------------------------------------------
def _im2col3d(x, ksize, stride, padding):
    kd, kh, kw = ksize
    sd, sh, sw = stride
    pd, ph, pw = padding
    x = jnp.pad(x, ((0, 0), (0, 0), (pd, pd), (ph, ph), (pw, pw)))
    n, c, d, h, w = x.shape
    do = (d - kd) // sd + 1
    ho = (h - kh) // sh + 1
    wo = (w - kw) // sw + 1
    cols = []
    for dz in range(kd):
        for dy in range(kh):
            for dx in range(kw):
                cols.append(
                    x[:, :,
                      dz:dz + (do - 1) * sd + 1:sd,
                      dy:dy + (ho - 1) * sh + 1:sh,
                      dx:dx + (wo - 1) * sw + 1:sw])
    p = jnp.stack(cols, axis=2)                # (n, c, kd*kh*kw, do, ho, wo)
    p = p.transpose(0, 3, 4, 5, 1, 2)          # (n, do, ho, wo, c, k3)
    return p.reshape(n * do * ho * wo, c * kd * kh * kw), (n, do, ho, wo)


def _im2col2d(x, ksize, stride, padding):
    kh, kw = ksize
    sh, sw = stride
    ph, pw = padding
    x = jnp.pad(x, ((0, 0), (0, 0), (ph, ph), (pw, pw)))
    n, c, h, w = x.shape
    ho = (h - kh) // sh + 1
    wo = (w - kw) // sw + 1
    cols = []
    for dy in range(kh):
        for dx in range(kw):
            cols.append(
                x[:, :,
                  dy:dy + (ho - 1) * sh + 1:sh,
                  dx:dx + (wo - 1) * sw + 1:sw])
    p = jnp.stack(cols, axis=2)                # (n, c, kh*kw, ho, wo)
    p = p.transpose(0, 3, 4, 1, 2)             # (n, ho, wo, c, k2)
    return p.reshape(n * ho * wo, c * kh * kw), (n, ho, wo)


def conv3d(x, w, b, *, stride, padding, relu):
    cout, cin, kd, kh, kw = w.shape
    patches, (n, do, ho, wo) = _im2col3d(x, (kd, kh, kw), stride, padding)
    wmat = w.reshape(cout, cin * kd * kh * kw).T
    out = matmul_bias(patches, wmat, b, relu=relu)
    return out.reshape(n, do, ho, wo, cout).transpose(0, 4, 1, 2, 3)


def conv2d(x, w, b, *, stride, padding, relu):
    cout, cin, kh, kw = w.shape
    patches, (n, ho, wo) = _im2col2d(x, (kh, kw), stride, padding)
    wmat = w.reshape(cout, cin * kh * kw).T
    out = matmul_bias(patches, wmat, b, relu=relu)
    return out.reshape(n, ho, wo, cout).transpose(0, 3, 1, 2)


def conv_transpose2d_shuffle(x, w_t, b, *, stride, padding, relu):
    """ConvTranspose2d with kernel == stride and output_padding == 0.

    Exact pixel-shuffle formulation: each input pixel produces a disjoint
    k x k output block (no overlap-add), then crop `padding` on each side.
    Avoids zero-dilated inputs (8/9 wasted MACs) entirely.
    """
    cin, cout, kh, kw = w_t.shape
    assert kh == kw == stride
    n, c, h, w = x.shape
    assert c == cin
    a = x.transpose(0, 2, 3, 1).reshape(n * h * w, cin)
    wmat = w_t.reshape(cin, cout * kh * kw)
    bvec = jnp.repeat(b, kh * kw)
    out = matmul_bias(a, wmat, bvec, relu=relu)          # (n*h*w, cout*kh*kw)
    out = out.reshape(n, h, w, cout, kh, kw).transpose(0, 3, 1, 4, 2, 5)
    out = out.reshape(n, cout, h * kh, w * kw)
    if padding:
        out = out[:, :, padding:-padding, padding:-padding]
    return out


def conv_transpose2d(x, w_t, b, *, stride, padding, output_padding, relu):
    """General ConvTranspose2d via zero-dilation + flipped-kernel conv (k > s)."""
    cin, cout, kh, kw = w_t.shape
    s, p, op = stride, padding, output_padding
    n, c, h, w = x.shape
    xd = jnp.zeros((n, c, (h - 1) * s + 1, (w - 1) * s + 1), x.dtype)
    xd = xd.at[:, :, ::s, ::s].set(x)
    lo_h, hi_h = kh - 1 - p, kh - 1 - p + op
    lo_w, hi_w = kw - 1 - p, kw - 1 - p + op
    xd = jnp.pad(xd, ((0, 0), (0, 0), (lo_h, hi_h), (lo_w, hi_w)))
    w_conv = jnp.flip(w_t, axis=(2, 3)).transpose(1, 0, 2, 3)
    return conv2d(xd, w_conv, b, stride=(1, 1), padding=(0, 0), relu=relu)


def _bn_fold(w, gamma, beta, mean, var, *, channel_axis, eps=1e-5):
    scale = gamma / jnp.sqrt(var + eps)
    shift = beta - mean * scale
    shape = [1] * w.ndim
    shape[channel_axis] = -1
    return w * scale.reshape(shape), shift


# ----------------------------------------------------------------------------
# Model: deterministic parameter init + forward
# ----------------------------------------------------------------------------
def init_params(key):
    ks = jax.random.split(key, 16)
    f32 = jnp.float32
    p = {
        "c1_w": 0.05 * jax.random.normal(ks[0], (16, 1, 3, 3, 3), f32),
        "c1_b": 0.05 * jax.random.normal(ks[1], (16,), f32),
        "c2_w": 0.05 * jax.random.normal(ks[2], (64, 16, 3, 3, 3), f32),
        "bn1_g": 1.0 + 0.1 * jax.random.normal(ks[3], (64,), f32),
        "bn1_b": 0.05 * jax.random.normal(ks[4], (64,), f32),
        "bn1_m": 0.05 * jax.random.normal(ks[5], (64,), f32),
        "bn1_v": 0.5 + jax.random.uniform(ks[6], (64,), f32),
        "c3_w": 0.05 * jax.random.normal(ks[7], (128, 64, 1, 3, 3), f32),
        "c3_b": 0.05 * jax.random.normal(ks[8], (128,), f32),
        "fc_w": 0.02 * jax.random.normal(ks[9], (1152, 1152), f32),  # (out, in)
        "fc_b": 0.05 * jax.random.normal(ks[10], (1152,), f32),
        "d1_w": 0.05 * jax.random.normal(ks[11], (128, 64, 3, 3), f32),
        "bn2_g": 1.0 + 0.1 * jax.random.normal(ks[12], (64,), f32),
        "bn2_b": 0.05 * jax.random.normal(ks[13], (64,), f32),
        "bn2_m": 0.05 * jax.random.normal(ks[14], (64,), f32),
        "bn2_v": 0.5 + jax.random.uniform(ks[15], (64,), f32),
        "d2_w": 0.05 * jax.random.normal(ks[0], (64, 16, 3, 3), f32),
        "d2_b": 0.05 * jax.random.normal(ks[1], (16,), f32),
        "d3_w": 0.05 * jax.random.normal(ks[2], (16, 1, 3, 3), f32),
        "d3_b": 0.05 * jax.random.normal(ks[3], (1,), f32),
    }
    return p


def conv_model_forward(p, x):
    # ---- encoder (3D convs, NCDHW) ----
    x = conv3d(x, p["c1_w"], p["c1_b"],
               stride=(1, 2, 2), padding=(1, 1, 1), relu=True)      # (N,16,3,25,25)
    w2, b2 = _bn_fold(p["c2_w"], p["bn1_g"], p["bn1_b"], p["bn1_m"],
                      p["bn1_v"], channel_axis=0)
    x = conv3d(x, w2, b2,
               stride=(1, 3, 3), padding=(0, 1, 1), relu=True)      # (N,64,1,9,9)
    x = conv3d(x, p["c3_w"], p["c3_b"],
               stride=(1, 3, 3), padding=(0, 0, 0), relu=True)      # (N,128,1,3,3)

    # ---- dense (Flatten -> Linear -> Dropout(eval) -> ReLU -> Unflatten) ----
    n = x.shape[0]
    x = x.reshape(n, -1)                                            # (N,1152)
    x = matmul_bias(x, p["fc_w"].T, p["fc_b"], relu=True)           # (N,1152)
    x = x.reshape(n, 128, 3, 3)

    # ---- decoder (2D transposed convs, NCHW) ----
    w_d1, b_d1 = _bn_fold(p["d1_w"], p["bn2_g"], p["bn2_b"], p["bn2_m"],
                          p["bn2_v"], channel_axis=1)
    x = conv_transpose2d_shuffle(x, w_d1, b_d1,
                                 stride=3, padding=0, relu=True)            # (N,64,9,9)
    x = conv_transpose2d_shuffle(x, p["d2_w"], p["d2_b"],
                                 stride=3, padding=1, relu=True)            # (N,16,25,25)
    x = conv_transpose2d(x, p["d3_w"], p["d3_b"],
                         stride=2, padding=1, output_padding=1, relu=False)  # (N,1,50,50)
    return x


if __name__ == "__main__":
    # Input spatial size is pinned by Linear(1152, 1152): (N, 1, 3, 50, 50).
    x = jax.random.normal(jax.random.PRNGKey(0), (2, 1, 3, 50, 50), jnp.float32)
    params = init_params(jax.random.PRNGKey(42))

    out = jax.jit(conv_model_forward)(params, x)
    out = jax.block_until_ready(out)

    assert out.shape == (2, 1, 50, 50), out.shape
    assert out.dtype == jnp.float32
    assert bool(jnp.all(jnp.isfinite(out)))
    print("KERNEL_OK")
</pallas_src>

<mosaic_0001>
module attributes {stable_mosaic.version = 11 : i64} {
  func.func @_mm_bias_kernel(%arg0: i32, %arg1: memref<1024x27xf32, #tpu.memory_space<vmem>>, %arg2: memref<27x128xf32, #tpu.memory_space<vmem>>, %arg3: memref<1x128xf32, #tpu.memory_space<vmem>>, %arg4: memref<1024x128xf32, #tpu.memory_space<vmem>>) attributes {dimension_semantics = [#tpu.dimension_semantics<parallel>], iteration_bounds = array<i64: 4>, scalar_prefetch = 0 : i64, scratch_operands = 0 : i64, tpu.core_type = #tpu.core_type<tc>, window_params = [{transform_indices = @transform_0, window_bounds = array<i64: 1024, 27>}, {pipeline_mode = #tpu.pipeline_mode<synchronous>, transform_indices = @transform_1, window_bounds = array<i64: 27, 128>}, {pipeline_mode = #tpu.pipeline_mode<synchronous>, transform_indices = @transform_2, window_bounds = array<i64: 1, 128>}, {transform_indices = @transform_3, window_bounds = array<i64: 1024, 128>}]} {
    %c0 = arith.constant 0 : index
    %c0_0 = arith.constant 0 : index
    %0 = vector.load %arg1[%c0, %c0_0] : memref<1024x27xf32, #tpu.memory_space<vmem>>, vector<1024x27xf32>
    %c0_1 = arith.constant 0 : index
    %c0_2 = arith.constant 0 : index
    %1 = vector.load %arg2[%c0_1, %c0_2] : memref<27x128xf32, #tpu.memory_space<vmem>>, vector<27x128xf32>
    %cst = arith.constant dense<0.000000e+00> : vector<1024x128xf32>
    %2 = tpu.matmul %0, %1, %cst {dimension_numbers = #tpu.dot_dimension_numbers<[1], [0], [0], [1], [0, 0, 1, 1], [], []>} : vector<1024x27xf32>, vector<27x128xf32>, vector<1024x128xf32> -> vector<1024x128xf32>
    %c0_3 = arith.constant 0 : index
    %c0_4 = arith.constant 0 : index
    %3 = vector.load %arg3[%c0_3, %c0_4] : memref<1x128xf32, #tpu.memory_space<vmem>>, vector<1x128xf32>
    %4 = vector.broadcast %3 : vector<1x128xf32> to vector<1024x128xf32>
    %5 = arith.addf %2, %4 : vector<1024x128xf32>
    %cst_5 = arith.constant 0.000000e+00 : f32
    %6 = vector.broadcast %cst_5 : f32 to vector<1024x128xf32>
    %7 = arith.maximumf %5, %6 : vector<1024x128xf32>
    %c0_6 = arith.constant 0 : index
    %c0_7 = arith.constant 0 : index
    %8 = vector.load %arg4[%c0_6, %c0_7] : memref<1024x128xf32, #tpu.memory_space<vmem>>, vector<1024x128xf32>
    tpu.vector_store %arg4[%c0_6, %c0_7], %7 {strides = array<i32>} : memref<1024x128xf32, #tpu.memory_space<vmem>>, vector<1024x128xf32>,
    return
  }
  func.func @transform_0(%arg0: i32) -> (i32, i32) {
    %c0_i32 = arith.constant 0 : i32
    %c0_i32_0 = arith.constant 0 : i32
    return %arg0, %c0_i32 : i32, i32
  }
  func.func @transform_1(%arg0: i32) -> (i32, i32) {
    %c0_i32 = arith.constant 0 : i32
    %c0_i32_0 = arith.constant 0 : i32
    %c0_i32_1 = arith.constant 0 : i32
    return %c0_i32, %c0_i32_0 : i32, i32
  }
  func.func @transform_2(%arg0: i32) -> (i32, i32) {
    %c0_i32 = arith.constant 0 : i32
    %c0_i32_0 = arith.constant 0 : i32
    %c0_i32_1 = arith.constant 0 : i32
    return %c0_i32, %c0_i32_0 : i32, i32
  }
  func.func @transform_3(%arg0: i32) -> (i32, i32) {
    %c0_i32 = arith.constant 0 : i32
    %c0_i32_0 = arith.constant 0 : i32
    return %arg0, %c0_i32 : i32, i32
  }
}

module attributes {stable_mosaic.version = 11 : i64} {
  func.func @_mm_bias_kernel(%arg0: i32, %arg1: memref<162x432xf32, #tpu.memory_space<vmem>>, %arg2: memref<432x128xf32, #tpu.memory_space<vmem>>, %arg3: memref<1x128xf32, #tpu.memory_space<vmem>>, %arg4: memref<162x128xf32, #tpu.memory_space<vmem>>) attributes {dimension_semantics = [#tpu.dimension_semantics<parallel>], iteration_bounds = array<i64: 1>, scalar_prefetch = 0 : i64, scratch_operands = 0 : i64, tpu.core_type = #tpu.core_type<tc>, window_params = [{transform_indices = @transform_0, window_bounds = array<i64: 162, 432>}, {pipeline_mode = #tpu.pipeline_mode<synchronous>, transform_indices = @transform_1, window_bounds = array<i64: 432, 128>}, {pipeline_mode = #tpu.pipeline_mode<synchronous>, transform_indices = @transform_2, window_bounds = array<i64: 1, 128>}, {transform_indices = @transform_3, window_bounds = array<i64: 162, 128>}]} {
    %c0 = arith.constant 0 : index
    %c0_0 = arith.constant 0 : index
    %0 = vector.load %arg1[%c0, %c0_0] : memref<162x432xf32, #tpu.memory_space<vmem>>, vector<162x432xf32>
    %c0_1 = arith.constant 0 : index
    %c0_2 = arith.constant 0 : index
    %1 = vector.load %arg2[%c0_1, %c0_2] : memref<432x128xf32, #tpu.memory_space<vmem>>, vector<432x128xf32>
    %cst = arith.constant dense<0.000000e+00> : vector<162x128xf32>
    %2 = tpu.matmul %0, %1, %cst {dimension_numbers = #tpu.dot_dimension_numbers<[1], [0], [0], [1], [0, 0, 1, 1], [], []>} : vector<162x432xf32>, vector<432x128xf32>, vector<162x128xf32> -> vector<162x128xf32>
    %c0_3 = arith.constant 0 : index
    %c0_4 = arith.constant 0 : index
    %3 = vector.load %arg3[%c0_3, %c0_4] : memref<1x128xf32, #tpu.memory_space<vmem>>, vector<1x128xf32>
    %4 = vector.broadcast %3 : vector<1x128xf32> to vector<162x128xf32>
    %5 = arith.addf %2, %4 : vector<162x128xf32>
    %cst_5 = arith.constant 0.000000e+00 : f32
    %6 = vector.broadcast %cst_5 : f32 to vector<162x128xf32>
    %7 = arith.maximumf %5, %6 : vector<162x128xf32>
    %c0_6 = arith.constant 0 : index
    %c0_7 = arith.constant 0 : index
    %8 = vector.load %arg4[%c0_6, %c0_7] : memref<162x128xf32, #tpu.memory_space<vmem>>, vector<162x128xf32>
    tpu.vector_store %arg4[%c0_6, %c0_7], %7 {strides = array<i32>} : memref<162x128xf32, #tpu.memory_space<vmem>>, vector<162x128xf32>,
    return
  }
  func.func @transform_0(%arg0: i32) -> (i32, i32) {
    %c0_i32 = arith.constant 0 : i32
    %c0_i32_0 = arith.constant 0 : i32
    return %arg0, %c0_i32 : i32, i32
  }
  func.func @transform_1(%arg0: i32) -> (i32, i32) {
    %c0_i32 = arith.constant 0 : i32
    %c0_i32_0 = arith.constant 0 : i32
    %c0_i32_1 = arith.constant 0 : i32
    return %c0_i32, %c0_i32_0 : i32, i32
  }
  func.func @transform_2(%arg0: i32) -> (i32, i32) {
    %c0_i32 = arith.constant 0 : i32
    %c0_i32_0 = arith.constant 0 : i32
    %c0_i32_1 = arith.constant 0 : i32
    return %c0_i32, %c0_i32_0 : i32, i32
  }
  func.func @transform_3(%arg0: i32) -> (i32, i32) {
    %c0_i32 = arith.constant 0 : i32
    %c0_i32_0 = arith.constant 0 : i32
    return %arg0, %c0_i32 : i32, i32
  }
}

module attributes {stable_mosaic.version = 11 : i64} {
  func.func @_mm_bias_kernel(%arg0: i32, %arg1: memref<18x576xf32, #tpu.memory_space<vmem>>, %arg2: memref<576x128xf32, #tpu.memory_space<vmem>>, %arg3: memref<1x128xf32, #tpu.memory_space<vmem>>, %arg4: memref<18x128xf32, #tpu.memory_space<vmem>>) attributes {dimension_semantics = [#tpu.dimension_semantics<parallel>], iteration_bounds = array<i64: 1>, scalar_prefetch = 0 : i64, scratch_operands = 0 : i64, tpu.core_type = #tpu.core_type<tc>, window_params = [{transform_indices = @transform_0, window_bounds = array<i64: 18, 576>}, {pipeline_mode = #tpu.pipeline_mode<synchronous>, transform_indices = @transform_1, window_bounds = array<i64: 576, 128>}, {pipeline_mode = #tpu.pipeline_mode<synchronous>, transform_indices = @transform_2, window_bounds = array<i64: 1, 128>}, {transform_indices = @transform_3, window_bounds = array<i64: 18, 128>}]} {
    %c0 = arith.constant 0 : index
    %c0_0 = arith.constant 0 : index
    %0 = vector.load %arg1[%c0, %c0_0] : memref<18x576xf32, #tpu.memory_space<vmem>>, vector<18x576xf32>
    %c0_1 = arith.constant 0 : index
    %c0_2 = arith.constant 0 : index
    %1 = vector.load %arg2[%c0_1, %c0_2] : memref<576x128xf32, #tpu.memory_space<vmem>>, vector<576x128xf32>
    %cst = arith.constant dense<0.000000e+00> : vector<18x128xf32>
    %2 = tpu.matmul %0, %1, %cst {dimension_numbers = #tpu.dot_dimension_numbers<[1], [0], [0], [1], [0, 0, 1, 1], [], []>} : vector<18x576xf32>, vector<576x128xf32>, vector<18x128xf32> -> vector<18x128xf32>
    %c0_3 = arith.constant 0 : index
    %c0_4 = arith.constant 0 : index
    %3 = vector.load %arg3[%c0_3, %c0_4] : memref<1x128xf32, #tpu.memory_space<vmem>>, vector<1x128xf32>
    %4 = vector.broadcast %3 : vector<1x128xf32> to vector<18x128xf32>
    %5 = arith.addf %2, %4 : vector<18x128xf32>
    %cst_5 = arith.constant 0.000000e+00 : f32
    %6 = vector.broadcast %cst_5 : f32 to vector<18x128xf32>
    %7 = arith.maximumf %5, %6 : vector<18x128xf32>
    %c0_6 = arith.constant 0 : index
    %c0_7 = arith.constant 0 : index
    %8 = vector.load %arg4[%c0_6, %c0_7] : memref<18x128xf32, #tpu.memory_space<vmem>>, vector<18x128xf32>
    tpu.vector_store %arg4[%c0_6, %c0_7], %7 {strides = array<i32>} : memref<18x128xf32, #tpu.memory_space<vmem>>, vector<18x128xf32>,
    return
  }
  func.func @transform_0(%arg0: i32) -> (i32, i32) {
    %c0_i32 = arith.constant 0 : i32
    %c0_i32_0 = arith.constant 0 : i32
    return %arg0, %c0_i32 : i32, i32
  }
  func.func @transform_1(%arg0: i32) -> (i32, i32) {
    %c0_i32 = arith.constant 0 : i32
    %c0_i32_0 = arith.constant 0 : i32
    %c0_i32_1 = arith.constant 0 : i32
    return %c0_i32, %c0_i32_0 : i32, i32
  }
  func.func @transform_2(%arg0: i32) -> (i32, i32) {
    %c0_i32 = arith.constant 0 : i32
    %c0_i32_0 = arith.constant 0 : i32
    %c0_i32_1 = arith.constant 0 : i32
    return %c0_i32, %c0_i32_0 : i32, i32
  }
  func.func @transform_3(%arg0: i32) -> (i32, i32) {
    %c0_i32 = arith.constant 0 : i32
    %c0_i32_0 = arith.constant 0 : i32
    return %arg0, %c0_i32 : i32, i32
  }
}

module attributes {stable_mosaic.version = 11 : i64} {
  func.func @_mm_bias_kernel(%arg0: i32, %arg1: memref<2x1152xf32, #tpu.memory_space<vmem>>, %arg2: memref<1152x1152xf32, #tpu.memory_space<vmem>>, %arg3: memref<1x1152xf32, #tpu.memory_space<vmem>>, %arg4: memref<2x1152xf32, #tpu.memory_space<vmem>>) attributes {dimension_semantics = [#tpu.dimension_semantics<parallel>], iteration_bounds = array<i64: 1>, scalar_prefetch = 0 : i64, scratch_operands = 0 : i64, tpu.core_type = #tpu.core_type<tc>, window_params = [{transform_indices = @transform_0, window_bounds = array<i64: 2, 1152>}, {pipeline_mode = #tpu.pipeline_mode<synchronous>, transform_indices = @transform_1, window_bounds = array<i64: 1152, 1152>}, {pipeline_mode = #tpu.pipeline_mode<synchronous>, transform_indices = @transform_2, window_bounds = array<i64: 1, 1152>}, {transform_indices = @transform_3, window_bounds = array<i64: 2, 1152>}]} {
    %c0 = arith.constant 0 : index
    %c0_0 = arith.constant 0 : index
    %0 = vector.load %arg1[%c0, %c0_0] : memref<2x1152xf32, #tpu.memory_space<vmem>>, vector<2x1152xf32>
    %c0_1 = arith.constant 0 : index
    %c0_2 = arith.constant 0 : index
    %1 = vector.load %arg2[%c0_1, %c0_2] : memref<1152x1152xf32, #tpu.memory_space<vmem>>, vector<1152x1152xf32>
    %cst = arith.constant dense<0.000000e+00> : vector<2x1152xf32>
    %2 = tpu.matmul %0, %1, %cst {dimension_numbers = #tpu.dot_dimension_numbers<[1], [0], [0], [1], [0, 0, 1, 1], [], []>} : vector<2x1152xf32>, vector<1152x1152xf32>, vector<2x1152xf32> -> vector<2x1152xf32>
    %c0_3 = arith.constant 0 : index
    %c0_4 = arith.constant 0 : index
    %3 = vector.load %arg3[%c0_3, %c0_4] : memref<1x1152xf32, #tpu.memory_space<vmem>>, vector<1x1152xf32>
    %4 = vector.broadcast %3 : vector<1x1152xf32> to vector<2x1152xf32>
    %5 = arith.addf %2, %4 : vector<2x1152xf32>
    %cst_5 = arith.constant 0.000000e+00 : f32
    %6 = vector.broadcast %cst_5 : f32 to vector<2x1152xf32>
    %7 = arith.maximumf %5, %6 : vector<2x1152xf32>
    %c0_6 = arith.constant 0 : index
    %c0_7 = arith.constant 0 : index
    %8 = vector.load %arg4[%c0_6, %c0_7] : memref<2x1152xf32, #tpu.memory_space<vmem>>, vector<2x1152xf32>
    tpu.vector_store %arg4[%c0_6, %c0_7], %7 {strides = array<i32>} : memref<2x1152xf32, #tpu.memory_space<vmem>>, vector<2x1152xf32>,
    return
  }
  func.func @transform_0(%arg0: i32) -> (i32, i32) {
    %c0_i32 = arith.constant 0 : i32
    %c0_i32_0 = arith.constant 0 : i32
    return %arg0, %c0_i32 : i32, i32
  }
  func.func @transform_1(%arg0: i32) -> (i32, i32) {
    %c0_i32 = arith.constant 0 : i32
    %c0_i32_0 = arith.constant 0 : i32
    %c0_i32_1 = arith.constant 0 : i32
    return %c0_i32, %c0_i32_0 : i32, i32
  }
  func.func @transform_2(%arg0: i32) -> (i32, i32) {
    %c0_i32 = arith.constant 0 : i32
    %c0_i32_0 = arith.constant 0 : i32
    %c0_i32_1 = arith.constant 0 : i32
    return %c0_i32, %c0_i32_0 : i32, i32
  }
  func.func @transform_3(%arg0: i32) -> (i32, i32) {
    %c0_i32 = arith.constant 0 : i32
    %c0_i32_0 = arith.constant 0 : i32
    return %arg0, %c0_i32 : i32, i32
  }
}

module attributes {stable_mosaic.version = 11 : i64} {
  func.func @_mm_bias_kernel(%arg0: i32, %arg1: memref<18x128xf32, #tpu.memory_space<vmem>>, %arg2: memref<128x640xf32, #tpu.memory_space<vmem>>, %arg3: memref<1x640xf32, #tpu.memory_space<vmem>>, %arg4: memref<18x640xf32, #tpu.memory_space<vmem>>) attributes {dimension_semantics = [#tpu.dimension_semantics<parallel>], iteration_bounds = array<i64: 1>, scalar_prefetch = 0 : i64, scratch_operands = 0 : i64, tpu.core_type = #tpu.core_type<tc>, window_params = [{transform_indices = @transform_0, window_bounds = array<i64: 18, 128>}, {pipeline_mode = #tpu.pipeline_mode<synchronous>, transform_indices = @transform_1, window_bounds = array<i64: 128, 640>}, {pipeline_mode = #tpu.pipeline_mode<synchronous>, transform_indices = @transform_2, window_bounds = array<i64: 1, 640>}, {transform_indices = @transform_3, window_bounds = array<i64: 18, 640>}]} {
    %c0 = arith.constant 0 : index
    %c0_0 = arith.constant 0 : index
    %0 = vector.load %arg1[%c0, %c0_0] : memref<18x128xf32, #tpu.memory_space<vmem>>, vector<18x128xf32>
    %c0_1 = arith.constant 0 : index
    %c0_2 = arith.constant 0 : index
    %1 = vector.load %arg2[%c0_1, %c0_2] : memref<128x640xf32, #tpu.memory_space<vmem>>, vector<128x640xf32>
    %cst = arith.constant dense<0.000000e+00> : vector<18x640xf32>
    %2 = tpu.matmul %0, %1, %cst {dimension_numbers = #tpu.dot_dimension_numbers<[1], [0], [0], [1], [0, 0, 1, 1], [], []>} : vector<18x128xf32>, vector<128x640xf32>, vector<18x640xf32> -> vector<18x640xf32>
    %c0_3 = arith.constant 0 : index
    %c0_4 = arith.constant 0 : index
    %3 = vector.load %arg3[%c0_3, %c0_4] : memref<1x640xf32, #tpu.memory_space<vmem>>, vector<1x640xf32>
    %4 = vector.broadcast %3 : vector<1x640xf32> to vector<18x640xf32>
    %5 = arith.addf %2, %4 : vector<18x640xf32>
    %cst_5 = arith.constant 0.000000e+00 : f32
    %6 = vector.broadcast %cst_5 : f32 to vector<18x640xf32>
    %7 = arith.maximumf %5, %6 : vector<18x640xf32>
    %c0_6 = arith.constant 0 : index
    %c0_7 = arith.constant 0 : index
    %8 = vector.load %arg4[%c0_6, %c0_7] : memref<18x640xf32, #tpu.memory_space<vmem>>, vector<18x640xf32>
    tpu.vector_store %arg4[%c0_6, %c0_7], %7 {strides = array<i32>} : memref<18x640xf32, #tpu.memory_space<vmem>>, vector<18x640xf32>,
    return
  }
  func.func @transform_0(%arg0: i32) -> (i32, i32) {
    %c0_i32 = arith.constant 0 : i32
    %c0_i32_0 = arith.constant 0 : i32
    return %arg0, %c0_i32 : i32, i32
  }
  func.func @transform_1(%arg0: i32) -> (i32, i32) {
    %c0_i32 = arith.constant 0 : i32
    %c0_i32_0 = arith.constant 0 : i32
    %c0_i32_1 = arith.constant 0 : i32
    return %c0_i32, %c0_i32_0 : i32, i32
  }
  func.func @transform_2(%arg0: i32) -> (i32, i32) {
    %c0_i32 = arith.constant 0 : i32
    %c0_i32_0 = arith.constant 0 : i32
    %c0_i32_1 = arith.constant 0 : i32
    return %c0_i32, %c0_i32_0 : i32, i32
  }
  func.func @transform_3(%arg0: i32) -> (i32, i32) {
    %c0_i32 = arith.constant 0 : i32
    %c0_i32_0 = arith.constant 0 : i32
    return %arg0, %c0_i32 : i32, i32
  }
}

module attributes {stable_mosaic.version = 11 : i64} {
  func.func @_mm_bias_kernel(%arg0: i32, %arg1: memref<162x64xf32, #tpu.memory_space<vmem>>, %arg2: memref<64x256xf32, #tpu.memory_space<vmem>>, %arg3: memref<1x256xf32, #tpu.memory_space<vmem>>, %arg4: memref<162x256xf32, #tpu.memory_space<vmem>>) attributes {dimension_semantics = [#tpu.dimension_semantics<parallel>], iteration_bounds = array<i64: 1>, scalar_prefetch = 0 : i64, scratch_operands = 0 : i64, tpu.core_type = #tpu.core_type<tc>, window_params = [{transform_indices = @transform_0, window_bounds = array<i64: 162, 64>}, {pipeline_mode = #tpu.pipeline_mode<synchronous>, transform_indices = @transform_1, window_bounds = array<i64: 64, 256>}, {pipeline_mode = #tpu.pipeline_mode<synchronous>, transform_indices = @transform_2, window_bounds = array<i64: 1, 256>}, {transform_indices = @transform_3, window_bounds = array<i64: 162, 256>}]} {
    %c0 = arith.constant 0 : index
    %c0_0 = arith.constant 0 : index
    %0 = vector.load %arg1[%c0, %c0_0] : memref<162x64xf32, #tpu.memory_space<vmem>>, vector<162x64xf32>
    %c0_1 = arith.constant 0 : index
    %c0_2 = arith.constant 0 : index
    %1 = vector.load %arg2[%c0_1, %c0_2] : memref<64x256xf32, #tpu.memory_space<vmem>>, vector<64x256xf32>
    %cst = arith.constant dense<0.000000e+00> : vector<162x256xf32>
    %2 = tpu.matmul %0, %1, %cst {dimension_numbers = #tpu.dot_dimension_numbers<[1], [0], [0], [1], [0, 0, 1, 1], [], []>} : vector<162x64xf32>, vector<64x256xf32>, vector<162x256xf32> -> vector<162x256xf32>
    %c0_3 = arith.constant 0 : index
    %c0_4 = arith.constant 0 : index
    %3 = vector.load %arg3[%c0_3, %c0_4] : memref<1x256xf32, #tpu.memory_space<vmem>>, vector<1x256xf32>
    %4 = vector.broadcast %3 : vector<1x256xf32> to vector<162x256xf32>
    %5 = arith.addf %2, %4 : vector<162x256xf32>
    %cst_5 = arith.constant 0.000000e+00 : f32
    %6 = vector.broadcast %cst_5 : f32 to vector<162x256xf32>
    %7 = arith.maximumf %5, %6 : vector<162x256xf32>
    %c0_6 = arith.constant 0 : index
    %c0_7 = arith.constant 0 : index
    %8 = vector.load %arg4[%c0_6, %c0_7] : memref<162x256xf32, #tpu.memory_space<vmem>>, vector<162x256xf32>
    tpu.vector_store %arg4[%c0_6, %c0_7], %7 {strides = array<i32>} : memref<162x256xf32, #tpu.memory_space<vmem>>, vector<162x256xf32>,
    return
  }
  func.func @transform_0(%arg0: i32) -> (i32, i32) {
    %c0_i32 = arith.constant 0 : i32
    %c0_i32_0 = arith.constant 0 : i32
    return %arg0, %c0_i32 : i32, i32
  }
  func.func @transform_1(%arg0: i32) -> (i32, i32) {
    %c0_i32 = arith.constant 0 : i32
    %c0_i32_0 = arith.constant 0 : i32
    %c0_i32_1 = arith.constant 0 : i32
    return %c0_i32, %c0_i32_0 : i32, i32
  }
  func.func @transform_2(%arg0: i32) -> (i32, i32) {
    %c0_i32 = arith.constant 0 : i32
    %c0_i32_0 = arith.constant 0 : i32
    %c0_i32_1 = arith.constant 0 : i32
    return %c0_i32, %c0_i32_0 : i32, i32
  }
  func.func @transform_3(%arg0: i32) -> (i32, i32) {
    %c0_i32 = arith.constant 0 : i32
    %c0_i32_0 = arith.constant 0 : i32
    return %arg0, %c0_i32 : i32, i32
  }
}

module attributes {stable_mosaic.version = 11 : i64} {
  func.func @_mm_bias_kernel(%arg0: i32, %arg1: memref<1024x144xf32, #tpu.memory_space<vmem>>, %arg2: memref<144x128xf32, #tpu.memory_space<vmem>>, %arg3: memref<1x128xf32, #tpu.memory_space<vmem>>, %arg4: memref<1024x128xf32, #tpu.memory_space<vmem>>) attributes {dimension_semantics = [#tpu.dimension_semantics<parallel>], iteration_bounds = array<i64: 5>, scalar_prefetch = 0 : i64, scratch_operands = 0 : i64, tpu.core_type = #tpu.core_type<tc>, window_params = [{transform_indices = @transform_0, window_bounds = array<i64: 1024, 144>}, {pipeline_mode = #tpu.pipeline_mode<synchronous>, transform_indices = @transform_1, window_bounds = array<i64: 144, 128>}, {pipeline_mode = #tpu.pipeline_mode<synchronous>, transform_indices = @transform_2, window_bounds = array<i64: 1, 128>}, {transform_indices = @transform_3, window_bounds = array<i64: 1024, 128>}]} {
    %c0 = arith.constant 0 : index
    %c0_0 = arith.constant 0 : index
    %0 = vector.load %arg1[%c0, %c0_0] : memref<1024x144xf32, #tpu.memory_space<vmem>>, vector<1024x144xf32>
    %c0_1 = arith.constant 0 : index
    %c0_2 = arith.constant 0 : index
    %1 = vector.load %arg2[%c0_1, %c0_2] : memref<144x128xf32, #tpu.memory_space<vmem>>, vector<144x128xf32>
    %cst = arith.constant dense<0.000000e+00> : vector<1024x128xf32>
    %2 = tpu.matmul %0, %1, %cst {dimension_numbers = #tpu.dot_dimension_numbers<[1], [0], [0], [1], [0, 0, 1, 1], [], []>} : vector<1024x144xf32>, vector<144x128xf32>, vector<1024x128xf32> -> vector<1024x128xf32>
    %c0_3 = arith.constant 0 : index
    %c0_4 = arith.constant 0 : index
    %3 = vector.load %arg3[%c0_3, %c0_4] : memref<1x128xf32, #tpu.memory_space<vmem>>, vector<1x128xf32>
    %4 = vector.broadcast %3 : vector<1x128xf32> to vector<1024x128xf32>
    %5 = arith.addf %2, %4 : vector<1024x128xf32>
    %c0_5 = arith.constant 0 : index
    %c0_6 = arith.constant 0 : index
    %6 = vector.load %arg4[%c0_5, %c0_6] : memref<1024x128xf32, #tpu.memory_space<vmem>>, vector<1024x128xf32>
    tpu.vector_store %arg4[%c0_5, %c0_6], %5 {strides = array<i32>} : memref<1024x128xf32, #tpu.memory_space<vmem>>, vector<1024x128xf32>,
    return
  }
  func.func @transform_0(%arg0: i32) -> (i32, i32) {
    %c0_i32 = arith.constant 0 : i32
    %c0_i32_0 = arith.constant 0 : i32
    return %arg0, %c0_i32 : i32, i32
  }
  func.func @transform_1(%arg0: i32) -> (i32, i32) {
    %c0_i32 = arith.constant 0 : i32
    %c0_i32_0 = arith.constant 0 : i32
    %c0_i32_1 = arith.constant 0 : i32
    return %c0_i32, %c0_i32_0 : i32, i32
  }
  func.func @transform_2(%arg0: i32) -> (i32, i32) {
    %c0_i32 = arith.constant 0 : i32
    %c0_i32_0 = arith.constant 0 : i32
    %c0_i32_1 = arith.constant 0 : i32
    return %c0_i32, %c0_i32_0 : i32, i32
  }
  func.func @transform_3(%arg0: i32) -> (i32, i32) {
    %c0_i32 = arith.constant 0 : i32
    %c0_i32_0 = arith.constant 0 : i32
    return %arg0, %c0_i32 : i32, i32
  }
}

</mosaic_0001>

<bundles_post_ra>
// kernel: conv_model_forward.7
= control target key start
LH: loop header
LB: loop body
LE: loop exit
PB: predicated region body
PF: predicated region fallthrough
CT: control target
= control target key end

     0   :  { %s2842_s12 = smov 0   ;;  %s2844_s13 = smov 0   ;;  %s3619_s0 = inlined_call_operand.vmem [shape: f32[3750,27], index: 0, kind: input, shape index: {}]   ;;  %s3620_s1 = inlined_call_operand.vmem [shape: f32[27,128], index: 1, kind: input, shape index: {}]   ;;  %s3621_s2 = inlined_call_operand.vmem [shape: f32[1,128], index: 2, kind: input, shape index: {}]   ;;  %s3622_s3 = inlined_call_operand.vmem [shape: f32[3750,128], index: 3, kind: output, shape index: {}]  }
   0x1   :  { %s2846_s14 = smov 0  }
   0x2 LB: > { %s2855_s15 = sadd.s32 4294967295, %s2788_s14   ;;  %s2857_s16 = sadd.s32 1, %s2788_s14   ;;  %s2788_s14 = sphi %s2846_s14, %s3631_s14   ;;  %s2784_s13 = sphi %s2844_s13, %s3630_s13   ;;  %s2780_s12 = sphi %s2842_s12, %s3629_s12  }
   0x3   : > { %s85_s17 = ssub.s32 %s2788_s14, %s2857_s16  ;;  %s88_s18 = sadd.s32 1, %s2784_s13 }
   0x4   : > { %p86_p0 = scmp.eq.s32.totalorder %s85_s17, 0  ;;  %p98_p1 = scmp.ne.s32.totalorder %s2784_s13, %s2780_s12 }
   0x5   : > { %p99_p2 = scmp.eq.s32.totalorder %s2855_s15, 3  ;;  %p2152_p3 = scmp.ge.s32.totalorder %s2788_s14, 1 }
   0x6   : > { %s2865_s19 = scalar_select %p86_p0, %s2784_s13, %s88_s18  }
   0x7   : > { %p2867_p4 = por %p99_p2, %p98_p1  ;;  %p146_p5 = scmp.lt.s32.totalorder %s2788_s14, 5 }
   0x9   : > { %p147_p6 = pnand %p2152_p3, %p146_p5 }
   0xa   : > { %s2878_s25 = sshll.u32 (!%p147_p6), %s2855_s15, 7  ;;  %s170_s8 = sand.u32 (!%p147_p6), 1, %s2780_s12  }
   0xb   : > { %150 = sbr.rel (%p147_p6) target bundleno = 414 (0x19e), region = 32  ;;  %p178_p7 = scmp.lt.s32.totalorder (!%p147_p6), %s2878_s25, 468 }
   0xc   : > { %s2153_s11 = sshll.u32 (!%p147_p6), %s170_s8, 10 }
   0xd   : > { %s3159_s12 = scalar_lea.vmem (!%p147_p6), [#allocation2], %s2153_s11  }
  0x10   : > { %v323_v0 = vld [vmem:[%s3620_s1 + $0x18] sm:$0x7]  ;;  %vm716_vm0 = vcmask 1042432   ;;  %v322_v1 = vld [vmem:[%s3620_s1 + $0x10] sm:$0xff]  ;;  %v321_v2 = vld [vmem:[%s3620_s1 + $0x8] sm:$0xff]  ;;  %s179_s28 = scalar_select %p178_p7, %s2878_s25, 468 }
  0x11   : > { %2438 = vmatprep.subr.msk.mxu0 %vm716_vm0, %v323_v0  ;;  %2638 = vmatprep.subr.msk.mxu1 %vm716_vm0, %v323_v0  ;;  %v320_v3 = vld [vmem:[%s3620_s1] sm:$0xff]  ;;  %vm331_vm1 = vcmask 220160   ;;  %s1689_s14 = ssub.s32 (%p2867_p4), 469, %s2878_s25  ;;  %s2303_s17 = sshll.u32 (%p2867_p4), %s2855_s15, 10 }
  0x12   : > { %2439 = vmatpush3.msk.msra.mxu0 %vm716_vm0, %v323_v0  ;;  %2642 = vmatpush3.msk.msra.mxu1 %vm716_vm0, %v323_v0  ;;  %s2155_s4 = sshll.u32 %s179_s28, 3  ;;  %p1690_p8 = scmp.lt.s32.totalorder (%p2867_p4), %s1689_s14, 128 }
  0x13   : > { %2440 = vmatprep.subr.mxu0 %v322_v1  ;;  %2639 = vmatprep.subr.mxu1 %v322_v1  ;;  %s2891_s7 = scalar_lea.vmem %s3619_s0, %s2155_s4  ;;  %s3420_s22 = scalar_lea.vmem (%p2867_p4), %s3622_s3, %s2303_s17  }
  0x14   : > { %2441 = vmatpush3.msra.mxu0 %v322_v1  ;;  %2643 = vmatpush3.msra.mxu1 %v322_v1  ;;  %v192_v4 = vld [vmem:[%s2891_s7] sm:$0xff]  ;;  %v193_v6 = vld [vmem:[%s2891_s7 + $0x8] sm:$0xff]  ;;  %v194_v8 = vld [vmem:[%s2891_s7 + $0x10] sm:$0xff] }
  0x15   : > { %2442 = vmatprep.subr.mxu0 %v321_v2  ;;  %2640 = vmatprep.subr.mxu1 %v321_v2  ;;  %v256_v5 = vld [vmem:[%s2891_s7 + $0x200] sm:$0xff]  ;;  %v257_v7 = vld [vmem:[%s2891_s7 + $0x208] sm:$0xff]  ;;  %v258_v9 = vld [vmem:[%s2891_s7 + $0x210] sm:$0xff] }
  0x16   : > { %2443 = vmatpush3.msra.mxu0 %v321_v2  ;;  %2644 = vmatpush3.msra.mxu1 %v321_v2  ;;  %v195_v10 = vld [vmem:[%s2891_s7 + $0x18] sm:$0xff]  ;;  %v196_v12 = vld [vmem:[%s2891_s7 + $0x20] sm:$0xff]  ;;  %v197_v14 = vld [vmem:[%s2891_s7 + $0x28] sm:$0xff] }
  0x17   : > { %2444 = vmatprep.subr.mxu0 %v320_v3  ;;  %2641 = vmatprep.subr.mxu1 %v320_v3  ;;  %v259_v11 = vld [vmem:[%s2891_s7 + $0x218] sm:$0xff]  ;;  %v260_v13 = vld [vmem:[%s2891_s7 + $0x220] sm:$0xff]  ;;  %v261_v15 = vld [vmem:[%s2891_s7 + $0x228] sm:$0xff] }
  0x18   : > { %2445 = vmatpush3.msra.mxu0 %v320_v3  ;;  %2645 = vmatpush3.msra.mxu1 %v320_v3  ;;  %v198_v16 = vld [vmem:[%s2891_s7 + $0x30] sm:$0xff]  ;;  %v199_v18 = vld [vmem:[%s2891_s7 + $0x38] sm:$0xff]  ;;  %v200_v20 = vld [vmem:[%s2891_s7 + $0x40] sm:$0xff] }
  0x19   : > { %2446 = vmatprep.mubr.msk.f32.mxu0 %vm331_vm1, %v192_v4  ;;  %2542 = vmatprep.mubr.msk.f32.mxu1 %vm331_vm1, %v256_v5  ;;  %v262_v17 = vld [vmem:[%s2891_s7 + $0x230] sm:$0xff]  ;;  %v263_v19 = vld [vmem:[%s2891_s7 + $0x238] sm:$0xff]  ;;  %v264_v21 = vld [vmem:[%s2891_s7 + $0x240] sm:$0xff] }
  0x1a   : > { %2447 = vmatmul.mubr.msk.f32.vlgmr.msra.gmra.mxu0 %vm331_vm1, %v193_v6  ;;  %2543 = vmatmul.mubr.msk.f32.vlgmr.msra.gmra.mxu1 %vm331_vm1, %v257_v7  ;;  %v201_v22 = vld [vmem:[%s2891_s7 + $0x48] sm:$0xff]  ;;  %v202_v24 = vld [vmem:[%s2891_s7 + $0x50] sm:$0xff]  ;;  %v203_v26 = vld [vmem:[%s2891_s7 + $0x58] sm:$0xff] }
  0x1b   : > { %2449 = vmatprep.mubr.msk.f32.mxu0 %vm331_vm1, %v194_v8  ;;  %2545 = vmatprep.mubr.msk.f32.mxu1 %vm331_vm1, %v258_v9  ;;  %v265_v23 = vld [vmem:[%s2891_s7 + $0x248] sm:$0xff]  ;;  %v266_v25 = vld [vmem:[%s2891_s7 + $0x250] sm:$0xff]  ;;  %v267_v27 = vld [vmem:[%s2891_s7 + $0x258] sm:$0xff] }
  0x1c   : > { %v204_v28 = vld [vmem:[%s2891_s7 + $0x60] sm:$0xff]  ;;  %v205_v30 = vld [vmem:[%s2891_s7 + $0x68] sm:$0xff]  ;;  %v206_v32 = vld [vmem:[%s2891_s7 + $0x70] sm:$0xff] }
  0x1d   : > { %v268_v29 = vld [vmem:[%s2891_s7 + $0x260] sm:$0xff]  ;;  %v269_v31 = vld [vmem:[%s2891_s7 + $0x268] sm:$0xff]  ;;  %v270_v33 = vld [vmem:[%s2891_s7 + $0x270] sm:$0xff] }
  0x1e   : > { %2450 = vmatmul.mubr.msk.f32.gmra.mxu0 %vm331_vm1, %v195_v10  ;;  %2546 = vmatmul.mubr.msk.f32.gmra.mxu1 %vm331_vm1, %v259_v11  ;;  %v207_v34 = vld [vmem:[%s2891_s7 + $0x78] sm:$0xff]  ;;  %v208_v36 = vld [vmem:[%s2891_s7 + $0x80] sm:$0xff]  ;;  %v209_v38 = vld [vmem:[%s2891_s7 + $0x88] sm:$0xff] }
  0x1f   : > { %2452 = vmatprep.mubr.msk.f32.mxu0 %vm331_vm1, %v196_v12  ;;  %2548 = vmatprep.mubr.msk.f32.mxu1 %vm331_vm1, %v260_v13  ;;  %v271_v35 = vld [vmem:[%s2891_s7 + $0x278] sm:$0xff]  ;;  %v272_v37 = vld [vmem:[%s2891_s7 + $0x280] sm:$0xff]  ;;  %v273_v39 = vld [vmem:[%s2891_s7 + $0x288] sm:$0xff] }
  0x20   : > { %v210_v40 = vld [vmem:[%s2891_s7 + $0x90] sm:$0xff]  ;;  %v211_v42 = vld [vmem:[%s2891_s7 + $0x98] sm:$0xff]  ;;  %v212_v44 = vld [vmem:[%s2891_s7 + $0xa0] sm:$0xff] }
  0x21   : > { %v274_v41 = vld [vmem:[%s2891_s7 + $0x290] sm:$0xff]  ;;  %v275_v43 = vld [vmem:[%s2891_s7 + $0x298] sm:$0xff]  ;;  %v276_v45 = vld [vmem:[%s2891_s7 + $0x2a0] sm:$0xff] }
  0x22   : > { %2453 = vmatmul.mubr.msk.f32.gmra.mxu0 %vm331_vm1, %v197_v14  ;;  %2549 = vmatmul.mubr.msk.f32.gmra.mxu1 %vm331_vm1, %v261_v15  ;;  %v213_v46 = vld [vmem:[%s2891_s7 + $0xa8] sm:$0xff]  ;;  %v214_v48 = vld [vmem:[%s2891_s7 + $0xb0] sm:$0xff]  ;;  %v215_v50 = vld [vmem:[%s2891_s7 + $0xb8] sm:$0xff] }
  0x23   : > { %2455 = vmatprep.mubr.msk.f32.mxu0 %vm331_vm1, %v198_v16  ;;  %2551 = vmatprep.mubr.msk.f32.mxu1 %vm331_vm1, %v262_v17  ;;  %v277_v47 = vld [vmem:[%s2891_s7 + $0x2a8] sm:$0xff]  ;;  %v278_v49 = vld [vmem:[%s2891_s7 + $0x2b0] sm:$0xff]  ;;  %v279_v51 = vld [vmem:[%s2891_s7 + $0x2b8] sm:$0xff] }
  0x24   : > { %v216_v52 = vld [vmem:[%s2891_s7 + $0xc0] sm:$0xff]  ;;  %v217_v54 = vld [vmem:[%s2891_s7 + $0xc8] sm:$0xff]  ;;  %v218_v56 = vld [vmem:[%s2891_s7 + $0xd0] sm:$0xff] }
  0x25   : > { %v280_v53 = vld [vmem:[%s2891_s7 + $0x2c0] sm:$0xff]  ;;  %v281_v55 = vld [vmem:[%s2891_s7 + $0x2c8] sm:$0xff]  ;;  %v282_v57 = vld [vmem:[%s2891_s7 + $0x2d0] sm:$0xff] }
  0x26   : > { %2456 = vmatmul.mubr.msk.f32.gmra.mxu0 %vm331_vm1, %v199_v18  ;;  %2552 = vmatmul.mubr.msk.f32.gmra.mxu1 %vm331_vm1, %v263_v19  ;;  %v219_v58 = vld [vmem:[%s2891_s7 + $0xd8] sm:$0xff]  ;;  %v220_v60 = vld [vmem:[%s2891_s7 + $0xe0] sm:$0xff]  ;;  %v221_v62 = vld [vmem:[%s2891_s7 + $0xe8] sm:$0xff] }
  0x27   : > { %2458 = vmatprep.mubr.msk.f32.mxu0 %vm331_vm1, %v200_v20  ;;  %2554 = vmatprep.mubr.msk.f32.mxu1 %vm331_vm1, %v264_v21  ;;  %v283_v59 = vld [vmem:[%s2891_s7 + $0x2d8] sm:$0xff]  ;;  %v284_v61 = vld [vmem:[%s2891_s7 + $0x2e0] sm:$0xff]  ;;  %v285_v63 = vld [vmem:[%s2891_s7 + $0x2e8] sm:$0xff] }
  0x28   : > { %v222_v0 = vld [vmem:[%s2891_s7 + $0xf0] sm:$0xff]  ;;  %v223_v2 = vld [vmem:[%s2891_s7 + $0xf8] sm:$0xff]  ;;  %v224_v4 = vld [vmem:[%s2891_s7 + $0x100] sm:$0xff] }
  0x29   : > { %v286_v1 = vld [vmem:[%s2891_s7 + $0x2f0] sm:$0xff]  ;;  %v287_v3 = vld [vmem:[%s2891_s7 + $0x2f8] sm:$0xff]  ;;  %v288_v5 = vld [vmem:[%s2891_s7 + $0x300] sm:$0xff] }
  0x2a   : > { %2459 = vmatmul.mubr.msk.f32.gmra.mxu0 %vm331_vm1, %v201_v22  ;;  %2555 = vmatmul.mubr.msk.f32.gmra.mxu1 %vm331_vm1, %v265_v23  ;;  %v225_v6 = vld [vmem:[%s2891_s7 + $0x108] sm:$0xff]  ;;  %v226_v8 = vld [vmem:[%s2891_s7 + $0x110] sm:$0xff]  ;;  %v227_v10 = vld [vmem:[%s2891_s7 + $0x118] sm:$0xff] }
  0x2b   : > { %2461 = vmatprep.mubr.msk.f32.mxu0 %vm331_vm1, %v202_v24  ;;  %2557 = vmatprep.mubr.msk.f32.mxu1 %vm331_vm1, %v266_v25  ;;  %v289_v7 = vld [vmem:[%s2891_s7 + $0x308] sm:$0xff]  ;;  %v290_v9 = vld [vmem:[%s2891_s7 + $0x310] sm:$0xff]  ;;  %v291_v11 = vld [vmem:[%s2891_s7 + $0x318] sm:$0xff] }
  0x2c   : > { %v228_v12 = vld [vmem:[%s2891_s7 + $0x120] sm:$0xff]  ;;  %v229_v14 = vld [vmem:[%s2891_s7 + $0x128] sm:$0xff]  ;;  %v230_v16 = vld [vmem:[%s2891_s7 + $0x130] sm:$0xff] }
  0x2d   : > { %v292_v13 = vld [vmem:[%s2891_s7 + $0x320] sm:$0xff]  ;;  %v293_v15 = vld [vmem:[%s2891_s7 + $0x328] sm:$0xff]  ;;  %v294_v17 = vld [vmem:[%s2891_s7 + $0x330] sm:$0xff] }
  0x2e   : > { %2462 = vmatmul.mubr.msk.f32.gmra.mxu0 %vm331_vm1, %v203_v26  ;;  %2558 = vmatmul.mubr.msk.f32.gmra.mxu1 %vm331_vm1, %v267_v27  ;;  %v231_v18 = vld [vmem:[%s2891_s7 + $0x138] sm:$0xff]  ;;  %v232_v20 = vld [vmem:[%s2891_s7 + $0x140] sm:$0xff]  ;;  %v233_v22 = vld [vmem:[%s2891_s7 + $0x148] sm:$0xff] }
  0x2f   : > { %2464 = vmatprep.mubr.msk.f32.mxu0 %vm331_vm1, %v204_v28  ;;  %2560 = vmatprep.mubr.msk.f32.mxu1 %vm331_vm1, %v268_v29  ;;  %v295_v19 = vld [vmem:[%s2891_s7 + $0x338] sm:$0xff]  ;;  %v296_v21 = vld [vmem:[%s2891_s7 + $0x340] sm:$0xff]  ;;  %v297_v23 = vld [vmem:[%s2891_s7 + $0x348] sm:$0xff] }
  0x30   : > { %v234_v24 = vld [vmem:[%s2891_s7 + $0x150] sm:$0xff]  ;;  %v235_v26 = vld [vmem:[%s2891_s7 + $0x158] sm:$0xff]  ;;  %v236_v28 = vld [vmem:[%s2891_s7 + $0x160] sm:$0xff] }
  0x31   : > { %v298_v25 = vld [vmem:[%s2891_s7 + $0x350] sm:$0xff]  ;;  %v299_v27 = vld [vmem:[%s2891_s7 + $0x358] sm:$0xff]  ;;  %v300_v29 = vld [vmem:[%s2891_s7 + $0x360] sm:$0xff] }
  0x32   : > { %2465 = vmatmul.mubr.msk.f32.gmra.mxu0 %vm331_vm1, %v205_v30  ;;  %2561 = vmatmul.mubr.msk.f32.gmra.mxu1 %vm331_vm1, %v269_v31  ;;  %v237_v30 = vld [vmem:[%s2891_s7 + $0x168] sm:$0xff] }
  0x33   : > { %2467 = vmatprep.mubr.msk.f32.mxu0 %vm331_vm1, %v206_v32  ;;  %2563 = vmatprep.mubr.msk.f32.mxu1 %vm331_vm1, %v270_v33  ;;  %v301_v31 = vld [vmem:[%s2891_s7 + $0x368] sm:$0xff]  ;;  %v238_v32 = vld [vmem:[%s2891_s7 + $0x170] sm:$0xff] }
  0x34   : > { %v302_v33 = vld [vmem:[%s2891_s7 + $0x370] sm:$0xff] }
  0x36   : > { %2468 = vmatmul.mubr.msk.f32.gmra.mxu0 %vm331_vm1, %v207_v34  ;;  %2564 = vmatmul.mubr.msk.f32.gmra.mxu1 %vm331_vm1, %v271_v35  ;;  %v239_v34 = vld [vmem:[%s2891_s7 + $0x178] sm:$0xff] }
  0x37   : > { %2470 = vmatprep.mubr.msk.f32.mxu0 %vm331_vm1, %v208_v36  ;;  %2566 = vmatprep.mubr.msk.f32.mxu1 %vm331_vm1, %v272_v37  ;;  %v303_v35 = vld [vmem:[%s2891_s7 + $0x378] sm:$0xff]  ;;  %v240_v36 = vld [vmem:[%s2891_s7 + $0x180] sm:$0xff] }
  0x38   : > { %v304_v37 = vld [vmem:[%s2891_s7 + $0x380] sm:$0xff] }
  0x3a   : > { %2471 = vmatmul.mubr.msk.f32.gmra.mxu0 %vm331_vm1, %v209_v38  ;;  %2567 = vmatmul.mubr.msk.f32.gmra.mxu1 %vm331_vm1, %v273_v39  ;;  %v241_v38 = vld [vmem:[%s2891_s7 + $0x188] sm:$0xff] }
  0x3b   : > { %2473 = vmatprep.mubr.msk.f32.mxu0 %vm331_vm1, %v210_v40  ;;  %2569 = vmatprep.mubr.msk.f32.mxu1 %vm331_vm1, %v274_v41  ;;  %v305_v39 = vld [vmem:[%s2891_s7 + $0x388] sm:$0xff]  ;;  %v242_v40 = vld [vmem:[%s2891_s7 + $0x190] sm:$0xff] }
  0x3c   : > { %v306_v41 = vld [vmem:[%s2891_s7 + $0x390] sm:$0xff] }
  0x3e   : > { %2474 = vmatmul.mubr.msk.f32.gmra.mxu0 %vm331_vm1, %v211_v42  ;;  %2570 = vmatmul.mubr.msk.f32.gmra.mxu1 %vm331_vm1, %v275_v43  ;;  %v243_v42 = vld [vmem:[%s2891_s7 + $0x198] sm:$0xff] }
  0x3f   : > { %2476 = vmatprep.mubr.msk.f32.mxu0 %vm331_vm1, %v212_v44  ;;  %2572 = vmatprep.mubr.msk.f32.mxu1 %vm331_vm1, %v276_v45  ;;  %v307_v43 = vld [vmem:[%s2891_s7 + $0x398] sm:$0xff]  ;;  %v244_v44 = vld [vmem:[%s2891_s7 + $0x1a0] sm:$0xff] }
  0x40   : > { %v308_v45 = vld [vmem:[%s2891_s7 + $0x3a0] sm:$0xff] }
  0x42   : > { %2477 = vmatmul.mubr.msk.f32.gmra.mxu0 %vm331_vm1, %v213_v46  ;;  %2573 = vmatmul.mubr.msk.f32.gmra.mxu1 %vm331_vm1, %v277_v47  ;;  %v245_v46 = vld [vmem:[%s2891_s7 + $0x1a8] sm:$0xff] }
  0x43   : > { %2479 = vmatprep.mubr.msk.f32.mxu0 %vm331_vm1, %v214_v48  ;;  %2575 = vmatprep.mubr.msk.f32.mxu1 %vm331_vm1, %v278_v49  ;;  %v309_v47 = vld [vmem:[%s2891_s7 + $0x3a8] sm:$0xff]  ;;  %v246_v48 = vld [vmem:[%s2891_s7 + $0x1b0] sm:$0xff] }
  0x44   : > { %v310_v49 = vld [vmem:[%s2891_s7 + $0x3b0] sm:$0xff] }
  0x46   : > { %2480 = vmatmul.mubr.msk.f32.gmra.mxu0 %vm331_vm1, %v215_v50  ;;  %2576 = vmatmul.mubr.msk.f32.gmra.mxu1 %vm331_vm1, %v279_v51  ;;  %v247_v50 = vld [vmem:[%s2891_s7 + $0x1b8] sm:$0xff] }
  0x47   : > { %2482 = vmatprep.mubr.msk.f32.mxu0 %vm331_vm1, %v216_v52  ;;  %2578 = vmatprep.mubr.msk.f32.mxu1 %vm331_vm1, %v280_v53  ;;  %v311_v51 = vld [vmem:[%s2891_s7 + $0x3b8] sm:$0xff]  ;;  %v248_v52 = vld [vmem:[%s2891_s7 + $0x1c0] sm:$0xff] }
  0x48   : > { %v312_v53 = vld [vmem:[%s2891_s7 + $0x3c0] sm:$0xff] }
  0x4a   : > { %2483 = vmatmul.mubr.msk.f32.gmra.mxu0 %vm331_vm1, %v217_v54  ;;  %2579 = vmatmul.mubr.msk.f32.gmra.mxu1 %vm331_vm1, %v281_v55  ;;  %v249_v54 = vld [vmem:[%s2891_s7 + $0x1c8] sm:$0xff] }
  0x4b   : > { %2485 = vmatprep.mubr.msk.f32.mxu0 %vm331_vm1, %v218_v56  ;;  %2581 = vmatprep.mubr.msk.f32.mxu1 %vm331_vm1, %v282_v57  ;;  %v313_v55 = vld [vmem:[%s2891_s7 + $0x3c8] sm:$0xff]  ;;  %v250_v56 = vld [vmem:[%s2891_s7 + $0x1d0] sm:$0xff] }
  0x4c   : > { %v314_v57 = vld [vmem:[%s2891_s7 + $0x3d0] sm:$0xff] }
  0x4e   : > { %2486 = vmatmul.mubr.msk.f32.gmra.mxu0 %vm331_vm1, %v219_v58  ;;  %2582 = vmatmul.mubr.msk.f32.gmra.mxu1 %vm331_vm1, %v283_v59  ;;  %v251_v58 = vld [vmem:[%s2891_s7 + $0x1d8] sm:$0xff] }
  0x4f   : > { %2488 = vmatprep.mubr.msk.f32.mxu0 %vm331_vm1, %v220_v60  ;;  %2584 = vmatprep.mubr.msk.f32.mxu1 %vm331_vm1, %v284_v61  ;;  %v315_v59 = vld [vmem:[%s2891_s7 + $0x3d8] sm:$0xff]  ;;  %v252_v60 = vld [vmem:[%s2891_s7 + $0x1e0] sm:$0xff] }
  0x50   : > { %v316_v61 = vld [vmem:[%s2891_s7 + $0x3e0] sm:$0xff] }
  0x52   : > { %2489 = vmatmul.mubr.msk.f32.gmra.mxu0 %vm331_vm1, %v221_v62  ;;  %2585 = vmatmul.mubr.msk.f32.gmra.mxu1 %vm331_vm1, %v285_v63  ;;  %v253_v62 = vld [vmem:[%s2891_s7 + $0x1e8] sm:$0xff] }
  0x53   : > { %2491 = vmatprep.mubr.msk.f32.mxu0 %vm331_vm1, %v222_v0  ;;  %2587 = vmatprep.mubr.msk.f32.mxu1 %vm331_vm1, %v286_v1  ;;  %v317_v63 = vld [vmem:[%s2891_s7 + $0x3e8] sm:$0xff]  ;;  %v254_v0 = vld [vmem:[%s2891_s7 + $0x1f0] sm:$0xff] }
  0x54   : > { %v318_v1 = vld [vmem:[%s2891_s7 + $0x3f0] sm:$0xff] }
  0x56   : > { %2492 = vmatmul.mubr.msk.f32.gmra.mxu0 %vm331_vm1, %v223_v2  ;;  %2588 = vmatmul.mubr.msk.f32.gmra.mxu1 %vm331_vm1, %v287_v3  ;;  %v255_v2 = vld [vmem:[%s2891_s7 + $0x1f8] sm:$0xff] }
  0x57   : > { %2494 = vmatprep.mubr.msk.f32.mxu0 %vm331_vm1, %v224_v4  ;;  %2590 = vmatprep.mubr.msk.f32.mxu1 %vm331_vm1, %v288_v5  ;;  %v319_v3 = vld [vmem:[%s2891_s7 + $0x3f8] sm:$0xff]  ;;  %v3153_v4 = vld [vmem:[%s3621_s2] ss:$0 sm:$0xff] }
  0x5a   : > { %2495 = vmatmul.mubr.msk.f32.gmra.mxu0 %vm331_vm1, %v225_v6  ;;  %2591 = vmatmul.mubr.msk.f32.gmra.mxu1 %vm331_vm1, %v289_v7 }
  0x5b   : > { %2497 = vmatprep.mubr.msk.f32.mxu0 %vm331_vm1, %v226_v8  ;;  %2593 = vmatprep.mubr.msk.f32.mxu1 %vm331_vm1, %v290_v9 }
  0x5e   : > { %2498 = vmatmul.mubr.msk.f32.gmra.mxu0 %vm331_vm1, %v227_v10  ;;  %2594 = vmatmul.mubr.msk.f32.gmra.mxu1 %vm331_vm1, %v291_v11 }
  0x5f   : > { %2500 = vmatprep.mubr.msk.f32.mxu0 %vm331_vm1, %v228_v12  ;;  %2596 = vmatprep.mubr.msk.f32.mxu1 %vm331_vm1, %v292_v13 }
  0x62   : > { %2501 = vmatmul.mubr.msk.f32.gmra.mxu0 %vm331_vm1, %v229_v14  ;;  %2597 = vmatmul.mubr.msk.f32.gmra.mxu1 %vm331_vm1, %v293_v15 }
  0x63   : > { %2503 = vmatprep.mubr.msk.f32.mxu0 %vm331_vm1, %v230_v16  ;;  %2599 = vmatprep.mubr.msk.f32.mxu1 %vm331_vm1, %v294_v17 }
  0x66   : > { %2504 = vmatmul.mubr.msk.f32.gmra.mxu0 %vm331_vm1, %v231_v18  ;;  %2600 = vmatmul.mubr.msk.f32.gmra.mxu1 %vm331_vm1, %v295_v19 }
  0x67   : > { %2506 = vmatprep.mubr.msk.f32.mxu0 %vm331_vm1, %v232_v20  ;;  %2602 = vmatprep.mubr.msk.f32.mxu1 %vm331_vm1, %v296_v21 }
  0x6a   : > { %2507 = vmatmul.mubr.msk.f32.gmra.mxu0 %vm331_vm1, %v233_v22  ;;  %2603 = vmatmul.mubr.msk.f32.gmra.mxu1 %vm331_vm1, %v297_v23 }
  0x6b   : > { %2509 = vmatprep.mubr.msk.f32.mxu0 %vm331_vm1, %v234_v24  ;;  %2605 = vmatprep.mubr.msk.f32.mxu1 %vm331_vm1, %v298_v25 }
  0x6e   : > { %2510 = vmatmul.mubr.msk.f32.gmra.mxu0 %vm331_vm1, %v235_v26  ;;  %2606 = vmatmul.mubr.msk.f32.gmra.mxu1 %vm331_vm1, %v299_v27 }
  0x6f   : > { %2512 = vmatprep.mubr.msk.f32.mxu0 %vm331_vm1, %v236_v28  ;;  %2608 = vmatprep.mubr.msk.f32.mxu1 %vm331_vm1, %v300_v29 }
  0x72   : > { %2513 = vmatmul.mubr.msk.f32.gmra.mxu0 %vm331_vm1, %v237_v30  ;;  %2609 = vmatmul.mubr.msk.f32.gmra.mxu1 %vm331_vm1, %v301_v31 }
  0x73   : > { %2515 = vmatprep.mubr.msk.f32.mxu0 %vm331_vm1, %v238_v32  ;;  %2611 = vmatprep.mubr.msk.f32.mxu1 %vm331_vm1, %v302_v33 }
  0x76   : > { %2516 = vmatmul.mubr.msk.f32.gmra.mxu0 %vm331_vm1, %v239_v34  ;;  %2612 = vmatmul.mubr.msk.f32.gmra.mxu1 %vm331_vm1, %v303_v35 }
  0x77   : > { %2518 = vmatprep.mubr.msk.f32.mxu0 %vm331_vm1, %v240_v36  ;;  %2614 = vmatprep.mubr.msk.f32.mxu1 %vm331_vm1, %v304_v37 }
  0x7a   : > { %2519 = vmatmul.mubr.msk.f32.gmra.mxu0 %vm331_vm1, %v241_v38  ;;  %2615 = vmatmul.mubr.msk.f32.gmra.mxu1 %vm331_vm1, %v305_v39 }
  0x7b   : > { %2521 = vmatprep.mubr.msk.f32.mxu0 %vm331_vm1, %v242_v40  ;;  %2617 = vmatprep.mubr.msk.f32.mxu1 %vm331_vm1, %v306_v41 }
  0x7e   : > { %2522 = vmatmul.mubr.msk.f32.gmra.mxu0 %vm331_vm1, %v243_v42  ;;  %2618 = vmatmul.mubr.msk.f32.gmra.mxu1 %vm331_vm1, %v307_v43 }
  0x7f   : > { %2524 = vmatprep.mubr.msk.f32.mxu0 %vm331_vm1, %v244_v44  ;;  %2620 = vmatprep.mubr.msk.f32.mxu1 %vm331_vm1, %v308_v45 }
  0x82   : > { %2525 = vmatmul.mubr.msk.f32.gmra.mxu0 %vm331_vm1, %v245_v46  ;;  %2621 = vmatmul.mubr.msk.f32.gmra.mxu1 %vm331_vm1, %v309_v47 }
  0x83   : > { %2527 = vmatprep.mubr.msk.f32.mxu0 %vm331_vm1, %v246_v48  ;;  %2623 = vmatprep.mubr.msk.f32.mxu1 %vm331_vm1, %v310_v49 }
  0x86   : > { %2528 = vmatmul.mubr.msk.f32.gmra.mxu0 %vm331_vm1, %v247_v50  ;;  %2624 = vmatmul.mubr.msk.f32.gmra.mxu1 %vm331_vm1, %v311_v51 }
  0x87   : > { %2530 = vmatprep.mubr.msk.f32.mxu0 %vm331_vm1, %v248_v52  ;;  %2626 = vmatprep.mubr.msk.f32.mxu1 %vm331_vm1, %v312_v53 }
  0x8a   : > { %2531 = vmatmul.mubr.msk.f32.gmra.mxu0 %vm331_vm1, %v249_v54  ;;  %2627 = vmatmul.mubr.msk.f32.gmra.mxu1 %vm331_vm1, %v313_v55 }
  0x8b   : > { %2533 = vmatprep.mubr.msk.f32.mxu0 %vm331_vm1, %v250_v56  ;;  %2629 = vmatprep.mubr.msk.f32.mxu1 %vm331_vm1, %v314_v57 }
  0x8e   : > { %2534 = vmatmul.mubr.msk.f32.gmra.mxu0 %vm331_vm1, %v251_v58  ;;  %2630 = vmatmul.mubr.msk.f32.gmra.mxu1 %vm331_vm1, %v315_v59 }
  0x8f   : > { %2536 = vmatprep.mubr.msk.f32.mxu0 %vm331_vm1, %v252_v60  ;;  %2632 = vmatprep.mubr.msk.f32.mxu1 %vm331_vm1, %v316_v61 }
  0x92   : > { %2537 = vmatmul.mubr.msk.f32.gmra.mxu0 %vm331_vm1, %v253_v62  ;;  %2633 = vmatmul.mubr.msk.f32.gmra.mxu1 %vm331_vm1, %v317_v63 }
  0x93   : > { %2539 = vmatprep.mubr.msk.f32.mxu0 %vm331_vm1, %v254_v0  ;;  %2635 = vmatprep.mubr.msk.f32.mxu1 %vm331_vm1, %v318_v1 }
  0x96   : > { %2540 = vmatmul.mubr.msk.f32.gmra.mxu0 %vm331_vm1, %v255_v2  ;;  %2636 = vmatmul.mubr.msk.f32.gmra.mxu1 %vm331_vm1, %v319_v3 }
  0xda   : > { %v2448_v5 = vpop.f32.mrf.mxu0  ;;  %v2544_v6 = vpop.f32.mrf.mxu1 }
  0xdb   : > { %v792_v7 = vadd.f32 %v2448_v5, %v3153_v4  ;;  %v1112_v8 = vadd.f32 %v2544_v6, %v3153_v4 }
  0xdc   : > { %v786_v9 = vpop.f32.mrf.mxu0  ;;  %v1106_v10 = vpop.f32.mrf.mxu1 }
  0xdd   : > { %v1426_v11 = vmax.f32 %v792_v7, 0.0  ;;  %v1490_v12 = vmax.f32 %v1112_v8, 0.0  ;;  %v787_v13 = vadd.f32 %v3153_v4, %v786_v9  ;;  %v1107_v14 = vadd.f32 %v3153_v4, %v1106_v10 }
  0xde   : > { %v2451_v15 = vpop.f32.mrf.mxu0  ;;  %v2547_v16 = vpop.f32.mrf.mxu1 }
  0xdf   : > { %1554 = vst [vmem:[%s3159_s12 + $0x8] sm:$0xff] %v1426_v11  ;;  %1618 = vst [vmem:[%s3159_s12 + $0x208] sm:$0xff] %v1490_v12  ;;  %v1425_v17 = vmax.f32 %v787_v13, 0.0  ;;  %v1489_v18 = vmax.f32 %v1107_v14, 0.0  ;;  %v802_v19 = vadd.f32 %v2451_v15, %v3153_v4  ;;  %v1122_v20 = vadd.f32 %v2547_v16, %v3153_v4 }
  0xe0   : > { %v796_v21 = vpop.f32.mrf.mxu0  ;;  %v1116_v22 = vpop.f32.mrf.mxu1 }
  0xe1   : > { %1553 = vst [vmem:[%s3159_s12] sm:$0xff] %v1425_v17  ;;  %1617 = vst [vmem:[%s3159_s12 + $0x200] sm:$0xff] %v1489_v18  ;;  %v1428_v23 = vmax.f32 %v802_v19, 0.0  ;;  %v1492_v24 = vmax.f32 %v1122_v20, 0.0  ;;  %v797_v25 = vadd.f32 %v3153_v4, %v796_v21  ;;  %v1117_v26 = vadd.f32 %v3153_v4, %v1116_v22 }
  0xe2   : > { %v2454_v27 = vpop.f32.mrf.mxu0  ;;  %v2550_v28 = vpop.f32.mrf.mxu1 }
  0xe3   : > { %1556 = vst [vmem:[%s3159_s12 + $0x18] sm:$0xff] %v1428_v23  ;;  %1620 = vst [vmem:[%s3159_s12 + $0x218] sm:$0xff] %v1492_v24  ;;  %v1427_v29 = vmax.f32 %v797_v25, 0.0  ;;  %v1491_v30 = vmax.f32 %v1117_v26, 0.0  ;;  %v812_v31 = vadd.f32 %v2454_v27, %v3153_v4  ;;  %v1132_v32 = vadd.f32 %v2550_v28, %v3153_v4 }
  0xe4   : > { %v806_v33 = vpop.f32.mrf.mxu0  ;;  %v1126_v34 = vpop.f32.mrf.mxu1 }
  0xe5   : > { %1555 = vst [vmem:[%s3159_s12 + $0x10] sm:$0xff] %v1427_v29  ;;  %1619 = vst [vmem:[%s3159_s12 + $0x210] sm:$0xff] %v1491_v30  ;;  %v1430_v35 = vmax.f32 %v812_v31, 0.0  ;;  %v1494_v36 = vmax.f32 %v1132_v32, 0.0  ;;  %v807_v37 = vadd.f32 %v3153_v4, %v806_v33  ;;  %v1127_v38 = vadd.f32 %v3153_v4, %v1126_v34 }
  0xe6   : > { %v2457_v39 = vpop.f32.mrf.mxu0  ;;  %v2553_v40 = vpop.f32.mrf.mxu1 }
  0xe7   : > { %1558 = vst [vmem:[%s3159_s12 + $0x28] sm:$0xff] %v1430_v35  ;;  %1622 = vst [vmem:[%s3159_s12 + $0x228] sm:$0xff] %v1494_v36  ;;  %v1429_v41 = vmax.f32 %v807_v37, 0.0  ;;  %v1493_v42 = vmax.f32 %v1127_v38, 0.0  ;;  %v822_v43 = vadd.f32 %v2457_v39, %v3153_v4  ;;  %v1142_v44 = vadd.f32 %v2553_v40, %v3153_v4 }
  0xe8   : > { %v816_v45 = vpop.f32.mrf.mxu0  ;;  %v1136_v46 = vpop.f32.mrf.mxu1 }
  0xe9   : > { %1557 = vst [vmem:[%s3159_s12 + $0x20] sm:$0xff] %v1429_v41  ;;  %1621 = vst [vmem:[%s3159_s12 + $0x220] sm:$0xff] %v1493_v42  ;;  %v1432_v47 = vmax.f32 %v822_v43, 0.0  ;;  %v1496_v48 = vmax.f32 %v1142_v44, 0.0  ;;  %v817_v49 = vadd.f32 %v3153_v4, %v816_v45  ;;  %v1137_v50 = vadd.f32 %v3153_v4, %v1136_v46 }
  0xea   : > { %v2460_v51 = vpop.f32.mrf.mxu0  ;;  %v2556_v52 = vpop.f32.mrf.mxu1 }
  0xeb   : > { %1560 = vst [vmem:[%s3159_s12 + $0x38] sm:$0xff] %v1432_v47  ;;  %1624 = vst [vmem:[%s3159_s12 + $0x238] sm:$0xff] %v1496_v48  ;;  %v1431_v53 = vmax.f32 %v817_v49, 0.0  ;;  %v1495_v54 = vmax.f32 %v1137_v50, 0.0  ;;  %v832_v55 = vadd.f32 %v2460_v51, %v3153_v4  ;;  %v1152_v56 = vadd.f32 %v2556_v52, %v3153_v4 }
  0xec   : > { %v826_v57 = vpop.f32.mrf.mxu0  ;;  %v1146_v58 = vpop.f32.mrf.mxu1 }
  0xed   : > { %1559 = vst [vmem:[%s3159_s12 + $0x30] sm:$0xff] %v1431_v53  ;;  %1623 = vst [vmem:[%s3159_s12 + $0x230] sm:$0xff] %v1495_v54  ;;  %v1434_v59 = vmax.f32 %v832_v55, 0.0  ;;  %v1498_v60 = vmax.f32 %v1152_v56, 0.0  ;;  %v827_v61 = vadd.f32 %v3153_v4, %v826_v57  ;;  %v1147_v62 = vadd.f32 %v3153_v4, %v1146_v58 }
  0xee   : > { %v2463_v63 = vpop.f32.mrf.mxu0  ;;  %v2559_v0 = vpop.f32.mrf.mxu1 }
  0xef   : > { %1562 = vst [vmem:[%s3159_s12 + $0x48] sm:$0xff] %v1434_v59  ;;  %1626 = vst [vmem:[%s3159_s12 + $0x248] sm:$0xff] %v1498_v60  ;;  %v1433_v1 = vmax.f32 %v827_v61, 0.0  ;;  %v1497_v2 = vmax.f32 %v1147_v62, 0.0  ;;  %v842_v3 = vadd.f32 %v2463_v63, %v3153_v4  ;;  %v1162_v5 = vadd.f32 %v2559_v0, %v3153_v4 }
  0xf0   : > { %v836_v6 = vpop.f32.mrf.mxu0  ;;  %v1156_v7 = vpop.f32.mrf.mxu1 }
  0xf1   : > { %1561 = vst [vmem:[%s3159_s12 + $0x40] sm:$0xff] %v1433_v1  ;;  %1625 = vst [vmem:[%s3159_s12 + $0x240] sm:$0xff] %v1497_v2  ;;  %v1436_v8 = vmax.f32 %v842_v3, 0.0  ;;  %v1500_v9 = vmax.f32 %v1162_v5, 0.0  ;;  %v837_v10 = vadd.f32 %v3153_v4, %v836_v6  ;;  %v1157_v11 = vadd.f32 %v3153_v4, %v1156_v7 }
  0xf2   : > { %v2466_v12 = vpop.f32.mrf.mxu0  ;;  %v2562_v13 = vpop.f32.mrf.mxu1 }
  0xf3   : > { %1564 = vst [vmem:[%s3159_s12 + $0x58] sm:$0xff] %v1436_v8  ;;  %1628 = vst [vmem:[%s3159_s12 + $0x258] sm:$0xff] %v1500_v9  ;;  %v1435_v14 = vmax.f32 %v837_v10, 0.0  ;;  %v1499_v15 = vmax.f32 %v1157_v11, 0.0  ;;  %v852_v16 = vadd.f32 %v2466_v12, %v3153_v4  ;;  %v1172_v17 = vadd.f32 %v2562_v13, %v3153_v4 }
  0xf4   : > { %v846_v18 = vpop.f32.mrf.mxu0  ;;  %v1166_v19 = vpop.f32.mrf.mxu1 }
  0xf5   : > { %1563 = vst [vmem:[%s3159_s12 + $0x50] sm:$0xff] %v1435_v14  ;;  %1627 = vst [vmem:[%s3159_s12 + $0x250] sm:$0xff] %v1499_v15  ;;  %v1438_v20 = vmax.f32 %v852_v16, 0.0  ;;  %v1502_v21 = vmax.f32 %v1172_v17, 0.0  ;;  %v847_v22 = vadd.f32 %v3153_v4, %v846_v18  ;;  %v1167_v23 = vadd.f32 %v3153_v4, %v1166_v19 }
  0xf6   : > { %v2469_v24 = vpop.f32.mrf.mxu0  ;;  %v2565_v25 = vpop.f32.mrf.mxu1 }
  0xf7   : > { %1566 = vst [vmem:[%s3159_s12 + $0x68] sm:$0xff] %v1438_v20  ;;  %1630 = vst [vmem:[%s3159_s12 + $0x268] sm:$0xff] %v1502_v21  ;;  %v1437_v26 = vmax.f32 %v847_v22, 0.0  ;;  %v1501_v27 = vmax.f32 %v1167_v23, 0.0  ;;  %v862_v28 = vadd.f32 %v2469_v24, %v3153_v4  ;;  %v1182_v29 = vadd.f32 %v2565_v25, %v3153_v4 }
  0xf8   : > { %v856_v30 = vpop.f32.mrf.mxu0  ;;  %v1176_v31 = vpop.f32.mrf.mxu1 }
  0xf9   : > { %1565 = vst [vmem:[%s3159_s12 + $0x60] sm:$0xff] %v1437_v26  ;;  %1629 = vst [vmem:[%s3159_s12 + $0x260] sm:$0xff] %v1501_v27  ;;  %v1440_v32 = vmax.f32 %v862_v28, 0.0  ;;  %v1504_v33 = vmax.f32 %v1182_v29, 0.0  ;;  %v857_v34 = vadd.f32 %v3153_v4, %v856_v30  ;;  %v1177_v35 = vadd.f32 %v3153_v4, %v1176_v31 }
  0xfa   : > { %v2472_v36 = vpop.f32.mrf.mxu0  ;;  %v2568_v37 = vpop.f32.mrf.mxu1 }
  0xfb   : > { %1568 = vst [vmem:[%s3159_s12 + $0x78] sm:$0xff] %v1440_v32  ;;  %1632 = vst [vmem:[%s3159_s12 + $0x278] sm:$0xff] %v1504_v33  ;;  %v1439_v38 = vmax.f32 %v857_v34, 0.0  ;;  %v1503_v39 = vmax.f32 %v1177_v35, 0.0  ;;  %v872_v40 = vadd.f32 %v2472_v36, %v3153_v4  ;;  %v1192_v41 = vadd.f32 %v2568_v37, %v3153_v4 }
  0xfc   : > { %v866_v42 = vpop.f32.mrf.mxu0  ;;  %v1186_v43 = vpop.f32.mrf.mxu1 }
  0xfd   : > { %1567 = vst [vmem:[%s3159_s12 + $0x70] sm:$0xff] %v1439_v38  ;;  %1631 = vst [vmem:[%s3159_s12 + $0x270] sm:$0xff] %v1503_v39  ;;  %v1442_v44 = vmax.f32 %v872_v40, 0.0  ;;  %v1506_v45 = vmax.f32 %v1192_v41, 0.0  ;;  %v867_v46 = vadd.f32 %v3153_v4, %v866_v42  ;;  %v1187_v47 = vadd.f32 %v3153_v4, %v1186_v43 }
  0xfe   : > { %v2475_v48 = vpop.f32.mrf.mxu0  ;;  %v2571_v49 = vpop.f32.mrf.mxu1 }
  0xff   : > { %1570 = vst [vmem:[%s3159_s12 + $0x88] sm:$0xff] %v1442_v44  ;;  %1634 = vst [vmem:[%s3159_s12 + $0x288] sm:$0xff] %v1506_v45  ;;  %v1441_v50 = vmax.f32 %v867_v46, 0.0  ;;  %v1505_v51 = vmax.f32 %v1187_v47, 0.0  ;;  %v882_v52 = vadd.f32 %v2475_v48, %v3153_v4  ;;  %v1202_v53 = vadd.f32 %v2571_v49, %v3153_v4 }
 0x100   : > { %v876_v54 = vpop.f32.mrf.mxu0  ;;  %v1196_v55 = vpop.f32.mrf.mxu1 }
 0x101   : > { %1569 = vst [vmem:[%s3159_s12 + $0x80] sm:$0xff] %v1441_v50  ;;  %1633 = vst [vmem:[%s3159_s12 + $0x280] sm:$0xff] %v1505_v51  ;;  %v1444_v56 = vmax.f32 %v882_v52, 0.0  ;;  %v1508_v57 = vmax.f32 %v1202_v53, 0.0  ;;  %v877_v58 = vadd.f32 %v3153_v4, %v876_v54  ;;  %v1197_v59 = vadd.f32 %v3153_v4, %v1196_v55 }
 0x102   : > { %v2478_v60 = vpop.f32.mrf.mxu0  ;;  %v2574_v61 = vpop.f32.mrf.mxu1 }
 0x103   : > { %1572 = vst [vmem:[%s3159_s12 + $0x98] sm:$0xff] %v1444_v56  ;;  %1636 = vst [vmem:[%s3159_s12 + $0x298] sm:$0xff] %v1508_v57  ;;  %v1443_v62 = vmax.f32 %v877_v58, 0.0  ;;  %v1507_v63 = vmax.f32 %v1197_v59, 0.0  ;;  %v892_v0 = vadd.f32 %v2478_v60, %v3153_v4  ;;  %v1212_v1 = vadd.f32 %v2574_v61, %v3153_v4 }
 0x104   : > { %v886_v2 = vpop.f32.mrf.mxu0  ;;  %v1206_v3 = vpop.f32.mrf.mxu1 }
 0x105   : > { %1571 = vst [vmem:[%s3159_s12 + $0x90] sm:$0xff] %v1443_v62  ;;  %1635 = vst [vmem:[%s3159_s12 + $0x290] sm:$0xff] %v1507_v63  ;;  %v1446_v5 = vmax.f32 %v892_v0, 0.0  ;;  %v1510_v6 = vmax.f32 %v1212_v1, 0.0  ;;  %v887_v7 = vadd.f32 %v3153_v4, %v886_v2  ;;  %v1207_v8 = vadd.f32 %v3153_v4, %v1206_v3 }
 0x106   : > { %v2481_v9 = vpop.f32.mrf.mxu0  ;;  %v2577_v10 = vpop.f32.mrf.mxu1 }
 0x107   : > { %1574 = vst [vmem:[%s3159_s12 + $0xa8] sm:$0xff] %v1446_v5  ;;  %1638 = vst [vmem:[%s3159_s12 + $0x2a8] sm:$0xff] %v1510_v6  ;;  %v1445_v11 = vmax.f32 %v887_v7, 0.0  ;;  %v1509_v12 = vmax.f32 %v1207_v8, 0.0  ;;  %v902_v13 = vadd.f32 %v2481_v9, %v3153_v4  ;;  %v1222_v14 = vadd.f32 %v2577_v10, %v3153_v4 }
 0x108   : > { %v896_v15 = vpop.f32.mrf.mxu0  ;;  %v1216_v16 = vpop.f32.mrf.mxu1 }
 0x109   : > { %1573 = vst [vmem:[%s3159_s12 + $0xa0] sm:$0xff] %v1445_v11  ;;  %1637 = vst [vmem:[%s3159_s12 + $0x2a0] sm:$0xff] %v1509_v12  ;;  %v1448_v17 = vmax.f32 %v902_v13, 0.0  ;;  %v1512_v18 = vmax.f32 %v1222_v14, 0.0  ;;  %v897_v19 = vadd.f32 %v3153_v4, %v896_v15  ;;  %v1217_v20 = vadd.f32 %v3153_v4, %v1216_v16 }
 0x10a   : > { %v2484_v21 = vpop.f32.mrf.mxu0  ;;  %v2580_v22 = vpop.f32.mrf.mxu1 }
 0x10b   : > { %1576 = vst [vmem:[%s3159_s12 + $0xb8] sm:$0xff] %v1448_v17  ;;  %1640 = vst [vmem:[%s3159_s12 + $0x2b8] sm:$0xff] %v1512_v18  ;;  %v1447_v23 = vmax.f32 %v897_v19, 0.0  ;;  %v1511_v24 = vmax.f32 %v1217_v20, 0.0  ;;  %v912_v25 = vadd.f32 %v2484_v21, %v3153_v4  ;;  %v1232_v26 = vadd.f32 %v2580_v22, %v3153_v4 }
 0x10c   : > { %v906_v27 = vpop.f32.mrf.mxu0  ;;  %v1226_v28 = vpop.f32.mrf.mxu1 }
 0x10d   : > { %1575 = vst [vmem:[%s3159_s12 + $0xb0] sm:$0xff] %v1447_v23  ;;  %1639 = vst [vmem:[%s3159_s12 + $0x2b0] sm:$0xff] %v1511_v24  ;;  %v1450_v29 = vmax.f32 %v912_v25, 0.0  ;;  %v1514_v30 = vmax.f32 %v1232_v26, 0.0  ;;  %v907_v31 = vadd.f32 %v3153_v4, %v906_v27  ;;  %v1227_v32 = vadd.f32 %v3153_v4, %v1226_v28 }
 0x10e   : > { %v2487_v33 = vpop.f32.mrf.mxu0  ;;  %v2583_v34 = vpop.f32.mrf.mxu1 }
 0x10f   : > { %1578 = vst [vmem:[%s3159_s12 + $0xc8] sm:$0xff] %v1450_v29  ;;  %1642 = vst [vmem:[%s3159_s12 + $0x2c8] sm:$0xff] %v1514_v30  ;;  %v1449_v35 = vmax.f32 %v907_v31, 0.0  ;;  %v1513_v36 = vmax.f32 %v1227_v32, 0.0  ;;  %v922_v37 = vadd.f32 %v2487_v33, %v3153_v4  ;;  %v1242_v38 = vadd.f32 %v2583_v34, %v3153_v4 }
 0x110   : > { %v916_v39 = vpop.f32.mrf.mxu0  ;;  %v1236_v40 = vpop.f32.mrf.mxu1 }
 0x111   : > { %1577 = vst [vmem:[%s3159_s12 + $0xc0] sm:$0xff] %v1449_v35  ;;  %1641 = vst [vmem:[%s3159_s12 + $0x2c0] sm:$0xff] %v1513_v36  ;;  %v1452_v41 = vmax.f32 %v922_v37, 0.0  ;;  %v1516_v42 = vmax.f32 %v1242_v38, 0.0  ;;  %v917_v43 = vadd.f32 %v3153_v4, %v916_v39  ;;  %v1237_v44 = vadd.f32 %v3153_v4, %v1236_v40 }
 0x112   : > { %v2490_v45 = vpop.f32.mrf.mxu0  ;;  %v2586_v46 = vpop.f32.mrf.mxu1 }
 0x113   : > { %1580 = vst [vmem:[%s3159_s12 + $0xd8] sm:$0xff] %v1452_v41  ;;  %1644 = vst [vmem:[%s3159_s12 + $0x2d8] sm:$0xff] %v1516_v42  ;;  %v1451_v47 = vmax.f32 %v917_v43, 0.0  ;;  %v1515_v48 = vmax.f32 %v1237_v44, 0.0  ;;  %v932_v49 = vadd.f32 %v2490_v45, %v3153_v4  ;;  %v1252_v50 = vadd.f32 %v2586_v46, %v3153_v4 }
 0x114   : > { %v926_v51 = vpop.f32.mrf.mxu0  ;;  %v1246_v52 = vpop.f32.mrf.mxu1 }
 0x115   : > { %1579 = vst [vmem:[%s3159_s12 + $0xd0] sm:$0xff] %v1451_v47  ;;  %1643 = vst [vmem:[%s3159_s12 + $0x2d0] sm:$0xff] %v1515_v48  ;;  %v1454_v53 = vmax.f32 %v932_v49, 0.0  ;;  %v1518_v54 = vmax.f32 %v1252_v50, 0.0  ;;  %v927_v55 = vadd.f32 %v3153_v4, %v926_v51  ;;  %v1247_v56 = vadd.f32 %v3153_v4, %v1246_v52 }
 0x116   : > { %v2493_v57 = vpop.f32.mrf.mxu0  ;;  %v2589_v58 = vpop.f32.mrf.mxu1 }
 0x117   : > { %1582 = vst [vmem:[%s3159_s12 + $0xe8] sm:$0xff] %v1454_v53  ;;  %1646 = vst [vmem:[%s3159_s12 + $0x2e8] sm:$0xff] %v1518_v54  ;;  %v1453_v59 = vmax.f32 %v927_v55, 0.0  ;;  %v1517_v60 = vmax.f32 %v1247_v56, 0.0  ;;  %v942_v61 = vadd.f32 %v2493_v57, %v3153_v4  ;;  %v1262_v62 = vadd.f32 %v2589_v58, %v3153_v4 }
 0x118   : > { %v936_v63 = vpop.f32.mrf.mxu0  ;;  %v1256_v0 = vpop.f32.mrf.mxu1 }
 0x119   : > { %1581 = vst [vmem:[%s3159_s12 + $0xe0] sm:$0xff] %v1453_v59  ;;  %1645 = vst [vmem:[%s3159_s12 + $0x2e0] sm:$0xff] %v1517_v60  ;;  %v1456_v1 = vmax.f32 %v942_v61, 0.0  ;;  %v1520_v2 = vmax.f32 %v1262_v62, 0.0  ;;  %v937_v3 = vadd.f32 %v3153_v4, %v936_v63  ;;  %v1257_v5 = vadd.f32 %v3153_v4, %v1256_v0 }
 0x11a   : > { %v2496_v6 = vpop.f32.mrf.mxu0  ;;  %v2592_v7 = vpop.f32.mrf.mxu1 }
 0x11b   : > { %1584 = vst [vmem:[%s3159_s12 + $0xf8] sm:$0xff] %v1456_v1  ;;  %1648 = vst [vmem:[%s3159_s12 + $0x2f8] sm:$0xff] %v1520_v2  ;;  %v1455_v8 = vmax.f32 %v937_v3, 0.0  ;;  %v1519_v9 = vmax.f32 %v1257_v5, 0.0  ;;  %v952_v10 = vadd.f32 %v2496_v6, %v3153_v4  ;;  %v1272_v11 = vadd.f32 %v2592_v7, %v3153_v4 }
 0x11c   : > { %v946_v12 = vpop.f32.mrf.mxu0  ;;  %v1266_v13 = vpop.f32.mrf.mxu1 }
 0x11d   : > { %1583 = vst [vmem:[%s3159_s12 + $0xf0] sm:$0xff] %v1455_v8  ;;  %1647 = vst [vmem:[%s3159_s12 + $0x2f0] sm:$0xff] %v1519_v9  ;;  %v1458_v14 = vmax.f32 %v952_v10, 0.0  ;;  %v1522_v15 = vmax.f32 %v1272_v11, 0.0  ;;  %v947_v16 = vadd.f32 %v3153_v4, %v946_v12  ;;  %v1267_v17 = vadd.f32 %v3153_v4, %v1266_v13 }
 0x11e   : > { %v2499_v18 = vpop.f32.mrf.mxu0  ;;  %v2595_v19 = vpop.f32.mrf.mxu1 }
 0x11f   : > { %1586 = vst [vmem:[%s3159_s12 + $0x108] sm:$0xff] %v1458_v14  ;;  %1650 = vst [vmem:[%s3159_s12 + $0x308] sm:$0xff] %v1522_v15  ;;  %v1457_v20 = vmax.f32 %v947_v16, 0.0  ;;  %v1521_v21 = vmax.f32 %v1267_v17, 0.0  ;;  %v962_v22 = vadd.f32 %v2499_v18, %v3153_v4  ;;  %v1282_v23 = vadd.f32 %v2595_v19, %v3153_v4 }
 0x120   : > { %v956_v24 = vpop.f32.mrf.mxu0  ;;  %v1276_v25 = vpop.f32.mrf.mxu1 }
 0x121   : > { %1585 = vst [vmem:[%s3159_s12 + $0x100] sm:$0xff] %v1457_v20  ;;  %1649 = vst [vmem:[%s3159_s12 + $0x300] sm:$0xff] %v1521_v21  ;;  %v1460_v26 = vmax.f32 %v962_v22, 0.0  ;;  %v1524_v27 = vmax.f32 %v1282_v23, 0.0  ;;  %v957_v28 = vadd.f32 %v3153_v4, %v956_v24  ;;  %v1277_v29 = vadd.f32 %v3153_v4, %v1276_v25 }
 0x122   : > { %v2502_v30 = vpop.f32.mrf.mxu0  ;;  %v2598_v31 = vpop.f32.mrf.mxu1 }
 0x123   : > { %1588 = vst [vmem:[%s3159_s12 + $0x118] sm:$0xff] %v1460_v26  ;;  %1652 = vst [vmem:[%s3159_s12 + $0x318] sm:$0xff] %v1524_v27  ;;  %v1459_v32 = vmax.f32 %v957_v28, 0.0  ;;  %v1523_v33 = vmax.f32 %v1277_v29, 0.0  ;;  %v972_v34 = vadd.f32 %v2502_v30, %v3153_v4  ;;  %v1292_v35 = vadd.f32 %v2598_v31, %v3153_v4 }
 0x124   : > { %v966_v36 = vpop.f32.mrf.mxu0  ;;  %v1286_v37 = vpop.f32.mrf.mxu1 }
 0x125   : > { %1587 = vst [vmem:[%s3159_s12 + $0x110] sm:$0xff] %v1459_v32  ;;  %1651 = vst [vmem:[%s3159_s12 + $0x310] sm:$0xff] %v1523_v33  ;;  %v1462_v38 = vmax.f32 %v972_v34, 0.0  ;;  %v1526_v39 = vmax.f32 %v1292_v35, 0.0  ;;  %v967_v40 = vadd.f32 %v3153_v4, %v966_v36  ;;  %v1287_v41 = vadd.f32 %v3153_v4, %v1286_v37 }
 0x126   : > { %v2505_v42 = vpop.f32.mrf.mxu0  ;;  %v2601_v43 = vpop.f32.mrf.mxu1 }
 0x127   : > { %1590 = vst [vmem:[%s3159_s12 + $0x128] sm:$0xff] %v1462_v38  ;;  %1654 = vst [vmem:[%s3159_s12 + $0x328] sm:$0xff] %v1526_v39  ;;  %v1461_v44 = vmax.f32 %v967_v40, 0.0  ;;  %v1525_v45 = vmax.f32 %v1287_v41, 0.0  ;;  %v982_v46 = vadd.f32 %v2505_v42, %v3153_v4  ;;  %v1302_v47 = vadd.f32 %v2601_v43, %v3153_v4 }
 0x128   : > { %v976_v48 = vpop.f32.mrf.mxu0  ;;  %v1296_v49 = vpop.f32.mrf.mxu1 }
 0x129   : > { %1589 = vst [vmem:[%s3159_s12 + $0x120] sm:$0xff] %v1461_v44  ;;  %1653 = vst [vmem:[%s3159_s12 + $0x320] sm:$0xff] %v1525_v45  ;;  %v1464_v50 = vmax.f32 %v982_v46, 0.0  ;;  %v1528_v51 = vmax.f32 %v1302_v47, 0.0  ;;  %v977_v52 = vadd.f32 %v3153_v4, %v976_v48  ;;  %v1297_v53 = vadd.f32 %v3153_v4, %v1296_v49 }
 0x12a   : > { %v2508_v54 = vpop.f32.mrf.mxu0  ;;  %v2604_v55 = vpop.f32.mrf.mxu1 }
 0x12b   : > { %1592 = vst [vmem:[%s3159_s12 + $0x138] sm:$0xff] %v1464_v50  ;;  %1656 = vst [vmem:[%s3159_s12 + $0x338] sm:$0xff] %v1528_v51  ;;  %v1463_v56 = vmax.f32 %v977_v52, 0.0  ;;  %v1527_v57 = vmax.f32 %v1297_v53, 0.0  ;;  %v992_v58 = vadd.f32 %v2508_v54, %v3153_v4  ;;  %v1312_v59 = vadd.f32 %v2604_v55, %v3153_v4 }
 0x12c   : > { %v986_v60 = vpop.f32.mrf.mxu0  ;;  %v1306_v61 = vpop.f32.mrf.mxu1 }
 0x12d   : > { %1591 = vst [vmem:[%s3159_s12 + $0x130] sm:$0xff] %v1463_v56  ;;  %1655 = vst [vmem:[%s3159_s12 + $0x330] sm:$0xff] %v1527_v57  ;;  %v1466_v62 = vmax.f32 %v992_v58, 0.0  ;;  %v1530_v63 = vmax.f32 %v1312_v59, 0.0  ;;  %v987_v0 = vadd.f32 %v3153_v4, %v986_v60  ;;  %v1307_v1 = vadd.f32 %v3153_v4, %v1306_v61 }
 0x12e   : > { %v2511_v2 = vpop.f32.mrf.mxu0  ;;  %v2607_v3 = vpop.f32.mrf.mxu1 }
 0x12f   : > { %1594 = vst [vmem:[%s3159_s12 + $0x148] sm:$0xff] %v1466_v62  ;;  %1658 = vst [vmem:[%s3159_s12 + $0x348] sm:$0xff] %v1530_v63  ;;  %v1465_v5 = vmax.f32 %v987_v0, 0.0  ;;  %v1529_v6 = vmax.f32 %v1307_v1, 0.0  ;;  %v1002_v7 = vadd.f32 %v2511_v2, %v3153_v4  ;;  %v1322_v8 = vadd.f32 %v2607_v3, %v3153_v4 }
 0x130   : > { %v996_v9 = vpop.f32.mrf.mxu0  ;;  %v1316_v10 = vpop.f32.mrf.mxu1 }
 0x131   : > { %1593 = vst [vmem:[%s3159_s12 + $0x140] sm:$0xff] %v1465_v5  ;;  %1657 = vst [vmem:[%s3159_s12 + $0x340] sm:$0xff] %v1529_v6  ;;  %v1468_v11 = vmax.f32 %v1002_v7, 0.0  ;;  %v1532_v12 = vmax.f32 %v1322_v8, 0.0  ;;  %v997_v13 = vadd.f32 %v3153_v4, %v996_v9  ;;  %v1317_v14 = vadd.f32 %v3153_v4, %v1316_v10 }
 0x132   : > { %v2514_v15 = vpop.f32.mrf.mxu0  ;;  %v2610_v16 = vpop.f32.mrf.mxu1 }
 0x133   : > { %1596 = vst [vmem:[%s3159_s12 + $0x158] sm:$0xff] %v1468_v11  ;;  %1660 = vst [vmem:[%s3159_s12 + $0x358] sm:$0xff] %v1532_v12  ;;  %v1467_v17 = vmax.f32 %v997_v13, 0.0  ;;  %v1531_v18 = vmax.f32 %v1317_v14, 0.0  ;;  %v1012_v19 = vadd.f32 %v2514_v15, %v3153_v4  ;;  %v1332_v20 = vadd.f32 %v2610_v16, %v3153_v4 }
 0x134   : > { %v1006_v21 = vpop.f32.mrf.mxu0  ;;  %v1326_v22 = vpop.f32.mrf.mxu1 }
 0x135   : > { %1595 = vst [vmem:[%s3159_s12 + $0x150] sm:$0xff] %v1467_v17  ;;  %1659 = vst [vmem:[%s3159_s12 + $0x350] sm:$0xff] %v1531_v18  ;;  %v1470_v23 = vmax.f32 %v1012_v19, 0.0  ;;  %v1534_v24 = vmax.f32 %v1332_v20, 0.0  ;;  %v1007_v25 = vadd.f32 %v3153_v4, %v1006_v21  ;;  %v1327_v26 = vadd.f32 %v3153_v4, %v1326_v22 }
 0x136   : > { %v2517_v27 = vpop.f32.mrf.mxu0  ;;  %v2613_v28 = vpop.f32.mrf.mxu1 }
 0x137   : > { %1598 = vst [vmem:[%s3159_s12 + $0x168] sm:$0xff] %v1470_v23  ;;  %1662 = vst [vmem:[%s3159_s12 + $0x368] sm:$0xff] %v1534_v24  ;;  %v1469_v29 = vmax.f32 %v1007_v25, 0.0  ;;  %v1533_v30 = vmax.f32 %v1327_v26, 0.0  ;;  %v1022_v31 = vadd.f32 %v2517_v27, %v3153_v4  ;;  %v1342_v32 = vadd.f32 %v2613_v28, %v3153_v4 }
 0x138   : > { %v1016_v33 = vpop.f32.mrf.mxu0  ;;  %v1336_v34 = vpop.f32.mrf.mxu1 }
 0x139   : > { %1597 = vst [vmem:[%s3159_s12 + $0x160] sm:$0xff] %v1469_v29  ;;  %1661 = vst [vmem:[%s3159_s12 + $0x360] sm:$0xff] %v1533_v30  ;;  %v1472_v35 = vmax.f32 %v1022_v31, 0.0  ;;  %v1536_v36 = vmax.f32 %v1342_v32, 0.0  ;;  %v1017_v37 = vadd.f32 %v3153_v4, %v1016_v33  ;;  %v1337_v38 = vadd.f32 %v3153_v4, %v1336_v34 }
 0x13a   : > { %v2520_v39 = vpop.f32.mrf.mxu0  ;;  %v2616_v40 = vpop.f32.mrf.mxu1 }
 0x13b   : > { %1600 = vst [vmem:[%s3159_s12 + $0x178] sm:$0xff] %v1472_v35  ;;  %1664 = vst [vmem:[%s3159_s12 + $0x378] sm:$0xff] %v1536_v36  ;;  %v1471_v41 = vmax.f32 %v1017_v37, 0.0  ;;  %v1535_v42 = vmax.f32 %v1337_v38, 0.0  ;;  %v1032_v43 = vadd.f32 %v2520_v39, %v3153_v4  ;;  %v1352_v44 = vadd.f32 %v2616_v40, %v3153_v4 }
 0x13c   : > { %v1026_v45 = vpop.f32.mrf.mxu0  ;;  %v1346_v46 = vpop.f32.mrf.mxu1 }
 0x13d   : > { %1599 = vst [vmem:[%s3159_s12 + $0x170] sm:$0xff] %v1471_v41  ;;  %1663 = vst [vmem:[%s3159_s12 + $0x370] sm:$0xff] %v1535_v42  ;;  %v1474_v47 = vmax.f32 %v1032_v43, 0.0  ;;  %v1538_v48 = vmax.f32 %v1352_v44, 0.0  ;;  %v1027_v49 = vadd.f32 %v3153_v4, %v1026_v45  ;;  %v1347_v50 = vadd.f32 %v3153_v4, %v1346_v46 }
 0x13e   : > { %v2523_v51 = vpop.f32.mrf.mxu0  ;;  %v2619_v52 = vpop.f32.mrf.mxu1 }
 0x13f   : > { %1602 = vst [vmem:[%s3159_s12 + $0x188] sm:$0xff] %v1474_v47  ;;  %1666 = vst [vmem:[%s3159_s12 + $0x388] sm:$0xff] %v1538_v48  ;;  %v1473_v53 = vmax.f32 %v1027_v49, 0.0  ;;  %v1537_v54 = vmax.f32 %v1347_v50, 0.0  ;;  %v1042_v55 = vadd.f32 %v2523_v51, %v3153_v4  ;;  %v1362_v56 = vadd.f32 %v2619_v52, %v3153_v4 }
 0x140   : > { %v1036_v57 = vpop.f32.mrf.mxu0  ;;  %v1356_v58 = vpop.f32.mrf.mxu1 }
 0x141   : > { %1601 = vst [vmem:[%s3159_s12 + $0x180] sm:$0xff] %v1473_v53  ;;  %1665 = vst [vmem:[%s3159_s12 + $0x380] sm:$0xff] %v1537_v54  ;;  %v1476_v59 = vmax.f32 %v1042_v55, 0.0  ;;  %v1540_v60 = vmax.f32 %v1362_v56, 0.0  ;;  %v1037_v61 = vadd.f32 %v3153_v4, %v1036_v57  ;;  %v1357_v62 = vadd.f32 %v3153_v4, %v1356_v58 }
 0x142   : > { %v2526_v63 = vpop.f32.mrf.mxu0  ;;  %v2622_v0 = vpop.f32.mrf.mxu1 }
 0x143   : > { %1604 = vst [vmem:[%s3159_s12 + $0x198] sm:$0xff] %v1476_v59  ;;  %1668 = vst [vmem:[%s3159_s12 + $0x398] sm:$0xff] %v1540_v60  ;;  %v1475_v1 = vmax.f32 %v1037_v61, 0.0  ;;  %v1539_v2 = vmax.f32 %v1357_v62, 0.0  ;;  %v1052_v3 = vadd.f32 %v2526_v63, %v3153_v4  ;;  %v1372_v5 = vadd.f32 %v2622_v0, %v3153_v4 }
 0x144   : > { %v1046_v6 = vpop.f32.mrf.mxu0  ;;  %v1366_v7 = vpop.f32.mrf.mxu1 }
 0x145   : > { %1603 = vst [vmem:[%s3159_s12 + $0x190] sm:$0xff] %v1475_v1  ;;  %1667 = vst [vmem:[%s3159_s12 + $0x390] sm:$0xff] %v1539_v2  ;;  %v1478_v8 = vmax.f32 %v1052_v3, 0.0  ;;  %v1542_v9 = vmax.f32 %v1372_v5, 0.0  ;;  %v1047_v10 = vadd.f32 %v3153_v4, %v1046_v6  ;;  %v1367_v11 = vadd.f32 %v3153_v4, %v1366_v7 }
 0x146   : > { %v2529_v12 = vpop.f32.mrf.mxu0  ;;  %v2625_v13 = vpop.f32.mrf.mxu1 }
 0x147   : > { %1606 = vst [vmem:[%s3159_s12 + $0x1a8] sm:$0xff] %v1478_v8  ;;  %1670 = vst [vmem:[%s3159_s12 + $0x3a8] sm:$0xff] %v1542_v9  ;;  %v1477_v14 = vmax.f32 %v1047_v10, 0.0  ;;  %v1541_v15 = vmax.f32 %v1367_v11, 0.0  ;;  %v1062_v16 = vadd.f32 %v2529_v12, %v3153_v4  ;;  %v1382_v17 = vadd.f32 %v2625_v13, %v3153_v4 }
 0x148   : > { %v1056_v18 = vpop.f32.mrf.mxu0  ;;  %v1376_v19 = vpop.f32.mrf.mxu1 }
 0x149   : > { %1605 = vst [vmem:[%s3159_s12 + $0x1a0] sm:$0xff] %v1477_v14  ;;  %1669 = vst [vmem:[%s3159_s12 + $0x3a0] sm:$0xff] %v1541_v15  ;;  %v1480_v20 = vmax.f32 %v1062_v16, 0.0  ;;  %v1544_v21 = vmax.f32 %v1382_v17, 0.0  ;;  %v1057_v22 = vadd.f32 %v3153_v4, %v1056_v18  ;;  %v1377_v23 = vadd.f32 %v3153_v4, %v1376_v19 }
 0x14a   : > { %v2532_v24 = vpop.f32.mrf.mxu0  ;;  %v2628_v25 = vpop.f32.mrf.mxu1 }
 0x14b   : > { %1608 = vst [vmem:[%s3159_s12 + $0x1b8] sm:$0xff] %v1480_v20  ;;  %1672 = vst [vmem:[%s3159_s12 + $0x3b8] sm:$0xff] %v1544_v21  ;;  %v1479_v26 = vmax.f32 %v1057_v22, 0.0  ;;  %v1543_v27 = vmax.f32 %v1377_v23, 0.0  ;;  %v1072_v28 = vadd.f32 %v2532_v24, %v3153_v4  ;;  %v1392_v29 = vadd.f32 %v2628_v25, %v3153_v4 }
 0x14c   : > { %v1066_v30 = vpop.f32.mrf.mxu0  ;;  %v1386_v31 = vpop.f32.mrf.mxu1 }
 0x14d   : > { %1607 = vst [vmem:[%s3159_s12 + $0x1b0] sm:$0xff] %v1479_v26  ;;  %1671 = vst [vmem:[%s3159_s12 + $0x3b0] sm:$0xff] %v1543_v27  ;;  %v1482_v32 = vmax.f32 %v1072_v28, 0.0  ;;  %v1546_v33 = vmax.f32 %v1392_v29, 0.0  ;;  %v1067_v34 = vadd.f32 %v3153_v4, %v1066_v30  ;;  %v1387_v35 = vadd.f32 %v3153_v4, %v1386_v31 }
 0x14e   : > { %v2535_v36 = vpop.f32.mrf.mxu0  ;;  %v2631_v37 = vpop.f32.mrf.mxu1 }
 0x14f   : > { %1610 = vst [vmem:[%s3159_s12 + $0x1c8] sm:$0xff] %v1482_v32  ;;  %1674 = vst [vmem:[%s3159_s12 + $0x3c8] sm:$0xff] %v1546_v33  ;;  %v1481_v38 = vmax.f32 %v1067_v34, 0.0  ;;  %v1545_v39 = vmax.f32 %v1387_v35, 0.0  ;;  %v1082_v40 = vadd.f32 %v2535_v36, %v3153_v4  ;;  %v1402_v41 = vadd.f32 %v2631_v37, %v3153_v4 }
 0x150   : > { %v1076_v42 = vpop.f32.mrf.mxu0  ;;  %v1396_v43 = vpop.f32.mrf.mxu1 }
 0x151   : > { %1609 = vst [vmem:[%s3159_s12 + $0x1c0] sm:$0xff] %v1481_v38  ;;  %1673 = vst [vmem:[%s3159_s12 + $0x3c0] sm:$0xff] %v1545_v39  ;;  %v1484_v44 = vmax.f32 %v1082_v40, 0.0  ;;  %v1548_v45 = vmax.f32 %v1402_v41, 0.0  ;;  %v1077_v46 = vadd.f32 %v3153_v4, %v1076_v42  ;;  %v1397_v47 = vadd.f32 %v3153_v4, %v1396_v43 }
 0x152   : > { %v2538_v48 = vpop.f32.mrf.mxu0  ;;  %v2634_v49 = vpop.f32.mrf.mxu1 }
 0x153   : > { %1612 = vst [vmem:[%s3159_s12 + $0x1d8] sm:$0xff] %v1484_v44  ;;  %1676 = vst [vmem:[%s3159_s12 + $0x3d8] sm:$0xff] %v1548_v45  ;;  %v1483_v50 = vmax.f32 %v1077_v46, 0.0  ;;  %v1547_v51 = vmax.f32 %v1397_v47, 0.0  ;;  %v1092_v52 = vadd.f32 %v2538_v48, %v3153_v4  ;;  %v1412_v53 = vadd.f32 %v2634_v49, %v3153_v4 }
 0x154   : > { %v1086_v54 = vpop.f32.mrf.mxu0  ;;  %v1406_v55 = vpop.f32.mrf.mxu1 }
 0x155   : > { %1611 = vst [vmem:[%s3159_s12 + $0x1d0] sm:$0xff] %v1483_v50  ;;  %1675 = vst [vmem:[%s3159_s12 + $0x3d0] sm:$0xff] %v1547_v51  ;;  %v1486_v56 = vmax.f32 %v1092_v52, 0.0  ;;  %v1550_v57 = vmax.f32 %v1412_v53, 0.0  ;;  %v1087_v58 = vadd.f32 %v3153_v4, %v1086_v54  ;;  %v1407_v59 = vadd.f32 %v3153_v4, %v1406_v55 }
 0x156   : > { %v2541_v60 = vpop.f32.mrf.mxu0  ;;  %v2637_v61 = vpop.f32.mrf.mxu1 }
 0x157   : > { %1614 = vst [vmem:[%s3159_s12 + $0x1e8] sm:$0xff] %v1486_v56  ;;  %1678 = vst [vmem:[%s3159_s12 + $0x3e8] sm:$0xff] %v1550_v57  ;;  %v1485_v62 = vmax.f32 %v1087_v58, 0.0  ;;  %v1549_v63 = vmax.f32 %v1407_v59, 0.0  ;;  %v1102_v0 = vadd.f32 %v2541_v60, %v3153_v4  ;;  %v1422_v1 = vadd.f32 %v2637_v61, %v3153_v4 }
 0x158   : > { %v1096_v2 = vpop.f32.mrf.mxu0  ;;  %v1416_v3 = vpop.f32.mrf.mxu1 }
 0x159   : > { %1613 = vst [vmem:[%s3159_s12 + $0x1e0] sm:$0xff] %v1485_v62  ;;  %1677 = vst [vmem:[%s3159_s12 + $0x3e0] sm:$0xff] %v1549_v63  ;;  %v1488_v5 = vmax.f32 %v1102_v0, 0.0  ;;  %v1552_v6 = vmax.f32 %v1422_v1, 0.0  ;;  %v1097_v7 = vadd.f32 %v3153_v4, %v1096_v2  ;;  %v1417_v8 = vadd.f32 %v3153_v4, %v1416_v3  ;;  %1687 = sbr.rel (!%p2867_p4) target bundleno = 414 (0x19e), region = 36 }
 0x15b   : > { %1616 = vst [vmem:[%s3159_s12 + $0x1f8] sm:$0xff] %v1488_v5  ;;  %1680 = vst [vmem:[%s3159_s12 + $0x3f8] sm:$0xff] %v1552_v6  ;;  %v1487_v9 = vmax.f32 %v1097_v7, 0.0  ;;  %v1551_v10 = vmax.f32 %v1417_v8, 0.0 }
 0x15d   : > { %1615 = vst [vmem:[%s3159_s12 + $0x1f0] sm:$0xff] %v1487_v9  ;;  %1679 = vst [vmem:[%s3159_s12 + $0x3f0] sm:$0xff] %v1551_v10 }
 0x15e   : > { %s3633_s14 = smov (!%p1690_p8, %s1689_s14), 128 }
 0x15f   : > { %s2288_s23 = sshll.u32 %s3633_s14, 7 }
 0x160   : > { %p2291_p9 = scmp.eq.s32.totalorder %s2288_s23, 0 }
 0x161   : > { %s3426_s24 = sshrl.u32 (!%p2291_p9), %s3633_s14, 6 }
 0x162   : > { %1698 = sbr.rel (%p2291_p9) target bundleno = 414 (0x19e), region = 40  ;;  %p2292_p10 = scmp.le.s32.totalorder (!%p2291_p9), %s3426_s24, 0 }
 0x167   : > { %2105 = sbr.rel (%p2292_p10) target bundleno = 397 (0x18d), region = 116  ;;  %s3624_s15 = smov (!%p2292_p10), %s3420_s22 }
 0x168   : > { %s3625_s20 = smov (!%p2292_p10), %s3159_s12  ;;  %s3435_s25 = smov (!%p2292_p10), 0  }
 0x169   : > { %s3437_s26 = smov (!%p2292_p10), 0  }
 0x16c LB: >> { %v1887_v4 = vld [vmem:[%s2796_s20] sm:$0xff]  ;;  %v1889_v11 = vld [vmem:[%s2796_s20 + $0x8] sm:$0xff]  ;;  %v1891_v12 = vld [vmem:[%s2796_s20 + $0x10] sm:$0xff]  ;;  %s2015_s27 = sadd.s32 1, %s2800_s25  ;;  %s1881_s26 = sadd.s32 1, %s2804_s26   ;;  %s2804_s26 = sphi %s3437_s26, %s1881_s26   ;;  %s2800_s25 = sphi %s3435_s25, %s3628_s25   ;;  %s2796_s20 = sphi %s3625_s20, %s3627_s20   ;;  %s2792_s15 = sphi %s3624_s15, %s3626_s15  }
 0x16d   : >> { %1888 = vst [vmem:[%s2792_s15] sm:$0xff] %v1887_v4  ;;  %1890 = vst [vmem:[%s2792_s15 + $0x8] sm:$0xff] %v1889_v11  ;;  %v1893_v13 = vld [vmem:[%s2796_s20 + $0x18] sm:$0xff]  ;;  %v1895_v14 = vld [vmem:[%s2796_s20 + $0x20] sm:$0xff]  ;;  %p2016_p11 = scmp.ge.s32.totalorder %s2015_s27, %s3426_s24  ;;  %p1880_p12 = scmp.ge.s32.totalorder %s1881_s26, %s3426_s24 }
 0x16e   : >> { %1892 = vst [vmem:[%s2792_s15 + $0x10] sm:$0xff] %v1891_v12  ;;  %v1897_v15 = vld [vmem:[%s2796_s20 + $0x28] sm:$0xff]  ;;  %1894 = vst [vmem:[%s2792_s15 + $0x18] sm:$0xff] %v1893_v13  ;;  %v1899_v16 = vld [vmem:[%s2796_s20 + $0x30] sm:$0xff] }
 0x16f   : >> { %1896 = vst [vmem:[%s2792_s15 + $0x20] sm:$0xff] %v1895_v14  ;;  %1898 = vst [vmem:[%s2792_s15 + $0x28] sm:$0xff] %v1897_v15  ;;  %v1901_v17 = vld [vmem:[%s2796_s20 + $0x38] sm:$0xff]  ;;  %v1903_v18 = vld [vmem:[%s2796_s20 + $0x40] sm:$0xff]  ;;  %s3635_s27 = smov (%p2016_p11, %s2015_s27), 0 }
 0x170   : >> { %1900 = vst [vmem:[%s2792_s15 + $0x30] sm:$0xff] %v1899_v16  ;;  %1902 = vst [vmem:[%s2792_s15 + $0x38] sm:$0xff] %v1901_v17  ;;  %v1905_v19 = vld [vmem:[%s2796_s20 + $0x48] sm:$0xff]  ;;  %v1907_v20 = vld [vmem:[%s2796_s20 + $0x50] sm:$0xff]  ;;  %s2293_s28 = sshll.u32 %s3635_s27, 9  ;;  %s3628_s25 = smov %s3635_s27 }
 0x171   : >> { %1904 = vst [vmem:[%s2792_s15 + $0x40] sm:$0xff] %v1903_v18  ;;  %v1909_v21 = vld [vmem:[%s2796_s20 + $0x58] sm:$0xff]  ;;  %1906 = vst [vmem:[%s2792_s15 + $0x48] sm:$0xff] %v1905_v19  ;;  %v1911_v22 = vld [vmem:[%s2796_s20 + $0x60] sm:$0xff]  ;;  %s3493_s29 = scalar_lea.vmem %s3159_s12, %s2293_s28 [#allocation2]   ;;  %s3496_s30 = scalar_lea.vmem %s3420_s22, %s2293_s28  }
 0x172   : >> { %1908 = vst [vmem:[%s2792_s15 + $0x50] sm:$0xff] %v1907_v20  ;;  %1910 = vst [vmem:[%s2792_s15 + $0x58] sm:$0xff] %v1909_v21  ;;  %v1913_v23 = vld [vmem:[%s2796_s20 + $0x68] sm:$0xff]  ;;  %v1915_v24 = vld [vmem:[%s2796_s20 + $0x70] sm:$0xff] }
 0x173   : >> { %1912 = vst [vmem:[%s2792_s15 + $0x60] sm:$0xff] %v1911_v22  ;;  %1914 = vst [vmem:[%s2792_s15 + $0x68] sm:$0xff] %v1913_v23  ;;  %v1917_v25 = vld [vmem:[%s2796_s20 + $0x78] sm:$0xff]  ;;  %v1919_v26 = vld [vmem:[%s2796_s20 + $0x80] sm:$0xff] }
 0x174   : >> { %1916 = vst [vmem:[%s2792_s15 + $0x70] sm:$0xff] %v1915_v24  ;;  %v1921_v27 = vld [vmem:[%s2796_s20 + $0x88] sm:$0xff]  ;;  %1918 = vst [vmem:[%s2792_s15 + $0x78] sm:$0xff] %v1917_v25  ;;  %v1923_v28 = vld [vmem:[%s2796_s20 + $0x90] sm:$0xff] }
 0x175   : >> { %1920 = vst [vmem:[%s2792_s15 + $0x80] sm:$0xff] %v1919_v26  ;;  %1922 = vst [vmem:[%s2792_s15 + $0x88] sm:$0xff] %v1921_v27  ;;  %v1925_v29 = vld [vmem:[%s2796_s20 + $0x98] sm:$0xff]  ;;  %v1927_v30 = vld [vmem:[%s2796_s20 + $0xa0] sm:$0xff] }
 0x176   : >> { %1924 = vst [vmem:[%s2792_s15 + $0x90] sm:$0xff] %v1923_v28  ;;  %1926 = vst [vmem:[%s2792_s15 + $0x98] sm:$0xff] %v1925_v29  ;;  %v1929_v31 = vld [vmem:[%s2796_s20 + $0xa8] sm:$0xff]  ;;  %v1931_v32 = vld [vmem:[%s2796_s20 + $0xb0] sm:$0xff] }
 0x177   : >> { %1928 = vst [vmem:[%s2792_s15 + $0xa0] sm:$0xff] %v1927_v30  ;;  %v1933_v33 = vld [vmem:[%s2796_s20 + $0xb8] sm:$0xff]  ;;  %1930 = vst [vmem:[%s2792_s15 + $0xa8] sm:$0xff] %v1929_v31  ;;  %v1935_v34 = vld [vmem:[%s2796_s20 + $0xc0] sm:$0xff] }
 0x178   : >> { %1932 = vst [vmem:[%s2792_s15 + $0xb0] sm:$0xff] %v1931_v32  ;;  %1934 = vst [vmem:[%s2792_s15 + $0xb8] sm:$0xff] %v1933_v33  ;;  %v1937_v35 = vld [vmem:[%s2796_s20 + $0xc8] sm:$0xff]  ;;  %v1939_v36 = vld [vmem:[%s2796_s20 + $0xd0] sm:$0xff] }
 0x179   : >> { %1936 = vst [vmem:[%s2792_s15 + $0xc0] sm:$0xff] %v1935_v34  ;;  %1938 = vst [vmem:[%s2792_s15 + $0xc8] sm:$0xff] %v1937_v35  ;;  %v1941_v37 = vld [vmem:[%s2796_s20 + $0xd8] sm:$0xff]  ;;  %v1943_v38 = vld [vmem:[%s2796_s20 + $0xe0] sm:$0xff] }
 0x17a   : >> { %1940 = vst [vmem:[%s2792_s15 + $0xd0] sm:$0xff] %v1939_v36  ;;  %v1945_v39 = vld [vmem:[%s2796_s20 + $0xe8] sm:$0xff]  ;;  %1942 = vst [vmem:[%s2792_s15 + $0xd8] sm:$0xff] %v1941_v37  ;;  %v1947_v40 = vld [vmem:[%s2796_s20 + $0xf0] sm:$0xff] }
 0x17b   : >> { %1944 = vst [vmem:[%s2792_s15 + $0xe0] sm:$0xff] %v1943_v38  ;;  %1946 = vst [vmem:[%s2792_s15 + $0xe8] sm:$0xff] %v1945_v39  ;;  %v1949_v41 = vld [vmem:[%s2796_s20 + $0xf8] sm:$0xff]  ;;  %v1951_v42 = vld [vmem:[%s2796_s20 + $0x100] sm:$0xff] }
 0x17c   : >> { %1948 = vst [vmem:[%s2792_s15 + $0xf0] sm:$0xff] %v1947_v40  ;;  %1950 = vst [vmem:[%s2792_s15 + $0xf8] sm:$0xff] %v1949_v41  ;;  %v1953_v43 = vld [vmem:[%s2796_s20 + $0x108] sm:$0xff]  ;;  %v1955_v44 = vld [vmem:[%s2796_s20 + $0x110] sm:$0xff] }
 0x17d   : >> { %1952 = vst [vmem:[%s2792_s15 + $0x100] sm:$0xff] %v1951_v42  ;;  %v1957_v45 = vld [vmem:[%s2796_s20 + $0x118] sm:$0xff]  ;;  %1954 = vst [vmem:[%s2792_s15 + $0x108] sm:$0xff] %v1953_v43  ;;  %v1959_v46 = vld [vmem:[%s2796_s20 + $0x120] sm:$0xff] }
 0x17e   : >> { %1956 = vst [vmem:[%s2792_s15 + $0x110] sm:$0xff] %v1955_v44  ;;  %1958 = vst [vmem:[%s2792_s15 + $0x118] sm:$0xff] %v1957_v45  ;;  %v1961_v47 = vld [vmem:[%s2796_s20 + $0x128] sm:$0xff]  ;;  %v1963_v48 = vld [vmem:[%s2796_s20 + $0x130] sm:$0xff] }
 0x17f   : >> { %1960 = vst [vmem:[%s2792_s15 + $0x120] sm:$0xff] %v1959_v46  ;;  %1962 = vst [vmem:[%s2792_s15 + $0x128] sm:$0xff] %v1961_v47  ;;  %v1965_v49 = vld [vmem:[%s2796_s20 + $0x138] sm:$0xff]  ;;  %v1967_v50 = vld [vmem:[%s2796_s20 + $0x140] sm:$0xff] }
 0x180   : >> { %1964 = vst [vmem:[%s2792_s15 + $0x130] sm:$0xff] %v1963_v48  ;;  %v1969_v51 = vld [vmem:[%s2796_s20 + $0x148] sm:$0xff]  ;;  %1966 = vst [vmem:[%s2792_s15 + $0x138] sm:$0xff] %v1965_v49  ;;  %v1971_v52 = vld [vmem:[%s2796_s20 + $0x150] sm:$0xff] }
 0x181   : >> { %1968 = vst [vmem:[%s2792_s15 + $0x140] sm:$0xff] %v1967_v50  ;;  %1970 = vst [vmem:[%s2792_s15 + $0x148] sm:$0xff] %v1969_v51  ;;  %v1973_v53 = vld [vmem:[%s2796_s20 + $0x158] sm:$0xff]  ;;  %v1975_v54 = vld [vmem:[%s2796_s20 + $0x160] sm:$0xff] }
 0x182   : >> { %1972 = vst [vmem:[%s2792_s15 + $0x150] sm:$0xff] %v1971_v52  ;;  %1974 = vst [vmem:[%s2792_s15 + $0x158] sm:$0xff] %v1973_v53  ;;  %v1977_v55 = vld [vmem:[%s2796_s20 + $0x168] sm:$0xff]  ;;  %v1979_v56 = vld [vmem:[%s2796_s20 + $0x170] sm:$0xff] }
 0x183   : >> { %1976 = vst [vmem:[%s2792_s15 + $0x160] sm:$0xff] %v1975_v54  ;;  %v1981_v57 = vld [vmem:[%s2796_s20 + $0x178] sm:$0xff]  ;;  %1978 = vst [vmem:[%s2792_s15 + $0x168] sm:$0xff] %v1977_v55  ;;  %v1983_v58 = vld [vmem:[%s2796_s20 + $0x180] sm:$0xff] }
 0x184   : >> { %1980 = vst [vmem:[%s2792_s15 + $0x170] sm:$0xff] %v1979_v56  ;;  %1982 = vst [vmem:[%s2792_s15 + $0x178] sm:$0xff] %v1981_v57  ;;  %v1985_v59 = vld [vmem:[%s2796_s20 + $0x188] sm:$0xff]  ;;  %v1987_v60 = vld [vmem:[%s2796_s20 + $0x190] sm:$0xff] }
 0x185   : >> { %1984 = vst [vmem:[%s2792_s15 + $0x180] sm:$0xff] %v1983_v58  ;;  %1986 = vst [vmem:[%s2792_s15 + $0x188] sm:$0xff] %v1985_v59  ;;  %v1989_v61 = vld [vmem:[%s2796_s20 + $0x198] sm:$0xff]  ;;  %v1991_v62 = vld [vmem:[%s2796_s20 + $0x1a0] sm:$0xff] }
 0x186   : >> { %1988 = vst [vmem:[%s2792_s15 + $0x190] sm:$0xff] %v1987_v60  ;;  %v1993_v63 = vld [vmem:[%s2796_s20 + $0x1a8] sm:$0xff]  ;;  %1990 = vst [vmem:[%s2792_s15 + $0x198] sm:$0xff] %v1989_v61  ;;  %v1995_v0 = vld [vmem:[%s2796_s20 + $0x1b0] sm:$0xff] }
 0x187   : >> { %1992 = vst [vmem:[%s2792_s15 + $0x1a0] sm:$0xff] %v1991_v62  ;;  %1994 = vst [vmem:[%s2792_s15 + $0x1a8] sm:$0xff] %v1993_v63  ;;  %v1997_v1 = vld [vmem:[%s2796_s20 + $0x1b8] sm:$0xff]  ;;  %v1999_v2 = vld [vmem:[%s2796_s20 + $0x1c0] sm:$0xff] }
 0x188   : >> { %1996 = vst [vmem:[%s2792_s15 + $0x1b0] sm:$0xff] %v1995_v0  ;;  %1998 = vst [vmem:[%s2792_s15 + $0x1b8] sm:$0xff] %v1997_v1  ;;  %v2001_v3 = vld [vmem:[%s2796_s20 + $0x1c8] sm:$0xff]  ;;  %v2003_v5 = vld [vmem:[%s2796_s20 + $0x1d0] sm:$0xff]  ;;  %1883 = sbr.rel (!%p1880_p12) target bundleno = 364 (0x16c), region = 122 }
 0x189   : >> { %2000 = vst [vmem:[%s2792_s15 + $0x1c0] sm:$0xff] %v1999_v2  ;;  %v2005_v6 = vld [vmem:[%s2796_s20 + $0x1d8] sm:$0xff]  ;;  %2002 = vst [vmem:[%s2792_s15 + $0x1c8] sm:$0xff] %v2001_v3  ;;  %v2007_v7 = vld [vmem:[%s2796_s20 + $0x1e0] sm:$0xff] }
 0x18a   : >> { %2004 = vst [vmem:[%s2792_s15 + $0x1d0] sm:$0xff] %v2003_v5  ;;  %2006 = vst [vmem:[%s2792_s15 + $0x1d8] sm:$0xff] %v2005_v6  ;;  %v2009_v8 = vld [vmem:[%s2796_s20 + $0x1e8] sm:$0xff]  ;;  %v2011_v9 = vld [vmem:[%s2796_s20 + $0x1f0] sm:$0xff] }
 0x18b   : >> { %2008 = vst [vmem:[%s2792_s15 + $0x1e0] sm:$0xff] %v2007_v7  ;;  %2010 = vst [vmem:[%s2792_s15 + $0x1e8] sm:$0xff] %v2009_v8  ;;  %v2013_v10 = vld [vmem:[%s2796_s20 + $0x1f8] sm:$0xff]  ;;  %s3627_s20 = smov %s3493_s29 }
 0x18c   : >> { %2012 = vst [vmem:[%s2792_s15 + $0x1f0] sm:$0xff] %v2011_v9  ;;  %2014 = vst [vmem:[%s2792_s15 + $0x1f8] sm:$0xff] %v2013_v10  ;;  %s3626_s15 = smov %s3496_s30 }
 0x18d PF: > { %s3601_s4 = sand.u32 63, %s3633_s14   ;;  %s2304_s5 = sshll.u32 %s3426_s24, 9 }
 0x18e   : > { %s2026_s6 = scalar_lea.vmem %s3159_s12, %s2304_s5 [#allocation2]   ;;  %s2028_s7 = scalar_lea.vmem %s3420_s22, %s2304_s5  }
 0x18f   : > { %p2298_p13 = scmp.le.s32.totalorder %s3601_s4, 0 }
 0x190   : > { %s2806_s8 = smov (!%p2298_p13), %s2028_s7   ;;  %s2810_s9 = smov (!%p2298_p13), %s2026_s6  }
 0x191   : > { %2119 = sbr.rel (%p2298_p13) target bundleno = 414 (0x19e), region = 127  ;;  %s2814_s10 = smov (!%p2298_p13), 0  }
 0x192   : > { %s2818_s11 = smov (!%p2298_p13), 0  }
 0x196 LB: >> { %v2038_v4 = vld [vmem:[%s2812_s9] sm:$0xff]  ;;  %s2040_s14 = sadd.s32 1, %s2816_s10  ;;  %s2032_s11 = sadd.s32 1, %s2820_s11   ;;  %s2820_s11 = sphi %s2818_s11, %s2032_s11   ;;  %s2816_s10 = sphi %s2814_s10, %s2815_s10   ;;  %s2812_s9 = sphi %s2810_s9, %s2045_s9   ;;  %s2808_s8 = sphi %s2806_s8, %s2046_s8  }
 0x197   : >> { %2039 = vst [vmem:[%s2808_s8] sm:$0xff] %v2038_v4  ;;  %p2041_p0 = scmp.ge.s32.totalorder %s2040_s14, %s3601_s4  ;;  %p2031_p1 = scmp.ge.s32.totalorder %s2032_s11, %s3601_s4 }
 0x199   : >> { %s3637_s14 = smov (%p2041_p0, %s2040_s14), 0  ;;  %2034 = sbr.rel (!%p2031_p1) target bundleno = 406 (0x196), region = 133 }
 0x19a   : >> { %s2299_s12 = sshll.u32 %s3637_s14, 3  ;;  %s2815_s10 = smov %s3637_s14  }
 0x19b   : >> { %s2045_s9 = scalar_lea.vmem %s2026_s6, %s2299_s12 [#allocation2]   ;;  %s2046_s8 = scalar_lea.vmem %s2028_s7, %s2299_s12  }
 0x19e PF: > { %p10_p2 = scmp.ge.s32.totalorder %s2857_s16, 6   ;;  %s3629_s12 = smov %s2784_s13 }
 0x19f   : > { %s3630_s13 = smov %s2865_s19  ;;  %s3631_s14 = smov %s2857_s16 }
 0x1a0   :  { %12 = sbr.rel (!%p10_p2) target bundleno = 2 (0x2), region = 144 }

// kernel: conv_model_forward.8
= control target key start
LH: loop header
LB: loop body
LE: loop exit
PB: predicated region body
PF: predicated region fallthrough
CT: control target
= control target key end

     0   :  { %v632_v0 = vmov 0.0   ;;  %vm159_vm0 = vcmask 392192   ;;  %s1231_s1 = inlined_call_operand.vmem [shape: f32[432,128], index: 1, kind: input, shape index: {}]   ;;  %s1232_s0 = inlined_call_operand.vmem [shape: f32[162,432], index: 0, kind: input, shape index: {}]   ;;  %s1233_s2 = inlined_call_operand.vmem [shape: f32[1,128], index: 2, kind: input, shape index: {}]   ;;  %s1234_s3 = inlined_call_operand.vmem [shape: f32[162,128], index: 3, kind: output, shape index: {}]  }
   0x1   :  { %223 = vmatprep.subr.mxu0 %v632_v0  ;;  %v113_v1 = vld [vmem:[%s1231_s1 + $0x78] sm:$0xff]  ;;  %v112_v2 = vld [vmem:[%s1231_s1 + $0x70] sm:$0xff]  ;;  %393 = vmatprep.subr.mxu1 %v632_v0  ;;  %v111_v3 = vld [vmem:[%s1231_s1 + $0x68] sm:$0xff] }
   0x2   :  { %224 = vmatpush1.msra.mxu0 %v113_v1  ;;  %v145_v4 = vld [vmem:[%s1231_s1 + $0x178] sm:$0xff]  ;;  %v110_v5 = vld [vmem:[%s1231_s1 + $0x60] sm:$0xff]  ;;  %v144_v6 = vld [vmem:[%s1231_s1 + $0x170] sm:$0xff] }
   0x3   :  { %225 = vmatprep.subr.mxu0 %v632_v0  ;;  %394 = vmatpush1.msra.mxu1 %v145_v4  ;;  %v143_v7 = vld [vmem:[%s1231_s1 + $0x168] sm:$0xff]  ;;  %v109_v8 = vld [vmem:[%s1231_s1 + $0x58] sm:$0xff]  ;;  %v142_v9 = vld [vmem:[%s1231_s1 + $0x160] sm:$0xff] }
   0x4   :  { %226 = vmatpush1.msra.mxu0 %v112_v2  ;;  %395 = vmatprep.subr.mxu1 %v632_v0  ;;  %v108_v10 = vld [vmem:[%s1231_s1 + $0x50] sm:$0xff]  ;;  %v141_v11 = vld [vmem:[%s1231_s1 + $0x158] sm:$0xff]  ;;  %v107_v12 = vld [vmem:[%s1231_s1 + $0x48] sm:$0xff] }
   0x5   :  { %227 = vmatprep.subr.mxu0 %v632_v0  ;;  %396 = vmatpush1.msra.mxu1 %v144_v6  ;;  %v140_v13 = vld [vmem:[%s1231_s1 + $0x150] sm:$0xff]  ;;  %v106_v14 = vld [vmem:[%s1231_s1 + $0x40] sm:$0xff]  ;;  %v139_v15 = vld [vmem:[%s1231_s1 + $0x148] sm:$0xff] }
   0x6   :  { %228 = vmatpush1.msra.mxu0 %v111_v3  ;;  %397 = vmatprep.subr.mxu1 %v632_v0  ;;  %v105_v16 = vld [vmem:[%s1231_s1 + $0x38] sm:$0xff]  ;;  %v138_v17 = vld [vmem:[%s1231_s1 + $0x140] sm:$0xff]  ;;  %v104_v18 = vld [vmem:[%s1231_s1 + $0x30] sm:$0xff] }
   0x7   :  { %229 = vmatprep.subr.mxu0 %v632_v0  ;;  %398 = vmatpush1.msra.mxu1 %v143_v7  ;;  %v137_v19 = vld [vmem:[%s1231_s1 + $0x138] sm:$0xff]  ;;  %v103_v20 = vld [vmem:[%s1231_s1 + $0x28] sm:$0xff]  ;;  %v136_v21 = vld [vmem:[%s1231_s1 + $0x130] sm:$0xff] }
   0x8   :  { %230 = vmatpush1.msra.mxu0 %v110_v5  ;;  %399 = vmatprep.subr.mxu1 %v632_v0  ;;  %v102_v22 = vld [vmem:[%s1231_s1 + $0x20] sm:$0xff]  ;;  %v135_v23 = vld [vmem:[%s1231_s1 + $0x128] sm:$0xff]  ;;  %v101_v24 = vld [vmem:[%s1231_s1 + $0x18] sm:$0xff] }
   0x9   :  { %231 = vmatprep.subr.mxu0 %v632_v0  ;;  %400 = vmatpush1.msra.mxu1 %v142_v9  ;;  %v134_v25 = vld [vmem:[%s1231_s1 + $0x120] sm:$0xff]  ;;  %v100_v26 = vld [vmem:[%s1231_s1 + $0x10] sm:$0xff]  ;;  %v133_v27 = vld [vmem:[%s1231_s1 + $0x118] sm:$0xff] }
   0xa   :  { %232 = vmatpush1.msra.mxu0 %v109_v8  ;;  %401 = vmatprep.subr.mxu1 %v632_v0  ;;  %v99_v28 = vld [vmem:[%s1231_s1 + $0x8] sm:$0xff]  ;;  %v132_v29 = vld [vmem:[%s1231_s1 + $0x110] sm:$0xff]  ;;  %v98_v30 = vld [vmem:[%s1231_s1] sm:$0xff] }
   0xb   :  { %233 = vmatprep.subr.mxu0 %v632_v0  ;;  %402 = vmatpush1.msra.mxu1 %v141_v11  ;;  %v131_v31 = vld [vmem:[%s1231_s1 + $0x108] sm:$0xff]  ;;  %v129_v32 = vld [vmem:[%s1231_s1 + $0xf8] sm:$0xff]  ;;  %v130_v33 = vld [vmem:[%s1231_s1 + $0x100] sm:$0xff] }
   0xc   :  { %234 = vmatpush1.msra.mxu0 %v108_v10  ;;  %403 = vmatprep.subr.mxu1 %v632_v0  ;;  %v128_v34 = vld [vmem:[%s1231_s1 + $0xf0] sm:$0xff]  ;;  %v151_v35 = vld [vmem:[%s1231_s1 + $0x1a8] sm:$0xff]  ;;  %v150_v37 = vld [vmem:[%s1231_s1 + $0x1a0] sm:$0xff] }
   0xd   :  { %235 = vmatprep.subr.mxu0 %v632_v0  ;;  %404 = vmatpush1.msra.mxu1 %v140_v13  ;;  %v127_v36 = vld [vmem:[%s1231_s1 + $0xe8] sm:$0xff]  ;;  %v126_v38 = vld [vmem:[%s1231_s1 + $0xe0] sm:$0xff]  ;;  %v149_v39 = vld [vmem:[%s1231_s1 + $0x198] sm:$0xff] }
   0xe   :  { %236 = vmatpush1.msra.mxu0 %v107_v12  ;;  %405 = vmatprep.subr.mxu1 %v632_v0  ;;  %v125_v40 = vld [vmem:[%s1231_s1 + $0xd8] sm:$0xff]  ;;  %v148_v41 = vld [vmem:[%s1231_s1 + $0x190] sm:$0xff]  ;;  %v147_v43 = vld [vmem:[%s1231_s1 + $0x188] sm:$0xff] }
   0xf   :  { %237 = vmatprep.subr.mxu0 %v632_v0  ;;  %406 = vmatpush1.msra.mxu1 %v139_v15  ;;  %v124_v42 = vld [vmem:[%s1231_s1 + $0xd0] sm:$0xff]  ;;  %v123_v44 = vld [vmem:[%s1231_s1 + $0xc8] sm:$0xff]  ;;  %v122_v46 = vld [vmem:[%s1231_s1 + $0xc0] sm:$0xff] }
  0x10   :  { %238 = vmatpush1.msra.mxu0 %v106_v14  ;;  %407 = vmatprep.subr.mxu1 %v632_v0  ;;  %v15_v45 = vld [vmem:[%s1232_s0 + $0x8] sm:$0xff]  ;;  %v146_v47 = vld [vmem:[%s1231_s1 + $0x180] sm:$0xff]  ;;  %v17_v48 = vld [vmem:[%s1232_s0 + $0x18] sm:$0xff] }
  0x11   :  { %239 = vmatprep.subr.mxu0 %v632_v0  ;;  %408 = vmatpush1.msra.mxu1 %v138_v17  ;;  %v121_v49 = vld [vmem:[%s1231_s1 + $0xb8] sm:$0xff]  ;;  %v16_v50 = vld [vmem:[%s1232_s0 + $0x10] sm:$0xff]  ;;  %v119_v53 = vld [vmem:[%s1231_s1 + $0xa8] sm:$0xff] }
  0x12   :  { %240 = vmatpush1.msra.mxu0 %v105_v16  ;;  %409 = vmatprep.subr.mxu1 %v632_v0  ;;  %v21_v51 = vld [vmem:[%s1232_s0 + $0x38] sm:$0xff]  ;;  %v120_v52 = vld [vmem:[%s1231_s1 + $0xb0] sm:$0xff]  ;;  %v118_v56 = vld [vmem:[%s1231_s1 + $0xa0] sm:$0xff] }
  0x13   :  { %241 = vmatprep.subr.mxu0 %v632_v0  ;;  %410 = vmatpush1.msra.mxu1 %v137_v19  ;;  %v20_v54 = vld [vmem:[%s1232_s0 + $0x30] sm:$0xff]  ;;  %v25_v55 = vld [vmem:[%s1232_s0 + $0x58] sm:$0xff]  ;;  %v115_v61 = vld [vmem:[%s1231_s1 + $0x88] sm:$0xff] }
  0x14   :  { %242 = vmatpush1.msra.mxu0 %v104_v18  ;;  %411 = vmatprep.subr.mxu1 %v632_v0  ;;  %v117_v57 = vld [vmem:[%s1231_s1 + $0x98] sm:$0xff]  ;;  %v24_v58 = vld [vmem:[%s1232_s0 + $0x50] sm:$0xff]  ;;  %v114_v1 = vld [vmem:[%s1231_s1 + $0x80] sm:$0xff] }
  0x15   :  { %243 = vmatprep.subr.mxu0 %v632_v0  ;;  %412 = vmatpush1.msra.mxu1 %v136_v21  ;;  %v29_v59 = vld [vmem:[%s1232_s0 + $0x78] sm:$0xff]  ;;  %v116_v60 = vld [vmem:[%s1231_s1 + $0x90] sm:$0xff]  ;;  %v14_v2 = vld [vmem:[%s1232_s0] sm:$0xff] }
  0x16   :  { %244 = vmatpush1.msra.mxu0 %v103_v20  ;;  %413 = vmatprep.subr.mxu1 %v632_v0  ;;  %v28_v62 = vld [vmem:[%s1232_s0 + $0x70] sm:$0xff]  ;;  %v33_v63 = vld [vmem:[%s1232_s0 + $0x98] sm:$0xff]  ;;  %v19_v3 = vld [vmem:[%s1232_s0 + $0x28] sm:$0xff] }
  0x17   :  { %245 = vmatprep.subr.mxu0 %v632_v0  ;;  %414 = vmatpush1.msra.mxu1 %v135_v23  ;;  %v32_v4 = vld [vmem:[%s1232_s0 + $0x90] sm:$0xff]  ;;  %v37_v5 = vld [vmem:[%s1232_s0 + $0xb8] sm:$0xff]  ;;  %v23_v6 = vld [vmem:[%s1232_s0 + $0x48] sm:$0xff] }
  0x18   :  { %246 = vmatpush1.msra.mxu0 %v102_v22  ;;  %415 = vmatprep.subr.mxu1 %v632_v0  ;;  %v36_v7 = vld [vmem:[%s1232_s0 + $0xb0] sm:$0xff]  ;;  %v41_v8 = vld [vmem:[%s1232_s0 + $0xd8] sm:$0xff]  ;;  %v22_v9 = vld [vmem:[%s1232_s0 + $0x40] sm:$0xff] }
  0x19   :  { %247 = vmatprep.subr.mxu0 %v632_v0  ;;  %416 = vmatpush1.msra.mxu1 %v134_v25  ;;  %v27_v10 = vld [vmem:[%s1232_s0 + $0x68] sm:$0xff]  ;;  %v40_v11 = vld [vmem:[%s1232_s0 + $0xd0] sm:$0xff]  ;;  %v45_v12 = vld [vmem:[%s1232_s0 + $0xf8] sm:$0xff] }
  0x1a   :  { %248 = vmatpush1.msra.mxu0 %v101_v24  ;;  %417 = vmatprep.subr.mxu1 %v632_v0  ;;  %v26_v13 = vld [vmem:[%s1232_s0 + $0x60] sm:$0xff]  ;;  %v31_v14 = vld [vmem:[%s1232_s0 + $0x88] sm:$0xff]  ;;  %v44_v15 = vld [vmem:[%s1232_s0 + $0xf0] sm:$0xff] }
  0x1b   :  { %249 = vmatprep.subr.mxu0 %v632_v0  ;;  %418 = vmatpush1.msra.mxu1 %v133_v27  ;;  %v49_v16 = vld [vmem:[%s1232_s0 + $0x118] sm:$0xff]  ;;  %v30_v17 = vld [vmem:[%s1232_s0 + $0x80] sm:$0xff]  ;;  %v35_v18 = vld [vmem:[%s1232_s0 + $0xa8] sm:$0xff] }
  0x1c   :  { %250 = vmatpush1.msra.mxu0 %v100_v26  ;;  %419 = vmatprep.subr.mxu1 %v632_v0  ;;  %v48_v19 = vld [vmem:[%s1232_s0 + $0x110] sm:$0xff]  ;;  %v53_v20 = vld [vmem:[%s1232_s0 + $0x138] sm:$0xff]  ;;  %v34_v21 = vld [vmem:[%s1232_s0 + $0xa0] sm:$0xff] }
  0x1d   :  { %251 = vmatprep.subr.mxu0 %v632_v0  ;;  %420 = vmatpush1.msra.mxu1 %v132_v29  ;;  %v39_v22 = vld [vmem:[%s1232_s0 + $0xc8] sm:$0xff]  ;;  %v52_v23 = vld [vmem:[%s1232_s0 + $0x130] sm:$0xff]  ;;  %v57_v24 = vld [vmem:[%s1232_s0 + $0x158] sm:$0xff] }
  0x1e   :  { %252 = vmatpush1.msra.mxu0 %v99_v28  ;;  %421 = vmatprep.subr.mxu1 %v632_v0  ;;  %v38_v25 = vld [vmem:[%s1232_s0 + $0xc0] sm:$0xff]  ;;  %v43_v26 = vld [vmem:[%s1232_s0 + $0xe8] sm:$0xff]  ;;  %v56_v27 = vld [vmem:[%s1232_s0 + $0x150] sm:$0xff] }
  0x1f   :  { %253 = vmatprep.subr.mxu0 %v632_v0  ;;  %422 = vmatpush1.msra.mxu1 %v131_v31  ;;  %v61_v28 = vld [vmem:[%s1232_s0 + $0x178] sm:$0xff]  ;;  %v42_v29 = vld [vmem:[%s1232_s0 + $0xe0] sm:$0xff]  ;;  %v60_v31 = vld [vmem:[%s1232_s0 + $0x170] sm:$0xff] }
  0x20   :  { %254 = vmatpush1.msra.mxu0 %v98_v30  ;;  %423 = vmatprep.subr.mxu1 %v632_v0  ;;  %v47_v30 = vld [vmem:[%s1232_s0 + $0x108] sm:$0xff] }
  0x21   :  { %255 = vmatprep.subr.mxu0 %v632_v0  ;;  %424 = vmatpush1.msra.mxu1 %v130_v33  ;;  %v46_v33 = vld [vmem:[%s1232_s0 + $0x100] sm:$0xff] }
  0x22   :  { %256 = vmatpush2.msra.mxu0 %v129_v32  ;;  %445 = vmatprep.subr.mxu1 %v632_v0  ;;  %v65_v32 = vld [vmem:[%s1232_s0 + $0x198] sm:$0xff] }
  0x23   :  { %257 = vmatprep.subr.mxu0 %v632_v0  ;;  %446 = vmatpush2.msra.mxu1 %v151_v35  ;;  %v64_v35 = vld [vmem:[%s1232_s0 + $0x190] sm:$0xff] }
  0x24   :  { %258 = vmatpush2.msra.mxu0 %v128_v34  ;;  %447 = vmatprep.subr.mxu1 %v632_v0  ;;  %v51_v34 = vld [vmem:[%s1232_s0 + $0x128] sm:$0xff] }
  0x25   :  { %259 = vmatprep.subr.mxu0 %v632_v0  ;;  %448 = vmatpush2.msra.mxu1 %v150_v37  ;;  %v50_v37 = vld [vmem:[%s1232_s0 + $0x120] sm:$0xff] }
  0x26   :  { %260 = vmatpush2.msra.mxu0 %v127_v36  ;;  %449 = vmatprep.subr.mxu1 %v632_v0  ;;  %v69_v36 = vld [vmem:[%s1232_s0 + $0x1b8] sm:$0xff] }
  0x27   :  { %261 = vmatprep.subr.mxu0 %v632_v0  ;;  %450 = vmatpush2.msra.mxu1 %v149_v39  ;;  %v68_v39 = vld [vmem:[%s1232_s0 + $0x1b0] sm:$0xff] }
  0x28   :  { %262 = vmatpush2.msra.mxu0 %v126_v38  ;;  %451 = vmatprep.subr.mxu1 %v632_v0  ;;  %v55_v38 = vld [vmem:[%s1232_s0 + $0x148] sm:$0xff] }
  0x29   :  { %263 = vmatprep.subr.mxu0 %v632_v0  ;;  %452 = vmatpush2.msra.mxu1 %v148_v41  ;;  %v54_v41 = vld [vmem:[%s1232_s0 + $0x140] sm:$0xff] }
  0x2a   :  { %264 = vmatpush2.msra.mxu0 %v125_v40  ;;  %453 = vmatprep.subr.mxu1 %v632_v0  ;;  %v73_v40 = vld [vmem:[%s1232_s0 + $0x1d8] sm:$0xff] }
  0x2b   :  { %265 = vmatprep.subr.mxu0 %v632_v0  ;;  %454 = vmatpush2.msra.mxu1 %v147_v43  ;;  %v72_v43 = vld [vmem:[%s1232_s0 + $0x1d0] sm:$0xff] }
  0x2c   :  { %266 = vmatpush2.msra.mxu0 %v124_v42  ;;  %455 = vmatprep.subr.mxu1 %v632_v0  ;;  %v59_v42 = vld [vmem:[%s1232_s0 + $0x168] sm:$0xff] }
  0x2d   :  { %267 = vmatprep.subr.mxu0 %v632_v0  ;;  %287 = vmatprep.mubr.f32.mxu0 %v15_v45  ;;  %v58_v45 = vld [vmem:[%s1232_s0 + $0x160] sm:$0xff] }
  0x2e   :  { %268 = vmatpush2.msra.mxu0 %v123_v44  ;;  %456 = vmatpush2.msra.mxu1 %v146_v47  ;;  %v77_v44 = vld [vmem:[%s1232_s0 + $0x1f8] sm:$0xff]  ;;  %v76_v47 = vld [vmem:[%s1232_s0 + $0x1f0] sm:$0xff] }
  0x2f   :  { %269 = vmatprep.subr.mxu0 %v632_v0  ;;  %610 = vmatprep.mubr.msk.f32.mxu1 %vm159_vm0, %v17_v48  ;;  %v81_v48 = vld [vmem:[%s1232_s0 + $0x218] sm:$0xff] }
  0x30   :  { %270 = vmatpush2.msra.mxu0 %v122_v46  ;;  %458 = vmatmul.mubr.f32.vlgmr.msra.gmra.mxu1 %v16_v50  ;;  %v63_v46 = vld [vmem:[%s1232_s0 + $0x188] sm:$0xff] }
  0x31   :  { %271 = vmatprep.subr.mxu0 %v632_v0  ;;  %611 = vmatprep.mubr.msk.f32.mxu1 %vm159_vm0, %v21_v51  ;;  %v67_v50 = vld [vmem:[%s1232_s0 + $0x1a8] sm:$0xff]  ;;  %v80_v51 = vld [vmem:[%s1232_s0 + $0x210] sm:$0xff] }
  0x32   :  { %272 = vmatpush2.msra.mxu0 %v121_v49  ;;  %v62_v49 = vld [vmem:[%s1232_s0 + $0x180] sm:$0xff] }
  0x33   :  { %273 = vmatprep.subr.mxu0 %v632_v0 }
  0x34   :  { %274 = vmatpush2.msra.mxu0 %v120_v52  ;;  %463 = vmatmul.mubr.f32.gmra.mxu1 %v20_v54  ;;  %v85_v52 = vld [vmem:[%s1232_s0 + $0x238] sm:$0xff]  ;;  %v71_v54 = vld [vmem:[%s1232_s0 + $0x1c8] sm:$0xff] }
  0x35   :  { %275 = vmatprep.subr.mxu0 %v632_v0  ;;  %612 = vmatprep.mubr.msk.f32.mxu1 %vm159_vm0, %v25_v55  ;;  %v84_v55 = vld [vmem:[%s1232_s0 + $0x230] sm:$0xff] }
  0x36   :  { %276 = vmatpush2.msra.mxu0 %v119_v53  ;;  %v66_v53 = vld [vmem:[%s1232_s0 + $0x1a0] sm:$0xff] }
  0x37   :  { %277 = vmatprep.subr.mxu0 %v632_v0 }
  0x38   :  { %278 = vmatpush2.msra.mxu0 %v118_v56  ;;  %468 = vmatmul.mubr.f32.gmra.mxu1 %v24_v58  ;;  %v89_v56 = vld [vmem:[%s1232_s0 + $0x258] sm:$0xff]  ;;  %v75_v58 = vld [vmem:[%s1232_s0 + $0x1e8] sm:$0xff] }
  0x39   :  { %279 = vmatprep.subr.mxu0 %v632_v0  ;;  %613 = vmatprep.mubr.msk.f32.mxu1 %vm159_vm0, %v29_v59  ;;  %v88_v59 = vld [vmem:[%s1232_s0 + $0x250] sm:$0xff] }
  0x3a   :  { %280 = vmatpush2.msra.mxu0 %v117_v57  ;;  %v70_v57 = vld [vmem:[%s1232_s0 + $0x1c0] sm:$0xff] }
  0x3b   :  { %281 = vmatprep.subr.mxu0 %v632_v0 }
  0x3c   :  { %282 = vmatpush2.msra.mxu0 %v116_v60  ;;  %473 = vmatmul.mubr.f32.gmra.mxu1 %v28_v62  ;;  %v93_v60 = vld [vmem:[%s1232_s0 + $0x278] sm:$0xff]  ;;  %v79_v62 = vld [vmem:[%s1232_s0 + $0x208] sm:$0xff] }
  0x3d   :  { %283 = vmatprep.subr.mxu0 %v632_v0  ;;  %614 = vmatprep.mubr.msk.f32.mxu1 %vm159_vm0, %v33_v63  ;;  %v92_v63 = vld [vmem:[%s1232_s0 + $0x270] sm:$0xff] }
  0x3e   :  { %284 = vmatpush2.msra.mxu0 %v115_v61  ;;  %v74_v61 = vld [vmem:[%s1232_s0 + $0x1e0] sm:$0xff] }
  0x3f   :  { %285 = vmatprep.subr.mxu0 %v632_v0  ;;  %v18_v0 = vld [vmem:[%s1232_s0 + $0x20] sm:$0xff] }
  0x40   :  { %286 = vmatpush2.msra.mxu0 %v114_v1  ;;  %478 = vmatmul.mubr.f32.gmra.mxu1 %v32_v4  ;;  %v97_v1 = vld [vmem:[%s1232_s0 + $0x298] sm:$0x3]  ;;  %v96_v4 = vld [vmem:[%s1232_s0 + $0x290] sm:$0x3] }
  0x41   :  { %288 = vmatmul.mubr.f32.vlgmr.msra.gmra.mxu0 %v14_v2  ;;  %615 = vmatprep.mubr.msk.f32.mxu1 %vm159_vm0, %v37_v5  ;;  %v78_v2 = vld [vmem:[%s1232_s0 + $0x200] sm:$0xff] }
  0x42   :  { %292 = vmatprep.mubr.f32.mxu0 %v19_v3  ;;  %v83_v3 = vld [vmem:[%s1232_s0 + $0x228] sm:$0xff]  ;;  %v82_v5 = vld [vmem:[%s1232_s0 + $0x220] sm:$0xff] }
  0x44   :  { %483 = vmatmul.mubr.f32.gmra.mxu1 %v36_v7  ;;  %v91_v7 = vld [vmem:[%s1232_s0 + $0x268] sm:$0xff] }
  0x45   :  { %293 = vmatmul.mubr.f32.gmra.mxu0 %v18_v0  ;;  %616 = vmatprep.mubr.msk.f32.mxu1 %vm159_vm0, %v41_v8  ;;  %v87_v0 = vld [vmem:[%s1232_s0 + $0x248] sm:$0xff]  ;;  %v90_v8 = vld [vmem:[%s1232_s0 + $0x260] sm:$0xff] }
  0x46   :  { %297 = vmatprep.mubr.f32.mxu0 %v23_v6  ;;  %v86_v6 = vld [vmem:[%s1232_s0 + $0x240] sm:$0xff] }
  0x48   :  { %488 = vmatmul.mubr.f32.gmra.mxu1 %v40_v11 }
  0x49   :  { %298 = vmatmul.mubr.f32.gmra.mxu0 %v22_v9  ;;  %617 = vmatprep.mubr.msk.f32.mxu1 %vm159_vm0, %v45_v12  ;;  %v95_v9 = vld [vmem:[%s1232_s0 + $0x288] sm:$0x3] }
  0x4a   :  { %302 = vmatprep.mubr.f32.mxu0 %v27_v10  ;;  %v94_v10 = vld [vmem:[%s1232_s0 + $0x280] sm:$0x3] }
  0x4c   :  { %493 = vmatmul.mubr.f32.gmra.mxu1 %v44_v15 }
  0x4d   :  { %303 = vmatmul.mubr.f32.gmra.mxu0 %v26_v13  ;;  %618 = vmatprep.mubr.msk.f32.mxu1 %vm159_vm0, %v49_v16 }
  0x4e   :  { %307 = vmatprep.mubr.f32.mxu0 %v31_v14 }
  0x50   :  { %498 = vmatmul.mubr.f32.gmra.mxu1 %v48_v19 }
  0x51   :  { %308 = vmatmul.mubr.f32.gmra.mxu0 %v30_v17  ;;  %619 = vmatprep.mubr.msk.f32.mxu1 %vm159_vm0, %v53_v20 }
  0x52   :  { %312 = vmatprep.mubr.f32.mxu0 %v35_v18  ;;  %v1145_v18 = vld [vmem:[%s1233_s2] ss:$0 sm:$0xff] }
  0x54   :  { %503 = vmatmul.mubr.f32.gmra.mxu1 %v52_v23 }
  0x55   :  { %313 = vmatmul.mubr.f32.gmra.mxu0 %v34_v21  ;;  %620 = vmatprep.mubr.msk.f32.mxu1 %vm159_vm0, %v57_v24 }
  0x56   :  { %317 = vmatprep.mubr.f32.mxu0 %v39_v22 }
  0x58   :  { %508 = vmatmul.mubr.f32.gmra.mxu1 %v56_v27 }
  0x59   :  { %318 = vmatmul.mubr.f32.gmra.mxu0 %v38_v25  ;;  %621 = vmatprep.mubr.msk.f32.mxu1 %vm159_vm0, %v61_v28 }
  0x5a   :  { %322 = vmatprep.mubr.f32.mxu0 %v43_v26 }
  0x5c   :  { %513 = vmatmul.mubr.f32.gmra.mxu1 %v60_v31 }
  0x5d   :  { %323 = vmatmul.mubr.f32.gmra.mxu0 %v42_v29  ;;  %622 = vmatprep.mubr.msk.f32.mxu1 %vm159_vm0, %v65_v32 }
  0x5e   :  { %327 = vmatprep.mubr.f32.mxu0 %v47_v30 }
  0x60   :  { %518 = vmatmul.mubr.f32.gmra.mxu1 %v64_v35 }
  0x61   :  { %328 = vmatmul.mubr.f32.gmra.mxu0 %v46_v33  ;;  %623 = vmatprep.mubr.msk.f32.mxu1 %vm159_vm0, %v69_v36 }
  0x62   :  { %332 = vmatprep.mubr.f32.mxu0 %v51_v34 }
  0x64   :  { %523 = vmatmul.mubr.f32.gmra.mxu1 %v68_v39 }
  0x65   :  { %333 = vmatmul.mubr.f32.gmra.mxu0 %v50_v37  ;;  %624 = vmatprep.mubr.msk.f32.mxu1 %vm159_vm0, %v73_v40 }
  0x66   :  { %337 = vmatprep.mubr.f32.mxu0 %v55_v38 }
  0x68   :  { %528 = vmatmul.mubr.f32.gmra.mxu1 %v72_v43 }
  0x69   :  { %338 = vmatmul.mubr.f32.gmra.mxu0 %v54_v41  ;;  %625 = vmatprep.mubr.msk.f32.mxu1 %vm159_vm0, %v77_v44 }
  0x6a   :  { %342 = vmatprep.mubr.f32.mxu0 %v59_v42 }
  0x6c   :  { %533 = vmatmul.mubr.f32.gmra.mxu1 %v76_v47 }
  0x6d   :  { %343 = vmatmul.mubr.f32.gmra.mxu0 %v58_v45  ;;  %626 = vmatprep.mubr.msk.f32.mxu1 %vm159_vm0, %v81_v48 }
  0x6e   :  { %347 = vmatprep.mubr.f32.mxu0 %v63_v46 }
  0x70   :  { %538 = vmatmul.mubr.f32.gmra.mxu1 %v80_v51 }
  0x71   :  { %348 = vmatmul.mubr.f32.gmra.mxu0 %v62_v49  ;;  %627 = vmatprep.mubr.msk.f32.mxu1 %vm159_vm0, %v85_v52 }
  0x72   :  { %352 = vmatprep.mubr.f32.mxu0 %v67_v50 }
  0x74   :  { %543 = vmatmul.mubr.f32.gmra.mxu1 %v84_v55 }
  0x75   :  { %353 = vmatmul.mubr.f32.gmra.mxu0 %v66_v53  ;;  %628 = vmatprep.mubr.msk.f32.mxu1 %vm159_vm0, %v89_v56 }
  0x76   :  { %357 = vmatprep.mubr.f32.mxu0 %v71_v54 }
  0x78   :  { %548 = vmatmul.mubr.f32.gmra.mxu1 %v88_v59 }
  0x79   :  { %358 = vmatmul.mubr.f32.gmra.mxu0 %v70_v57  ;;  %629 = vmatprep.mubr.msk.f32.mxu1 %vm159_vm0, %v93_v60 }
  0x7a   :  { %362 = vmatprep.mubr.f32.mxu0 %v75_v58 }
  0x7c   :  { %553 = vmatmul.mubr.f32.gmra.mxu1 %v92_v63 }
  0x7d   :  { %363 = vmatmul.mubr.f32.gmra.mxu0 %v74_v61  ;;  %630 = vmatprep.mubr.msk.f32.mxu1 %vm159_vm0, %v97_v1 }
  0x7e   :  { %367 = vmatprep.mubr.f32.mxu0 %v79_v62 }
  0x80   :  { %558 = vmatmul.mubr.f32.gmra.mxu1 %v96_v4 }
  0x81   :  { %368 = vmatmul.mubr.f32.gmra.mxu0 %v78_v2 }
  0x82   :  { %372 = vmatprep.mubr.f32.mxu0 %v83_v3 }
  0x85   :  { %373 = vmatmul.mubr.f32.gmra.mxu0 %v82_v5 }
  0x86   :  { %377 = vmatprep.mubr.f32.mxu0 %v87_v0 }
  0x89   :  { %378 = vmatmul.mubr.f32.gmra.mxu0 %v86_v6 }
  0x8a   :  { %382 = vmatprep.mubr.f32.mxu0 %v91_v7 }
  0x8d   :  { %383 = vmatmul.mubr.f32.gmra.mxu0 %v90_v8 }
  0x8e   :  { %387 = vmatprep.mubr.f32.mxu0 %v95_v9 }
  0x91   :  { %388 = vmatmul.mubr.f32.gmra.mxu0 %v94_v10 }
  0xf0   :  { %v459_v11 = vpop.f32.mrf.mxu1 }
  0xf2   :  { %v461_v12 = vpop.f32.mrf.mxu1 }
  0xf4   :  { %v464_v13 = vpop.f32.mrf.mxu1 }
  0xf6   :  { %v466_v14 = vpop.f32.mrf.mxu1 }
  0xf8   :  { %v469_v15 = vpop.f32.mrf.mxu1 }
  0xfa   :  { %v471_v16 = vpop.f32.mrf.mxu1 }
  0xfc   :  { %v474_v17 = vpop.f32.mrf.mxu1 }
  0xfe   :  { %v476_v19 = vpop.f32.mrf.mxu1 }
 0x100   :  { %v479_v22 = vpop.f32.mrf.mxu1 }
 0x101   :  { %v289_v20 = vpop.f32.mrf.mxu0 }
 0x102   :  { %v290_v21 = vadd.f32 %v1145_v18, %v289_v20  ;;  %v481_v25 = vpop.f32.mrf.mxu1 }
 0x103   :  { %v291_v23 = vpop.f32.mrf.mxu0 }
 0x104   :  { %v460_v24 = vadd.f32 %v459_v11, %v290_v21  ;;  %v484_v29 = vpop.f32.mrf.mxu1 }
 0x105   :  { %v294_v26 = vpop.f32.mrf.mxu0 }
 0x106   :  { %v563_v27 = vmax.f32 %v460_v24, 0.0  ;;  %v295_v28 = vadd.f32 %v1145_v18, %v294_v26  ;;  %v486_v32 = vpop.f32.mrf.mxu1 }
 0x107   :  { %v296_v30 = vpop.f32.mrf.mxu0 }
 0x108   :  { %584 = vst [vmem:[%s1234_s3] sm:$0xff] %v563_v27  ;;  %v465_v31 = vadd.f32 %v464_v13, %v295_v28  ;;  %v489_v36 = vpop.f32.mrf.mxu1 }
 0x109   :  { %v299_v33 = vpop.f32.mrf.mxu0 }
 0x10a   :  { %v564_v34 = vmax.f32 %v465_v31, 0.0  ;;  %v300_v35 = vadd.f32 %v1145_v18, %v299_v33  ;;  %v491_v39 = vpop.f32.mrf.mxu1 }
 0x10b   :  { %v301_v37 = vpop.f32.mrf.mxu0 }
 0x10c   :  { %585 = vst [vmem:[%s1234_s3 + $0x8] sm:$0xff] %v564_v34  ;;  %v470_v38 = vadd.f32 %v469_v15, %v300_v35  ;;  %v494_v43 = vpop.f32.mrf.mxu1 }
 0x10d   :  { %v304_v40 = vpop.f32.mrf.mxu0 }
 0x10e   :  { %v565_v41 = vmax.f32 %v470_v38, 0.0  ;;  %v305_v42 = vadd.f32 %v1145_v18, %v304_v40  ;;  %v496_v46 = vpop.f32.mrf.mxu1 }
 0x10f   :  { %v306_v44 = vpop.f32.mrf.mxu0 }
 0x110   :  { %586 = vst [vmem:[%s1234_s3 + $0x10] sm:$0xff] %v565_v41  ;;  %v475_v45 = vadd.f32 %v474_v17, %v305_v42  ;;  %v499_v50 = vpop.f32.mrf.mxu1 }
 0x111   :  { %v309_v47 = vpop.f32.mrf.mxu0 }
 0x112   :  { %v566_v48 = vmax.f32 %v475_v45, 0.0  ;;  %v310_v49 = vadd.f32 %v1145_v18, %v309_v47  ;;  %v501_v53 = vpop.f32.mrf.mxu1 }
 0x113   :  { %v311_v51 = vpop.f32.mrf.mxu0 }
 0x114   :  { %587 = vst [vmem:[%s1234_s3 + $0x18] sm:$0xff] %v566_v48  ;;  %v480_v52 = vadd.f32 %v479_v22, %v310_v49  ;;  %v504_v57 = vpop.f32.mrf.mxu1 }
 0x115   :  { %v314_v54 = vpop.f32.mrf.mxu0 }
 0x116   :  { %v567_v55 = vmax.f32 %v480_v52, 0.0  ;;  %v315_v56 = vadd.f32 %v1145_v18, %v314_v54  ;;  %v506_v60 = vpop.f32.mrf.mxu1 }
 0x117   :  { %v316_v58 = vpop.f32.mrf.mxu0 }
 0x118   :  { %588 = vst [vmem:[%s1234_s3 + $0x20] sm:$0xff] %v567_v55  ;;  %v485_v59 = vadd.f32 %v484_v29, %v315_v56  ;;  %v509_v1 = vpop.f32.mrf.mxu1 }
 0x119   :  { %v319_v61 = vpop.f32.mrf.mxu0 }
 0x11a   :  { %v568_v62 = vmax.f32 %v485_v59, 0.0  ;;  %v320_v63 = vadd.f32 %v1145_v18, %v319_v61  ;;  %v511_v4 = vpop.f32.mrf.mxu1 }
 0x11b   :  { %v321_v2 = vpop.f32.mrf.mxu0 }
 0x11c   :  { %589 = vst [vmem:[%s1234_s3 + $0x28] sm:$0xff] %v568_v62  ;;  %v490_v3 = vadd.f32 %v489_v36, %v320_v63  ;;  %v514_v7 = vpop.f32.mrf.mxu1 }
 0x11d   :  { %v324_v5 = vpop.f32.mrf.mxu0 }
 0x11e   :  { %v569_v0 = vmax.f32 %v490_v3, 0.0  ;;  %v325_v6 = vadd.f32 %v1145_v18, %v324_v5  ;;  %v516_v10 = vpop.f32.mrf.mxu1 }
 0x11f   :  { %v326_v8 = vpop.f32.mrf.mxu0 }
 0x120   :  { %590 = vst [vmem:[%s1234_s3 + $0x30] sm:$0xff] %v569_v0  ;;  %v495_v9 = vadd.f32 %v494_v43, %v325_v6  ;;  %v519_v14 = vpop.f32.mrf.mxu1 }
 0x121   :  { %v329_v11 = vpop.f32.mrf.mxu0 }
 0x122   :  { %v570_v12 = vmax.f32 %v495_v9, 0.0  ;;  %v330_v13 = vadd.f32 %v1145_v18, %v329_v11  ;;  %v521_v17 = vpop.f32.mrf.mxu1 }
 0x123   :  { %v331_v15 = vpop.f32.mrf.mxu0 }
 0x124   :  { %591 = vst [vmem:[%s1234_s3 + $0x38] sm:$0xff] %v570_v12  ;;  %v500_v16 = vadd.f32 %v499_v50, %v330_v13  ;;  %v524_v22 = vpop.f32.mrf.mxu1 }
 0x125   :  { %v334_v19 = vpop.f32.mrf.mxu0 }
 0x126   :  { %v571_v20 = vmax.f32 %v500_v16, 0.0  ;;  %v335_v21 = vadd.f32 %v1145_v18, %v334_v19  ;;  %v526_v25 = vpop.f32.mrf.mxu1 }
 0x127   :  { %v336_v23 = vpop.f32.mrf.mxu0 }
 0x128   :  { %592 = vst [vmem:[%s1234_s3 + $0x40] sm:$0xff] %v571_v20  ;;  %v505_v24 = vadd.f32 %v504_v57, %v335_v21  ;;  %v529_v29 = vpop.f32.mrf.mxu1 }
 0x129   :  { %v339_v26 = vpop.f32.mrf.mxu0 }
 0x12a   :  { %v572_v27 = vmax.f32 %v505_v24, 0.0  ;;  %v340_v28 = vadd.f32 %v1145_v18, %v339_v26  ;;  %v531_v32 = vpop.f32.mrf.mxu1 }
 0x12b   :  { %v341_v30 = vpop.f32.mrf.mxu0 }
 0x12c   :  { %593 = vst [vmem:[%s1234_s3 + $0x48] sm:$0xff] %v572_v27  ;;  %v510_v31 = vadd.f32 %v509_v1, %v340_v28  ;;  %v534_v36 = vpop.f32.mrf.mxu1 }
 0x12d   :  { %v344_v33 = vpop.f32.mrf.mxu0 }
 0x12e   :  { %v573_v34 = vmax.f32 %v510_v31, 0.0  ;;  %v345_v35 = vadd.f32 %v1145_v18, %v344_v33  ;;  %v536_v39 = vpop.f32.mrf.mxu1 }
 0x12f   :  { %v346_v37 = vpop.f32.mrf.mxu0 }
 0x130   :  { %594 = vst [vmem:[%s1234_s3 + $0x50] sm:$0xff] %v573_v34  ;;  %v515_v38 = vadd.f32 %v514_v7, %v345_v35  ;;  %v539_v43 = vpop.f32.mrf.mxu1 }
 0x131   :  { %v349_v40 = vpop.f32.mrf.mxu0 }
 0x132   :  { %v574_v41 = vmax.f32 %v515_v38, 0.0  ;;  %v350_v42 = vadd.f32 %v1145_v18, %v349_v40  ;;  %v541_v46 = vpop.f32.mrf.mxu1 }
 0x133   :  { %v351_v44 = vpop.f32.mrf.mxu0 }
 0x134   :  { %595 = vst [vmem:[%s1234_s3 + $0x58] sm:$0xff] %v574_v41  ;;  %v520_v45 = vadd.f32 %v519_v14, %v350_v42  ;;  %v544_v50 = vpop.f32.mrf.mxu1 }
 0x135   :  { %v354_v47 = vpop.f32.mrf.mxu0 }
 0x136   :  { %v575_v48 = vmax.f32 %v520_v45, 0.0  ;;  %v355_v49 = vadd.f32 %v1145_v18, %v354_v47  ;;  %v546_v53 = vpop.f32.mrf.mxu1 }
 0x137   :  { %v356_v51 = vpop.f32.mrf.mxu0 }
 0x138   :  { %596 = vst [vmem:[%s1234_s3 + $0x60] sm:$0xff] %v575_v48  ;;  %v525_v52 = vadd.f32 %v524_v22, %v355_v49  ;;  %v549_v57 = vpop.f32.mrf.mxu1 }
 0x139   :  { %v359_v54 = vpop.f32.mrf.mxu0 }
 0x13a   :  { %v576_v55 = vmax.f32 %v525_v52, 0.0  ;;  %v360_v56 = vadd.f32 %v1145_v18, %v359_v54  ;;  %v551_v60 = vpop.f32.mrf.mxu1 }
 0x13b   :  { %v361_v58 = vpop.f32.mrf.mxu0 }
 0x13c   :  { %597 = vst [vmem:[%s1234_s3 + $0x68] sm:$0xff] %v576_v55  ;;  %v530_v59 = vadd.f32 %v529_v29, %v360_v56  ;;  %v554_v1 = vpop.f32.mrf.mxu1 }
 0x13d   :  { %v364_v61 = vpop.f32.mrf.mxu0 }
 0x13e   :  { %v577_v62 = vmax.f32 %v530_v59, 0.0  ;;  %v365_v63 = vadd.f32 %v1145_v18, %v364_v61  ;;  %v556_v4 = vpop.f32.mrf.mxu1 }
 0x13f   :  { %v366_v2 = vpop.f32.mrf.mxu0 }
 0x140   :  { %598 = vst [vmem:[%s1234_s3 + $0x70] sm:$0xff] %v577_v62  ;;  %v535_v3 = vadd.f32 %v534_v36, %v365_v63  ;;  %v559_v7 = vpop.f32.mrf.mxu1 }
 0x141   :  { %v369_v5 = vpop.f32.mrf.mxu0 }
 0x142   :  { %v578_v0 = vmax.f32 %v535_v3, 0.0  ;;  %v370_v6 = vadd.f32 %v1145_v18, %v369_v5  ;;  %v561_v10 = vpop.f32.mrf.mxu1 }
 0x143   :  { %v371_v8 = vpop.f32.mrf.mxu0 }
 0x144   :  { %599 = vst [vmem:[%s1234_s3 + $0x78] sm:$0xff] %v578_v0  ;;  %v540_v9 = vadd.f32 %v539_v43, %v370_v6 }
 0x145   :  { %v374_v11 = vpop.f32.mrf.mxu0 }
 0x146   :  { %v579_v12 = vmax.f32 %v540_v9, 0.0  ;;  %v375_v13 = vadd.f32 %v1145_v18, %v374_v11 }
 0x147   :  { %v376_v14 = vpop.f32.mrf.mxu0 }
 0x148   :  { %600 = vst [vmem:[%s1234_s3 + $0x80] sm:$0xff] %v579_v12  ;;  %v545_v15 = vadd.f32 %v544_v50, %v375_v13 }
 0x149   :  { %v379_v16 = vpop.f32.mrf.mxu0 }
 0x14a   :  { %v580_v17 = vmax.f32 %v545_v15, 0.0  ;;  %v380_v19 = vadd.f32 %v1145_v18, %v379_v16 }
 0x14b   :  { %v381_v20 = vpop.f32.mrf.mxu0 }
 0x14c   :  { %601 = vst [vmem:[%s1234_s3 + $0x88] sm:$0xff] %v580_v17  ;;  %v550_v21 = vadd.f32 %v549_v57, %v380_v19 }
 0x14d   :  { %v384_v22 = vpop.f32.mrf.mxu0 }
 0x14e   :  { %v581_v23 = vmax.f32 %v550_v21, 0.0  ;;  %v385_v24 = vadd.f32 %v1145_v18, %v384_v22 }
 0x14f   :  { %v386_v25 = vpop.f32.mrf.mxu0 }
 0x150   :  { %602 = vst [vmem:[%s1234_s3 + $0x90] sm:$0xff] %v581_v23  ;;  %v555_v26 = vadd.f32 %v554_v1, %v385_v24 }
 0x151   :  { %v389_v27 = vpop.f32.mrf.mxu0 }
 0x152   :  { %v582_v28 = vmax.f32 %v555_v26, 0.0  ;;  %v390_v29 = vadd.f32 %v1145_v18, %v389_v27 }
 0x153   :  { %v391_v30 = vpop.f32.mrf.mxu0 }
 0x154   :  { %603 = vst [vmem:[%s1234_s3 + $0x98] sm:$0xff] %v582_v28  ;;  %v560_v31 = vadd.f32 %v559_v7, %v390_v29 }
 0x156   :  { %v583_v32 = vmax.f32 %v560_v31, 0.0 }
 0x158   :  { %604 = vst [vmem:[%s1234_s3 + $0xa0] sm:$0x3] %v583_v32 }

// kernel: conv_model_forward.9
= control target key start
LH: loop header
LB: loop body
LE: loop exit
PB: predicated region body
PF: predicated region fallthrough
CT: control target
= control target key end

     0   :  { %vm108_vm0 = vcmask 523264   ;;  %vm509_vm1 = vmmov 0   ;;  %s822_s1 = inlined_call_operand.vmem [shape: f32[576,128], index: 1, kind: input, shape index: {}]   ;;  %s823_s0 = inlined_call_operand.vmem [shape: f32[18,576], index: 0, kind: input, shape index: {}]   ;;  %s824_s2 = inlined_call_operand.vmem [shape: f32[1,128], index: 2, kind: input, shape index: {}]   ;;  %s825_s3 = inlined_call_operand.vmem [shape: f32[18,128], index: 3, kind: output, shape index: {}]  }
   0x1   :  { %v60_v0 = vld [vmem:[%s822_s1 + $0xf8] sm:$0xff]  ;;  %v59_v4 = vld [vmem:[%s822_s1 + $0xf0] sm:$0xff]  ;;  %v58_v8 = vld [vmem:[%s822_s1 + $0xe8] sm:$0xff] }
   0x2   :  { %v92_v1 = vld [vmem:[%s822_s1 + $0x1f8] sm:$0xff]  ;;  %372 = vmatprep.subr.mxu0 %v60_v0  ;;  %v91_v5 = vld [vmem:[%s822_s1 + $0x1f0] sm:$0xff]  ;;  %v90_v9 = vld [vmem:[%s822_s1 + $0x1e8] sm:$0xff] }
   0x3   :  { %v44_v2 = vld [vmem:[%s822_s1 + $0x78] sm:$0xff]  ;;  %413 = vmatprep.subr.mxu1 %v92_v1  ;;  %v43_v6 = vld [vmem:[%s822_s1 + $0x70] sm:$0xff]  ;;  %v42_v10 = vld [vmem:[%s822_s1 + $0x68] sm:$0xff] }
   0x4   :  { %v76_v3 = vld [vmem:[%s822_s1 + $0x178] sm:$0xff]  ;;  %373 = vmatpush3.msra.mxu0 %v44_v2  ;;  %v75_v7 = vld [vmem:[%s822_s1 + $0x170] sm:$0xff]  ;;  %v74_v11 = vld [vmem:[%s822_s1 + $0x168] sm:$0xff] }
   0x5   :  { %414 = vmatpush3.msra.mxu1 %v76_v3  ;;  %374 = vmatprep.subr.mxu0 %v59_v4  ;;  %v57_v12 = vld [vmem:[%s822_s1 + $0xe0] sm:$0xff]  ;;  %v56_v16 = vld [vmem:[%s822_s1 + $0xd8] sm:$0xff]  ;;  %v55_v20 = vld [vmem:[%s822_s1 + $0xd0] sm:$0xff] }
   0x6   :  { %415 = vmatprep.subr.mxu1 %v91_v5  ;;  %375 = vmatpush3.msra.mxu0 %v43_v6  ;;  %v89_v13 = vld [vmem:[%s822_s1 + $0x1e0] sm:$0xff]  ;;  %v88_v17 = vld [vmem:[%s822_s1 + $0x1d8] sm:$0xff]  ;;  %v87_v21 = vld [vmem:[%s822_s1 + $0x1d0] sm:$0xff]  ;;  %v508_v5 = vmov 0.0  }
   0x7   :  { %416 = vmatpush3.msra.mxu1 %v75_v7  ;;  %376 = vmatprep.subr.mxu0 %v58_v8  ;;  %v41_v14 = vld [vmem:[%s822_s1 + $0x60] sm:$0xff]  ;;  %v40_v18 = vld [vmem:[%s822_s1 + $0x58] sm:$0xff]  ;;  %v39_v22 = vld [vmem:[%s822_s1 + $0x50] sm:$0xff] }
   0x8   :  { %417 = vmatprep.subr.mxu1 %v90_v9  ;;  %v73_v15 = vld [vmem:[%s822_s1 + $0x160] sm:$0xff]  ;;  %377 = vmatpush3.msra.mxu0 %v42_v10  ;;  %v72_v19 = vld [vmem:[%s822_s1 + $0x158] sm:$0xff]  ;;  %v71_v23 = vld [vmem:[%s822_s1 + $0x150] sm:$0xff] }
   0x9   :  { %418 = vmatpush3.msra.mxu1 %v74_v11  ;;  %378 = vmatprep.subr.mxu0 %v57_v12  ;;  %v54_v24 = vld [vmem:[%s822_s1 + $0xc8] sm:$0xff]  ;;  %v53_v28 = vld [vmem:[%s822_s1 + $0xc0] sm:$0xff]  ;;  %v52_v32 = vld [vmem:[%s822_s1 + $0xb8] sm:$0xff] }
   0xa   :  { %419 = vmatprep.subr.mxu1 %v89_v13  ;;  %379 = vmatpush3.msra.mxu0 %v41_v14  ;;  %v86_v25 = vld [vmem:[%s822_s1 + $0x1c8] sm:$0xff]  ;;  %v85_v29 = vld [vmem:[%s822_s1 + $0x1c0] sm:$0xff]  ;;  %v84_v33 = vld [vmem:[%s822_s1 + $0x1b8] sm:$0xff] }
   0xb   :  { %420 = vmatpush3.msra.mxu1 %v73_v15  ;;  %380 = vmatprep.subr.mxu0 %v56_v16  ;;  %v38_v26 = vld [vmem:[%s822_s1 + $0x48] sm:$0xff]  ;;  %v37_v30 = vld [vmem:[%s822_s1 + $0x40] sm:$0xff]  ;;  %v36_v34 = vld [vmem:[%s822_s1 + $0x38] sm:$0xff] }
   0xc   :  { %421 = vmatprep.subr.mxu1 %v88_v17  ;;  %381 = vmatpush3.msra.mxu0 %v40_v18  ;;  %v70_v27 = vld [vmem:[%s822_s1 + $0x148] sm:$0xff]  ;;  %v69_v31 = vld [vmem:[%s822_s1 + $0x140] sm:$0xff]  ;;  %v68_v35 = vld [vmem:[%s822_s1 + $0x138] sm:$0xff] }
   0xd   :  { %422 = vmatpush3.msra.mxu1 %v72_v19  ;;  %382 = vmatprep.subr.mxu0 %v55_v20  ;;  %v51_v36 = vld [vmem:[%s822_s1 + $0xb0] sm:$0xff]  ;;  %v50_v40 = vld [vmem:[%s822_s1 + $0xa8] sm:$0xff]  ;;  %v49_v44 = vld [vmem:[%s822_s1 + $0xa0] sm:$0xff] }
   0xe   :  { %423 = vmatprep.subr.mxu1 %v87_v21  ;;  %383 = vmatpush3.msra.mxu0 %v39_v22  ;;  %v83_v37 = vld [vmem:[%s822_s1 + $0x1b0] sm:$0xff]  ;;  %v82_v41 = vld [vmem:[%s822_s1 + $0x1a8] sm:$0xff]  ;;  %v81_v45 = vld [vmem:[%s822_s1 + $0x1a0] sm:$0xff] }
   0xf   :  { %424 = vmatpush3.msra.mxu1 %v71_v23  ;;  %384 = vmatprep.subr.mxu0 %v54_v24  ;;  %v35_v38 = vld [vmem:[%s822_s1 + $0x30] sm:$0xff]  ;;  %v34_v42 = vld [vmem:[%s822_s1 + $0x28] sm:$0xff]  ;;  %v33_v46 = vld [vmem:[%s822_s1 + $0x20] sm:$0xff] }
  0x10   :  { %425 = vmatprep.subr.mxu1 %v86_v25  ;;  %385 = vmatpush3.msra.mxu0 %v38_v26  ;;  %v67_v39 = vld [vmem:[%s822_s1 + $0x130] sm:$0xff]  ;;  %v66_v43 = vld [vmem:[%s822_s1 + $0x128] sm:$0xff]  ;;  %v65_v47 = vld [vmem:[%s822_s1 + $0x120] sm:$0xff] }
  0x11   :  { %426 = vmatpush3.msra.mxu1 %v70_v27  ;;  %386 = vmatprep.subr.mxu0 %v53_v28  ;;  %v48_v48 = vld [vmem:[%s822_s1 + $0x98] sm:$0xff]  ;;  %v47_v52 = vld [vmem:[%s822_s1 + $0x90] sm:$0xff]  ;;  %v46_v56 = vld [vmem:[%s822_s1 + $0x88] sm:$0xff] }
  0x12   :  { %427 = vmatprep.subr.mxu1 %v85_v29  ;;  %387 = vmatpush3.msra.mxu0 %v37_v30  ;;  %v80_v49 = vld [vmem:[%s822_s1 + $0x198] sm:$0xff]  ;;  %v79_v53 = vld [vmem:[%s822_s1 + $0x190] sm:$0xff]  ;;  %v78_v57 = vld [vmem:[%s822_s1 + $0x188] sm:$0xff] }
  0x13   :  { %428 = vmatpush3.msra.mxu1 %v69_v31  ;;  %388 = vmatprep.subr.mxu0 %v52_v32  ;;  %v32_v50 = vld [vmem:[%s822_s1 + $0x18] sm:$0xff]  ;;  %v31_v54 = vld [vmem:[%s822_s1 + $0x10] sm:$0xff]  ;;  %v30_v58 = vld [vmem:[%s822_s1 + $0x8] sm:$0xff] }
  0x14   :  { %429 = vmatprep.subr.mxu1 %v84_v33  ;;  %389 = vmatpush3.msra.mxu0 %v36_v34  ;;  %v64_v51 = vld [vmem:[%s822_s1 + $0x118] sm:$0xff]  ;;  %v63_v55 = vld [vmem:[%s822_s1 + $0x110] sm:$0xff]  ;;  %v62_v59 = vld [vmem:[%s822_s1 + $0x108] sm:$0xff] }
  0x15   :  { %430 = vmatpush3.msra.mxu1 %v68_v35  ;;  %390 = vmatprep.subr.mxu0 %v51_v36  ;;  %v45_v60 = vld [vmem:[%s822_s1 + $0x80] sm:$0xff]  ;;  %v15_v63 = vld [vmem:[%s823_s0 + $0x8] sm:$0xff]  ;;  %v17_v1 = vld [vmem:[%s823_s0 + $0x18] sm:$0xff] }
  0x16   :  { %431 = vmatprep.subr.mxu1 %v83_v37  ;;  %391 = vmatpush3.msra.mxu0 %v35_v38  ;;  %v77_v61 = vld [vmem:[%s822_s1 + $0x180] sm:$0xff]  ;;  %v16_v3 = vld [vmem:[%s823_s0 + $0x10] sm:$0xff]  ;;  %v100_v4 = vld [vmem:[%s822_s1 + $0x238] sm:$0xff] }
  0x17   :  { %432 = vmatpush3.msra.mxu1 %v67_v39  ;;  %392 = vmatprep.subr.mxu0 %v50_v40  ;;  %v29_v62 = vld [vmem:[%s822_s1] sm:$0xff]  ;;  %v20_v6 = vld [vmem:[%s823_s0 + $0x30] sm:$0xff]  ;;  %v19_v8 = vld [vmem:[%s823_s0 + $0x28] sm:$0xff] }
  0x18   :  { %433 = vmatprep.subr.mxu1 %v82_v41  ;;  %393 = vmatpush3.msra.mxu0 %v34_v42  ;;  %v61_v0 = vld [vmem:[%s822_s1 + $0x100] sm:$0xff]  ;;  %v99_v7 = vld [vmem:[%s822_s1 + $0x230] sm:$0xff]  ;;  %v98_v10 = vld [vmem:[%s822_s1 + $0x228] sm:$0xff] }
  0x19   :  { %434 = vmatpush3.msra.mxu1 %v66_v43  ;;  %394 = vmatprep.subr.mxu0 %v49_v44  ;;  %v14_v2 = vld [vmem:[%s823_s0] sm:$0xff]  ;;  %v21_v11 = vld [vmem:[%s823_s0 + $0x38] sm:$0xff]  ;;  %v24_v14 = vld [vmem:[%s823_s0 + $0x50] sm:$0x3] }
  0x1a   :  { %435 = vmatprep.subr.mxu1 %v81_v45  ;;  %395 = vmatpush3.msra.mxu0 %v33_v46  ;;  %v22_v9 = vld [vmem:[%s823_s0 + $0x40] sm:$0xff]  ;;  %v25_v12 = vld [vmem:[%s823_s0 + $0x58] sm:$0x3]  ;;  %v27_v15 = vld [vmem:[%s823_s0 + $0x68] sm:$0x3] }
  0x1b   :  { %436 = vmatpush3.msra.mxu1 %v65_v47  ;;  %396 = vmatprep.subr.mxu0 %v48_v48  ;;  %v97_v13 = vld [vmem:[%s822_s1 + $0x220] sm:$0xff]  ;;  %v96_v16 = vld [vmem:[%s822_s1 + $0x218] sm:$0xff]  ;;  %v95_v18 = vld [vmem:[%s822_s1 + $0x210] sm:$0xff] }
  0x1c   :  { %437 = vmatprep.subr.mxu1 %v80_v49  ;;  %397 = vmatpush3.msra.mxu0 %v32_v50  ;;  %v26_v17 = vld [vmem:[%s823_s0 + $0x60] sm:$0x3]  ;;  %v94_v19 = vld [vmem:[%s822_s1 + $0x208] sm:$0xff]  ;;  %v28_v23 = vld [vmem:[%s823_s0 + $0x70] sm:$0x3] }
  0x1d   :  { %438 = vmatpush3.msra.mxu1 %v64_v51  ;;  %398 = vmatprep.subr.mxu0 %v47_v52  ;;  %v93_v20 = vld [vmem:[%s822_s1 + $0x200] sm:$0xff]  ;;  %v23_v22 = vld [vmem:[%s823_s0 + $0x48] sm:$0xff] }
  0x1e   :  { %439 = vmatprep.subr.mxu1 %v79_v53  ;;  %399 = vmatpush3.msra.mxu0 %v31_v54  ;;  %v18_v21 = vld [vmem:[%s823_s0 + $0x20] sm:$0xff] }
  0x1f   :  { %440 = vmatpush3.msra.mxu1 %v63_v55  ;;  %400 = vmatprep.subr.mxu0 %v46_v56  ;;  %v368_v35 = vld [vmem:[%s824_s2] ss:$0 sm:$0xff] }
  0x20   :  { %441 = vmatprep.subr.mxu1 %v78_v57  ;;  %401 = vmatpush3.msra.mxu0 %v30_v58 }
  0x21   :  { %442 = vmatpush3.msra.mxu1 %v62_v59  ;;  %402 = vmatprep.subr.mxu0 %v45_v60 }
  0x22   :  { %443 = vmatprep.subr.mxu1 %v77_v61  ;;  %403 = vmatpush3.msra.mxu0 %v29_v62 }
  0x23   :  { %182 = vmatprep.mubr.f32.mxu0 %v15_v63  ;;  %444 = vmatpush3.msra.mxu1 %v61_v0 }
  0x24   :  { %262 = vmatprep.mubr.f32.mxu1 %v17_v1  ;;  %183 = vmatmul.mubr.f32.vlgmr.msra.gmra.mxu0 %v14_v2 }
  0x25   :  { %263 = vmatmul.mubr.f32.vlgmr.msra.gmra.mxu1 %v16_v3  ;;  %465 = vmatprep.subr.mxu0 %v508_v5 }
  0x26   :  { %490 = vmatprep.subr.mxu1 %v508_v5  ;;  %466 = vmatpush3.msra.mxu0 %v100_v4 }
  0x27   :  { %498 = vmatpush3.msra.mxu1 %v100_v4  ;;  %467 = vmatprep.subr.mxu0 %v508_v5 }
  0x28   :  { %491 = vmatprep.subr.mxu1 %v508_v5  ;;  %187 = vmatprep.mubr.f32.mxu0 %v20_v6 }
  0x29   :  { %468 = vmatpush3.msra.mxu0 %v99_v7  ;;  %499 = vmatpush3.msra.mxu1 %v99_v7 }
  0x2a   :  { %188 = vmatmul.mubr.f32.gmra.mxu0 %v19_v8  ;;  %469 = vmatprep.subr.mxu0 %v508_v5 }
  0x2b   :  { %492 = vmatprep.subr.mxu1 %v508_v5  ;;  %267 = vmatprep.mubr.f32.mxu1 %v22_v9 }
  0x2c   :  { %470 = vmatpush3.msra.mxu0 %v98_v10  ;;  %500 = vmatpush3.msra.mxu1 %v98_v10 }
  0x2d   :  { %471 = vmatprep.subr.mxu0 %v508_v5  ;;  %268 = vmatmul.mubr.f32.gmra.mxu1 %v21_v11 }
  0x2e   :  { %493 = vmatprep.subr.mxu1 %v508_v5  ;;  %192 = vmatprep.mubr.f32.mxu0 %v25_v12 }
  0x2f   :  { %472 = vmatpush3.msra.mxu0 %v97_v13  ;;  %501 = vmatpush3.msra.mxu1 %v97_v13 }
  0x30   :  { %193 = vmatmul.mubr.f32.gmra.mxu0 %v24_v14  ;;  %473 = vmatprep.subr.mxu0 %v508_v5 }
  0x31   :  { %494 = vmatprep.subr.mxu1 %v508_v5  ;;  %272 = vmatprep.mubr.f32.mxu1 %v27_v15 }
  0x32   :  { %474 = vmatpush3.msra.mxu0 %v96_v16  ;;  %502 = vmatpush3.msra.mxu1 %v96_v16 }
  0x33   :  { %475 = vmatprep.subr.mxu0 %v508_v5  ;;  %273 = vmatmul.mubr.f32.gmra.mxu1 %v26_v17 }
  0x34   :  { %495 = vmatprep.subr.mxu1 %v508_v5  ;;  %476 = vmatpush3.msra.mxu0 %v95_v18 }
  0x35   :  { %503 = vmatpush3.msra.mxu1 %v95_v18  ;;  %477 = vmatprep.subr.mxu0 %v508_v5 }
  0x36   :  { %496 = vmatprep.subr.mxu1 %v508_v5  ;;  %478 = vmatpush3.msra.mxu0 %v94_v19 }
  0x37   :  { %504 = vmatpush3.msra.mxu1 %v94_v19  ;;  %479 = vmatprep.subr.mxu0 %v508_v5 }
  0x38   :  { %497 = vmatprep.subr.mxu1 %v508_v5  ;;  %480 = vmatpush3.msra.mxu0 %v93_v20 }
  0x39   :  { %505 = vmatpush3.msra.mxu1 %v93_v20  ;;  %481 = vmatprep.mubr.msk.f32.mxu0 %vm509_vm1, %v508_v5 }
  0x3a   :  { %484 = vmatprep.mubr.msk.f32.mxu1 %vm509_vm1, %v508_v5  ;;  %482 = vmatmul.mubr.msk.f32.vlgmr.msra.gmra.mxu0 %vm108_vm0, %v18_v21 }
  0x3b   :  { %485 = vmatmul.mubr.msk.f32.vlgmr.msra.gmra.mxu1 %vm108_vm0, %v23_v22 }
  0x3c   :  { %487 = vmatprep.mubr.msk.f32.mxu1 %vm509_vm1, %v508_v5 }
  0x3f   :  { %488 = vmatmul.mubr.msk.f32.gmra.mxu1 %vm108_vm0, %v28_v23 }
  0xe4   :  { %v404_v24 = vpop.f32.mrf.mxu0 }
  0xe5   :  { %v445_v26 = vpop.f32.mrf.mxu1 }
  0xe6   :  { %v405_v25 = vpop.f32.mrf.mxu0 }
  0xe7   :  { %v446_v28 = vpop.f32.mrf.mxu1  ;;  %v406_v33 = vadd.f32 %v405_v25, %v404_v24 }
  0xe8   :  { %v447_v43 = vadd.f32 %v446_v28, %v445_v26 }
  0xe9   :  { %v185_v38 = vadd.f32 %v406_v33, %v368_v35 }
  0xea   :  { %v407_v27 = vpop.f32.mrf.mxu0 }
  0xeb   :  { %v265_v46 = vadd.f32 %v447_v43, %v185_v38 }
  0xec   :  { %v408_v29 = vpop.f32.mrf.mxu0 }
  0xed   :  { %v448_v30 = vpop.f32.mrf.mxu1  ;;  %v409_v34 = vadd.f32 %v408_v29, %v407_v27 }
  0xef   :  { %v449_v32 = vpop.f32.mrf.mxu1  ;;  %v190_v39 = vadd.f32 %v409_v34, %v368_v35 }
  0xf0   :  { %v410_v31 = vpop.f32.mrf.mxu0  ;;  %v450_v40 = vadd.f32 %v449_v32, %v448_v30 }
  0xf2   :  { %v411_v36 = vpop.f32.mrf.mxu0  ;;  %v270_v47 = vadd.f32 %v450_v40, %v190_v39 }
  0xf3   :  { %v451_v37 = vpop.f32.mrf.mxu1  ;;  %v412_v41 = vadd.f32 %v411_v36, %v410_v31 }
  0xf5   :  { %v452_v42 = vpop.f32.mrf.mxu1  ;;  %v195_v44 = vadd.f32 %v412_v41, %v368_v35 }
  0xf6   :  { %v453_v45 = vadd.f32 %v452_v42, %v451_v37 }
  0xf8   :  { %v275_v56 = vadd.f32 %v453_v45, %v195_v44 }
  0xfa   :  { %v344_v48 = vpop.f32.mrf.mxu0 }
  0xfb   :  { %v349_v49 = vpop.f32.mrf.mxu1  ;;  %v345_v50 = vadd.f32 %v344_v48, %v265_v46 }
  0xfc   :  { %v350_v51 = vadd.f32 %v349_v49, %v270_v47  ;;  %v483_v53 = vpop.f32.mrf.mxu0 }
  0xfd   :  { %v486_v52 = vpop.f32.mrf.mxu1  ;;  %v358_v54 = vmax.f32 %v345_v50, 0.0 }
  0xfe   :  { %v359_v55 = vmax.f32 %v350_v51, 0.0 }
  0xff   :  { %v354_v57 = vpop.f32.mrf.mxu1  ;;  %361 = vst [vmem:[%s825_s3] sm:$0xff] %v358_v54 }
 0x100   :  { %362 = vst [vmem:[%s825_s3 + $0x8] sm:$0xff] %v359_v55  ;;  %v355_v58 = vadd.f32 %v354_v57, %v275_v56 }
 0x101   :  { %v489_v59 = vpop.f32.mrf.mxu1 }
 0x102   :  { %v360_v60 = vmax.f32 %v355_v58, 0.0 }
 0x104   :  { %363 = vst [vmem:[%s825_s3 + $0x10] sm:$0x3] %v360_v60 }

// kernel: conv_model_forward.11
= control target key start
LH: loop header
LB: loop body
LE: loop exit
PB: predicated region body
PF: predicated region fallthrough
CT: control target
= control target key end

     0   :  { %v498_v3 = vmov 0.0   ;;  %vm499_vm0 = vmmov 0   ;;  %s863_s1 = inlined_call_operand.vmem [shape: f32[128,640], index: 1, kind: input, shape index: {}]   ;;  %s864_s0 = inlined_call_operand.vmem [shape: f32[18,128], index: 0, kind: input, shape index: {}]   ;;  %s865_s2 = inlined_call_operand.vmem [shape: f32[1,640], index: 2, kind: input, shape index: {}]   ;;  %s866_s3 = inlined_call_operand.vmem [shape: f32[18,640], index: 3, kind: output, shape index: {}]  }
   0x1   :  { %v95_v0 = vld [vmem:[%s863_s1 + $0x270] sm:$0xff]  ;;  %v94_v1 = vld [vmem:[%s863_s1 + $0x268] sm:$0xff]  ;;  %v93_v2 = vld [vmem:[%s863_s1 + $0x260] sm:$0xff]  ;;  %271 = vmatprep.mubr.f32.mxu1 %v498_v3  ;;  %188 = vmatprep.mubr.f32.mxu0 %v498_v3 }
   0x2   :  { %207 = vmatprep.subr.mxu1 %v95_v0  ;;  %124 = vmatprep.subr.mxu0 %v93_v2  ;;  %v90_v4 = vld [vmem:[%s863_s1 + $0x248] sm:$0xff]  ;;  %v92_v5 = vld [vmem:[%s863_s1 + $0x258] sm:$0xff]  ;;  %v89_v6 = vld [vmem:[%s863_s1 + $0x240] sm:$0xff] }
   0x3   :  { %208 = vmatpush1.msra.mxu1 %v94_v1  ;;  %125 = vmatpush1.msra.mxu0 %v92_v5  ;;  %v88_v7 = vld [vmem:[%s863_s1 + $0x238] sm:$0xff]  ;;  %v85_v8 = vld [vmem:[%s863_s1 + $0x220] sm:$0xff]  ;;  %v87_v9 = vld [vmem:[%s863_s1 + $0x230] sm:$0xff] }
   0x4   :  { %209 = vmatprep.subr.mxu1 %v90_v4  ;;  %126 = vmatprep.subr.mxu0 %v88_v7  ;;  %v84_v10 = vld [vmem:[%s863_s1 + $0x218] sm:$0xff]  ;;  %v83_v11 = vld [vmem:[%s863_s1 + $0x210] sm:$0xff]  ;;  %v82_v13 = vld [vmem:[%s863_s1 + $0x208] sm:$0xff] }
   0x5   :  { %210 = vmatpush1.msra.mxu1 %v89_v6  ;;  %127 = vmatpush1.msra.mxu0 %v87_v9  ;;  %v80_v12 = vld [vmem:[%s863_s1 + $0x1f8] sm:$0xff]  ;;  %v78_v14 = vld [vmem:[%s863_s1 + $0x1e8] sm:$0xff]  ;;  %v79_v15 = vld [vmem:[%s863_s1 + $0x1f0] sm:$0xff] }
   0x6   :  { %211 = vmatprep.subr.mxu1 %v85_v8  ;;  %128 = vmatprep.subr.mxu0 %v83_v11  ;;  %v77_v16 = vld [vmem:[%s863_s1 + $0x1e0] sm:$0xff]  ;;  %v75_v17 = vld [vmem:[%s863_s1 + $0x1d0] sm:$0xff]  ;;  %v74_v19 = vld [vmem:[%s863_s1 + $0x1c8] sm:$0xff] }
   0x7   :  { %212 = vmatpush1.msra.mxu1 %v84_v10  ;;  %129 = vmatpush1.msra.mxu0 %v82_v13  ;;  %v73_v18 = vld [vmem:[%s863_s1 + $0x1c0] sm:$0xff]  ;;  %v72_v20 = vld [vmem:[%s863_s1 + $0x1b8] sm:$0xff]  ;;  %v70_v21 = vld [vmem:[%s863_s1 + $0x1a8] sm:$0xff] }
   0x8   :  { %213 = vmatprep.subr.mxu1 %v80_v12  ;;  %130 = vmatprep.subr.mxu0 %v78_v14  ;;  %v68_v22 = vld [vmem:[%s863_s1 + $0x198] sm:$0xff]  ;;  %v69_v23 = vld [vmem:[%s863_s1 + $0x1a0] sm:$0xff]  ;;  %v67_v24 = vld [vmem:[%s863_s1 + $0x190] sm:$0xff] }
   0x9   :  { %214 = vmatpush1.msra.mxu1 %v79_v15  ;;  %131 = vmatpush1.msra.mxu0 %v77_v16  ;;  %v65_v25 = vld [vmem:[%s863_s1 + $0x180] sm:$0xff]  ;;  %v63_v26 = vld [vmem:[%s863_s1 + $0x170] sm:$0xff]  ;;  %v64_v27 = vld [vmem:[%s863_s1 + $0x178] sm:$0xff] }
   0xa   :  { %215 = vmatprep.subr.mxu1 %v75_v17  ;;  %132 = vmatprep.subr.mxu0 %v73_v18  ;;  %v62_v28 = vld [vmem:[%s863_s1 + $0x168] sm:$0xff]  ;;  %v60_v29 = vld [vmem:[%s863_s1 + $0x158] sm:$0xff]  ;;  %v59_v31 = vld [vmem:[%s863_s1 + $0x150] sm:$0xff] }
   0xb   :  { %216 = vmatpush1.msra.mxu1 %v74_v19  ;;  %133 = vmatpush1.msra.mxu0 %v72_v20  ;;  %v58_v30 = vld [vmem:[%s863_s1 + $0x148] sm:$0xff]  ;;  %v57_v32 = vld [vmem:[%s863_s1 + $0x140] sm:$0xff]  ;;  %v55_v33 = vld [vmem:[%s863_s1 + $0x130] sm:$0xff] }
   0xc   :  { %217 = vmatprep.subr.mxu1 %v70_v21  ;;  %134 = vmatprep.subr.mxu0 %v68_v22  ;;  %v53_v34 = vld [vmem:[%s863_s1 + $0x120] sm:$0xff]  ;;  %v54_v35 = vld [vmem:[%s863_s1 + $0x128] sm:$0xff]  ;;  %v52_v36 = vld [vmem:[%s863_s1 + $0x118] sm:$0xff]  ;;  %v99_v21 = vlaneseq }
   0xd   :  { %218 = vmatpush1.msra.mxu1 %v69_v23  ;;  %135 = vmatpush1.msra.mxu0 %v67_v24  ;;  %v50_v37 = vld [vmem:[%s863_s1 + $0x108] sm:$0xff]  ;;  %v48_v38 = vld [vmem:[%s863_s1 + $0xf8] sm:$0xff]  ;;  %v49_v39 = vld [vmem:[%s863_s1 + $0x100] sm:$0xff] }
   0xe   :  { %219 = vmatprep.subr.mxu1 %v65_v25  ;;  %136 = vmatprep.subr.mxu0 %v63_v26  ;;  %v47_v40 = vld [vmem:[%s863_s1 + $0xf0] sm:$0xff]  ;;  %v45_v41 = vld [vmem:[%s863_s1 + $0xe0] sm:$0xff]  ;;  %v44_v43 = vld [vmem:[%s863_s1 + $0xd8] sm:$0xff]  ;;  %v100_v22 = vshrl.u32 %v99_v21, 7 }
   0xf   :  { %220 = vmatpush1.msra.mxu1 %v64_v27  ;;  %137 = vmatpush1.msra.mxu0 %v62_v28  ;;  %v43_v42 = vld [vmem:[%s863_s1 + $0xd0] sm:$0xff]  ;;  %v42_v44 = vld [vmem:[%s863_s1 + $0xc8] sm:$0xff]  ;;  %v40_v45 = vld [vmem:[%s863_s1 + $0xb8] sm:$0xff] }
  0x10   :  { %221 = vmatprep.subr.mxu1 %v60_v29  ;;  %138 = vmatprep.subr.mxu0 %v58_v30  ;;  %v38_v46 = vld [vmem:[%s863_s1 + $0xa8] sm:$0xff]  ;;  %v39_v47 = vld [vmem:[%s863_s1 + $0xb0] sm:$0xff]  ;;  %v37_v48 = vld [vmem:[%s863_s1 + $0xa0] sm:$0xff]  ;;  %v109_v23 = vsub.s32 2, %v100_v22  ;;  %v113_v25 = vsub.s32 3, %v100_v22  ;;  %v101_v26 = vsub.s32 0, %v100_v22 }
  0x11   :  { %222 = vmatpush1.msra.mxu1 %v59_v31  ;;  %139 = vmatpush1.msra.mxu0 %v57_v32  ;;  %v35_v49 = vld [vmem:[%s863_s1 + $0x90] sm:$0xff]  ;;  %v33_v50 = vld [vmem:[%s863_s1 + $0x80] sm:$0xff]  ;;  %v34_v51 = vld [vmem:[%s863_s1 + $0x88] sm:$0xff]  ;;  %v105_v28 = vsub.s32 1, %v100_v22 }
  0x12   :  { %223 = vmatprep.subr.mxu1 %v55_v33  ;;  %140 = vmatprep.subr.mxu0 %v53_v34  ;;  %v32_v52 = vld [vmem:[%s863_s1 + $0x78] sm:$0xff]  ;;  %v30_v53 = vld [vmem:[%s863_s1 + $0x68] sm:$0xff]  ;;  %v29_v55 = vld [vmem:[%s863_s1 + $0x60] sm:$0xff] }
  0x13   :  { %224 = vmatpush1.msra.mxu1 %v54_v35  ;;  %141 = vmatpush1.msra.mxu0 %v52_v36  ;;  %v28_v54 = vld [vmem:[%s863_s1 + $0x58] sm:$0xff]  ;;  %v27_v56 = vld [vmem:[%s863_s1 + $0x50] sm:$0xff]  ;;  %v25_v57 = vld [vmem:[%s863_s1 + $0x40] sm:$0xff] }
  0x14   :  { %225 = vmatprep.subr.mxu1 %v50_v37  ;;  %142 = vmatprep.subr.mxu0 %v48_v38  ;;  %v23_v58 = vld [vmem:[%s863_s1 + $0x30] sm:$0xff]  ;;  %v24_v59 = vld [vmem:[%s863_s1 + $0x38] sm:$0xff]  ;;  %v22_v60 = vld [vmem:[%s863_s1 + $0x28] sm:$0xff] }
  0x15   :  { %226 = vmatpush1.msra.mxu1 %v49_v39  ;;  %143 = vmatpush1.msra.mxu0 %v47_v40  ;;  %v20_v61 = vld [vmem:[%s863_s1 + $0x18] sm:$0xff]  ;;  %v18_v62 = vld [vmem:[%s863_s1 + $0x8] sm:$0xff]  ;;  %v19_v63 = vld [vmem:[%s863_s1 + $0x10] sm:$0xff] }
  0x16   :  { %227 = vmatprep.subr.mxu1 %v45_v41  ;;  %144 = vmatprep.subr.mxu0 %v43_v42  ;;  %v17_v0 = vld [vmem:[%s863_s1] sm:$0xff]  ;;  %v96_v2 = vld [vmem:[%s863_s1 + $0x278] sm:$0xff]  ;;  %v91_v4 = vld [vmem:[%s863_s1 + $0x250] sm:$0xff] }
  0x17   :  { %228 = vmatpush1.msra.mxu1 %v44_v43  ;;  %145 = vmatpush1.msra.mxu0 %v42_v44  ;;  %v717_v1 = vld [vmem:[%s864_s0] sm:$0xff]  ;;  %v86_v5 = vld [vmem:[%s863_s1 + $0x228] sm:$0xff]  ;;  %v76_v7 = vld [vmem:[%s863_s1 + $0x1d8] sm:$0xff] }
  0x18   :  { %229 = vmatprep.subr.mxu1 %v40_v45  ;;  %146 = vmatprep.subr.mxu0 %v38_v46  ;;  %v81_v6 = vld [vmem:[%s863_s1 + $0x200] sm:$0xff]  ;;  %v71_v8 = vld [vmem:[%s863_s1 + $0x1b0] sm:$0xff]  ;;  %v66_v9 = vld [vmem:[%s863_s1 + $0x188] sm:$0xff] }
  0x19   :  { %230 = vmatpush1.msra.mxu1 %v39_v47  ;;  %147 = vmatpush1.msra.mxu0 %v37_v48  ;;  %v61_v10 = vld [vmem:[%s863_s1 + $0x160] sm:$0xff]  ;;  %v56_v11 = vld [vmem:[%s863_s1 + $0x138] sm:$0xff]  ;;  %v51_v12 = vld [vmem:[%s863_s1 + $0x110] sm:$0xff] }
  0x1a   :  { %231 = vmatprep.subr.mxu1 %v35_v49  ;;  %148 = vmatprep.subr.mxu0 %v33_v50  ;;  %v46_v13 = vld [vmem:[%s863_s1 + $0xe8] sm:$0xff]  ;;  %v41_v15 = vld [vmem:[%s863_s1 + $0xc0] sm:$0xff]  ;;  %v36_v16 = vld [vmem:[%s863_s1 + $0x98] sm:$0xff] }
  0x1b   :  { %232 = vmatpush1.msra.mxu1 %v34_v51  ;;  %149 = vmatpush1.msra.mxu0 %v32_v52  ;;  %v15_v14 = vld [vmem:[%s864_s0 + $0x8] sm:$0xff]  ;;  %v16_v17 = vld [vmem:[%s864_s0 + $0x10] sm:$0x3]  ;;  %v21_v20 = vld [vmem:[%s863_s1 + $0x20] sm:$0xff] }
  0x1c   :  { %233 = vmatprep.subr.mxu1 %v30_v53  ;;  %150 = vmatprep.subr.mxu0 %v28_v54  ;;  %v31_v18 = vld [vmem:[%s863_s1 + $0x70] sm:$0xff]  ;;  %v26_v19 = vld [vmem:[%s863_s1 + $0x48] sm:$0xff]  ;;  %v97_v24 = vld [vmem:[%s865_s2] sm:$0x1f] }
  0x1d   :  { %234 = vmatpush1.msra.mxu1 %v29_v55  ;;  %151 = vmatpush1.msra.mxu0 %v27_v56  ;;  %v110_v27 = vrot.slane %v97_v24, %v109_v23  ;;  %v114_v29 = vrot.slane %v97_v24, %v113_v25  ;;  %v102_v30 = vrot.slane %v97_v24, %v101_v26  ;;  %v117_v55 = vsub.s32 4, %v100_v22 }
  0x1e   :  { %235 = vmatprep.subr.mxu1 %v25_v57  ;;  %152 = vmatprep.subr.mxu0 %v23_v58  ;;  %v106_v33 = vrot.slane %v97_v24, %v105_v28 }
  0x1f   :  { %236 = vmatpush1.msra.mxu1 %v24_v59  ;;  %153 = vmatpush1.msra.mxu0 %v22_v60 }
  0x20   :  { %237 = vmatprep.subr.mxu1 %v20_v61  ;;  %154 = vmatprep.subr.mxu0 %v18_v62 }
  0x21   :  { %238 = vmatpush1.msra.mxu1 %v19_v63  ;;  %155 = vmatpush1.msra.mxu0 %v17_v0  ;;  %v118_v0 = vrot.slane %v97_v24, %v117_v55 }
  0x22   :  { %272 = vmatmul.mubr.f32.vlgmr.msra.gmra.mxu1 %v717_v1  ;;  %464 = vmatprep.subr.mxu1 %v498_v3 }
  0x23   :  { %480 = vmatpush3.msra.mxu1 %v96_v2  ;;  %423 = vmatprep.subr.mxu0 %v498_v3 }
  0x24   :  { %465 = vmatprep.subr.mxu1 %v498_v3  ;;  %189 = vmatmul.mubr.f32.vlgmr.msra.gmra.mxu0 %v717_v1 }
  0x25   :  { %424 = vmatpush3.msra.mxu0 %v96_v2  ;;  %481 = vmatpush3.msra.mxu1 %v91_v4 }
  0x26   :  { %425 = vmatprep.subr.mxu0 %v498_v3  ;;  %466 = vmatprep.subr.mxu1 %v498_v3 }
  0x27   :  { %426 = vmatpush3.msra.mxu0 %v91_v4  ;;  %482 = vmatpush3.msra.mxu1 %v86_v5 }
  0x28   :  { %427 = vmatprep.subr.mxu0 %v498_v3  ;;  %467 = vmatprep.subr.mxu1 %v498_v3 }
  0x29   :  { %428 = vmatpush3.msra.mxu0 %v86_v5  ;;  %483 = vmatpush3.msra.mxu1 %v81_v6 }
  0x2a   :  { %429 = vmatprep.subr.mxu0 %v498_v3  ;;  %468 = vmatprep.subr.mxu1 %v498_v3 }
  0x2b   :  { %430 = vmatpush3.msra.mxu0 %v81_v6  ;;  %484 = vmatpush3.msra.mxu1 %v76_v7 }
  0x2c   :  { %431 = vmatprep.subr.mxu0 %v498_v3  ;;  %469 = vmatprep.subr.mxu1 %v498_v3 }
  0x2d   :  { %432 = vmatpush3.msra.mxu0 %v76_v7  ;;  %485 = vmatpush3.msra.mxu1 %v71_v8 }
  0x2e   :  { %433 = vmatprep.subr.mxu0 %v498_v3  ;;  %470 = vmatprep.subr.mxu1 %v498_v3 }
  0x2f   :  { %434 = vmatpush3.msra.mxu0 %v71_v8  ;;  %486 = vmatpush3.msra.mxu1 %v66_v9 }
  0x30   :  { %435 = vmatprep.subr.mxu0 %v498_v3  ;;  %471 = vmatprep.subr.mxu1 %v498_v3 }
  0x31   :  { %436 = vmatpush3.msra.mxu0 %v66_v9  ;;  %487 = vmatpush3.msra.mxu1 %v61_v10 }
  0x32   :  { %437 = vmatprep.subr.mxu0 %v498_v3  ;;  %472 = vmatprep.subr.mxu1 %v498_v3 }
  0x33   :  { %438 = vmatpush3.msra.mxu0 %v61_v10  ;;  %488 = vmatpush3.msra.mxu1 %v56_v11 }
  0x34   :  { %439 = vmatprep.subr.mxu0 %v498_v3  ;;  %473 = vmatprep.subr.mxu1 %v498_v3 }
  0x35   :  { %440 = vmatpush3.msra.mxu0 %v56_v11  ;;  %489 = vmatpush3.msra.mxu1 %v51_v12 }
  0x36   :  { %441 = vmatprep.subr.mxu0 %v498_v3  ;;  %474 = vmatprep.subr.mxu1 %v498_v3 }
  0x37   :  { %277 = vmatprep.mubr.f32.mxu1 %v498_v3  ;;  %442 = vmatpush3.msra.mxu0 %v51_v12 }
  0x38   :  { %490 = vmatpush3.msra.mxu1 %v46_v13  ;;  %443 = vmatprep.subr.mxu0 %v498_v3 }
  0x39   :  { %278 = vmatmul.mubr.f32.gmra.mxu1 %v15_v14  ;;  %475 = vmatprep.subr.mxu1 %v498_v3 }
  0x3a   :  { %444 = vmatpush3.msra.mxu0 %v46_v13  ;;  %491 = vmatpush3.msra.mxu1 %v41_v15 }
  0x3b   :  { %445 = vmatprep.subr.mxu0 %v498_v3  ;;  %476 = vmatprep.subr.mxu1 %v498_v3 }
  0x3c   :  { %194 = vmatprep.mubr.f32.mxu0 %v498_v3  ;;  %283 = vmatprep.mubr.f32.mxu1 %v498_v3 }
  0x3d   :  { %446 = vmatpush3.msra.mxu0 %v41_v15  ;;  %492 = vmatpush3.msra.mxu1 %v36_v16 }
  0x3e   :  { %195 = vmatmul.mubr.f32.gmra.mxu0 %v15_v14  ;;  %284 = vmatmul.mubr.f32.gmra.mxu1 %v16_v17 }
  0x3f   :  { %447 = vmatprep.subr.mxu0 %v498_v3  ;;  %477 = vmatprep.subr.mxu1 %v498_v3 }
  0x40   :  { %448 = vmatpush3.msra.mxu0 %v36_v16  ;;  %493 = vmatpush3.msra.mxu1 %v31_v18 }
  0x41   :  { %449 = vmatprep.subr.mxu0 %v498_v3  ;;  %478 = vmatprep.subr.mxu1 %v498_v3 }
  0x42   :  { %200 = vmatprep.mubr.f32.mxu0 %v498_v3  ;;  %450 = vmatpush3.msra.mxu0 %v31_v18 }
  0x43   :  { %494 = vmatpush3.msra.mxu1 %v26_v19  ;;  %201 = vmatmul.mubr.f32.gmra.mxu0 %v16_v17 }
  0x44   :  { %451 = vmatprep.subr.mxu0 %v498_v3  ;;  %479 = vmatprep.subr.mxu1 %v498_v3 }
  0x45   :  { %452 = vmatpush3.msra.mxu0 %v26_v19  ;;  %495 = vmatpush3.msra.mxu1 %v21_v20 }
  0x46   :  { %458 = vmatprep.mubr.msk.f32.mxu1 %vm499_vm0, %v498_v3  ;;  %453 = vmatprep.subr.mxu0 %v498_v3 }
  0x47   :  { %459 = vmatmul.mubr.f32.vlgmr.msra.gmra.mxu1 %v15_v14  ;;  %454 = vmatpush3.msra.mxu0 %v21_v20 }
  0x48   :  { %455 = vmatprep.mubr.msk.f32.mxu0 %vm499_vm0, %v498_v3  ;;  %461 = vmatprep.mubr.msk.f32.mxu1 %vm499_vm0, %v498_v3 }
  0x49   :  { %456 = vmatmul.mubr.f32.vlgmr.msra.gmra.mxu0 %v717_v1 }
  0x4b   :  { %462 = vmatmul.mubr.f32.gmra.mxu1 %v16_v17 }
  0xe2   :  { %v273_v31 = vpop.f32.mrf.mxu1 }
  0xe3   :  { %v274_v32 = vadd.f32 %v273_v31, %v110_v27 }
  0xe4   :  { %v275_v3 = vpop.f32.mrf.mxu1  ;;  %v190_v34 = vpop.f32.mrf.mxu0 }
  0xe5   :  { %v372_v35 = vmax.f32 %v274_v32, 0.0  ;;  %v276_v36 = vadd.f32 %v275_v3, %v114_v29  ;;  %v191_v37 = vadd.f32 %v190_v34, %v102_v30 }
  0xe6   :  { %v192_v38 = vpop.f32.mrf.mxu0 }
  0xe7   :  { %387 = vst [vmem:[%s866_s3 + $0x10] sm:$0xff] %v372_v35  ;;  %v373_v39 = vmax.f32 %v276_v36, 0.0  ;;  %v370_v40 = vmax.f32 %v191_v37, 0.0  ;;  %v193_v41 = vadd.f32 %v192_v38, %v106_v33 }
  0xe9   :  { %388 = vst [vmem:[%s866_s3 + $0x18] sm:$0xff] %v373_v39  ;;  %385 = vst [vmem:[%s866_s3] sm:$0xff] %v370_v40  ;;  %v371_v42 = vmax.f32 %v193_v41, 0.0 }
  0xeb   :  { %386 = vst [vmem:[%s866_s3 + $0x8] sm:$0xff] %v371_v42 }
  0xf9   :  { %v279_v43 = vpop.f32.mrf.mxu1 }
  0xfa   :  { %v280_v44 = vadd.f32 %v279_v43, %v110_v27 }
  0xfb   :  { %v281_v45 = vpop.f32.mrf.mxu1 }
  0xfc   :  { %v377_v46 = vmax.f32 %v280_v44, 0.0  ;;  %v282_v47 = vadd.f32 %v281_v45, %v114_v29 }
  0xfe   :  { %392 = vst [vmem:[%s866_s3 + $0x38] sm:$0xff] %v377_v46  ;;  %v378_v48 = vmax.f32 %v282_v47, 0.0  ;;  %v196_v49 = vpop.f32.mrf.mxu0  ;;  %v285_v50 = vpop.f32.mrf.mxu1 }
  0xff   :  { %v197_v51 = vadd.f32 %v196_v49, %v102_v30  ;;  %v286_v52 = vadd.f32 %v285_v50, %v110_v27 }
 0x100   :  { %393 = vst [vmem:[%s866_s3 + $0x40] sm:$0xff] %v378_v48  ;;  %v198_v53 = vpop.f32.mrf.mxu0  ;;  %v287_v54 = vpop.f32.mrf.mxu1 }
 0x101   :  { %v375_v56 = vmax.f32 %v197_v51, 0.0  ;;  %v382_v57 = vmax.f32 %v286_v52, 0.0  ;;  %v199_v58 = vadd.f32 %v198_v53, %v106_v33  ;;  %v288_v59 = vadd.f32 %v287_v54, %v114_v29 }
 0x103   :  { %390 = vst [vmem:[%s866_s3 + $0x28] sm:$0xff] %v375_v56  ;;  %397 = vst [vmem:[%s866_s3 + $0x60] sm:$0x3] %v382_v57  ;;  %v376_v60 = vmax.f32 %v199_v58, 0.0  ;;  %v383_v61 = vmax.f32 %v288_v59, 0.0  ;;  %v202_v62 = vpop.f32.mrf.mxu0 }
 0x104   :  { %v203_v63 = vadd.f32 %v202_v62, %v102_v30 }
 0x105   :  { %391 = vst [vmem:[%s866_s3 + $0x30] sm:$0xff] %v376_v60  ;;  %398 = vst [vmem:[%s866_s3 + $0x68] sm:$0x3] %v383_v61  ;;  %v204_v1 = vpop.f32.mrf.mxu0 }
 0x106   :  { %v380_v2 = vmax.f32 %v203_v63, 0.0  ;;  %v205_v4 = vadd.f32 %v204_v1, %v106_v33 }
 0x107   :  { %v361_v5 = vpop.f32.mrf.mxu1 }
 0x108   :  { %395 = vst [vmem:[%s866_s3 + $0x50] sm:$0x3] %v380_v2  ;;  %v381_v6 = vmax.f32 %v205_v4, 0.0  ;;  %v362_v7 = vadd.f32 %v361_v5, %v118_v0 }
 0x109   :  { %v356_v8 = vpop.f32.mrf.mxu0  ;;  %v460_v9 = vpop.f32.mrf.mxu1 }
 0x10a   :  { %396 = vst [vmem:[%s866_s3 + $0x58] sm:$0x3] %v381_v6  ;;  %v379_v10 = vmax.f32 %v362_v7, 0.0  ;;  %v357_v11 = vadd.f32 %v356_v8, %v118_v0 }
 0x10b   :  { %v457_v12 = vpop.f32.mrf.mxu0  ;;  %v366_v13 = vpop.f32.mrf.mxu1 }
 0x10c   :  { %394 = vst [vmem:[%s866_s3 + $0x48] sm:$0xff] %v379_v10  ;;  %v374_v14 = vmax.f32 %v357_v11, 0.0  ;;  %v367_v15 = vadd.f32 %v366_v13, %v118_v0 }
 0x10d   :  { %v463_v16 = vpop.f32.mrf.mxu1 }
 0x10e   :  { %389 = vst [vmem:[%s866_s3 + $0x20] sm:$0xff] %v374_v14  ;;  %v384_v17 = vmax.f32 %v367_v15, 0.0 }
 0x110   :  { %399 = vst [vmem:[%s866_s3 + $0x70] sm:$0x3] %v384_v17 }

// kernel: conv_model_forward.10
= control target key start
LH: loop header
LB: loop body
LE: loop exit
PB: predicated region body
PF: predicated region fallthrough
CT: control target
= control target key end

     0   :  { %vm3460_vm0 = vmmov 0   ;;  %s7539_s1 = inlined_call_operand.vmem [shape: f32[1152,1152], index: 1, kind: input, shape index: {}]   ;;  %s7540_s0 = inlined_call_operand.vmem [shape: f32[2,1152], index: 0, kind: input, shape index: {}]   ;;  %s7541_s2 = inlined_call_operand.vmem [shape: f32[1,1152], index: 2, kind: input, shape index: {}]   ;;  %s7542_s3 = inlined_call_operand.vmem [shape: f32[2,1152], index: 3, kind: output, shape index: {}]  }
   0x1   :  { %v153_v0 = vld [vmem:[%s7539_s1 + $0x440] sm:$0xff]  ;;  %v152_v2 = vld [vmem:[%s7539_s1 + $0x438] sm:$0xff]  ;;  %v143_v6 = vld [vmem:[%s7539_s1 + $0x3f0] sm:$0xff] }
   0x2   :  { %v441_v1 = vld [vmem:[%s7539_s1 + $0xd40] sm:$0xff]  ;;  %1415 = vmatprep.subr.mxu0 %v153_v0  ;;  %v440_v3 = vld [vmem:[%s7539_s1 + $0xd38] sm:$0xff]  ;;  %v431_v7 = vld [vmem:[%s7539_s1 + $0xcf0] sm:$0xff] }
   0x3   :  { %1486 = vmatprep.subr.mxu1 %v441_v1  ;;  %v144_v4 = vld [vmem:[%s7539_s1 + $0x3f8] sm:$0xff]  ;;  %1416 = vmatpush1.msra.mxu0 %v152_v2  ;;  %v135_v8 = vld [vmem:[%s7539_s1 + $0x3b0] sm:$0xff]  ;;  %v134_v10 = vld [vmem:[%s7539_s1 + $0x3a8] sm:$0xff] }
   0x4   :  { %v432_v5 = vld [vmem:[%s7539_s1 + $0xcf8] sm:$0xff]  ;;  %1487 = vmatpush1.msra.mxu1 %v440_v3  ;;  %1417 = vmatprep.subr.mxu0 %v144_v4  ;;  %v423_v9 = vld [vmem:[%s7539_s1 + $0xcb0] sm:$0xff]  ;;  %v422_v11 = vld [vmem:[%s7539_s1 + $0xca8] sm:$0xff] }
   0x5   :  { %1488 = vmatprep.subr.mxu1 %v432_v5  ;;  %1418 = vmatpush1.msra.mxu0 %v143_v6  ;;  %v126_v12 = vld [vmem:[%s7539_s1 + $0x368] sm:$0xff]  ;;  %v125_v14 = vld [vmem:[%s7539_s1 + $0x360] sm:$0xff]  ;;  %v116_v18 = vld [vmem:[%s7539_s1 + $0x318] sm:$0xff] }
   0x6   :  { %1489 = vmatpush1.msra.mxu1 %v431_v7  ;;  %v414_v13 = vld [vmem:[%s7539_s1 + $0xc68] sm:$0xff]  ;;  %1419 = vmatprep.subr.mxu0 %v135_v8  ;;  %v413_v15 = vld [vmem:[%s7539_s1 + $0xc60] sm:$0xff]  ;;  %v404_v19 = vld [vmem:[%s7539_s1 + $0xc18] sm:$0xff] }
   0x7   :  { %1490 = vmatprep.subr.mxu1 %v423_v9  ;;  %1420 = vmatpush1.msra.mxu0 %v134_v10  ;;  %v117_v16 = vld [vmem:[%s7539_s1 + $0x320] sm:$0xff]  ;;  %v108_v20 = vld [vmem:[%s7539_s1 + $0x2d8] sm:$0xff]  ;;  %v107_v22 = vld [vmem:[%s7539_s1 + $0x2d0] sm:$0xff] }
   0x8   :  { %1491 = vmatpush1.msra.mxu1 %v422_v11  ;;  %v405_v17 = vld [vmem:[%s7539_s1 + $0xc20] sm:$0xff]  ;;  %1421 = vmatprep.subr.mxu0 %v126_v12  ;;  %v396_v21 = vld [vmem:[%s7539_s1 + $0xbd8] sm:$0xff]  ;;  %v395_v23 = vld [vmem:[%s7539_s1 + $0xbd0] sm:$0xff] }
   0x9   :  { %1492 = vmatprep.subr.mxu1 %v414_v13  ;;  %1422 = vmatpush1.msra.mxu0 %v125_v14  ;;  %v99_v24 = vld [vmem:[%s7539_s1 + $0x290] sm:$0xff]  ;;  %v98_v26 = vld [vmem:[%s7539_s1 + $0x288] sm:$0xff]  ;;  %v89_v30 = vld [vmem:[%s7539_s1 + $0x240] sm:$0xff] }
   0xa   :  { %1493 = vmatpush1.msra.mxu1 %v413_v15  ;;  %1423 = vmatprep.subr.mxu0 %v117_v16  ;;  %v387_v25 = vld [vmem:[%s7539_s1 + $0xb90] sm:$0xff]  ;;  %v386_v27 = vld [vmem:[%s7539_s1 + $0xb88] sm:$0xff]  ;;  %v377_v31 = vld [vmem:[%s7539_s1 + $0xb40] sm:$0xff] }
   0xb   :  { %1494 = vmatprep.subr.mxu1 %v405_v17  ;;  %1424 = vmatpush1.msra.mxu0 %v116_v18  ;;  %v90_v28 = vld [vmem:[%s7539_s1 + $0x248] sm:$0xff]  ;;  %v81_v32 = vld [vmem:[%s7539_s1 + $0x200] sm:$0xff]  ;;  %v80_v34 = vld [vmem:[%s7539_s1 + $0x1f8] sm:$0xff] }
   0xc   :  { %1495 = vmatpush1.msra.mxu1 %v404_v19  ;;  %1425 = vmatprep.subr.mxu0 %v108_v20  ;;  %v378_v29 = vld [vmem:[%s7539_s1 + $0xb48] sm:$0xff]  ;;  %v369_v33 = vld [vmem:[%s7539_s1 + $0xb00] sm:$0xff]  ;;  %v368_v35 = vld [vmem:[%s7539_s1 + $0xaf8] sm:$0xff] }
   0xd   :  { %1496 = vmatprep.subr.mxu1 %v396_v21  ;;  %1426 = vmatpush1.msra.mxu0 %v107_v22  ;;  %v72_v36 = vld [vmem:[%s7539_s1 + $0x1b8] sm:$0xff]  ;;  %v71_v38 = vld [vmem:[%s7539_s1 + $0x1b0] sm:$0xff]  ;;  %v62_v42 = vld [vmem:[%s7539_s1 + $0x168] sm:$0xff] }
   0xe   :  { %1497 = vmatpush1.msra.mxu1 %v395_v23  ;;  %1427 = vmatprep.subr.mxu0 %v99_v24  ;;  %v360_v37 = vld [vmem:[%s7539_s1 + $0xab8] sm:$0xff]  ;;  %v359_v39 = vld [vmem:[%s7539_s1 + $0xab0] sm:$0xff]  ;;  %v350_v43 = vld [vmem:[%s7539_s1 + $0xa68] sm:$0xff] }
   0xf   :  { %1498 = vmatprep.subr.mxu1 %v387_v25  ;;  %1428 = vmatpush1.msra.mxu0 %v98_v26  ;;  %v63_v40 = vld [vmem:[%s7539_s1 + $0x170] sm:$0xff]  ;;  %v54_v44 = vld [vmem:[%s7539_s1 + $0x128] sm:$0xff]  ;;  %v53_v46 = vld [vmem:[%s7539_s1 + $0x120] sm:$0xff] }
  0x10   :  { %1499 = vmatpush1.msra.mxu1 %v386_v27  ;;  %1429 = vmatprep.subr.mxu0 %v90_v28  ;;  %v351_v41 = vld [vmem:[%s7539_s1 + $0xa70] sm:$0xff]  ;;  %v342_v45 = vld [vmem:[%s7539_s1 + $0xa28] sm:$0xff]  ;;  %v341_v47 = vld [vmem:[%s7539_s1 + $0xa20] sm:$0xff] }
  0x11   :  { %1500 = vmatprep.subr.mxu1 %v378_v29  ;;  %1430 = vmatpush1.msra.mxu0 %v89_v30  ;;  %v45_v48 = vld [vmem:[%s7539_s1 + $0xe0] sm:$0xff]  ;;  %v44_v50 = vld [vmem:[%s7539_s1 + $0xd8] sm:$0xff]  ;;  %v35_v54 = vld [vmem:[%s7539_s1 + $0x90] sm:$0xff]  ;;  %v1317_v30 = vlaneseq }
  0x12   :  { %1501 = vmatpush1.msra.mxu1 %v377_v31  ;;  %1431 = vmatprep.subr.mxu0 %v81_v32  ;;  %v333_v49 = vld [vmem:[%s7539_s1 + $0x9e0] sm:$0xff]  ;;  %v332_v51 = vld [vmem:[%s7539_s1 + $0x9d8] sm:$0xff]  ;;  %v323_v55 = vld [vmem:[%s7539_s1 + $0x990] sm:$0xff]  ;;  %v3458_v31 = vmov 1983009808  }
  0x13   :  { %1502 = vmatprep.subr.mxu1 %v369_v33  ;;  %1432 = vmatpush1.msra.mxu0 %v80_v34  ;;  %v36_v52 = vld [vmem:[%s7539_s1 + $0x98] sm:$0xff]  ;;  %v27_v56 = vld [vmem:[%s7539_s1 + $0x50] sm:$0xff]  ;;  %v26_v58 = vld [vmem:[%s7539_s1 + $0x48] sm:$0xff]  ;;  %v1367_v32 = vunpack.c.l.s4 %v3458_v31 }
  0x14   :  { %1503 = vmatpush1.msra.mxu1 %v368_v35  ;;  %1433 = vmatprep.subr.mxu0 %v72_v36  ;;  %v324_v53 = vld [vmem:[%s7539_s1 + $0x998] sm:$0xff]  ;;  %v315_v57 = vld [vmem:[%s7539_s1 + $0x950] sm:$0xff]  ;;  %v314_v59 = vld [vmem:[%s7539_s1 + $0x948] sm:$0xff] }
  0x15   :  { %1504 = vmatprep.subr.mxu1 %v360_v37  ;;  %1434 = vmatpush1.msra.mxu0 %v71_v38  ;;  %v18_v60 = vld [vmem:[%s7539_s1 + $0x8] sm:$0xff]  ;;  %v17_v62 = vld [vmem:[%s7539_s1] sm:$0xff]  ;;  %v296_v2 = vld [vmem:[%s7539_s1 + $0x8b8] sm:$0xff] }
  0x16   :  { %1505 = vmatpush1.msra.mxu1 %v359_v39  ;;  %1435 = vmatprep.subr.mxu0 %v63_v40  ;;  %v306_v61 = vld [vmem:[%s7539_s1 + $0x908] sm:$0xff]  ;;  %v305_v63 = vld [vmem:[%s7539_s1 + $0x900] sm:$0xff]  ;;  %v584_v3 = vld [vmem:[%s7539_s1 + $0x11b8] sm:$0xff] }
  0x17   :  { %1506 = vmatprep.subr.mxu1 %v351_v41  ;;  %1436 = vmatpush1.msra.mxu0 %v62_v42  ;;  %v297_v0 = vld [vmem:[%s7539_s1 + $0x8c0] sm:$0xff]  ;;  %v288_v4 = vld [vmem:[%s7539_s1 + $0x878] sm:$0xff]  ;;  %v287_v6 = vld [vmem:[%s7539_s1 + $0x870] sm:$0xff]  ;;  %v3787_v41 = vshrl.u32 %v1317_v30, 7  ;;  %v1368_v42 = vunpack.c.0.s8 %v1367_v32 }
  0x18   :  { %1507 = vmatpush1.msra.mxu1 %v350_v43  ;;  %1437 = vmatprep.subr.mxu0 %v54_v44  ;;  %v585_v1 = vld [vmem:[%s7539_s1 + $0x11c0] sm:$0xff]  ;;  %v576_v5 = vld [vmem:[%s7539_s1 + $0x1178] sm:$0xff]  ;;  %v575_v7 = vld [vmem:[%s7539_s1 + $0x1170] sm:$0xff] }
  0x19   :  { %1508 = vmatprep.subr.mxu1 %v342_v45  ;;  %1438 = vmatpush1.msra.mxu0 %v53_v46  ;;  %v279_v8 = vld [vmem:[%s7539_s1 + $0x830] sm:$0xff]  ;;  %v278_v10 = vld [vmem:[%s7539_s1 + $0x828] sm:$0xff]  ;;  %v269_v14 = vld [vmem:[%s7539_s1 + $0x7e0] sm:$0xff] }
  0x1a   :  { %1509 = vmatpush1.msra.mxu1 %v341_v47  ;;  %1439 = vmatprep.subr.mxu0 %v45_v48  ;;  %v567_v9 = vld [vmem:[%s7539_s1 + $0x1130] sm:$0xff]  ;;  %v566_v11 = vld [vmem:[%s7539_s1 + $0x1128] sm:$0xff]  ;;  %v557_v15 = vld [vmem:[%s7539_s1 + $0x10e0] sm:$0xff] }
  0x1b   :  { %1510 = vmatprep.subr.mxu1 %v333_v49  ;;  %1440 = vmatpush1.msra.mxu0 %v44_v50  ;;  %v270_v12 = vld [vmem:[%s7539_s1 + $0x7e8] sm:$0xff]  ;;  %v261_v16 = vld [vmem:[%s7539_s1 + $0x7a0] sm:$0xff]  ;;  %v260_v18 = vld [vmem:[%s7539_s1 + $0x798] sm:$0xff] }
  0x1c   :  { %1511 = vmatpush1.msra.mxu1 %v332_v51  ;;  %1441 = vmatprep.subr.mxu0 %v36_v52  ;;  %v558_v13 = vld [vmem:[%s7539_s1 + $0x10e8] sm:$0xff]  ;;  %v549_v17 = vld [vmem:[%s7539_s1 + $0x10a0] sm:$0xff]  ;;  %v548_v19 = vld [vmem:[%s7539_s1 + $0x1098] sm:$0xff]  ;;  %v3817_v52 = vsub.s32 %v1368_v42, %v3787_v41 }
  0x1d   :  { %1512 = vmatprep.subr.mxu1 %v324_v53  ;;  %1442 = vmatpush1.msra.mxu0 %v35_v54  ;;  %v252_v20 = vld [vmem:[%s7539_s1 + $0x758] sm:$0xff]  ;;  %v251_v22 = vld [vmem:[%s7539_s1 + $0x750] sm:$0xff]  ;;  %v242_v26 = vld [vmem:[%s7539_s1 + $0x708] sm:$0xff] }
  0x1e   :  { %1513 = vmatpush1.msra.mxu1 %v323_v55  ;;  %1443 = vmatprep.subr.mxu0 %v27_v56  ;;  %v540_v21 = vld [vmem:[%s7539_s1 + $0x1058] sm:$0xff]  ;;  %v539_v23 = vld [vmem:[%s7539_s1 + $0x1050] sm:$0xff]  ;;  %v530_v27 = vld [vmem:[%s7539_s1 + $0x1008] sm:$0xff] }
  0x1f   :  { %1514 = vmatprep.subr.mxu1 %v315_v57  ;;  %1444 = vmatpush1.msra.mxu0 %v26_v58  ;;  %v243_v24 = vld [vmem:[%s7539_s1 + $0x710] sm:$0xff]  ;;  %v234_v28 = vld [vmem:[%s7539_s1 + $0x6c8] sm:$0xff]  ;;  %v233_v33 = vld [vmem:[%s7539_s1 + $0x6c0] sm:$0xff] }
  0x20   :  { %1515 = vmatpush1.msra.mxu1 %v314_v59  ;;  %1445 = vmatprep.subr.mxu0 %v18_v60  ;;  %v531_v25 = vld [vmem:[%s7539_s1 + $0x1010] sm:$0xff]  ;;  %v522_v29 = vld [vmem:[%s7539_s1 + $0xfc8] sm:$0xff]  ;;  %v521_v34 = vld [vmem:[%s7539_s1 + $0xfc0] sm:$0xff] }
  0x21   :  { %1516 = vmatprep.subr.mxu1 %v306_v61  ;;  %1446 = vmatpush1.msra.mxu0 %v17_v62  ;;  %v225_v35 = vld [vmem:[%s7539_s1 + $0x680] sm:$0xff]  ;;  %v224_v37 = vld [vmem:[%s7539_s1 + $0x678] sm:$0xff]  ;;  %v215_v43 = vld [vmem:[%s7539_s1 + $0x630] sm:$0xff] }
  0x22   :  { %1517 = vmatpush1.msra.mxu1 %v305_v63  ;;  %1447 = vmatprep.subr.mxu0 %v297_v0  ;;  %v513_v36 = vld [vmem:[%s7539_s1 + $0xf80] sm:$0xff]  ;;  %v512_v38 = vld [vmem:[%s7539_s1 + $0xf78] sm:$0xff]  ;;  %v503_v44 = vld [vmem:[%s7539_s1 + $0xf30] sm:$0xff] }
  0x23   :  { %1518 = vmatprep.subr.mxu1 %v585_v1  ;;  %1448 = vmatpush2.msra.mxu0 %v296_v2  ;;  %v216_v39 = vld [vmem:[%s7539_s1 + $0x638] sm:$0xff]  ;;  %v207_v45 = vld [vmem:[%s7539_s1 + $0x5f0] sm:$0xff]  ;;  %v206_v47 = vld [vmem:[%s7539_s1 + $0x5e8] sm:$0xff] }
  0x24   :  { %1519 = vmatpush2.msra.mxu1 %v584_v3  ;;  %1449 = vmatprep.subr.mxu0 %v288_v4  ;;  %v504_v40 = vld [vmem:[%s7539_s1 + $0xf38] sm:$0xff]  ;;  %v495_v46 = vld [vmem:[%s7539_s1 + $0xef0] sm:$0xff]  ;;  %v494_v48 = vld [vmem:[%s7539_s1 + $0xee8] sm:$0xff] }
  0x25   :  { %1520 = vmatprep.subr.mxu1 %v576_v5  ;;  %1450 = vmatpush2.msra.mxu0 %v287_v6  ;;  %v14_v49 = vld [vmem:[%s7540_s0] sm:$0xff]  ;;  %v198_v50 = vld [vmem:[%s7539_s1 + $0x5a8] sm:$0xff]  ;;  %v188_v58 = vld [vmem:[%s7539_s1 + $0x558] sm:$0xff] }
  0x26   :  { %1521 = vmatpush2.msra.mxu1 %v575_v7  ;;  %1451 = vmatprep.subr.mxu0 %v279_v8  ;;  %v486_v51 = vld [vmem:[%s7539_s1 + $0xea8] sm:$0xff]  ;;  %v197_v53 = vld [vmem:[%s7539_s1 + $0x5a0] sm:$0xff]  ;;  %v1365_v57 = vcombine.high %v14_v49, %v14_v49  ;;  %v476_v59 = vld [vmem:[%s7539_s1 + $0xe58] sm:$0xff]  ;;  %v3844_v62 = vrot.slane %v14_v49, %v3817_v52 }
  0x27   :  { %1522 = vmatprep.subr.mxu1 %v567_v9  ;;  %1452 = vmatpush2.msra.mxu0 %v278_v10  ;;  %v485_v54 = vld [vmem:[%s7539_s1 + $0xea0] sm:$0xff]  ;;  %v180_v60 = vld [vmem:[%s7539_s1 + $0x518] sm:$0xff]  ;;  %v179_v63 = vld [vmem:[%s7539_s1 + $0x510] sm:$0xff] }
  0x28   :  { %1523 = vmatpush2.msra.mxu1 %v566_v11  ;;  %1453 = vmatprep.subr.mxu0 %v270_v12  ;;  %v189_v55 = vld [vmem:[%s7539_s1 + $0x560] sm:$0xff]  ;;  %v468_v61 = vld [vmem:[%s7539_s1 + $0xe18] sm:$0xff]  ;;  %v467_v0 = vld [vmem:[%s7539_s1 + $0xe10] sm:$0xff]  ;;  %v3859_v3 = vrot.slane %v1365_v57, %v3817_v52  ;;  %v3875_v8 = vcombine.high %v3844_v62, %v3844_v62 }
  0x29   :  { %1524 = vmatprep.subr.mxu1 %v558_v13  ;;  %1454 = vmatpush2.msra.mxu0 %v269_v14  ;;  %v477_v56 = vld [vmem:[%s7539_s1 + $0xe60] sm:$0xff]  ;;  %v171_v1 = vld [vmem:[%s7539_s1 + $0x4d0] sm:$0xff]  ;;  %v170_v4 = vld [vmem:[%s7539_s1 + $0x4c8] sm:$0xff] }
  0x2a   :  { %1525 = vmatpush2.msra.mxu1 %v557_v15  ;;  %1455 = vmatprep.subr.mxu0 %v261_v16  ;;  %v459_v2 = vld [vmem:[%s7539_s1 + $0xdd0] sm:$0xff]  ;;  %v458_v5 = vld [vmem:[%s7539_s1 + $0xdc8] sm:$0xff]  ;;  %v161_v9 = vld [vmem:[%s7539_s1 + $0x480] sm:$0xff]  ;;  %v3885_v11 = vcombine.high %v3859_v3, %v3859_v3 }
  0x2b   :  { %1526 = vmatprep.subr.mxu1 %v549_v17  ;;  %1456 = vmatpush2.msra.mxu0 %v260_v18  ;;  %v162_v6 = vld [vmem:[%s7539_s1 + $0x488] sm:$0xff]  ;;  %v449_v10 = vld [vmem:[%s7539_s1 + $0xd80] sm:$0xff]  ;;  %v728_v14 = vld [vmem:[%s7539_s1 + $0x1638] sm:$0xff] }
  0x2c   :  { %1527 = vmatpush2.msra.mxu1 %v548_v19  ;;  %1457 = vmatprep.subr.mxu0 %v252_v20  ;;  %v450_v7 = vld [vmem:[%s7539_s1 + $0xd88] sm:$0xff]  ;;  %v729_v12 = vld [vmem:[%s7539_s1 + $0x1640] sm:$0xff]  ;;  %v1016_v15 = vld [vmem:[%s7539_s1 + $0x1f38] sm:$0xff] }
  0x2d   :  { %1528 = vmatprep.subr.mxu1 %v540_v21  ;;  %1458 = vmatpush2.msra.mxu0 %v251_v22  ;;  %v1017_v13 = vld [vmem:[%s7539_s1 + $0x1f40] sm:$0xff]  ;;  %v720_v16 = vld [vmem:[%s7539_s1 + $0x15f8] sm:$0xff]  ;;  %v719_v18 = vld [vmem:[%s7539_s1 + $0x15f0] sm:$0xff] }
  0x2e   :  { %1529 = vmatpush2.msra.mxu1 %v539_v23  ;;  %1459 = vmatprep.subr.mxu0 %v243_v24  ;;  %v1008_v17 = vld [vmem:[%s7539_s1 + $0x1ef8] sm:$0xff]  ;;  %v1007_v19 = vld [vmem:[%s7539_s1 + $0x1ef0] sm:$0xff]  ;;  %v710_v22 = vld [vmem:[%s7539_s1 + $0x15a8] sm:$0xff] }
  0x2f   :  { %1530 = vmatprep.subr.mxu1 %v531_v25  ;;  %1460 = vmatpush2.msra.mxu0 %v242_v26  ;;  %v711_v20 = vld [vmem:[%s7539_s1 + $0x15b0] sm:$0xff]  ;;  %v998_v23 = vld [vmem:[%s7539_s1 + $0x1ea8] sm:$0xff]  ;;  %v701_v26 = vld [vmem:[%s7539_s1 + $0x1560] sm:$0xff] }
  0x30   :  { %1531 = vmatpush2.msra.mxu1 %v530_v27  ;;  %1461 = vmatprep.subr.mxu0 %v234_v28  ;;  %v999_v21 = vld [vmem:[%s7539_s1 + $0x1eb0] sm:$0xff]  ;;  %v702_v24 = vld [vmem:[%s7539_s1 + $0x1568] sm:$0xff]  ;;  %v989_v27 = vld [vmem:[%s7539_s1 + $0x1e60] sm:$0xff] }
  0x31   :  { %1532 = vmatprep.subr.mxu1 %v522_v29  ;;  %1462 = vmatpush2.msra.mxu0 %v233_v33  ;;  %v990_v25 = vld [vmem:[%s7539_s1 + $0x1e68] sm:$0xff]  ;;  %v693_v28 = vld [vmem:[%s7539_s1 + $0x1520] sm:$0xff]  ;;  %v692_v30 = vld [vmem:[%s7539_s1 + $0x1518] sm:$0xff] }
  0x32   :  { %1533 = vmatpush2.msra.mxu1 %v521_v34  ;;  %1463 = vmatprep.subr.mxu0 %v225_v35  ;;  %v981_v29 = vld [vmem:[%s7539_s1 + $0x1e20] sm:$0xff]  ;;  %v980_v31 = vld [vmem:[%s7539_s1 + $0x1e18] sm:$0xff]  ;;  %v683_v34 = vld [vmem:[%s7539_s1 + $0x14d0] sm:$0xff] }
  0x33   :  { %1534 = vmatprep.subr.mxu1 %v513_v36  ;;  %1464 = vmatpush2.msra.mxu0 %v224_v37  ;;  %v684_v32 = vld [vmem:[%s7539_s1 + $0x14d8] sm:$0xff]  ;;  %v971_v35 = vld [vmem:[%s7539_s1 + $0x1dd0] sm:$0xff]  ;;  %v954_v42 = vld [vmem:[%s7539_s1 + $0x1d48] sm:$0xff] }
  0x34   :  { %1535 = vmatpush2.msra.mxu1 %v512_v38  ;;  %1465 = vmatprep.subr.mxu0 %v216_v39  ;;  %v972_v33 = vld [vmem:[%s7539_s1 + $0x1dd8] sm:$0xff]  ;;  %v675_v36 = vld [vmem:[%s7539_s1 + $0x1490] sm:$0xff]  ;;  %v674_v38 = vld [vmem:[%s7539_s1 + $0x1488] sm:$0xff] }
  0x35   :  { %1536 = vmatprep.subr.mxu1 %v504_v40  ;;  %1466 = vmatpush2.msra.mxu0 %v215_v43  ;;  %v963_v37 = vld [vmem:[%s7539_s1 + $0x1d90] sm:$0xff]  ;;  %v962_v39 = vld [vmem:[%s7539_s1 + $0x1d88] sm:$0xff]  ;;  %v665_v43 = vld [vmem:[%s7539_s1 + $0x1440] sm:$0xff] }
  0x36   :  { %1537 = vmatpush2.msra.mxu1 %v503_v44  ;;  %1467 = vmatprep.subr.mxu0 %v207_v45  ;;  %v666_v40 = vld [vmem:[%s7539_s1 + $0x1448] sm:$0xff]  ;;  %v953_v44 = vld [vmem:[%s7539_s1 + $0x1d40] sm:$0xff]  ;;  %v648_v49 = vld [vmem:[%s7539_s1 + $0x13b8] sm:$0xff] }
  0x37   :  { %1538 = vmatprep.subr.mxu1 %v495_v46  ;;  %1468 = vmatpush2.msra.mxu0 %v206_v47  ;;  %v657_v45 = vld [vmem:[%s7539_s1 + $0x1400] sm:$0xff]  ;;  %v656_v47 = vld [vmem:[%s7539_s1 + $0x13f8] sm:$0xff]  ;;  %v926_v57 = vld [vmem:[%s7539_s1 + $0x1c68] sm:$0xff] }
  0x38   :  { %1539 = vmatpush2.msra.mxu1 %v494_v48  ;;  %1469 = vmatprep.subr.mxu0 %v198_v50  ;;  %v945_v46 = vld [vmem:[%s7539_s1 + $0x1d00] sm:$0xff]  ;;  %v944_v48 = vld [vmem:[%s7539_s1 + $0x1cf8] sm:$0xff] }
  0x39   :  { %1540 = vmatprep.subr.mxu1 %v486_v51  ;;  %1470 = vmatpush2.msra.mxu0 %v197_v53  ;;  %v936_v50 = vld [vmem:[%s7539_s1 + $0x1cb8] sm:$0xff]  ;;  %v647_v51 = vld [vmem:[%s7539_s1 + $0x13b0] sm:$0xff] }
  0x3a   :  { %1541 = vmatpush2.msra.mxu1 %v485_v54  ;;  %1471 = vmatprep.subr.mxu0 %v189_v55  ;;  %v935_v53 = vld [vmem:[%s7539_s1 + $0x1cb0] sm:$0xff] }
  0x3b   :  { %1542 = vmatprep.subr.mxu1 %v477_v56  ;;  %1472 = vmatpush2.msra.mxu0 %v188_v58  ;;  %v639_v54 = vld [vmem:[%s7539_s1 + $0x1370] sm:$0xff]  ;;  %v638_v56 = vld [vmem:[%s7539_s1 + $0x1368] sm:$0xff] }
  0x3c   :  { %1543 = vmatpush2.msra.mxu1 %v476_v59  ;;  %1473 = vmatprep.subr.mxu0 %v180_v60  ;;  %v927_v55 = vld [vmem:[%s7539_s1 + $0x1c70] sm:$0xff]  ;;  %v630_v58 = vld [vmem:[%s7539_s1 + $0x1328] sm:$0xff]  ;;  %v629_v60 = vld [vmem:[%s7539_s1 + $0x1320] sm:$0xff] }
  0x3d   :  { %1544 = vmatprep.subr.mxu1 %v468_v61  ;;  %1474 = vmatpush2.msra.mxu0 %v179_v63  ;;  %v918_v59 = vld [vmem:[%s7539_s1 + $0x1c28] sm:$0xff]  ;;  %v917_v61 = vld [vmem:[%s7539_s1 + $0x1c20] sm:$0xff] }
  0x3e   :  { %1545 = vmatpush2.msra.mxu1 %v467_v0  ;;  %1475 = vmatprep.subr.mxu0 %v171_v1  ;;  %v621_v63 = vld [vmem:[%s7539_s1 + $0x12e0] sm:$0xff]  ;;  %v620_v1 = vld [vmem:[%s7539_s1 + $0x12d8] sm:$0xff] }
  0x3f   :  { %1546 = vmatprep.subr.mxu1 %v459_v2  ;;  %1476 = vmatpush2.msra.mxu0 %v170_v4  ;;  %v909_v0 = vld [vmem:[%s7539_s1 + $0x1be0] sm:$0xff]  ;;  %v908_v2 = vld [vmem:[%s7539_s1 + $0x1bd8] sm:$0xff] }
  0x40   :  { %1547 = vmatpush2.msra.mxu1 %v458_v5  ;;  %1477 = vmatprep.subr.mxu0 %v162_v6  ;;  %v612_v4 = vld [vmem:[%s7539_s1 + $0x1298] sm:$0xff]  ;;  %v611_v6 = vld [vmem:[%s7539_s1 + $0x1290] sm:$0xff] }
  0x41   :  { %1548 = vmatprep.subr.mxu1 %v450_v7  ;;  %1478 = vmatpush2.msra.mxu0 %v161_v9  ;;  %v900_v5 = vld [vmem:[%s7539_s1 + $0x1b98] sm:$0xff]  ;;  %v899_v7 = vld [vmem:[%s7539_s1 + $0x1b90] sm:$0xff] }
  0x42   :  { %1479 = vmatprep.mubr.f32.mxu0 %v3875_v8  ;;  %1549 = vmatpush2.msra.mxu1 %v449_v10  ;;  %v603_v9 = vld [vmem:[%s7539_s1 + $0x1250] sm:$0xff] }
  0x43   :  { %1480 = vmatmul.mubr.f32.vlgmr.msra.gmra.mxu0 %v3844_v62  ;;  %1550 = vmatprep.mubr.f32.mxu1 %v3885_v11  ;;  %v891_v10 = vld [vmem:[%s7539_s1 + $0x1b50] sm:$0xff] }
  0x44   :  { %1557 = vmatprep.subr.mxu0 %v729_v12  ;;  %1628 = vmatprep.subr.mxu1 %v1017_v13  ;;  %v602_v12 = vld [vmem:[%s7539_s1 + $0x1248] sm:$0xff] }
  0x45   :  { %1551 = vmatmul.mubr.f32.vlgmr.msra.gmra.mxu1 %v3859_v3  ;;  %1558 = vmatpush1.msra.mxu0 %v728_v14  ;;  %v890_v13 = vld [vmem:[%s7539_s1 + $0x1b48] sm:$0xff] }
  0x46   :  { %1629 = vmatpush1.msra.mxu1 %v1016_v15  ;;  %1559 = vmatprep.subr.mxu0 %v720_v16  ;;  %v594_v14 = vld [vmem:[%s7539_s1 + $0x1208] sm:$0xff]  ;;  %v593_v16 = vld [vmem:[%s7539_s1 + $0x1200] sm:$0xff] }
  0x47   :  { %1630 = vmatprep.subr.mxu1 %v1008_v17  ;;  %1560 = vmatpush1.msra.mxu0 %v719_v18  ;;  %v882_v15 = vld [vmem:[%s7539_s1 + $0x1b08] sm:$0xff]  ;;  %v881_v17 = vld [vmem:[%s7539_s1 + $0x1b00] sm:$0xff] }
  0x48   :  { %1631 = vmatpush1.msra.mxu1 %v1007_v19  ;;  %1561 = vmatprep.subr.mxu0 %v711_v20  ;;  %v873_v18 = vld [vmem:[%s7539_s1 + $0x1ac0] sm:$0xff]  ;;  %v872_v20 = vld [vmem:[%s7539_s1 + $0x1ab8] sm:$0xff] }
  0x49   :  { %1632 = vmatprep.subr.mxu1 %v999_v21  ;;  %1562 = vmatpush1.msra.mxu0 %v710_v22  ;;  %v1161_v19 = vld [vmem:[%s7539_s1 + $0x23c0] sm:$0xff]  ;;  %v1160_v21 = vld [vmem:[%s7539_s1 + $0x23b8] sm:$0xff] }
  0x4a   :  { %1633 = vmatpush1.msra.mxu1 %v998_v23  ;;  %1563 = vmatprep.subr.mxu0 %v702_v24  ;;  %v864_v22 = vld [vmem:[%s7539_s1 + $0x1a78] sm:$0xff]  ;;  %v863_v24 = vld [vmem:[%s7539_s1 + $0x1a70] sm:$0xff] }
  0x4b   :  { %1634 = vmatprep.subr.mxu1 %v990_v25  ;;  %1564 = vmatpush1.msra.mxu0 %v701_v26  ;;  %v1152_v23 = vld [vmem:[%s7539_s1 + $0x2378] sm:$0xff]  ;;  %v1151_v25 = vld [vmem:[%s7539_s1 + $0x2370] sm:$0xff] }
  0x4c   :  { %1635 = vmatpush1.msra.mxu1 %v989_v27  ;;  %1565 = vmatprep.subr.mxu0 %v693_v28  ;;  %v855_v26 = vld [vmem:[%s7539_s1 + $0x1a30] sm:$0xff]  ;;  %v854_v28 = vld [vmem:[%s7539_s1 + $0x1a28] sm:$0xff] }
  0x4d   :  { %1636 = vmatprep.subr.mxu1 %v981_v29  ;;  %1566 = vmatpush1.msra.mxu0 %v692_v30  ;;  %v1143_v27 = vld [vmem:[%s7539_s1 + $0x2330] sm:$0xff]  ;;  %v1142_v29 = vld [vmem:[%s7539_s1 + $0x2328] sm:$0xff] }
  0x4e   :  { %1637 = vmatpush1.msra.mxu1 %v980_v31  ;;  %1567 = vmatprep.subr.mxu0 %v684_v32  ;;  %v846_v30 = vld [vmem:[%s7539_s1 + $0x19e8] sm:$0xff]  ;;  %v845_v32 = vld [vmem:[%s7539_s1 + $0x19e0] sm:$0xff] }
  0x4f   :  { %1638 = vmatprep.subr.mxu1 %v972_v33  ;;  %1568 = vmatpush1.msra.mxu0 %v683_v34  ;;  %v1134_v31 = vld [vmem:[%s7539_s1 + $0x22e8] sm:$0xff]  ;;  %v1133_v33 = vld [vmem:[%s7539_s1 + $0x22e0] sm:$0xff] }
  0x50   :  { %1639 = vmatpush1.msra.mxu1 %v971_v35  ;;  %1569 = vmatprep.subr.mxu0 %v675_v36  ;;  %v837_v34 = vld [vmem:[%s7539_s1 + $0x19a0] sm:$0xff]  ;;  %v836_v36 = vld [vmem:[%s7539_s1 + $0x1998] sm:$0xff] }
  0x51   :  { %1640 = vmatprep.subr.mxu1 %v963_v37  ;;  %1570 = vmatpush1.msra.mxu0 %v674_v38  ;;  %v1125_v35 = vld [vmem:[%s7539_s1 + $0x22a0] sm:$0xff]  ;;  %v1124_v37 = vld [vmem:[%s7539_s1 + $0x2298] sm:$0xff] }
  0x52   :  { %1641 = vmatpush1.msra.mxu1 %v962_v39  ;;  %1571 = vmatprep.subr.mxu0 %v666_v40  ;;  %v828_v38 = vld [vmem:[%s7539_s1 + $0x1958] sm:$0xff]  ;;  %v827_v40 = vld [vmem:[%s7539_s1 + $0x1950] sm:$0xff] }
  0x53   :  { %1642 = vmatprep.subr.mxu1 %v954_v42  ;;  %1572 = vmatpush1.msra.mxu0 %v665_v43  ;;  %v1116_v39 = vld [vmem:[%s7539_s1 + $0x2258] sm:$0xff]  ;;  %v1115_v42 = vld [vmem:[%s7539_s1 + $0x2250] sm:$0xff] }
  0x54   :  { %1643 = vmatpush1.msra.mxu1 %v953_v44  ;;  %1573 = vmatprep.subr.mxu0 %v657_v45  ;;  %v819_v43 = vld [vmem:[%s7539_s1 + $0x1910] sm:$0xff]  ;;  %v818_v45 = vld [vmem:[%s7539_s1 + $0x1908] sm:$0xff] }
  0x55   :  { %1644 = vmatprep.subr.mxu1 %v945_v46  ;;  %1574 = vmatpush1.msra.mxu0 %v656_v47  ;;  %v1107_v44 = vld [vmem:[%s7539_s1 + $0x2210] sm:$0xff]  ;;  %v1106_v46 = vld [vmem:[%s7539_s1 + $0x2208] sm:$0xff] }
  0x56   :  { %1645 = vmatpush1.msra.mxu1 %v944_v48  ;;  %1575 = vmatprep.subr.mxu0 %v648_v49  ;;  %v810_v47 = vld [vmem:[%s7539_s1 + $0x18c8] sm:$0xff]  ;;  %v809_v49 = vld [vmem:[%s7539_s1 + $0x18c0] sm:$0xff] }
  0x57   :  { %1646 = vmatprep.subr.mxu1 %v936_v50  ;;  %1576 = vmatpush1.msra.mxu0 %v647_v51  ;;  %v1098_v48 = vld [vmem:[%s7539_s1 + $0x21c8] sm:$0xff]  ;;  %v1097_v50 = vld [vmem:[%s7539_s1 + $0x21c0] sm:$0xff] }
  0x58   :  { %1647 = vmatpush1.msra.mxu1 %v935_v53  ;;  %1577 = vmatprep.subr.mxu0 %v639_v54  ;;  %v801_v51 = vld [vmem:[%s7539_s1 + $0x1880] sm:$0xff]  ;;  %v800_v54 = vld [vmem:[%s7539_s1 + $0x1878] sm:$0xff] }
  0x59   :  { %1648 = vmatprep.subr.mxu1 %v927_v55  ;;  %1578 = vmatpush1.msra.mxu0 %v638_v56  ;;  %v1089_v53 = vld [vmem:[%s7539_s1 + $0x2180] sm:$0xff]  ;;  %v1088_v55 = vld [vmem:[%s7539_s1 + $0x2178] sm:$0xff] }
  0x5a   :  { %1649 = vmatpush1.msra.mxu1 %v926_v57  ;;  %1579 = vmatprep.subr.mxu0 %v630_v58  ;;  %v792_v56 = vld [vmem:[%s7539_s1 + $0x1838] sm:$0xff]  ;;  %v791_v58 = vld [vmem:[%s7539_s1 + $0x1830] sm:$0xff] }
  0x5b   :  { %1650 = vmatprep.subr.mxu1 %v918_v59  ;;  %1580 = vmatpush1.msra.mxu0 %v629_v60  ;;  %v1080_v57 = vld [vmem:[%s7539_s1 + $0x2138] sm:$0xff]  ;;  %v1079_v59 = vld [vmem:[%s7539_s1 + $0x2130] sm:$0xff] }
  0x5c   :  { %1651 = vmatpush1.msra.mxu1 %v917_v61  ;;  %1581 = vmatprep.subr.mxu0 %v621_v63  ;;  %v783_v60 = vld [vmem:[%s7539_s1 + $0x17f0] sm:$0xff]  ;;  %v782_v63 = vld [vmem:[%s7539_s1 + $0x17e8] sm:$0xff] }
  0x5d   :  { %1652 = vmatprep.subr.mxu1 %v909_v0  ;;  %1582 = vmatpush1.msra.mxu0 %v620_v1  ;;  %v1071_v61 = vld [vmem:[%s7539_s1 + $0x20f0] sm:$0xff]  ;;  %v1070_v0 = vld [vmem:[%s7539_s1 + $0x20e8] sm:$0xff] }
  0x5e   :  { %1653 = vmatpush1.msra.mxu1 %v908_v2  ;;  %1583 = vmatprep.subr.mxu0 %v612_v4  ;;  %v15_v1 = vld [vmem:[%s7540_s0 + $0x8] sm:$0xff] }
  0x5f   :  { %1654 = vmatprep.subr.mxu1 %v900_v5  ;;  %1584 = vmatpush1.msra.mxu0 %v611_v6  ;;  %v774_v2 = vld [vmem:[%s7539_s1 + $0x17a8] sm:$0xff]  ;;  %v773_v5 = vld [vmem:[%s7539_s1 + $0x17a0] sm:$0xff] }
  0x60   :  { %1655 = vmatpush1.msra.mxu1 %v899_v7  ;;  %1585 = vmatprep.subr.mxu0 %v603_v9  ;;  %v1062_v4 = vld [vmem:[%s7539_s1 + $0x20a8] sm:$0xff]  ;;  %v1061_v6 = vld [vmem:[%s7539_s1 + $0x20a0] sm:$0xff] }
  0x61   :  { %1656 = vmatprep.subr.mxu1 %v891_v10  ;;  %1586 = vmatpush1.msra.mxu0 %v602_v12  ;;  %v765_v7 = vld [vmem:[%s7539_s1 + $0x1760] sm:$0xff]  ;;  %v1382_v10 = vcombine.high %v15_v1, %v15_v1  ;;  %v764_v12 = vld [vmem:[%s7539_s1 + $0x1758] sm:$0xff] }
  0x62   :  { %1657 = vmatpush1.msra.mxu1 %v890_v13  ;;  %1587 = vmatprep.subr.mxu0 %v594_v14  ;;  %v1053_v9 = vld [vmem:[%s7539_s1 + $0x2060] sm:$0xff]  ;;  %v1052_v13 = vld [vmem:[%s7539_s1 + $0x2058] sm:$0xff] }
  0x63   :  { %1658 = vmatprep.subr.mxu1 %v882_v15  ;;  %1588 = vmatpush1.msra.mxu0 %v593_v16  ;;  %v756_v14 = vld [vmem:[%s7539_s1 + $0x1718] sm:$0xff]  ;;  %v4249_v16 = vrot.slane %v15_v1, %v3817_v52  ;;  %v1233_v1 = vld [vmem:[%s7539_s1 + $0x2600] sm:$0xff] }
  0x64   :  { %1659 = vmatpush1.msra.mxu1 %v881_v17  ;;  %1589 = vmatprep.subr.mxu0 %v873_v18  ;;  %v1044_v15 = vld [vmem:[%s7539_s1 + $0x2018] sm:$0xff]  ;;  %v755_v17 = vld [vmem:[%s7539_s1 + $0x1710] sm:$0xff] }
  0x65   :  { %1660 = vmatprep.subr.mxu1 %v1161_v19  ;;  %1590 = vmatpush2.msra.mxu0 %v872_v20  ;;  %v1043_v18 = vld [vmem:[%s7539_s1 + $0x2010] sm:$0xff] }
  0x66   :  { %1661 = vmatpush2.msra.mxu1 %v1160_v21  ;;  %1591 = vmatprep.subr.mxu0 %v864_v22  ;;  %v747_v19 = vld [vmem:[%s7539_s1 + $0x16d0] sm:$0xff]  ;;  %v4264_v21 = vrot.slane %v1382_v10, %v3817_v52  ;;  %v746_v22 = vld [vmem:[%s7539_s1 + $0x16c8] sm:$0xff]  ;;  %v73_v10 = vld [vmem:[%s7539_s1 + $0x1c0] sm:$0xff] }
  0x67   :  { %1662 = vmatprep.subr.mxu1 %v1152_v23  ;;  %1592 = vmatpush2.msra.mxu0 %v863_v24  ;;  %v1035_v20 = vld [vmem:[%s7539_s1 + $0x1fd0] sm:$0xff]  ;;  %v1034_v23 = vld [vmem:[%s7539_s1 + $0x1fc8] sm:$0xff] }
  0x68   :  { %1663 = vmatpush2.msra.mxu1 %v1151_v25  ;;  %1593 = vmatprep.subr.mxu0 %v855_v26  ;;  %v738_v24 = vld [vmem:[%s7539_s1 + $0x1688] sm:$0xff]  ;;  %v4280_v26 = vcombine.high %v4249_v16, %v4249_v16 }
  0x69   :  { %1664 = vmatprep.subr.mxu1 %v1143_v27  ;;  %1594 = vmatpush2.msra.mxu0 %v854_v28  ;;  %v1026_v25 = vld [vmem:[%s7539_s1 + $0x1f88] sm:$0xff]  ;;  %v737_v27 = vld [vmem:[%s7539_s1 + $0x1680] sm:$0xff] }
  0x6a   :  { %1665 = vmatpush2.msra.mxu1 %v1142_v29  ;;  %1595 = vmatprep.subr.mxu0 %v846_v30  ;;  %v1025_v28 = vld [vmem:[%s7539_s1 + $0x1f80] sm:$0xff]  ;;  %v4290_v29 = vcombine.high %v4264_v21, %v4264_v21 }
  0x6b   :  { %1666 = vmatprep.subr.mxu1 %v1134_v31  ;;  %1596 = vmatpush2.msra.mxu0 %v845_v32  ;;  %v1305_v30 = vld [vmem:[%s7539_s1 + $0x2840] sm:$0xff]  ;;  %v155_v31 = vld [vmem:[%s7539_s1 + $0x450] sm:$0xff]  ;;  %v1304_v32 = vld [vmem:[%s7539_s1 + $0x2838] sm:$0xff] }
  0x6c   :  { %1667 = vmatpush2.msra.mxu1 %v1133_v33  ;;  %1597 = vmatprep.subr.mxu0 %v837_v34  ;;  %v154_v33 = vld [vmem:[%s7539_s1 + $0x448] sm:$0xff]  ;;  %v1296_v34 = vld [vmem:[%s7539_s1 + $0x27f8] sm:$0xff] }
  0x6d   :  { %1668 = vmatprep.subr.mxu1 %v1125_v35  ;;  %1598 = vmatpush2.msra.mxu0 %v836_v36  ;;  %v146_v35 = vld [vmem:[%s7539_s1 + $0x408] sm:$0xff]  ;;  %v1295_v36 = vld [vmem:[%s7539_s1 + $0x27f0] sm:$0xff] }
  0x6e   :  { %1669 = vmatpush2.msra.mxu1 %v1124_v37  ;;  %1599 = vmatprep.subr.mxu0 %v828_v38  ;;  %v145_v37 = vld [vmem:[%s7539_s1 + $0x400] sm:$0xff]  ;;  %v1287_v38 = vld [vmem:[%s7539_s1 + $0x27b0] sm:$0xff] }
  0x6f   :  { %1670 = vmatprep.subr.mxu1 %v1116_v39  ;;  %1600 = vmatpush2.msra.mxu0 %v827_v40  ;;  %v137_v39 = vld [vmem:[%s7539_s1 + $0x3c0] sm:$0xff]  ;;  %v1286_v40 = vld [vmem:[%s7539_s1 + $0x27a8] sm:$0xff] }
  0x70   :  { %1671 = vmatpush2.msra.mxu1 %v1115_v42  ;;  %1601 = vmatprep.subr.mxu0 %v819_v43  ;;  %v136_v42 = vld [vmem:[%s7539_s1 + $0x3b8] sm:$0xff]  ;;  %v1278_v43 = vld [vmem:[%s7539_s1 + $0x2768] sm:$0xff] }
  0x71   :  { %1672 = vmatprep.subr.mxu1 %v1107_v44  ;;  %1602 = vmatpush2.msra.mxu0 %v818_v45  ;;  %v128_v44 = vld [vmem:[%s7539_s1 + $0x378] sm:$0xff]  ;;  %v1277_v45 = vld [vmem:[%s7539_s1 + $0x2760] sm:$0xff] }
  0x72   :  { %1673 = vmatpush2.msra.mxu1 %v1106_v46  ;;  %1603 = vmatprep.subr.mxu0 %v810_v47  ;;  %v127_v46 = vld [vmem:[%s7539_s1 + $0x370] sm:$0xff]  ;;  %v1269_v47 = vld [vmem:[%s7539_s1 + $0x2720] sm:$0xff] }
  0x73   :  { %1674 = vmatprep.subr.mxu1 %v1098_v48  ;;  %1604 = vmatpush2.msra.mxu0 %v809_v49  ;;  %v119_v48 = vld [vmem:[%s7539_s1 + $0x330] sm:$0xff]  ;;  %v1268_v49 = vld [vmem:[%s7539_s1 + $0x2718] sm:$0xff] }
  0x74   :  { %1675 = vmatpush2.msra.mxu1 %v1097_v50  ;;  %1605 = vmatprep.subr.mxu0 %v801_v51  ;;  %v118_v50 = vld [vmem:[%s7539_s1 + $0x328] sm:$0xff]  ;;  %v1260_v51 = vld [vmem:[%s7539_s1 + $0x26d8] sm:$0xff] }
  0x75   :  { %1676 = vmatprep.subr.mxu1 %v1089_v53  ;;  %1606 = vmatpush2.msra.mxu0 %v800_v54  ;;  %v110_v53 = vld [vmem:[%s7539_s1 + $0x2e8] sm:$0xff]  ;;  %v1259_v54 = vld [vmem:[%s7539_s1 + $0x26d0] sm:$0xff] }
  0x76   :  { %1677 = vmatpush2.msra.mxu1 %v1088_v55  ;;  %1607 = vmatprep.subr.mxu0 %v792_v56  ;;  %v109_v55 = vld [vmem:[%s7539_s1 + $0x2e0] sm:$0xff]  ;;  %v1251_v56 = vld [vmem:[%s7539_s1 + $0x2690] sm:$0xff] }
  0x77   :  { %1678 = vmatprep.subr.mxu1 %v1080_v57  ;;  %1608 = vmatpush2.msra.mxu0 %v791_v58  ;;  %v101_v57 = vld [vmem:[%s7539_s1 + $0x2a0] sm:$0xff]  ;;  %v1250_v58 = vld [vmem:[%s7539_s1 + $0x2688] sm:$0xff] }
  0x78   :  { %1679 = vmatpush2.msra.mxu1 %v1079_v59  ;;  %1609 = vmatprep.subr.mxu0 %v783_v60  ;;  %v100_v59 = vld [vmem:[%s7539_s1 + $0x298] sm:$0xff]  ;;  %v1242_v60 = vld [vmem:[%s7539_s1 + $0x2648] sm:$0xff] }
  0x79   :  { %1680 = vmatprep.subr.mxu1 %v1071_v61  ;;  %1610 = vmatpush2.msra.mxu0 %v782_v63  ;;  %v92_v61 = vld [vmem:[%s7539_s1 + $0x258] sm:$0xff]  ;;  %v1241_v63 = vld [vmem:[%s7539_s1 + $0x2640] sm:$0xff] }
  0x7a   :  { %1681 = vmatpush2.msra.mxu1 %v1070_v0  ;;  %1611 = vmatprep.subr.mxu0 %v774_v2  ;;  %v91_v0 = vld [vmem:[%s7539_s1 + $0x250] sm:$0xff] }
  0x7b   :  { %1682 = vmatprep.subr.mxu1 %v1062_v4  ;;  %1612 = vmatpush2.msra.mxu0 %v773_v5  ;;  %v83_v2 = vld [vmem:[%s7539_s1 + $0x210] sm:$0xff]  ;;  %v1232_v4 = vld [vmem:[%s7539_s1 + $0x25f8] sm:$0xff]  ;;  %v82_v5 = vld [vmem:[%s7539_s1 + $0x208] sm:$0xff] }
  0x7c   :  { %1683 = vmatpush2.msra.mxu1 %v1061_v6  ;;  %1613 = vmatprep.subr.mxu0 %v765_v7  ;;  %v1224_v6 = vld [vmem:[%s7539_s1 + $0x25b8] sm:$0xff]  ;;  %v74_v7 = vld [vmem:[%s7539_s1 + $0x1c8] sm:$0xff] }
  0x7d   :  { %1684 = vmatprep.subr.mxu1 %v1053_v9  ;;  %1614 = vmatpush2.msra.mxu0 %v764_v12  ;;  %v1223_v9 = vld [vmem:[%s7539_s1 + $0x25b0] sm:$0xff] }
  0x7e   :  { %1685 = vmatpush2.msra.mxu1 %v1052_v13  ;;  %1615 = vmatprep.subr.mxu0 %v756_v14  ;;  %v1215_v12 = vld [vmem:[%s7539_s1 + $0x2570] sm:$0xff]  ;;  %v65_v13 = vld [vmem:[%s7539_s1 + $0x180] sm:$0xff]  ;;  %v1214_v14 = vld [vmem:[%s7539_s1 + $0x2568] sm:$0xff] }
  0x7f   :  { %1686 = vmatprep.subr.mxu1 %v1044_v15  ;;  %1616 = vmatpush2.msra.mxu0 %v755_v17  ;;  %v64_v15 = vld [vmem:[%s7539_s1 + $0x178] sm:$0xff]  ;;  %v1206_v17 = vld [vmem:[%s7539_s1 + $0x2528] sm:$0xff] }
  0x80   :  { %1687 = vmatpush2.msra.mxu1 %v1043_v18  ;;  %1617 = vmatprep.subr.mxu0 %v747_v19  ;;  %v56_v18 = vld [vmem:[%s7539_s1 + $0x138] sm:$0xff]  ;;  %v1205_v19 = vld [vmem:[%s7539_s1 + $0x2520] sm:$0xff] }
  0x81   :  { %1688 = vmatprep.subr.mxu1 %v1035_v20  ;;  %1618 = vmatpush2.msra.mxu0 %v746_v22  ;;  %v55_v20 = vld [vmem:[%s7539_s1 + $0x130] sm:$0xff]  ;;  %v1197_v22 = vld [vmem:[%s7539_s1 + $0x24e0] sm:$0xff] }
  0x82   :  { %1689 = vmatpush2.msra.mxu1 %v1034_v23  ;;  %1619 = vmatprep.subr.mxu0 %v738_v24  ;;  %v47_v23 = vld [vmem:[%s7539_s1 + $0xf0] sm:$0xff]  ;;  %v1196_v24 = vld [vmem:[%s7539_s1 + $0x24d8] sm:$0xff] }
  0x83   :  { %1690 = vmatprep.subr.mxu1 %v1026_v25  ;;  %1620 = vmatpush2.msra.mxu0 %v737_v27  ;;  %v46_v25 = vld [vmem:[%s7539_s1 + $0xe8] sm:$0xff]  ;;  %v1188_v27 = vld [vmem:[%s7539_s1 + $0x2498] sm:$0xff] }
  0x84   :  { %1621 = vmatprep.mubr.f32.mxu0 %v4280_v26  ;;  %1691 = vmatpush2.msra.mxu1 %v1025_v28  ;;  %v38_v28 = vld [vmem:[%s7539_s1 + $0xa8] sm:$0xff] }
  0x85   :  { %1622 = vmatmul.mubr.f32.vlgmr.msra.gmra.mxu0 %v4249_v16  ;;  %1692 = vmatprep.mubr.f32.mxu1 %v4290_v29 }
  0x86   :  { %1699 = vmatprep.subr.mxu0 %v1305_v30  ;;  %1770 = vmatprep.subr.mxu1 %v155_v31  ;;  %v1187_v30 = vld [vmem:[%s7539_s1 + $0x2490] sm:$0xff]  ;;  %v37_v31 = vld [vmem:[%s7539_s1 + $0xa0] sm:$0xff] }
  0x87   :  { %1693 = vmatmul.mubr.f32.vlgmr.msra.gmra.mxu1 %v4264_v21  ;;  %1700 = vmatpush1.msra.mxu0 %v1304_v32  ;;  %v1179_v32 = vld [vmem:[%s7539_s1 + $0x2450] sm:$0xff] }
  0x88   :  { %1771 = vmatpush1.msra.mxu1 %v154_v33  ;;  %1701 = vmatprep.subr.mxu0 %v1296_v34  ;;  %v29_v33 = vld [vmem:[%s7539_s1 + $0x60] sm:$0xff]  ;;  %v1178_v34 = vld [vmem:[%s7539_s1 + $0x2448] sm:$0xff] }
  0x89   :  { %1772 = vmatprep.subr.mxu1 %v146_v35  ;;  %1702 = vmatpush1.msra.mxu0 %v1295_v36  ;;  %v28_v35 = vld [vmem:[%s7539_s1 + $0x58] sm:$0xff]  ;;  %v1170_v36 = vld [vmem:[%s7539_s1 + $0x2408] sm:$0xff] }
  0x8a   :  { %1773 = vmatpush1.msra.mxu1 %v145_v37  ;;  %1703 = vmatprep.subr.mxu0 %v1287_v38  ;;  %v20_v37 = vld [vmem:[%s7539_s1 + $0x18] sm:$0xff]  ;;  %v1169_v38 = vld [vmem:[%s7539_s1 + $0x2400] sm:$0xff] }
  0x8b   :  { %1774 = vmatprep.subr.mxu1 %v137_v39  ;;  %1704 = vmatpush1.msra.mxu0 %v1286_v40  ;;  %v19_v39 = vld [vmem:[%s7539_s1 + $0x10] sm:$0xff] }
  0x8c   :  { %1775 = vmatpush1.msra.mxu1 %v136_v42  ;;  %1705 = vmatprep.subr.mxu0 %v1278_v43  ;;  %v3255_v40 = vld.sshfl [vmem:[%s7540_s0 + $0x10] sm:$0x3 pattern:$0x76325410] }
  0x8d   :  { %1776 = vmatprep.subr.mxu1 %v128_v44  ;;  %1706 = vmatpush1.msra.mxu0 %v1277_v45  ;;  %v299_v42 = vld [vmem:[%s7539_s1 + $0x8d0] sm:$0xff]  ;;  %v3459_v44 = vmov 0.0   ;;  %v298_v45 = vld [vmem:[%s7539_s1 + $0x8c8] sm:$0xff] }
  0x8e   :  { %1777 = vmatpush1.msra.mxu1 %v127_v46  ;;  %1707 = vmatprep.subr.mxu0 %v1269_v47  ;;  %v443_v43 = vld [vmem:[%s7539_s1 + $0xd50] sm:$0xff]  ;;  %v442_v46 = vld [vmem:[%s7539_s1 + $0xd48] sm:$0xff] }
  0x8f   :  { %1778 = vmatprep.subr.mxu1 %v119_v48  ;;  %1708 = vmatpush1.msra.mxu0 %v1268_v49  ;;  %v290_v47 = vld [vmem:[%s7539_s1 + $0x888] sm:$0xff]  ;;  %v289_v49 = vld [vmem:[%s7539_s1 + $0x880] sm:$0xff] }
  0x90   :  { %1779 = vmatpush1.msra.mxu1 %v118_v50  ;;  %1709 = vmatprep.subr.mxu0 %v1260_v51  ;;  %v434_v48 = vld [vmem:[%s7539_s1 + $0xd08] sm:$0xff]  ;;  %v433_v50 = vld [vmem:[%s7539_s1 + $0xd00] sm:$0xff] }
  0x91   :  { %1780 = vmatprep.subr.mxu1 %v110_v53  ;;  %1710 = vmatpush1.msra.mxu0 %v1259_v54  ;;  %v281_v51 = vld [vmem:[%s7539_s1 + $0x840] sm:$0xff]  ;;  %v280_v54 = vld [vmem:[%s7539_s1 + $0x838] sm:$0xff] }
  0x92   :  { %1781 = vmatpush1.msra.mxu1 %v109_v55  ;;  %1711 = vmatprep.subr.mxu0 %v1251_v56  ;;  %v425_v53 = vld [vmem:[%s7539_s1 + $0xcc0] sm:$0xff]  ;;  %v424_v55 = vld [vmem:[%s7539_s1 + $0xcb8] sm:$0xff] }
  0x93   :  { %1782 = vmatprep.subr.mxu1 %v101_v57  ;;  %1712 = vmatpush1.msra.mxu0 %v1250_v58  ;;  %v272_v56 = vld [vmem:[%s7539_s1 + $0x7f8] sm:$0xff]  ;;  %v271_v58 = vld [vmem:[%s7539_s1 + $0x7f0] sm:$0xff] }
  0x94   :  { %1783 = vmatpush1.msra.mxu1 %v100_v59  ;;  %1713 = vmatprep.subr.mxu0 %v1242_v60  ;;  %v416_v57 = vld [vmem:[%s7539_s1 + $0xc78] sm:$0xff]  ;;  %v415_v59 = vld [vmem:[%s7539_s1 + $0xc70] sm:$0xff] }
  0x95   :  { %1784 = vmatprep.subr.mxu1 %v92_v61  ;;  %1714 = vmatpush1.msra.mxu0 %v1241_v63  ;;  %v263_v60 = vld [vmem:[%s7539_s1 + $0x7b0] sm:$0xff]  ;;  %v262_v63 = vld [vmem:[%s7539_s1 + $0x7a8] sm:$0xff] }
  0x96   :  { %1785 = vmatpush1.msra.mxu1 %v91_v0  ;;  %1715 = vmatprep.subr.mxu0 %v1233_v1  ;;  %v407_v61 = vld [vmem:[%s7539_s1 + $0xc30] sm:$0xff]  ;;  %v406_v0 = vld [vmem:[%s7539_s1 + $0xc28] sm:$0xff] }
  0x97   :  { %1786 = vmatprep.subr.mxu1 %v83_v2  ;;  %1716 = vmatpush1.msra.mxu0 %v1232_v4  ;;  %v254_v1 = vld [vmem:[%s7539_s1 + $0x768] sm:$0xff]  ;;  %v253_v4 = vld [vmem:[%s7539_s1 + $0x760] sm:$0xff] }
  0x98   :  { %1787 = vmatpush1.msra.mxu1 %v82_v5  ;;  %1717 = vmatprep.subr.mxu0 %v1224_v6  ;;  %v398_v2 = vld [vmem:[%s7539_s1 + $0xbe8] sm:$0xff]  ;;  %v397_v5 = vld [vmem:[%s7539_s1 + $0xbe0] sm:$0xff] }
  0x99   :  { %1788 = vmatprep.subr.mxu1 %v74_v7  ;;  %1718 = vmatpush1.msra.mxu0 %v1223_v9  ;;  %v245_v6 = vld [vmem:[%s7539_s1 + $0x720] sm:$0xff]  ;;  %v244_v9 = vld [vmem:[%s7539_s1 + $0x718] sm:$0xff] }
  0x9a   :  { %1789 = vmatpush1.msra.mxu1 %v73_v10  ;;  %1719 = vmatprep.subr.mxu0 %v1215_v12  ;;  %v389_v7 = vld [vmem:[%s7539_s1 + $0xba0] sm:$0xff]  ;;  %v388_v10 = vld [vmem:[%s7539_s1 + $0xb98] sm:$0xff] }
  0x9b   :  { %1790 = vmatprep.subr.mxu1 %v65_v13  ;;  %1720 = vmatpush1.msra.mxu0 %v1214_v14  ;;  %v236_v12 = vld [vmem:[%s7539_s1 + $0x6d8] sm:$0xff]  ;;  %v235_v14 = vld [vmem:[%s7539_s1 + $0x6d0] sm:$0xff] }
  0x9c   :  { %1791 = vmatpush1.msra.mxu1 %v64_v15  ;;  %1721 = vmatprep.subr.mxu0 %v1206_v17  ;;  %v380_v13 = vld [vmem:[%s7539_s1 + $0xb58] sm:$0xff]  ;;  %v379_v15 = vld [vmem:[%s7539_s1 + $0xb50] sm:$0xff] }
  0x9d   :  { %1792 = vmatprep.subr.mxu1 %v56_v18  ;;  %1722 = vmatpush1.msra.mxu0 %v1205_v19  ;;  %v227_v17 = vld [vmem:[%s7539_s1 + $0x690] sm:$0xff]  ;;  %v226_v19 = vld [vmem:[%s7539_s1 + $0x688] sm:$0xff] }
  0x9e   :  { %1793 = vmatpush1.msra.mxu1 %v55_v20  ;;  %1723 = vmatprep.subr.mxu0 %v1197_v22  ;;  %v371_v18 = vld [vmem:[%s7539_s1 + $0xb10] sm:$0xff]  ;;  %v370_v20 = vld [vmem:[%s7539_s1 + $0xb08] sm:$0xff] }
  0x9f   :  { %1794 = vmatprep.subr.mxu1 %v47_v23  ;;  %1724 = vmatpush1.msra.mxu0 %v1196_v24  ;;  %v218_v22 = vld [vmem:[%s7539_s1 + $0x648] sm:$0xff]  ;;  %v217_v24 = vld [vmem:[%s7539_s1 + $0x640] sm:$0xff] }
  0xa0   :  { %1795 = vmatpush1.msra.mxu1 %v46_v25  ;;  %1725 = vmatprep.subr.mxu0 %v1188_v27  ;;  %v362_v23 = vld [vmem:[%s7539_s1 + $0xac8] sm:$0xff]  ;;  %v361_v25 = vld [vmem:[%s7539_s1 + $0xac0] sm:$0xff] }
  0xa1   :  { %1796 = vmatprep.subr.mxu1 %v38_v28  ;;  %1726 = vmatpush1.msra.mxu0 %v1187_v30  ;;  %v209_v27 = vld [vmem:[%s7539_s1 + $0x600] sm:$0xff]  ;;  %v208_v30 = vld [vmem:[%s7539_s1 + $0x5f8] sm:$0xff] }
  0xa2   :  { %1797 = vmatpush1.msra.mxu1 %v37_v31  ;;  %1727 = vmatprep.subr.mxu0 %v1179_v32  ;;  %v353_v28 = vld [vmem:[%s7539_s1 + $0xa80] sm:$0xff]  ;;  %v352_v31 = vld [vmem:[%s7539_s1 + $0xa78] sm:$0xff] }
  0xa3   :  { %1798 = vmatprep.subr.mxu1 %v29_v33  ;;  %1728 = vmatpush1.msra.mxu0 %v1178_v34  ;;  %v200_v32 = vld [vmem:[%s7539_s1 + $0x5b8] sm:$0xff]  ;;  %v199_v34 = vld [vmem:[%s7539_s1 + $0x5b0] sm:$0xff] }
  0xa4   :  { %1799 = vmatpush1.msra.mxu1 %v28_v35  ;;  %1729 = vmatprep.subr.mxu0 %v1170_v36  ;;  %v344_v33 = vld [vmem:[%s7539_s1 + $0xa38] sm:$0xff]  ;;  %v343_v35 = vld [vmem:[%s7539_s1 + $0xa30] sm:$0xff] }
  0xa5   :  { %1800 = vmatprep.subr.mxu1 %v20_v37  ;;  %1730 = vmatpush1.msra.mxu0 %v1169_v38  ;;  %v191_v36 = vld [vmem:[%s7539_s1 + $0x570] sm:$0xff]  ;;  %v190_v38 = vld [vmem:[%s7539_s1 + $0x568] sm:$0xff] }
  0xa6   :  { %1763 = vmatprep.mubr.f32.mxu0 %v3459_v44  ;;  %1801 = vmatpush1.msra.mxu1 %v19_v39  ;;  %v335_v37 = vld [vmem:[%s7539_s1 + $0x9f0] sm:$0xff]  ;;  %v334_v39 = vld [vmem:[%s7539_s1 + $0x9e8] sm:$0xff] }
  0xa7   :  { %1764 = vmatmul.mubr.f32.vlgmr.msra.gmra.mxu0 %v3255_v40  ;;  %1802 = vmatprep.subr.mxu1 %v299_v42  ;;  %v182_v40 = vld [vmem:[%s7539_s1 + $0x528] sm:$0xff] }
  0xa8   :  { %1841 = vmatprep.subr.mxu0 %v443_v43  ;;  %1803 = vmatpush2.msra.mxu1 %v298_v45  ;;  %v326_v42 = vld [vmem:[%s7539_s1 + $0x9a8] sm:$0xff]  ;;  %v181_v43 = vld [vmem:[%s7539_s1 + $0x520] sm:$0xff] }
  0xa9   :  { %1842 = vmatpush1.msra.mxu0 %v442_v46  ;;  %1804 = vmatprep.subr.mxu1 %v290_v47  ;;  %v325_v45 = vld [vmem:[%s7539_s1 + $0x9a0] sm:$0xff] }
  0xaa   :  { %1843 = vmatprep.subr.mxu0 %v434_v48  ;;  %1805 = vmatpush2.msra.mxu1 %v289_v49  ;;  %v173_v46 = vld [vmem:[%s7539_s1 + $0x4e0] sm:$0xff]  ;;  %v172_v48 = vld [vmem:[%s7539_s1 + $0x4d8] sm:$0xff] }
  0xab   :  { %1844 = vmatpush1.msra.mxu0 %v433_v50  ;;  %1806 = vmatprep.subr.mxu1 %v281_v51  ;;  %v317_v47 = vld [vmem:[%s7539_s1 + $0x960] sm:$0xff]  ;;  %v316_v49 = vld [vmem:[%s7539_s1 + $0x958] sm:$0xff] }
  0xac   :  { %1845 = vmatprep.subr.mxu0 %v425_v53  ;;  %1807 = vmatpush2.msra.mxu1 %v280_v54  ;;  %v164_v50 = vld [vmem:[%s7539_s1 + $0x498] sm:$0xff]  ;;  %v163_v53 = vld [vmem:[%s7539_s1 + $0x490] sm:$0xff] }
  0xad   :  { %1846 = vmatpush1.msra.mxu0 %v424_v55  ;;  %1808 = vmatprep.subr.mxu1 %v272_v56  ;;  %v308_v51 = vld [vmem:[%s7539_s1 + $0x918] sm:$0xff]  ;;  %v307_v54 = vld [vmem:[%s7539_s1 + $0x910] sm:$0xff] }
  0xae   :  { %1847 = vmatprep.subr.mxu0 %v416_v57  ;;  %1809 = vmatpush2.msra.mxu1 %v271_v58  ;;  %v587_v55 = vld [vmem:[%s7539_s1 + $0x11d0] sm:$0xff]  ;;  %v586_v57 = vld [vmem:[%s7539_s1 + $0x11c8] sm:$0xff] }
  0xaf   :  { %1848 = vmatpush1.msra.mxu0 %v415_v59  ;;  %1810 = vmatprep.subr.mxu1 %v263_v60  ;;  %v731_v56 = vld [vmem:[%s7539_s1 + $0x1650] sm:$0xff]  ;;  %v730_v58 = vld [vmem:[%s7539_s1 + $0x1648] sm:$0xff] }
  0xb0   :  { %1849 = vmatprep.subr.mxu0 %v407_v61  ;;  %1811 = vmatpush2.msra.mxu1 %v262_v63  ;;  %v578_v59 = vld [vmem:[%s7539_s1 + $0x1188] sm:$0xff]  ;;  %v577_v61 = vld [vmem:[%s7539_s1 + $0x1180] sm:$0xff] }
  0xb1   :  { %1850 = vmatpush1.msra.mxu0 %v406_v0  ;;  %1812 = vmatprep.subr.mxu1 %v254_v1  ;;  %v722_v60 = vld [vmem:[%s7539_s1 + $0x1608] sm:$0xff]  ;;  %v721_v63 = vld [vmem:[%s7539_s1 + $0x1600] sm:$0xff] }
  0xb2   :  { %1851 = vmatprep.subr.mxu0 %v398_v2  ;;  %1813 = vmatpush2.msra.mxu1 %v253_v4  ;;  %v569_v0 = vld [vmem:[%s7539_s1 + $0x1140] sm:$0xff]  ;;  %v568_v2 = vld [vmem:[%s7539_s1 + $0x1138] sm:$0xff] }
  0xb3   :  { %1852 = vmatpush1.msra.mxu0 %v397_v5  ;;  %1814 = vmatprep.subr.mxu1 %v245_v6  ;;  %v713_v1 = vld [vmem:[%s7539_s1 + $0x15c0] sm:$0xff]  ;;  %v712_v4 = vld [vmem:[%s7539_s1 + $0x15b8] sm:$0xff] }
  0xb4   :  { %1853 = vmatprep.subr.mxu0 %v389_v7  ;;  %1815 = vmatpush2.msra.mxu1 %v244_v9  ;;  %v560_v5 = vld [vmem:[%s7539_s1 + $0x10f8] sm:$0xff]  ;;  %v559_v7 = vld [vmem:[%s7539_s1 + $0x10f0] sm:$0xff] }
  0xb5   :  { %1854 = vmatpush1.msra.mxu0 %v388_v10  ;;  %1816 = vmatprep.subr.mxu1 %v236_v12  ;;  %v704_v6 = vld [vmem:[%s7539_s1 + $0x1578] sm:$0xff]  ;;  %v703_v9 = vld [vmem:[%s7539_s1 + $0x1570] sm:$0xff] }
  0xb6   :  { %1855 = vmatprep.subr.mxu0 %v380_v13  ;;  %1817 = vmatpush2.msra.mxu1 %v235_v14  ;;  %v551_v10 = vld [vmem:[%s7539_s1 + $0x10b0] sm:$0xff]  ;;  %v550_v13 = vld [vmem:[%s7539_s1 + $0x10a8] sm:$0xff] }
  0xb7   :  { %1856 = vmatpush1.msra.mxu0 %v379_v15  ;;  %1818 = vmatprep.subr.mxu1 %v227_v17  ;;  %v695_v12 = vld [vmem:[%s7539_s1 + $0x1530] sm:$0xff]  ;;  %v694_v14 = vld [vmem:[%s7539_s1 + $0x1528] sm:$0xff] }
  0xb8   :  { %1857 = vmatprep.subr.mxu0 %v371_v18  ;;  %1819 = vmatpush2.msra.mxu1 %v226_v19  ;;  %v542_v15 = vld [vmem:[%s7539_s1 + $0x1068] sm:$0xff]  ;;  %v541_v18 = vld [vmem:[%s7539_s1 + $0x1060] sm:$0xff] }
  0xb9   :  { %1858 = vmatpush1.msra.mxu0 %v370_v20  ;;  %1820 = vmatprep.subr.mxu1 %v218_v22  ;;  %v686_v17 = vld [vmem:[%s7539_s1 + $0x14e8] sm:$0xff]  ;;  %v685_v19 = vld [vmem:[%s7539_s1 + $0x14e0] sm:$0xff] }
  0xba   :  { %1859 = vmatprep.subr.mxu0 %v362_v23  ;;  %1821 = vmatpush2.msra.mxu1 %v217_v24  ;;  %v533_v20 = vld [vmem:[%s7539_s1 + $0x1020] sm:$0xff]  ;;  %v532_v23 = vld [vmem:[%s7539_s1 + $0x1018] sm:$0xff] }
  0xbb   :  { %1860 = vmatpush1.msra.mxu0 %v361_v25  ;;  %1822 = vmatprep.subr.mxu1 %v209_v27  ;;  %v677_v22 = vld [vmem:[%s7539_s1 + $0x14a0] sm:$0xff]  ;;  %v676_v24 = vld [vmem:[%s7539_s1 + $0x1498] sm:$0xff] }
  0xbc   :  { %1861 = vmatprep.subr.mxu0 %v353_v28  ;;  %1823 = vmatpush2.msra.mxu1 %v208_v30  ;;  %v524_v25 = vld [vmem:[%s7539_s1 + $0xfd8] sm:$0xff]  ;;  %v523_v28 = vld [vmem:[%s7539_s1 + $0xfd0] sm:$0xff] }
  0xbd   :  { %1862 = vmatpush1.msra.mxu0 %v352_v31  ;;  %1824 = vmatprep.subr.mxu1 %v200_v32  ;;  %v668_v27 = vld [vmem:[%s7539_s1 + $0x1458] sm:$0xff]  ;;  %v667_v30 = vld [vmem:[%s7539_s1 + $0x1450] sm:$0xff] }
  0xbe   :  { %1863 = vmatprep.subr.mxu0 %v344_v33  ;;  %1825 = vmatpush2.msra.mxu1 %v199_v34  ;;  %v515_v31 = vld [vmem:[%s7539_s1 + $0xf90] sm:$0xff]  ;;  %v514_v33 = vld [vmem:[%s7539_s1 + $0xf88] sm:$0xff] }
  0xbf   :  { %1864 = vmatpush1.msra.mxu0 %v343_v35  ;;  %1826 = vmatprep.subr.mxu1 %v191_v36  ;;  %v659_v32 = vld [vmem:[%s7539_s1 + $0x1410] sm:$0xff]  ;;  %v658_v34 = vld [vmem:[%s7539_s1 + $0x1408] sm:$0xff] }
  0xc0   :  { %1865 = vmatprep.subr.mxu0 %v335_v37  ;;  %1827 = vmatpush2.msra.mxu1 %v190_v38  ;;  %v506_v35 = vld [vmem:[%s7539_s1 + $0xf48] sm:$0xff]  ;;  %v505_v37 = vld [vmem:[%s7539_s1 + $0xf40] sm:$0xff] }
  0xc1   :  { %1866 = vmatpush1.msra.mxu0 %v334_v39  ;;  %1828 = vmatprep.subr.mxu1 %v182_v40  ;;  %v650_v36 = vld [vmem:[%s7539_s1 + $0x13c8] sm:$0xff]  ;;  %v649_v38 = vld [vmem:[%s7539_s1 + $0x13c0] sm:$0xff] }
  0xc2   :  { %1867 = vmatprep.subr.mxu0 %v326_v42  ;;  %1829 = vmatpush2.msra.mxu1 %v181_v43  ;;  %v497_v39 = vld [vmem:[%s7539_s1 + $0xf00] sm:$0xff]  ;;  %v496_v42 = vld [vmem:[%s7539_s1 + $0xef8] sm:$0xff] }
  0xc3   :  { %1868 = vmatpush1.msra.mxu0 %v325_v45  ;;  %1830 = vmatprep.subr.mxu1 %v173_v46  ;;  %v641_v40 = vld [vmem:[%s7539_s1 + $0x1380] sm:$0xff]  ;;  %v640_v43 = vld [vmem:[%s7539_s1 + $0x1378] sm:$0xff] }
  0xc4   :  { %1869 = vmatprep.subr.mxu0 %v317_v47  ;;  %1831 = vmatpush2.msra.mxu1 %v172_v48  ;;  %v488_v45 = vld [vmem:[%s7539_s1 + $0xeb8] sm:$0xff]  ;;  %v487_v47 = vld [vmem:[%s7539_s1 + $0xeb0] sm:$0xff] }
  0xc5   :  { %1870 = vmatpush1.msra.mxu0 %v316_v49  ;;  %1832 = vmatprep.subr.mxu1 %v164_v50  ;;  %v632_v46 = vld [vmem:[%s7539_s1 + $0x1338] sm:$0xff]  ;;  %v631_v48 = vld [vmem:[%s7539_s1 + $0x1330] sm:$0xff] }
  0xc6   :  { %1871 = vmatprep.subr.mxu0 %v308_v51  ;;  %1833 = vmatpush2.msra.mxu1 %v163_v53  ;;  %v479_v49 = vld [vmem:[%s7539_s1 + $0xe70] sm:$0xff]  ;;  %v478_v51 = vld [vmem:[%s7539_s1 + $0xe68] sm:$0xff] }
  0xc7   :  { %1872 = vmatpush1.msra.mxu0 %v307_v54  ;;  %1834 = vmatprep.mubr.f32.mxu1 %v3875_v8  ;;  %v623_v50 = vld [vmem:[%s7539_s1 + $0x12f0] sm:$0xff]  ;;  %v622_v53 = vld [vmem:[%s7539_s1 + $0x12e8] sm:$0xff] }
  0xc8   :  { %1873 = vmatprep.subr.mxu0 %v587_v55  ;;  %1912 = vmatprep.subr.mxu1 %v731_v56  ;;  %v470_v54 = vld [vmem:[%s7539_s1 + $0xe28] sm:$0xff]  ;;  %v469_v56 = vld [vmem:[%s7539_s1 + $0xe20] sm:$0xff] }
  0xc9   :  { %1835 = vmatmul.mubr.f32.vlgmr.msra.gmra.mxu1 %v3844_v62  ;;  %1874 = vmatpush2.msra.mxu0 %v586_v57  ;;  %v614_v55 = vld [vmem:[%s7539_s1 + $0x12a8] sm:$0xff]  ;;  %v613_v57 = vld [vmem:[%s7539_s1 + $0x12a0] sm:$0xff] }
  0xca   :  { %1913 = vmatpush1.msra.mxu1 %v730_v58  ;;  %1875 = vmatprep.subr.mxu0 %v578_v59  ;;  %v461_v58 = vld [vmem:[%s7539_s1 + $0xde0] sm:$0xff] }
  0xcb   :  { %1914 = vmatprep.subr.mxu1 %v722_v60  ;;  %1876 = vmatpush2.msra.mxu0 %v577_v61  ;;  %v605_v59 = vld [vmem:[%s7539_s1 + $0x1260] sm:$0xff]  ;;  %v460_v60 = vld [vmem:[%s7539_s1 + $0xdd8] sm:$0xff] }
  0xcc   :  { %1915 = vmatpush1.msra.mxu1 %v721_v63  ;;  %1877 = vmatprep.subr.mxu0 %v569_v0  ;;  %v604_v61 = vld [vmem:[%s7539_s1 + $0x1258] sm:$0xff] }
  0xcd   :  { %1916 = vmatprep.subr.mxu1 %v713_v1  ;;  %1878 = vmatpush2.msra.mxu0 %v568_v2  ;;  %v452_v63 = vld [vmem:[%s7539_s1 + $0xd98] sm:$0xff]  ;;  %v451_v1 = vld [vmem:[%s7539_s1 + $0xd90] sm:$0xff] }
  0xce   :  { %1917 = vmatpush1.msra.mxu1 %v712_v4  ;;  %1879 = vmatprep.subr.mxu0 %v560_v5  ;;  %v596_v0 = vld [vmem:[%s7539_s1 + $0x1218] sm:$0xff]  ;;  %v595_v2 = vld [vmem:[%s7539_s1 + $0x1210] sm:$0xff] }
  0xcf   :  { %1918 = vmatprep.subr.mxu1 %v704_v6  ;;  %1880 = vmatpush2.msra.mxu0 %v559_v7  ;;  %v875_v4 = vld [vmem:[%s7539_s1 + $0x1ad0] sm:$0xff]  ;;  %v874_v6 = vld [vmem:[%s7539_s1 + $0x1ac8] sm:$0xff] }
  0xd0   :  { %1919 = vmatpush1.msra.mxu1 %v703_v9  ;;  %1881 = vmatprep.subr.mxu0 %v551_v10  ;;  %v1019_v5 = vld [vmem:[%s7539_s1 + $0x1f50] sm:$0xff]  ;;  %v1018_v7 = vld [vmem:[%s7539_s1 + $0x1f48] sm:$0xff] }
  0xd1   :  { %1920 = vmatprep.subr.mxu1 %v695_v12  ;;  %1882 = vmatpush2.msra.mxu0 %v550_v13  ;;  %v866_v9 = vld [vmem:[%s7539_s1 + $0x1a88] sm:$0xff]  ;;  %v865_v12 = vld [vmem:[%s7539_s1 + $0x1a80] sm:$0xff] }
  0xd2   :  { %1921 = vmatpush1.msra.mxu1 %v694_v14  ;;  %1883 = vmatprep.subr.mxu0 %v542_v15  ;;  %v1010_v10 = vld [vmem:[%s7539_s1 + $0x1f08] sm:$0xff]  ;;  %v1009_v13 = vld [vmem:[%s7539_s1 + $0x1f00] sm:$0xff] }
  0xd3   :  { %1922 = vmatprep.subr.mxu1 %v686_v17  ;;  %1884 = vmatpush2.msra.mxu0 %v541_v18  ;;  %v857_v14 = vld [vmem:[%s7539_s1 + $0x1a40] sm:$0xff]  ;;  %v856_v17 = vld [vmem:[%s7539_s1 + $0x1a38] sm:$0xff] }
  0xd4   :  { %1923 = vmatpush1.msra.mxu1 %v685_v19  ;;  %1885 = vmatprep.subr.mxu0 %v533_v20  ;;  %v1001_v15 = vld [vmem:[%s7539_s1 + $0x1ec0] sm:$0xff]  ;;  %v1000_v18 = vld [vmem:[%s7539_s1 + $0x1eb8] sm:$0xff] }
  0xd5   :  { %1924 = vmatprep.subr.mxu1 %v677_v22  ;;  %1886 = vmatpush2.msra.mxu0 %v532_v23  ;;  %v848_v19 = vld [vmem:[%s7539_s1 + $0x19f8] sm:$0xff]  ;;  %v847_v22 = vld [vmem:[%s7539_s1 + $0x19f0] sm:$0xff] }
  0xd6   :  { %1925 = vmatpush1.msra.mxu1 %v676_v24  ;;  %1887 = vmatprep.subr.mxu0 %v524_v25  ;;  %v992_v20 = vld [vmem:[%s7539_s1 + $0x1e78] sm:$0xff]  ;;  %v991_v23 = vld [vmem:[%s7539_s1 + $0x1e70] sm:$0xff] }
  0xd7   :  { %1926 = vmatprep.subr.mxu1 %v668_v27  ;;  %1888 = vmatpush2.msra.mxu0 %v523_v28  ;;  %v839_v24 = vld [vmem:[%s7539_s1 + $0x19b0] sm:$0xff]  ;;  %v838_v27 = vld [vmem:[%s7539_s1 + $0x19a8] sm:$0xff] }
  0xd8   :  { %1927 = vmatpush1.msra.mxu1 %v667_v30  ;;  %1889 = vmatprep.subr.mxu0 %v515_v31  ;;  %v983_v25 = vld [vmem:[%s7539_s1 + $0x1e30] sm:$0xff]  ;;  %v982_v28 = vld [vmem:[%s7539_s1 + $0x1e28] sm:$0xff] }
  0xd9   :  { %1928 = vmatprep.subr.mxu1 %v659_v32  ;;  %1890 = vmatpush2.msra.mxu0 %v514_v33  ;;  %v830_v30 = vld [vmem:[%s7539_s1 + $0x1968] sm:$0xff]  ;;  %v829_v32 = vld [vmem:[%s7539_s1 + $0x1960] sm:$0xff] }
  0xda   :  { %1929 = vmatpush1.msra.mxu1 %v658_v34  ;;  %1891 = vmatprep.subr.mxu0 %v506_v35  ;;  %v974_v31 = vld [vmem:[%s7539_s1 + $0x1de8] sm:$0xff]  ;;  %v973_v33 = vld [vmem:[%s7539_s1 + $0x1de0] sm:$0xff] }
  0xdb   :  { %1930 = vmatprep.subr.mxu1 %v650_v36  ;;  %1892 = vmatpush2.msra.mxu0 %v505_v37  ;;  %v821_v34 = vld [vmem:[%s7539_s1 + $0x1920] sm:$0xff]  ;;  %v820_v36 = vld [vmem:[%s7539_s1 + $0x1918] sm:$0xff] }
  0xdc   :  { %1931 = vmatpush1.msra.mxu1 %v649_v38  ;;  %1893 = vmatprep.subr.mxu0 %v497_v39  ;;  %v965_v35 = vld [vmem:[%s7539_s1 + $0x1da0] sm:$0xff]  ;;  %v964_v37 = vld [vmem:[%s7539_s1 + $0x1d98] sm:$0xff] }
  0xdd   :  { %1932 = vmatprep.subr.mxu1 %v641_v40  ;;  %1894 = vmatpush2.msra.mxu0 %v496_v42  ;;  %v812_v38 = vld [vmem:[%s7539_s1 + $0x18d8] sm:$0xff]  ;;  %v811_v40 = vld [vmem:[%s7539_s1 + $0x18d0] sm:$0xff] }
  0xde   :  { %1933 = vmatpush1.msra.mxu1 %v640_v43  ;;  %1895 = vmatprep.subr.mxu0 %v488_v45  ;;  %v956_v39 = vld [vmem:[%s7539_s1 + $0x1d58] sm:$0xff]  ;;  %v955_v42 = vld [vmem:[%s7539_s1 + $0x1d50] sm:$0xff] }
  0xdf   :  { %1934 = vmatprep.subr.mxu1 %v632_v46  ;;  %1896 = vmatpush2.msra.mxu0 %v487_v47  ;;  %v803_v43 = vld [vmem:[%s7539_s1 + $0x1890] sm:$0xff]  ;;  %v802_v46 = vld [vmem:[%s7539_s1 + $0x1888] sm:$0xff] }
  0xe0   :  { %1935 = vmatpush1.msra.mxu1 %v631_v48  ;;  %1897 = vmatprep.subr.mxu0 %v479_v49  ;;  %v947_v45 = vld [vmem:[%s7539_s1 + $0x1d10] sm:$0xff]  ;;  %v946_v47 = vld [vmem:[%s7539_s1 + $0x1d08] sm:$0xff] }
  0xe1   :  { %1936 = vmatprep.subr.mxu1 %v623_v50  ;;  %1898 = vmatpush2.msra.mxu0 %v478_v51  ;;  %v794_v48 = vld [vmem:[%s7539_s1 + $0x1848] sm:$0xff]  ;;  %v793_v50 = vld [vmem:[%s7539_s1 + $0x1840] sm:$0xff] }
  0xe2   :  { %1937 = vmatpush1.msra.mxu1 %v622_v53  ;;  %1899 = vmatprep.subr.mxu0 %v470_v54  ;;  %v938_v49 = vld [vmem:[%s7539_s1 + $0x1cc8] sm:$0xff]  ;;  %v937_v51 = vld [vmem:[%s7539_s1 + $0x1cc0] sm:$0xff] }
  0xe3   :  { %1938 = vmatprep.subr.mxu1 %v614_v55  ;;  %1900 = vmatpush2.msra.mxu0 %v469_v56  ;;  %v785_v53 = vld [vmem:[%s7539_s1 + $0x1800] sm:$0xff]  ;;  %v784_v55 = vld [vmem:[%s7539_s1 + $0x17f8] sm:$0xff] }
  0xe4   :  { %1939 = vmatpush1.msra.mxu1 %v613_v57  ;;  %1901 = vmatprep.subr.mxu0 %v461_v58  ;;  %v929_v54 = vld [vmem:[%s7539_s1 + $0x1c80] sm:$0xff]  ;;  %v928_v56 = vld [vmem:[%s7539_s1 + $0x1c78] sm:$0xff] }
  0xe5   :  { %1940 = vmatprep.subr.mxu1 %v605_v59  ;;  %1902 = vmatpush2.msra.mxu0 %v460_v60  ;;  %v776_v57 = vld [vmem:[%s7539_s1 + $0x17b8] sm:$0xff]  ;;  %v775_v59 = vld [vmem:[%s7539_s1 + $0x17b0] sm:$0xff] }
  0xe6   :  { %1941 = vmatpush1.msra.mxu1 %v604_v61  ;;  %1903 = vmatprep.subr.mxu0 %v452_v63  ;;  %v920_v58 = vld [vmem:[%s7539_s1 + $0x1c38] sm:$0xff]  ;;  %v919_v60 = vld [vmem:[%s7539_s1 + $0x1c30] sm:$0xff] }
  0xe7   :  { %1942 = vmatprep.subr.mxu1 %v596_v0  ;;  %1904 = vmatpush2.msra.mxu0 %v451_v1  ;;  %v767_v61 = vld [vmem:[%s7539_s1 + $0x1770] sm:$0xff]  ;;  %v766_v0 = vld [vmem:[%s7539_s1 + $0x1768] sm:$0xff] }
  0xe8   :  { %1905 = vmatprep.mubr.f32.mxu0 %v3885_v11  ;;  %1943 = vmatpush1.msra.mxu1 %v595_v2  ;;  %v911_v63 = vld [vmem:[%s7539_s1 + $0x1bf0] sm:$0xff]  ;;  %v910_v1 = vld [vmem:[%s7539_s1 + $0x1be8] sm:$0xff] }
  0xe9   :  { %1906 = vmatmul.mubr.f32.vlgmr.msra.gmra.mxu0 %v3859_v3  ;;  %1944 = vmatprep.subr.mxu1 %v875_v4  ;;  %v758_v2 = vld [vmem:[%s7539_s1 + $0x1728] sm:$0xff] }
  0xea   :  { %1983 = vmatprep.subr.mxu0 %v1019_v5  ;;  %1945 = vmatpush2.msra.mxu1 %v874_v6  ;;  %v902_v4 = vld [vmem:[%s7539_s1 + $0x1ba8] sm:$0xff]  ;;  %v757_v5 = vld [vmem:[%s7539_s1 + $0x1720] sm:$0xff] }
  0xeb   :  { %1984 = vmatpush1.msra.mxu0 %v1018_v7  ;;  %1946 = vmatprep.subr.mxu1 %v866_v9  ;;  %v901_v6 = vld [vmem:[%s7539_s1 + $0x1ba0] sm:$0xff] }
  0xec   :  { %1985 = vmatprep.subr.mxu0 %v1010_v10  ;;  %1947 = vmatpush2.msra.mxu1 %v865_v12  ;;  %v749_v7 = vld [vmem:[%s7539_s1 + $0x16e0] sm:$0xff]  ;;  %v748_v10 = vld [vmem:[%s7539_s1 + $0x16d8] sm:$0xff] }
  0xed   :  { %1986 = vmatpush1.msra.mxu0 %v1009_v13  ;;  %1948 = vmatprep.subr.mxu1 %v857_v14  ;;  %v893_v9 = vld [vmem:[%s7539_s1 + $0x1b60] sm:$0xff]  ;;  %v892_v12 = vld [vmem:[%s7539_s1 + $0x1b58] sm:$0xff] }
  0xee   :  { %1987 = vmatprep.subr.mxu0 %v1001_v15  ;;  %1949 = vmatpush2.msra.mxu1 %v856_v17  ;;  %v740_v13 = vld [vmem:[%s7539_s1 + $0x1698] sm:$0xff]  ;;  %v739_v15 = vld [vmem:[%s7539_s1 + $0x1690] sm:$0xff] }
  0xef   :  { %1988 = vmatpush1.msra.mxu0 %v1000_v18  ;;  %1950 = vmatprep.subr.mxu1 %v848_v19  ;;  %v884_v14 = vld [vmem:[%s7539_s1 + $0x1b18] sm:$0xff]  ;;  %v883_v17 = vld [vmem:[%s7539_s1 + $0x1b10] sm:$0xff] }
  0xf0   :  { %1989 = vmatprep.subr.mxu0 %v992_v20  ;;  %1951 = vmatpush2.msra.mxu1 %v847_v22  ;;  %v1163_v18 = vld [vmem:[%s7539_s1 + $0x23d0] sm:$0xff]  ;;  %v1162_v20 = vld [vmem:[%s7539_s1 + $0x23c8] sm:$0xff] }
  0xf1   :  { %1990 = vmatpush1.msra.mxu0 %v991_v23  ;;  %1952 = vmatprep.subr.mxu1 %v839_v24  ;;  %v1307_v19 = vld [vmem:[%s7539_s1 + $0x2850] sm:$0xff]  ;;  %v1306_v22 = vld [vmem:[%s7539_s1 + $0x2848] sm:$0xff] }
  0xf2   :  { %1991 = vmatprep.subr.mxu0 %v983_v25  ;;  %1953 = vmatpush2.msra.mxu1 %v838_v27  ;;  %v1154_v23 = vld [vmem:[%s7539_s1 + $0x2388] sm:$0xff]  ;;  %v1153_v25 = vld [vmem:[%s7539_s1 + $0x2380] sm:$0xff] }
  0xf3   :  { %1992 = vmatpush1.msra.mxu0 %v982_v28  ;;  %1954 = vmatprep.subr.mxu1 %v830_v30  ;;  %v1298_v24 = vld [vmem:[%s7539_s1 + $0x2808] sm:$0xff]  ;;  %v1297_v27 = vld [vmem:[%s7539_s1 + $0x2800] sm:$0xff] }
  0xf4   :  { %1993 = vmatprep.subr.mxu0 %v974_v31  ;;  %1955 = vmatpush2.msra.mxu1 %v829_v32  ;;  %v1145_v28 = vld [vmem:[%s7539_s1 + $0x2340] sm:$0xff]  ;;  %v1144_v31 = vld [vmem:[%s7539_s1 + $0x2338] sm:$0xff] }
  0xf5   :  { %1994 = vmatpush1.msra.mxu0 %v973_v33  ;;  %1956 = vmatprep.subr.mxu1 %v821_v34  ;;  %v1289_v30 = vld [vmem:[%s7539_s1 + $0x27c0] sm:$0xff]  ;;  %v1288_v32 = vld [vmem:[%s7539_s1 + $0x27b8] sm:$0xff] }
  0xf6   :  { %1995 = vmatprep.subr.mxu0 %v965_v35  ;;  %1957 = vmatpush2.msra.mxu1 %v820_v36  ;;  %v1136_v33 = vld [vmem:[%s7539_s1 + $0x22f8] sm:$0xff]  ;;  %v1135_v35 = vld [vmem:[%s7539_s1 + $0x22f0] sm:$0xff] }
  0xf7   :  { %1996 = vmatpush1.msra.mxu0 %v964_v37  ;;  %1958 = vmatprep.subr.mxu1 %v812_v38  ;;  %v1280_v34 = vld [vmem:[%s7539_s1 + $0x2778] sm:$0xff]  ;;  %v1279_v36 = vld [vmem:[%s7539_s1 + $0x2770] sm:$0xff] }
  0xf8   :  { %1997 = vmatprep.subr.mxu0 %v956_v39  ;;  %1959 = vmatpush2.msra.mxu1 %v811_v40  ;;  %v1127_v37 = vld [vmem:[%s7539_s1 + $0x22b0] sm:$0xff]  ;;  %v1126_v39 = vld [vmem:[%s7539_s1 + $0x22a8] sm:$0xff] }
  0xf9   :  { %1998 = vmatpush1.msra.mxu0 %v955_v42  ;;  %1960 = vmatprep.subr.mxu1 %v803_v43  ;;  %v1271_v38 = vld [vmem:[%s7539_s1 + $0x2730] sm:$0xff]  ;;  %v1270_v40 = vld [vmem:[%s7539_s1 + $0x2728] sm:$0xff] }
  0xfa   :  { %1999 = vmatprep.subr.mxu0 %v947_v45  ;;  %1961 = vmatpush2.msra.mxu1 %v802_v46  ;;  %v1118_v42 = vld [vmem:[%s7539_s1 + $0x2268] sm:$0xff]  ;;  %v1117_v45 = vld [vmem:[%s7539_s1 + $0x2260] sm:$0xff] }
  0xfb   :  { %2000 = vmatpush1.msra.mxu0 %v946_v47  ;;  %1962 = vmatprep.subr.mxu1 %v794_v48  ;;  %v1262_v43 = vld [vmem:[%s7539_s1 + $0x26e8] sm:$0xff]  ;;  %v1261_v46 = vld [vmem:[%s7539_s1 + $0x26e0] sm:$0xff] }
  0xfc   :  { %2001 = vmatprep.subr.mxu0 %v938_v49  ;;  %1963 = vmatpush2.msra.mxu1 %v793_v50  ;;  %v1109_v47 = vld [vmem:[%s7539_s1 + $0x2220] sm:$0xff]  ;;  %v1108_v49 = vld [vmem:[%s7539_s1 + $0x2218] sm:$0xff] }
  0xfd   :  { %2002 = vmatpush1.msra.mxu0 %v937_v51  ;;  %1964 = vmatprep.subr.mxu1 %v785_v53  ;;  %v1253_v48 = vld [vmem:[%s7539_s1 + $0x26a0] sm:$0xff]  ;;  %v1252_v50 = vld [vmem:[%s7539_s1 + $0x2698] sm:$0xff] }
  0xfe   :  { %2003 = vmatprep.subr.mxu0 %v929_v54  ;;  %1965 = vmatpush2.msra.mxu1 %v784_v55  ;;  %v1100_v51 = vld [vmem:[%s7539_s1 + $0x21d8] sm:$0xff]  ;;  %v1099_v54 = vld [vmem:[%s7539_s1 + $0x21d0] sm:$0xff] }
  0xff   :  { %2004 = vmatpush1.msra.mxu0 %v928_v56  ;;  %1966 = vmatprep.subr.mxu1 %v776_v57  ;;  %v1244_v53 = vld [vmem:[%s7539_s1 + $0x2658] sm:$0xff]  ;;  %v1243_v55 = vld [vmem:[%s7539_s1 + $0x2650] sm:$0xff] }
 0x100   :  { %2005 = vmatprep.subr.mxu0 %v920_v58  ;;  %1967 = vmatpush2.msra.mxu1 %v775_v59  ;;  %v1091_v56 = vld [vmem:[%s7539_s1 + $0x2190] sm:$0xff]  ;;  %v1090_v58 = vld [vmem:[%s7539_s1 + $0x2188] sm:$0xff] }
 0x101   :  { %2006 = vmatpush1.msra.mxu0 %v919_v60  ;;  %1968 = vmatprep.subr.mxu1 %v767_v61  ;;  %v1235_v57 = vld [vmem:[%s7539_s1 + $0x2610] sm:$0xff]  ;;  %v1234_v59 = vld [vmem:[%s7539_s1 + $0x2608] sm:$0xff] }
 0x102   :  { %2007 = vmatprep.subr.mxu0 %v911_v63  ;;  %1969 = vmatpush2.msra.mxu1 %v766_v0  ;;  %v1082_v60 = vld [vmem:[%s7539_s1 + $0x2148] sm:$0xff]  ;;  %v1081_v63 = vld [vmem:[%s7539_s1 + $0x2140] sm:$0xff] }
 0x103   :  { %2008 = vmatpush1.msra.mxu0 %v910_v1  ;;  %1970 = vmatprep.subr.mxu1 %v758_v2  ;;  %v1226_v61 = vld [vmem:[%s7539_s1 + $0x25c8] sm:$0xff]  ;;  %v1225_v0 = vld [vmem:[%s7539_s1 + $0x25c0] sm:$0xff] }
 0x104   :  { %2009 = vmatprep.subr.mxu0 %v902_v4  ;;  %1971 = vmatpush2.msra.mxu1 %v757_v5  ;;  %v1073_v1 = vld [vmem:[%s7539_s1 + $0x2100] sm:$0xff]  ;;  %v1072_v4 = vld [vmem:[%s7539_s1 + $0x20f8] sm:$0xff] }
 0x105   :  { %2010 = vmatpush1.msra.mxu0 %v901_v6  ;;  %1972 = vmatprep.subr.mxu1 %v749_v7  ;;  %v1217_v2 = vld [vmem:[%s7539_s1 + $0x2580] sm:$0xff]  ;;  %v1216_v5 = vld [vmem:[%s7539_s1 + $0x2578] sm:$0xff] }
 0x106   :  { %2011 = vmatprep.subr.mxu0 %v893_v9  ;;  %1973 = vmatpush2.msra.mxu1 %v748_v10  ;;  %v1064_v6 = vld [vmem:[%s7539_s1 + $0x20b8] sm:$0xff]  ;;  %v1063_v9 = vld [vmem:[%s7539_s1 + $0x20b0] sm:$0xff] }
 0x107   :  { %2012 = vmatpush1.msra.mxu0 %v892_v12  ;;  %1974 = vmatprep.subr.mxu1 %v740_v13  ;;  %v1208_v7 = vld [vmem:[%s7539_s1 + $0x2538] sm:$0xff]  ;;  %v1207_v10 = vld [vmem:[%s7539_s1 + $0x2530] sm:$0xff] }
 0x108   :  { %2013 = vmatprep.subr.mxu0 %v884_v14  ;;  %1975 = vmatpush2.msra.mxu1 %v739_v15  ;;  %v1055_v12 = vld [vmem:[%s7539_s1 + $0x2070] sm:$0xff]  ;;  %v1054_v14 = vld [vmem:[%s7539_s1 + $0x2068] sm:$0xff] }
 0x109   :  { %1976 = vmatprep.mubr.f32.mxu1 %v4280_v26  ;;  %2014 = vmatpush1.msra.mxu0 %v883_v17  ;;  %v1199_v13 = vld [vmem:[%s7539_s1 + $0x24f0] sm:$0xff]  ;;  %v1198_v15 = vld [vmem:[%s7539_s1 + $0x24e8] sm:$0xff] }
 0x10a   :  { %1977 = vmatmul.mubr.f32.vlgmr.msra.gmra.mxu1 %v4249_v16  ;;  %2015 = vmatprep.subr.mxu0 %v1163_v18  ;;  %v1046_v17 = vld [vmem:[%s7539_s1 + $0x2028] sm:$0xff] }
 0x10b   :  { %2054 = vmatprep.subr.mxu1 %v1307_v19  ;;  %2016 = vmatpush2.msra.mxu0 %v1162_v20  ;;  %v1190_v18 = vld [vmem:[%s7539_s1 + $0x24a8] sm:$0xff]  ;;  %v1045_v19 = vld [vmem:[%s7539_s1 + $0x2020] sm:$0xff] }
 0x10c   :  { %2055 = vmatpush1.msra.mxu1 %v1306_v22  ;;  %2017 = vmatprep.subr.mxu0 %v1154_v23  ;;  %v1189_v20 = vld [vmem:[%s7539_s1 + $0x24a0] sm:$0xff] }
 0x10d   :  { %2056 = vmatprep.subr.mxu1 %v1298_v24  ;;  %2018 = vmatpush2.msra.mxu0 %v1153_v25  ;;  %v1037_v22 = vld [vmem:[%s7539_s1 + $0x1fe0] sm:$0xff]  ;;  %v1036_v24 = vld [vmem:[%s7539_s1 + $0x1fd8] sm:$0xff] }
 0x10e   :  { %2057 = vmatpush1.msra.mxu1 %v1297_v27  ;;  %2019 = vmatprep.subr.mxu0 %v1145_v28  ;;  %v1181_v23 = vld [vmem:[%s7539_s1 + $0x2460] sm:$0xff]  ;;  %v1180_v25 = vld [vmem:[%s7539_s1 + $0x2458] sm:$0xff] }
 0x10f   :  { %2058 = vmatprep.subr.mxu1 %v1289_v30  ;;  %2020 = vmatpush2.msra.mxu0 %v1144_v31  ;;  %v1028_v27 = vld [vmem:[%s7539_s1 + $0x1f98] sm:$0xff]  ;;  %v1027_v30 = vld [vmem:[%s7539_s1 + $0x1f90] sm:$0xff] }
 0x110   :  { %2059 = vmatpush1.msra.mxu1 %v1288_v32  ;;  %2021 = vmatprep.subr.mxu0 %v1136_v33  ;;  %v1172_v28 = vld [vmem:[%s7539_s1 + $0x2418] sm:$0xff]  ;;  %v1171_v31 = vld [vmem:[%s7539_s1 + $0x2410] sm:$0xff]  ;;  %v157_v32 = vld [vmem:[%s7539_s1 + $0x460] sm:$0xff] }
 0x111   :  { %2060 = vmatprep.subr.mxu1 %v1280_v34  ;;  %2022 = vmatpush2.msra.mxu0 %v1135_v35  ;;  %v445_v33 = vld [vmem:[%s7539_s1 + $0xd60] sm:$0xff]  ;;  %v156_v34 = vld [vmem:[%s7539_s1 + $0x458] sm:$0xff] }
 0x112   :  { %2061 = vmatpush1.msra.mxu1 %v1279_v36  ;;  %2023 = vmatprep.subr.mxu0 %v1127_v37  ;;  %v444_v35 = vld [vmem:[%s7539_s1 + $0xd58] sm:$0xff] }
 0x113   :  { %2062 = vmatprep.subr.mxu1 %v1271_v38  ;;  %2024 = vmatpush2.msra.mxu0 %v1126_v39  ;;  %v148_v36 = vld [vmem:[%s7539_s1 + $0x418] sm:$0xff]  ;;  %v3454_v38 = vld.sshfl [vmem:[%s7540_s0 + $0x10] sm:$0x3 pattern:$0x76325410] }
 0x114   :  { %2063 = vmatpush1.msra.mxu1 %v1270_v40  ;;  %2025 = vmatprep.subr.mxu0 %v1118_v42  ;;  %v436_v37 = vld [vmem:[%s7539_s1 + $0xd18] sm:$0xff]  ;;  %v147_v39 = vld [vmem:[%s7539_s1 + $0x410] sm:$0xff] }
 0x115   :  { %2064 = vmatprep.subr.mxu1 %v1262_v43  ;;  %2026 = vmatpush2.msra.mxu0 %v1117_v45  ;;  %v435_v40 = vld [vmem:[%s7539_s1 + $0xd10] sm:$0xff]  ;;  %v138_v45 = vld [vmem:[%s7539_s1 + $0x3c8] sm:$0xff] }
 0x116   :  { %2065 = vmatpush1.msra.mxu1 %v1261_v46  ;;  %2027 = vmatprep.subr.mxu0 %v1109_v47  ;;  %v139_v42 = vld [vmem:[%s7539_s1 + $0x3d0] sm:$0xff]  ;;  %v426_v46 = vld [vmem:[%s7539_s1 + $0xcc8] sm:$0xff] }
 0x117   :  { %2066 = vmatprep.subr.mxu1 %v1253_v48  ;;  %2028 = vmatpush2.msra.mxu0 %v1108_v49  ;;  %v427_v43 = vld [vmem:[%s7539_s1 + $0xcd0] sm:$0xff]  ;;  %v130_v47 = vld [vmem:[%s7539_s1 + $0x388] sm:$0xff]  ;;  %v129_v49 = vld [vmem:[%s7539_s1 + $0x380] sm:$0xff] }
 0x118   :  { %2067 = vmatpush1.msra.mxu1 %v1252_v50  ;;  %2029 = vmatprep.subr.mxu0 %v1100_v51  ;;  %v418_v48 = vld [vmem:[%s7539_s1 + $0xc88] sm:$0xff]  ;;  %v417_v50 = vld [vmem:[%s7539_s1 + $0xc80] sm:$0xff] }
 0x119   :  { %2068 = vmatprep.subr.mxu1 %v1244_v53  ;;  %2030 = vmatpush2.msra.mxu0 %v1099_v54  ;;  %v121_v51 = vld [vmem:[%s7539_s1 + $0x340] sm:$0xff]  ;;  %v120_v54 = vld [vmem:[%s7539_s1 + $0x338] sm:$0xff] }
 0x11a   :  { %2069 = vmatpush1.msra.mxu1 %v1243_v55  ;;  %2031 = vmatprep.subr.mxu0 %v1091_v56  ;;  %v409_v53 = vld [vmem:[%s7539_s1 + $0xc40] sm:$0xff]  ;;  %v408_v55 = vld [vmem:[%s7539_s1 + $0xc38] sm:$0xff] }
 0x11b   :  { %2070 = vmatprep.subr.mxu1 %v1235_v57  ;;  %2032 = vmatpush2.msra.mxu0 %v1090_v58  ;;  %v112_v56 = vld [vmem:[%s7539_s1 + $0x2f8] sm:$0xff]  ;;  %v111_v58 = vld [vmem:[%s7539_s1 + $0x2f0] sm:$0xff] }
 0x11c   :  { %2071 = vmatpush1.msra.mxu1 %v1234_v59  ;;  %2033 = vmatprep.subr.mxu0 %v1082_v60  ;;  %v400_v57 = vld [vmem:[%s7539_s1 + $0xbf8] sm:$0xff]  ;;  %v399_v59 = vld [vmem:[%s7539_s1 + $0xbf0] sm:$0xff] }
 0x11d   :  { %2072 = vmatprep.subr.mxu1 %v1226_v61  ;;  %2034 = vmatpush2.msra.mxu0 %v1081_v63  ;;  %v103_v60 = vld [vmem:[%s7539_s1 + $0x2b0] sm:$0xff]  ;;  %v102_v63 = vld [vmem:[%s7539_s1 + $0x2a8] sm:$0xff] }
 0x11e   :  { %2073 = vmatpush1.msra.mxu1 %v1225_v0  ;;  %2035 = vmatprep.subr.mxu0 %v1073_v1  ;;  %v391_v61 = vld [vmem:[%s7539_s1 + $0xbb0] sm:$0xff]  ;;  %v390_v0 = vld [vmem:[%s7539_s1 + $0xba8] sm:$0xff] }
 0x11f   :  { %2074 = vmatprep.subr.mxu1 %v1217_v2  ;;  %2036 = vmatpush2.msra.mxu0 %v1072_v4  ;;  %v94_v1 = vld [vmem:[%s7539_s1 + $0x268] sm:$0xff]  ;;  %v93_v4 = vld [vmem:[%s7539_s1 + $0x260] sm:$0xff] }
 0x120   :  { %2075 = vmatpush1.msra.mxu1 %v1216_v5  ;;  %2037 = vmatprep.subr.mxu0 %v1064_v6  ;;  %v382_v2 = vld [vmem:[%s7539_s1 + $0xb68] sm:$0xff]  ;;  %v381_v5 = vld [vmem:[%s7539_s1 + $0xb60] sm:$0xff] }
 0x121   :  { %2076 = vmatprep.subr.mxu1 %v1208_v7  ;;  %2038 = vmatpush2.msra.mxu0 %v1063_v9  ;;  %v85_v6 = vld [vmem:[%s7539_s1 + $0x220] sm:$0xff]  ;;  %v84_v9 = vld [vmem:[%s7539_s1 + $0x218] sm:$0xff] }
 0x122   :  { %2077 = vmatpush1.msra.mxu1 %v1207_v10  ;;  %2039 = vmatprep.subr.mxu0 %v1055_v12  ;;  %v373_v7 = vld [vmem:[%s7539_s1 + $0xb20] sm:$0xff]  ;;  %v372_v10 = vld [vmem:[%s7539_s1 + $0xb18] sm:$0xff] }
 0x123   :  { %2078 = vmatprep.subr.mxu1 %v1199_v13  ;;  %2040 = vmatpush2.msra.mxu0 %v1054_v14  ;;  %v76_v12 = vld [vmem:[%s7539_s1 + $0x1d8] sm:$0xff]  ;;  %v75_v14 = vld [vmem:[%s7539_s1 + $0x1d0] sm:$0xff] }
 0x124   :  { %2079 = vmatpush1.msra.mxu1 %v1198_v15  ;;  %2041 = vmatprep.subr.mxu0 %v1046_v17  ;;  %v364_v13 = vld [vmem:[%s7539_s1 + $0xad8] sm:$0xff]  ;;  %v363_v15 = vld [vmem:[%s7539_s1 + $0xad0] sm:$0xff] }
 0x125   :  { %2080 = vmatprep.subr.mxu1 %v1190_v18  ;;  %2042 = vmatpush2.msra.mxu0 %v1045_v19  ;;  %v67_v17 = vld [vmem:[%s7539_s1 + $0x190] sm:$0xff]  ;;  %v66_v19 = vld [vmem:[%s7539_s1 + $0x188] sm:$0xff] }
 0x126   :  { %2081 = vmatpush1.msra.mxu1 %v1189_v20  ;;  %2043 = vmatprep.subr.mxu0 %v1037_v22  ;;  %v355_v18 = vld [vmem:[%s7539_s1 + $0xa90] sm:$0xff]  ;;  %v354_v20 = vld [vmem:[%s7539_s1 + $0xa88] sm:$0xff] }
 0x127   :  { %2082 = vmatprep.subr.mxu1 %v1181_v23  ;;  %2044 = vmatpush2.msra.mxu0 %v1036_v24  ;;  %v58_v22 = vld [vmem:[%s7539_s1 + $0x148] sm:$0xff]  ;;  %v57_v24 = vld [vmem:[%s7539_s1 + $0x140] sm:$0xff] }
 0x128   :  { %2083 = vmatpush1.msra.mxu1 %v1180_v25  ;;  %2045 = vmatprep.subr.mxu0 %v1028_v27  ;;  %v346_v23 = vld [vmem:[%s7539_s1 + $0xa48] sm:$0xff]  ;;  %v345_v25 = vld [vmem:[%s7539_s1 + $0xa40] sm:$0xff] }
 0x129   :  { %2084 = vmatprep.subr.mxu1 %v1172_v28  ;;  %2046 = vmatpush2.msra.mxu0 %v1027_v30  ;;  %v49_v27 = vld [vmem:[%s7539_s1 + $0x100] sm:$0xff]  ;;  %v48_v30 = vld [vmem:[%s7539_s1 + $0xf8] sm:$0xff] }
 0x12a   :  { %2047 = vmatprep.mubr.f32.mxu0 %v4290_v29  ;;  %2085 = vmatpush1.msra.mxu1 %v1171_v31  ;;  %v337_v28 = vld [vmem:[%s7539_s1 + $0xa00] sm:$0xff]  ;;  %v336_v31 = vld [vmem:[%s7539_s1 + $0x9f8] sm:$0xff] }
 0x12b   :  { %2048 = vmatmul.mubr.f32.vlgmr.msra.gmra.mxu0 %v4264_v21  ;;  %2118 = vmatprep.mubr.f32.mxu1 %v3459_v44 }
 0x12c   :  { %2125 = vmatprep.subr.mxu0 %v157_v32  ;;  %2196 = vmatprep.subr.mxu1 %v445_v33  ;;  %v40_v32 = vld [vmem:[%s7539_s1 + $0xb8] sm:$0xff] }
 0x12d   :  { %2119 = vmatmul.mubr.f32.vlgmr.msra.gmra.mxu1 %v3454_v38  ;;  %2126 = vmatpush1.msra.mxu0 %v156_v34  ;;  %v328_v33 = vld [vmem:[%s7539_s1 + $0x9b8] sm:$0xff]  ;;  %v39_v34 = vld [vmem:[%s7539_s1 + $0xb0] sm:$0xff]  ;;  %v30_v38 = vld [vmem:[%s7539_s1 + $0x68] sm:$0xff] }
 0x12e   :  { %2197 = vmatpush1.msra.mxu1 %v444_v35  ;;  %2127 = vmatprep.subr.mxu0 %v148_v36  ;;  %v327_v35 = vld [vmem:[%s7539_s1 + $0x9b0] sm:$0xff] }
 0x12f   :  { %2198 = vmatprep.subr.mxu1 %v436_v37  ;;  %2128 = vmatpush1.msra.mxu0 %v147_v39  ;;  %v31_v36 = vld [vmem:[%s7539_s1 + $0x70] sm:$0xff]  ;;  %v318_v39 = vld [vmem:[%s7539_s1 + $0x968] sm:$0xff] }
 0x130   :  { %2199 = vmatpush1.msra.mxu1 %v435_v40  ;;  %2129 = vmatprep.subr.mxu0 %v139_v42  ;;  %v319_v37 = vld [vmem:[%s7539_s1 + $0x970] sm:$0xff]  ;;  %v22_v40 = vld [vmem:[%s7539_s1 + $0x28] sm:$0xff] }
 0x131   :  { %2200 = vmatprep.subr.mxu1 %v427_v43  ;;  %2130 = vmatpush1.msra.mxu0 %v138_v45  ;;  %v310_v42 = vld [vmem:[%s7539_s1 + $0x928] sm:$0xff]  ;;  %v21_v43 = vld [vmem:[%s7539_s1 + $0x20] sm:$0xff] }
 0x132   :  { %2201 = vmatpush1.msra.mxu1 %v426_v46  ;;  %2131 = vmatprep.subr.mxu0 %v130_v47  ;;  %v309_v45 = vld [vmem:[%s7539_s1 + $0x920] sm:$0xff] }
 0x133   :  { %2202 = vmatprep.subr.mxu1 %v418_v48  ;;  %2132 = vmatpush1.msra.mxu0 %v129_v49  ;;  %v301_v46 = vld [vmem:[%s7539_s1 + $0x8e0] sm:$0xff]  ;;  %v300_v48 = vld [vmem:[%s7539_s1 + $0x8d8] sm:$0xff] }
 0x134   :  { %2203 = vmatpush1.msra.mxu1 %v417_v50  ;;  %2133 = vmatprep.subr.mxu0 %v121_v51  ;;  %v589_v47 = vld [vmem:[%s7539_s1 + $0x11e0] sm:$0xff]  ;;  %v588_v49 = vld [vmem:[%s7539_s1 + $0x11d8] sm:$0xff] }
 0x135   :  { %2204 = vmatprep.subr.mxu1 %v409_v53  ;;  %2134 = vmatpush1.msra.mxu0 %v120_v54  ;;  %v292_v50 = vld [vmem:[%s7539_s1 + $0x898] sm:$0xff]  ;;  %v291_v53 = vld [vmem:[%s7539_s1 + $0x890] sm:$0xff] }
 0x136   :  { %2205 = vmatpush1.msra.mxu1 %v408_v55  ;;  %2135 = vmatprep.subr.mxu0 %v112_v56  ;;  %v580_v51 = vld [vmem:[%s7539_s1 + $0x1198] sm:$0xff]  ;;  %v579_v54 = vld [vmem:[%s7539_s1 + $0x1190] sm:$0xff] }
 0x137   :  { %2206 = vmatprep.subr.mxu1 %v400_v57  ;;  %2136 = vmatpush1.msra.mxu0 %v111_v58  ;;  %v283_v55 = vld [vmem:[%s7539_s1 + $0x850] sm:$0xff]  ;;  %v282_v57 = vld [vmem:[%s7539_s1 + $0x848] sm:$0xff] }
 0x138   :  { %2207 = vmatpush1.msra.mxu1 %v399_v59  ;;  %2137 = vmatprep.subr.mxu0 %v103_v60  ;;  %v571_v56 = vld [vmem:[%s7539_s1 + $0x1150] sm:$0xff]  ;;  %v570_v58 = vld [vmem:[%s7539_s1 + $0x1148] sm:$0xff] }
 0x139   :  { %2208 = vmatprep.subr.mxu1 %v391_v61  ;;  %2138 = vmatpush1.msra.mxu0 %v102_v63  ;;  %v274_v59 = vld [vmem:[%s7539_s1 + $0x808] sm:$0xff]  ;;  %v273_v61 = vld [vmem:[%s7539_s1 + $0x800] sm:$0xff] }
 0x13a   :  { %2209 = vmatpush1.msra.mxu1 %v390_v0  ;;  %2139 = vmatprep.subr.mxu0 %v94_v1  ;;  %v562_v60 = vld [vmem:[%s7539_s1 + $0x1108] sm:$0xff]  ;;  %v561_v63 = vld [vmem:[%s7539_s1 + $0x1100] sm:$0xff] }
 0x13b   :  { %2210 = vmatprep.subr.mxu1 %v382_v2  ;;  %2140 = vmatpush1.msra.mxu0 %v93_v4  ;;  %v265_v0 = vld [vmem:[%s7539_s1 + $0x7c0] sm:$0xff]  ;;  %v264_v2 = vld [vmem:[%s7539_s1 + $0x7b8] sm:$0xff] }
 0x13c   :  { %2211 = vmatpush1.msra.mxu1 %v381_v5  ;;  %2141 = vmatprep.subr.mxu0 %v85_v6  ;;  %v553_v1 = vld [vmem:[%s7539_s1 + $0x10c0] sm:$0xff]  ;;  %v552_v4 = vld [vmem:[%s7539_s1 + $0x10b8] sm:$0xff] }
 0x13d   :  { %2212 = vmatprep.subr.mxu1 %v373_v7  ;;  %2142 = vmatpush1.msra.mxu0 %v84_v9  ;;  %v256_v5 = vld [vmem:[%s7539_s1 + $0x778] sm:$0xff]  ;;  %v255_v7 = vld [vmem:[%s7539_s1 + $0x770] sm:$0xff] }
 0x13e   :  { %2213 = vmatpush1.msra.mxu1 %v372_v10  ;;  %2143 = vmatprep.subr.mxu0 %v76_v12  ;;  %v544_v6 = vld [vmem:[%s7539_s1 + $0x1078] sm:$0xff]  ;;  %v543_v9 = vld [vmem:[%s7539_s1 + $0x1070] sm:$0xff] }
 0x13f   :  { %2214 = vmatprep.subr.mxu1 %v364_v13  ;;  %2144 = vmatpush1.msra.mxu0 %v75_v14  ;;  %v247_v10 = vld [vmem:[%s7539_s1 + $0x730] sm:$0xff]  ;;  %v246_v13 = vld [vmem:[%s7539_s1 + $0x728] sm:$0xff] }
 0x140   :  { %2215 = vmatpush1.msra.mxu1 %v363_v15  ;;  %2145 = vmatprep.subr.mxu0 %v67_v17  ;;  %v535_v12 = vld [vmem:[%s7539_s1 + $0x1030] sm:$0xff]  ;;  %v534_v14 = vld [vmem:[%s7539_s1 + $0x1028] sm:$0xff] }
 0x141   :  { %2216 = vmatprep.subr.mxu1 %v355_v18  ;;  %2146 = vmatpush1.msra.mxu0 %v66_v19  ;;  %v238_v15 = vld [vmem:[%s7539_s1 + $0x6e8] sm:$0xff]  ;;  %v237_v18 = vld [vmem:[%s7539_s1 + $0x6e0] sm:$0xff] }
 0x142   :  { %2217 = vmatpush1.msra.mxu1 %v354_v20  ;;  %2147 = vmatprep.subr.mxu0 %v58_v22  ;;  %v526_v17 = vld [vmem:[%s7539_s1 + $0xfe8] sm:$0xff]  ;;  %v525_v19 = vld [vmem:[%s7539_s1 + $0xfe0] sm:$0xff] }
 0x143   :  { %2218 = vmatprep.subr.mxu1 %v346_v23  ;;  %2148 = vmatpush1.msra.mxu0 %v57_v24  ;;  %v229_v20 = vld [vmem:[%s7539_s1 + $0x6a0] sm:$0xff]  ;;  %v228_v23 = vld [vmem:[%s7539_s1 + $0x698] sm:$0xff] }
 0x144   :  { %2219 = vmatpush1.msra.mxu1 %v345_v25  ;;  %2149 = vmatprep.subr.mxu0 %v49_v27  ;;  %v517_v22 = vld [vmem:[%s7539_s1 + $0xfa0] sm:$0xff]  ;;  %v516_v24 = vld [vmem:[%s7539_s1 + $0xf98] sm:$0xff] }
 0x145   :  { %2220 = vmatprep.subr.mxu1 %v337_v28  ;;  %2150 = vmatpush1.msra.mxu0 %v48_v30  ;;  %v220_v25 = vld [vmem:[%s7539_s1 + $0x658] sm:$0xff]  ;;  %v219_v28 = vld [vmem:[%s7539_s1 + $0x650] sm:$0xff] }
 0x146   :  { %2221 = vmatpush1.msra.mxu1 %v336_v31  ;;  %2151 = vmatprep.subr.mxu0 %v40_v32  ;;  %v508_v27 = vld [vmem:[%s7539_s1 + $0xf58] sm:$0xff]  ;;  %v507_v30 = vld [vmem:[%s7539_s1 + $0xf50] sm:$0xff] }
 0x147   :  { %2222 = vmatprep.subr.mxu1 %v328_v33  ;;  %2152 = vmatpush1.msra.mxu0 %v39_v34  ;;  %v211_v31 = vld [vmem:[%s7539_s1 + $0x610] sm:$0xff]  ;;  %v210_v33 = vld [vmem:[%s7539_s1 + $0x608] sm:$0xff] }
 0x148   :  { %2223 = vmatpush1.msra.mxu1 %v327_v35  ;;  %2153 = vmatprep.subr.mxu0 %v31_v36  ;;  %v499_v32 = vld [vmem:[%s7539_s1 + $0xf10] sm:$0xff]  ;;  %v498_v34 = vld [vmem:[%s7539_s1 + $0xf08] sm:$0xff] }
 0x149   :  { %2224 = vmatprep.subr.mxu1 %v319_v37  ;;  %2154 = vmatpush1.msra.mxu0 %v30_v38  ;;  %v202_v35 = vld [vmem:[%s7539_s1 + $0x5c8] sm:$0xff]  ;;  %v201_v37 = vld [vmem:[%s7539_s1 + $0x5c0] sm:$0xff] }
 0x14a   :  { %2225 = vmatpush1.msra.mxu1 %v318_v39  ;;  %2155 = vmatprep.subr.mxu0 %v22_v40  ;;  %v490_v36 = vld [vmem:[%s7539_s1 + $0xec8] sm:$0xff]  ;;  %v489_v38 = vld [vmem:[%s7539_s1 + $0xec0] sm:$0xff] }
 0x14b   :  { %2226 = vmatprep.subr.mxu1 %v310_v42  ;;  %2156 = vmatpush1.msra.mxu0 %v21_v43  ;;  %v193_v39 = vld [vmem:[%s7539_s1 + $0x580] sm:$0xff]  ;;  %v192_v42 = vld [vmem:[%s7539_s1 + $0x578] sm:$0xff] }
 0x14c   :  { %2227 = vmatpush1.msra.mxu1 %v309_v45  ;;  %2157 = vmatprep.subr.mxu0 %v301_v46  ;;  %v481_v40 = vld [vmem:[%s7539_s1 + $0xe80] sm:$0xff]  ;;  %v480_v43 = vld [vmem:[%s7539_s1 + $0xe78] sm:$0xff] }
 0x14d   :  { %2228 = vmatprep.subr.mxu1 %v589_v47  ;;  %2158 = vmatpush2.msra.mxu0 %v300_v48  ;;  %v184_v45 = vld [vmem:[%s7539_s1 + $0x538] sm:$0xff]  ;;  %v183_v47 = vld [vmem:[%s7539_s1 + $0x530] sm:$0xff] }
 0x14e   :  { %2229 = vmatpush2.msra.mxu1 %v588_v49  ;;  %2159 = vmatprep.subr.mxu0 %v292_v50  ;;  %v472_v46 = vld [vmem:[%s7539_s1 + $0xe38] sm:$0xff]  ;;  %v471_v48 = vld [vmem:[%s7539_s1 + $0xe30] sm:$0xff] }
 0x14f   :  { %2230 = vmatprep.subr.mxu1 %v580_v51  ;;  %2160 = vmatpush2.msra.mxu0 %v291_v53  ;;  %v175_v49 = vld [vmem:[%s7539_s1 + $0x4f0] sm:$0xff]  ;;  %v174_v51 = vld [vmem:[%s7539_s1 + $0x4e8] sm:$0xff] }
 0x150   :  { %2231 = vmatpush2.msra.mxu1 %v579_v54  ;;  %2161 = vmatprep.subr.mxu0 %v283_v55  ;;  %v463_v50 = vld [vmem:[%s7539_s1 + $0xdf0] sm:$0xff]  ;;  %v462_v53 = vld [vmem:[%s7539_s1 + $0xde8] sm:$0xff] }
 0x151   :  { %2232 = vmatprep.subr.mxu1 %v571_v56  ;;  %2162 = vmatpush2.msra.mxu0 %v282_v57  ;;  %v166_v54 = vld [vmem:[%s7539_s1 + $0x4a8] sm:$0xff]  ;;  %v165_v56 = vld [vmem:[%s7539_s1 + $0x4a0] sm:$0xff] }
 0x152   :  { %2233 = vmatpush2.msra.mxu1 %v570_v58  ;;  %2163 = vmatprep.subr.mxu0 %v274_v59  ;;  %v454_v55 = vld [vmem:[%s7539_s1 + $0xda8] sm:$0xff]  ;;  %v453_v57 = vld [vmem:[%s7539_s1 + $0xda0] sm:$0xff] }
 0x153   :  { %2234 = vmatprep.subr.mxu1 %v562_v60  ;;  %2164 = vmatpush2.msra.mxu0 %v273_v61  ;;  %v733_v58 = vld [vmem:[%s7539_s1 + $0x1660] sm:$0xff]  ;;  %v732_v60 = vld [vmem:[%s7539_s1 + $0x1658] sm:$0xff] }
 0x154   :  { %2235 = vmatpush2.msra.mxu1 %v561_v63  ;;  %2165 = vmatprep.subr.mxu0 %v265_v0  ;;  %v1021_v59 = vld [vmem:[%s7539_s1 + $0x1f60] sm:$0xff]  ;;  %v1020_v61 = vld [vmem:[%s7539_s1 + $0x1f58] sm:$0xff] }
 0x155   :  { %2236 = vmatprep.subr.mxu1 %v553_v1  ;;  %2166 = vmatpush2.msra.mxu0 %v264_v2  ;;  %v724_v63 = vld [vmem:[%s7539_s1 + $0x1618] sm:$0xff]  ;;  %v723_v1 = vld [vmem:[%s7539_s1 + $0x1610] sm:$0xff] }
 0x156   :  { %2237 = vmatpush2.msra.mxu1 %v552_v4  ;;  %2167 = vmatprep.subr.mxu0 %v256_v5  ;;  %v1012_v0 = vld [vmem:[%s7539_s1 + $0x1f18] sm:$0xff]  ;;  %v1011_v2 = vld [vmem:[%s7539_s1 + $0x1f10] sm:$0xff] }
 0x157   :  { %2238 = vmatprep.subr.mxu1 %v544_v6  ;;  %2168 = vmatpush2.msra.mxu0 %v255_v7  ;;  %v715_v4 = vld [vmem:[%s7539_s1 + $0x15d0] sm:$0xff]  ;;  %v714_v6 = vld [vmem:[%s7539_s1 + $0x15c8] sm:$0xff] }
 0x158   :  { %2239 = vmatpush2.msra.mxu1 %v543_v9  ;;  %2169 = vmatprep.subr.mxu0 %v247_v10  ;;  %v1003_v5 = vld [vmem:[%s7539_s1 + $0x1ed0] sm:$0xff]  ;;  %v1002_v7 = vld [vmem:[%s7539_s1 + $0x1ec8] sm:$0xff] }
 0x159   :  { %2240 = vmatprep.subr.mxu1 %v535_v12  ;;  %2170 = vmatpush2.msra.mxu0 %v246_v13  ;;  %v706_v9 = vld [vmem:[%s7539_s1 + $0x1588] sm:$0xff]  ;;  %v705_v12 = vld [vmem:[%s7539_s1 + $0x1580] sm:$0xff] }
 0x15a   :  { %2241 = vmatpush2.msra.mxu1 %v534_v14  ;;  %2171 = vmatprep.subr.mxu0 %v238_v15  ;;  %v994_v10 = vld [vmem:[%s7539_s1 + $0x1e88] sm:$0xff]  ;;  %v993_v13 = vld [vmem:[%s7539_s1 + $0x1e80] sm:$0xff] }
 0x15b   :  { %2242 = vmatprep.subr.mxu1 %v526_v17  ;;  %2172 = vmatpush2.msra.mxu0 %v237_v18  ;;  %v697_v14 = vld [vmem:[%s7539_s1 + $0x1540] sm:$0xff]  ;;  %v696_v17 = vld [vmem:[%s7539_s1 + $0x1538] sm:$0xff] }
 0x15c   :  { %2243 = vmatpush2.msra.mxu1 %v525_v19  ;;  %2173 = vmatprep.subr.mxu0 %v229_v20  ;;  %v985_v15 = vld [vmem:[%s7539_s1 + $0x1e40] sm:$0xff]  ;;  %v984_v18 = vld [vmem:[%s7539_s1 + $0x1e38] sm:$0xff] }
 0x15d   :  { %2244 = vmatprep.subr.mxu1 %v517_v22  ;;  %2174 = vmatpush2.msra.mxu0 %v228_v23  ;;  %v688_v19 = vld [vmem:[%s7539_s1 + $0x14f8] sm:$0xff]  ;;  %v687_v22 = vld [vmem:[%s7539_s1 + $0x14f0] sm:$0xff] }
 0x15e   :  { %2245 = vmatpush2.msra.mxu1 %v516_v24  ;;  %2175 = vmatprep.subr.mxu0 %v220_v25  ;;  %v976_v20 = vld [vmem:[%s7539_s1 + $0x1df8] sm:$0xff]  ;;  %v975_v23 = vld [vmem:[%s7539_s1 + $0x1df0] sm:$0xff] }
 0x15f   :  { %2246 = vmatprep.subr.mxu1 %v508_v27  ;;  %2176 = vmatpush2.msra.mxu0 %v219_v28  ;;  %v679_v24 = vld [vmem:[%s7539_s1 + $0x14b0] sm:$0xff]  ;;  %v678_v27 = vld [vmem:[%s7539_s1 + $0x14a8] sm:$0xff] }
 0x160   :  { %2247 = vmatpush2.msra.mxu1 %v507_v30  ;;  %2177 = vmatprep.subr.mxu0 %v211_v31  ;;  %v967_v25 = vld [vmem:[%s7539_s1 + $0x1db0] sm:$0xff]  ;;  %v966_v28 = vld [vmem:[%s7539_s1 + $0x1da8] sm:$0xff] }
 0x161   :  { %2248 = vmatprep.subr.mxu1 %v499_v32  ;;  %2178 = vmatpush2.msra.mxu0 %v210_v33  ;;  %v670_v30 = vld [vmem:[%s7539_s1 + $0x1468] sm:$0xff]  ;;  %v669_v32 = vld [vmem:[%s7539_s1 + $0x1460] sm:$0xff] }
 0x162   :  { %2249 = vmatpush2.msra.mxu1 %v498_v34  ;;  %2179 = vmatprep.subr.mxu0 %v202_v35  ;;  %v958_v31 = vld [vmem:[%s7539_s1 + $0x1d68] sm:$0xff]  ;;  %v957_v33 = vld [vmem:[%s7539_s1 + $0x1d60] sm:$0xff] }
 0x163   :  { %2250 = vmatprep.subr.mxu1 %v490_v36  ;;  %2180 = vmatpush2.msra.mxu0 %v201_v37  ;;  %v661_v34 = vld [vmem:[%s7539_s1 + $0x1420] sm:$0xff]  ;;  %v660_v36 = vld [vmem:[%s7539_s1 + $0x1418] sm:$0xff] }
 0x164   :  { %2251 = vmatpush2.msra.mxu1 %v489_v38  ;;  %2181 = vmatprep.subr.mxu0 %v193_v39  ;;  %v949_v35 = vld [vmem:[%s7539_s1 + $0x1d20] sm:$0xff]  ;;  %v948_v37 = vld [vmem:[%s7539_s1 + $0x1d18] sm:$0xff] }
 0x165   :  { %2252 = vmatprep.subr.mxu1 %v481_v40  ;;  %2182 = vmatpush2.msra.mxu0 %v192_v42  ;;  %v652_v38 = vld [vmem:[%s7539_s1 + $0x13d8] sm:$0xff]  ;;  %v651_v40 = vld [vmem:[%s7539_s1 + $0x13d0] sm:$0xff] }
 0x166   :  { %2253 = vmatpush2.msra.mxu1 %v480_v43  ;;  %2183 = vmatprep.subr.mxu0 %v184_v45  ;;  %v940_v39 = vld [vmem:[%s7539_s1 + $0x1cd8] sm:$0xff]  ;;  %v939_v42 = vld [vmem:[%s7539_s1 + $0x1cd0] sm:$0xff] }
 0x167   :  { %2254 = vmatprep.subr.mxu1 %v472_v46  ;;  %2184 = vmatpush2.msra.mxu0 %v183_v47  ;;  %v643_v43 = vld [vmem:[%s7539_s1 + $0x1390] sm:$0xff]  ;;  %v642_v46 = vld [vmem:[%s7539_s1 + $0x1388] sm:$0xff] }
 0x168   :  { %2255 = vmatpush2.msra.mxu1 %v471_v48  ;;  %2185 = vmatprep.subr.mxu0 %v175_v49  ;;  %v931_v45 = vld [vmem:[%s7539_s1 + $0x1c90] sm:$0xff]  ;;  %v930_v47 = vld [vmem:[%s7539_s1 + $0x1c88] sm:$0xff] }
 0x169   :  { %2256 = vmatprep.subr.mxu1 %v463_v50  ;;  %2186 = vmatpush2.msra.mxu0 %v174_v51  ;;  %v634_v48 = vld [vmem:[%s7539_s1 + $0x1348] sm:$0xff]  ;;  %v633_v50 = vld [vmem:[%s7539_s1 + $0x1340] sm:$0xff] }
 0x16a   :  { %2257 = vmatpush2.msra.mxu1 %v462_v53  ;;  %2187 = vmatprep.subr.mxu0 %v166_v54  ;;  %v922_v49 = vld [vmem:[%s7539_s1 + $0x1c48] sm:$0xff]  ;;  %v921_v51 = vld [vmem:[%s7539_s1 + $0x1c40] sm:$0xff] }
 0x16b   :  { %2258 = vmatprep.subr.mxu1 %v454_v55  ;;  %2188 = vmatpush2.msra.mxu0 %v165_v56  ;;  %v625_v53 = vld [vmem:[%s7539_s1 + $0x1300] sm:$0xff]  ;;  %v624_v55 = vld [vmem:[%s7539_s1 + $0x12f8] sm:$0xff] }
 0x16c   :  { %2189 = vmatprep.mubr.f32.mxu0 %v3875_v8  ;;  %2259 = vmatpush2.msra.mxu1 %v453_v57  ;;  %v913_v54 = vld [vmem:[%s7539_s1 + $0x1c00] sm:$0xff]  ;;  %v912_v56 = vld [vmem:[%s7539_s1 + $0x1bf8] sm:$0xff] }
 0x16d   :  { %2190 = vmatmul.mubr.f32.vlgmr.msra.gmra.mxu0 %v3844_v62  ;;  %2260 = vmatprep.mubr.f32.mxu1 %v3885_v11  ;;  %v616_v57 = vld [vmem:[%s7539_s1 + $0x12b8] sm:$0xff] }
 0x16e   :  { %2267 = vmatprep.subr.mxu0 %v733_v58  ;;  %2338 = vmatprep.subr.mxu1 %v1021_v59  ;;  %v904_v58 = vld [vmem:[%s7539_s1 + $0x1bb8] sm:$0xff]  ;;  %v615_v59 = vld [vmem:[%s7539_s1 + $0x12b0] sm:$0xff] }
 0x16f   :  { %2261 = vmatmul.mubr.f32.vlgmr.msra.gmra.mxu1 %v3859_v3  ;;  %2268 = vmatpush1.msra.mxu0 %v732_v60  ;;  %v903_v60 = vld [vmem:[%s7539_s1 + $0x1bb0] sm:$0xff] }
 0x170   :  { %2339 = vmatpush1.msra.mxu1 %v1020_v61  ;;  %2269 = vmatprep.subr.mxu0 %v724_v63  ;;  %v607_v61 = vld [vmem:[%s7539_s1 + $0x1270] sm:$0xff] }
 0x171   :  { %2340 = vmatprep.subr.mxu1 %v1012_v0  ;;  %2270 = vmatpush1.msra.mxu0 %v723_v1  ;;  %v895_v63 = vld [vmem:[%s7539_s1 + $0x1b70] sm:$0xff]  ;;  %v606_v0 = vld [vmem:[%s7539_s1 + $0x1268] sm:$0xff] }
 0x172   :  { %2341 = vmatpush1.msra.mxu1 %v1011_v2  ;;  %2271 = vmatprep.subr.mxu0 %v715_v4  ;;  %v894_v1 = vld [vmem:[%s7539_s1 + $0x1b68] sm:$0xff] }
 0x173   :  { %2342 = vmatprep.subr.mxu1 %v1003_v5  ;;  %2272 = vmatpush1.msra.mxu0 %v714_v6  ;;  %v598_v2 = vld [vmem:[%s7539_s1 + $0x1228] sm:$0xff]  ;;  %v597_v5 = vld [vmem:[%s7539_s1 + $0x1220] sm:$0xff] }
 0x174   :  { %2343 = vmatpush1.msra.mxu1 %v1002_v7  ;;  %2273 = vmatprep.subr.mxu0 %v706_v9  ;;  %v886_v4 = vld [vmem:[%s7539_s1 + $0x1b28] sm:$0xff]  ;;  %v885_v6 = vld [vmem:[%s7539_s1 + $0x1b20] sm:$0xff] }
 0x175   :  { %2344 = vmatprep.subr.mxu1 %v994_v10  ;;  %2274 = vmatpush1.msra.mxu0 %v705_v12  ;;  %v877_v7 = vld [vmem:[%s7539_s1 + $0x1ae0] sm:$0xff]  ;;  %v876_v10 = vld [vmem:[%s7539_s1 + $0x1ad8] sm:$0xff] }
 0x176   :  { %2345 = vmatpush1.msra.mxu1 %v993_v13  ;;  %2275 = vmatprep.subr.mxu0 %v697_v14  ;;  %v1165_v9 = vld [vmem:[%s7539_s1 + $0x23e0] sm:$0xff]  ;;  %v1164_v12 = vld [vmem:[%s7539_s1 + $0x23d8] sm:$0xff] }
 0x177   :  { %2346 = vmatprep.subr.mxu1 %v985_v15  ;;  %2276 = vmatpush1.msra.mxu0 %v696_v17  ;;  %v868_v13 = vld [vmem:[%s7539_s1 + $0x1a98] sm:$0xff]  ;;  %v867_v15 = vld [vmem:[%s7539_s1 + $0x1a90] sm:$0xff] }
 0x178   :  { %2347 = vmatpush1.msra.mxu1 %v984_v18  ;;  %2277 = vmatprep.subr.mxu0 %v688_v19  ;;  %v1156_v14 = vld [vmem:[%s7539_s1 + $0x2398] sm:$0xff]  ;;  %v1155_v17 = vld [vmem:[%s7539_s1 + $0x2390] sm:$0xff] }
 0x179   :  { %2348 = vmatprep.subr.mxu1 %v976_v20  ;;  %2278 = vmatpush1.msra.mxu0 %v687_v22  ;;  %v859_v18 = vld [vmem:[%s7539_s1 + $0x1a50] sm:$0xff]  ;;  %v858_v20 = vld [vmem:[%s7539_s1 + $0x1a48] sm:$0xff] }
 0x17a   :  { %2349 = vmatpush1.msra.mxu1 %v975_v23  ;;  %2279 = vmatprep.subr.mxu0 %v679_v24  ;;  %v1147_v19 = vld [vmem:[%s7539_s1 + $0x2350] sm:$0xff]  ;;  %v1146_v22 = vld [vmem:[%s7539_s1 + $0x2348] sm:$0xff] }
 0x17b   :  { %2350 = vmatprep.subr.mxu1 %v967_v25  ;;  %2280 = vmatpush1.msra.mxu0 %v678_v27  ;;  %v850_v23 = vld [vmem:[%s7539_s1 + $0x1a08] sm:$0xff]  ;;  %v849_v25 = vld [vmem:[%s7539_s1 + $0x1a00] sm:$0xff] }
 0x17c   :  { %2351 = vmatpush1.msra.mxu1 %v966_v28  ;;  %2281 = vmatprep.subr.mxu0 %v670_v30  ;;  %v1138_v24 = vld [vmem:[%s7539_s1 + $0x2308] sm:$0xff]  ;;  %v1137_v27 = vld [vmem:[%s7539_s1 + $0x2300] sm:$0xff] }
 0x17d   :  { %2352 = vmatprep.subr.mxu1 %v958_v31  ;;  %2282 = vmatpush1.msra.mxu0 %v669_v32  ;;  %v841_v28 = vld [vmem:[%s7539_s1 + $0x19c0] sm:$0xff]  ;;  %v840_v31 = vld [vmem:[%s7539_s1 + $0x19b8] sm:$0xff] }
 0x17e   :  { %2353 = vmatpush1.msra.mxu1 %v957_v33  ;;  %2283 = vmatprep.subr.mxu0 %v661_v34  ;;  %v1129_v30 = vld [vmem:[%s7539_s1 + $0x22c0] sm:$0xff]  ;;  %v1128_v32 = vld [vmem:[%s7539_s1 + $0x22b8] sm:$0xff] }
 0x17f   :  { %2354 = vmatprep.subr.mxu1 %v949_v35  ;;  %2284 = vmatpush1.msra.mxu0 %v660_v36  ;;  %v832_v33 = vld [vmem:[%s7539_s1 + $0x1978] sm:$0xff]  ;;  %v831_v35 = vld [vmem:[%s7539_s1 + $0x1970] sm:$0xff] }
 0x180   :  { %2355 = vmatpush1.msra.mxu1 %v948_v37  ;;  %2285 = vmatprep.subr.mxu0 %v652_v38  ;;  %v1120_v34 = vld [vmem:[%s7539_s1 + $0x2278] sm:$0xff]  ;;  %v1119_v36 = vld [vmem:[%s7539_s1 + $0x2270] sm:$0xff] }
 0x181   :  { %2356 = vmatprep.subr.mxu1 %v940_v39  ;;  %2286 = vmatpush1.msra.mxu0 %v651_v40  ;;  %v823_v37 = vld [vmem:[%s7539_s1 + $0x1930] sm:$0xff]  ;;  %v822_v39 = vld [vmem:[%s7539_s1 + $0x1928] sm:$0xff] }
 0x182   :  { %2357 = vmatpush1.msra.mxu1 %v939_v42  ;;  %2287 = vmatprep.subr.mxu0 %v643_v43  ;;  %v1111_v38 = vld [vmem:[%s7539_s1 + $0x2230] sm:$0xff]  ;;  %v1110_v40 = vld [vmem:[%s7539_s1 + $0x2228] sm:$0xff] }
 0x183   :  { %2358 = vmatprep.subr.mxu1 %v931_v45  ;;  %2288 = vmatpush1.msra.mxu0 %v642_v46  ;;  %v814_v42 = vld [vmem:[%s7539_s1 + $0x18e8] sm:$0xff]  ;;  %v813_v45 = vld [vmem:[%s7539_s1 + $0x18e0] sm:$0xff] }
 0x184   :  { %2359 = vmatpush1.msra.mxu1 %v930_v47  ;;  %2289 = vmatprep.subr.mxu0 %v634_v48  ;;  %v1102_v43 = vld [vmem:[%s7539_s1 + $0x21e8] sm:$0xff]  ;;  %v1101_v46 = vld [vmem:[%s7539_s1 + $0x21e0] sm:$0xff] }
 0x185   :  { %2360 = vmatprep.subr.mxu1 %v922_v49  ;;  %2290 = vmatpush1.msra.mxu0 %v633_v50  ;;  %v805_v47 = vld [vmem:[%s7539_s1 + $0x18a0] sm:$0xff]  ;;  %v804_v49 = vld [vmem:[%s7539_s1 + $0x1898] sm:$0xff] }
 0x186   :  { %2361 = vmatpush1.msra.mxu1 %v921_v51  ;;  %2291 = vmatprep.subr.mxu0 %v625_v53  ;;  %v1093_v48 = vld [vmem:[%s7539_s1 + $0x21a0] sm:$0xff]  ;;  %v1092_v50 = vld [vmem:[%s7539_s1 + $0x2198] sm:$0xff] }
 0x187   :  { %2362 = vmatprep.subr.mxu1 %v913_v54  ;;  %2292 = vmatpush1.msra.mxu0 %v624_v55  ;;  %v796_v51 = vld [vmem:[%s7539_s1 + $0x1858] sm:$0xff]  ;;  %v795_v54 = vld [vmem:[%s7539_s1 + $0x1850] sm:$0xff] }
 0x188   :  { %2363 = vmatpush1.msra.mxu1 %v912_v56  ;;  %2293 = vmatprep.subr.mxu0 %v616_v57  ;;  %v1084_v53 = vld [vmem:[%s7539_s1 + $0x2158] sm:$0xff]  ;;  %v1083_v55 = vld [vmem:[%s7539_s1 + $0x2150] sm:$0xff] }
 0x189   :  { %2364 = vmatprep.subr.mxu1 %v904_v58  ;;  %2294 = vmatpush1.msra.mxu0 %v615_v59  ;;  %v787_v56 = vld [vmem:[%s7539_s1 + $0x1810] sm:$0xff]  ;;  %v786_v58 = vld [vmem:[%s7539_s1 + $0x1808] sm:$0xff] }
 0x18a   :  { %2365 = vmatpush1.msra.mxu1 %v903_v60  ;;  %2295 = vmatprep.subr.mxu0 %v607_v61  ;;  %v1075_v57 = vld [vmem:[%s7539_s1 + $0x2110] sm:$0xff]  ;;  %v1074_v59 = vld [vmem:[%s7539_s1 + $0x2108] sm:$0xff] }
 0x18b   :  { %2366 = vmatprep.subr.mxu1 %v895_v63  ;;  %2296 = vmatpush1.msra.mxu0 %v606_v0  ;;  %v778_v60 = vld [vmem:[%s7539_s1 + $0x17c8] sm:$0xff]  ;;  %v777_v63 = vld [vmem:[%s7539_s1 + $0x17c0] sm:$0xff] }
 0x18c   :  { %2367 = vmatpush1.msra.mxu1 %v894_v1  ;;  %2297 = vmatprep.subr.mxu0 %v598_v2  ;;  %v1066_v61 = vld [vmem:[%s7539_s1 + $0x20c8] sm:$0xff]  ;;  %v1065_v0 = vld [vmem:[%s7539_s1 + $0x20c0] sm:$0xff] }
 0x18d   :  { %2368 = vmatprep.subr.mxu1 %v886_v4  ;;  %2298 = vmatpush1.msra.mxu0 %v597_v5  ;;  %v769_v1 = vld [vmem:[%s7539_s1 + $0x1780] sm:$0xff]  ;;  %v768_v4 = vld [vmem:[%s7539_s1 + $0x1778] sm:$0xff] }
 0x18e   :  { %2369 = vmatpush1.msra.mxu1 %v885_v6  ;;  %2299 = vmatprep.subr.mxu0 %v877_v7  ;;  %v1057_v2 = vld [vmem:[%s7539_s1 + $0x2080] sm:$0xff]  ;;  %v1056_v5 = vld [vmem:[%s7539_s1 + $0x2078] sm:$0xff] }
 0x18f   :  { %2370 = vmatprep.subr.mxu1 %v1165_v9  ;;  %2300 = vmatpush2.msra.mxu0 %v876_v10  ;;  %v760_v6 = vld [vmem:[%s7539_s1 + $0x1738] sm:$0xff]  ;;  %v759_v9 = vld [vmem:[%s7539_s1 + $0x1730] sm:$0xff] }
 0x190   :  { %2371 = vmatpush2.msra.mxu1 %v1164_v12  ;;  %2301 = vmatprep.subr.mxu0 %v868_v13  ;;  %v1048_v7 = vld [vmem:[%s7539_s1 + $0x2038] sm:$0xff]  ;;  %v1047_v10 = vld [vmem:[%s7539_s1 + $0x2030] sm:$0xff] }
 0x191   :  { %2372 = vmatprep.subr.mxu1 %v1156_v14  ;;  %2302 = vmatpush2.msra.mxu0 %v867_v15  ;;  %v751_v12 = vld [vmem:[%s7539_s1 + $0x16f0] sm:$0xff]  ;;  %v750_v14 = vld [vmem:[%s7539_s1 + $0x16e8] sm:$0xff] }
 0x192   :  { %2373 = vmatpush2.msra.mxu1 %v1155_v17  ;;  %2303 = vmatprep.subr.mxu0 %v859_v18  ;;  %v1039_v13 = vld [vmem:[%s7539_s1 + $0x1ff0] sm:$0xff]  ;;  %v1038_v15 = vld [vmem:[%s7539_s1 + $0x1fe8] sm:$0xff] }
 0x193   :  { %2374 = vmatprep.subr.mxu1 %v1147_v19  ;;  %2304 = vmatpush2.msra.mxu0 %v858_v20  ;;  %v742_v17 = vld [vmem:[%s7539_s1 + $0x16a8] sm:$0xff]  ;;  %v741_v19 = vld [vmem:[%s7539_s1 + $0x16a0] sm:$0xff] }
 0x194   :  { %2375 = vmatpush2.msra.mxu1 %v1146_v22  ;;  %2305 = vmatprep.subr.mxu0 %v850_v23  ;;  %v1030_v18 = vld [vmem:[%s7539_s1 + $0x1fa8] sm:$0xff]  ;;  %v1029_v20 = vld [vmem:[%s7539_s1 + $0x1fa0] sm:$0xff]  ;;  %v159_v23 = vld [vmem:[%s7539_s1 + $0x470] sm:$0xff] }
 0x195   :  { %2376 = vmatprep.subr.mxu1 %v1138_v24  ;;  %2306 = vmatpush2.msra.mxu0 %v849_v25  ;;  %v1309_v22 = vld [vmem:[%s7539_s1 + $0x2860] sm:$0xff]  ;;  %v1308_v24 = vld [vmem:[%s7539_s1 + $0x2858] sm:$0xff]  ;;  %v158_v25 = vld [vmem:[%s7539_s1 + $0x468] sm:$0xff] }
 0x196   :  { %2377 = vmatpush2.msra.mxu1 %v1137_v27  ;;  %2307 = vmatprep.subr.mxu0 %v841_v28  ;;  %v1300_v27 = vld [vmem:[%s7539_s1 + $0x2818] sm:$0xff]  ;;  %v150_v28 = vld [vmem:[%s7539_s1 + $0x428] sm:$0xff] }
 0x197   :  { %2378 = vmatprep.subr.mxu1 %v1129_v30  ;;  %2308 = vmatpush2.msra.mxu0 %v840_v31  ;;  %v1299_v30 = vld [vmem:[%s7539_s1 + $0x2810] sm:$0xff]  ;;  %v149_v31 = vld [vmem:[%s7539_s1 + $0x420] sm:$0xff] }
 0x198   :  { %2379 = vmatpush2.msra.mxu1 %v1128_v32  ;;  %2309 = vmatprep.subr.mxu0 %v832_v33  ;;  %v1291_v32 = vld [vmem:[%s7539_s1 + $0x27d0] sm:$0xff]  ;;  %v141_v33 = vld [vmem:[%s7539_s1 + $0x3e0] sm:$0xff] }
 0x199   :  { %2380 = vmatprep.subr.mxu1 %v1120_v34  ;;  %2310 = vmatpush2.msra.mxu0 %v831_v35  ;;  %v1290_v34 = vld [vmem:[%s7539_s1 + $0x27c8] sm:$0xff]  ;;  %v140_v35 = vld [vmem:[%s7539_s1 + $0x3d8] sm:$0xff] }
 0x19a   :  { %2381 = vmatpush2.msra.mxu1 %v1119_v36  ;;  %2311 = vmatprep.subr.mxu0 %v823_v37  ;;  %v1282_v36 = vld [vmem:[%s7539_s1 + $0x2788] sm:$0xff]  ;;  %v132_v37 = vld [vmem:[%s7539_s1 + $0x398] sm:$0xff] }
 0x19b   :  { %2382 = vmatprep.subr.mxu1 %v1111_v38  ;;  %2312 = vmatpush2.msra.mxu0 %v822_v39  ;;  %v1281_v38 = vld [vmem:[%s7539_s1 + $0x2780] sm:$0xff]  ;;  %v131_v39 = vld [vmem:[%s7539_s1 + $0x390] sm:$0xff] }
 0x19c   :  { %2383 = vmatpush2.msra.mxu1 %v1110_v40  ;;  %2313 = vmatprep.subr.mxu0 %v814_v42  ;;  %v1273_v40 = vld [vmem:[%s7539_s1 + $0x2740] sm:$0xff]  ;;  %v123_v42 = vld [vmem:[%s7539_s1 + $0x350] sm:$0xff] }
 0x19d   :  { %2384 = vmatprep.subr.mxu1 %v1102_v43  ;;  %2314 = vmatpush2.msra.mxu0 %v813_v45  ;;  %v1272_v43 = vld [vmem:[%s7539_s1 + $0x2738] sm:$0xff]  ;;  %v122_v45 = vld [vmem:[%s7539_s1 + $0x348] sm:$0xff] }
 0x19e   :  { %2385 = vmatpush2.msra.mxu1 %v1101_v46  ;;  %2315 = vmatprep.subr.mxu0 %v805_v47  ;;  %v1264_v46 = vld [vmem:[%s7539_s1 + $0x26f8] sm:$0xff]  ;;  %v114_v47 = vld [vmem:[%s7539_s1 + $0x308] sm:$0xff] }
 0x19f   :  { %2386 = vmatprep.subr.mxu1 %v1093_v48  ;;  %2316 = vmatpush2.msra.mxu0 %v804_v49  ;;  %v1263_v48 = vld [vmem:[%s7539_s1 + $0x26f0] sm:$0xff]  ;;  %v113_v49 = vld [vmem:[%s7539_s1 + $0x300] sm:$0xff] }
 0x1a0   :  { %2387 = vmatpush2.msra.mxu1 %v1092_v50  ;;  %2317 = vmatprep.subr.mxu0 %v796_v51  ;;  %v1255_v50 = vld [vmem:[%s7539_s1 + $0x26b0] sm:$0xff]  ;;  %v105_v51 = vld [vmem:[%s7539_s1 + $0x2c0] sm:$0xff] }
 0x1a1   :  { %2388 = vmatprep.subr.mxu1 %v1084_v53  ;;  %2318 = vmatpush2.msra.mxu0 %v795_v54  ;;  %v1254_v53 = vld [vmem:[%s7539_s1 + $0x26a8] sm:$0xff]  ;;  %v104_v54 = vld [vmem:[%s7539_s1 + $0x2b8] sm:$0xff] }
 0x1a2   :  { %2389 = vmatpush2.msra.mxu1 %v1083_v55  ;;  %2319 = vmatprep.subr.mxu0 %v787_v56  ;;  %v1246_v55 = vld [vmem:[%s7539_s1 + $0x2668] sm:$0xff]  ;;  %v96_v56 = vld [vmem:[%s7539_s1 + $0x278] sm:$0xff] }
 0x1a3   :  { %2390 = vmatprep.subr.mxu1 %v1075_v57  ;;  %2320 = vmatpush2.msra.mxu0 %v786_v58  ;;  %v1245_v57 = vld [vmem:[%s7539_s1 + $0x2660] sm:$0xff]  ;;  %v95_v58 = vld [vmem:[%s7539_s1 + $0x270] sm:$0xff] }
 0x1a4   :  { %2391 = vmatpush2.msra.mxu1 %v1074_v59  ;;  %2321 = vmatprep.subr.mxu0 %v778_v60  ;;  %v1237_v59 = vld [vmem:[%s7539_s1 + $0x2620] sm:$0xff]  ;;  %v87_v60 = vld [vmem:[%s7539_s1 + $0x230] sm:$0xff] }
 0x1a5   :  { %2392 = vmatprep.subr.mxu1 %v1066_v61  ;;  %2322 = vmatpush2.msra.mxu0 %v777_v63  ;;  %v1236_v61 = vld [vmem:[%s7539_s1 + $0x2618] sm:$0xff]  ;;  %v86_v63 = vld [vmem:[%s7539_s1 + $0x228] sm:$0xff] }
 0x1a6   :  { %2393 = vmatpush2.msra.mxu1 %v1065_v0  ;;  %2323 = vmatprep.subr.mxu0 %v769_v1  ;;  %v1228_v0 = vld [vmem:[%s7539_s1 + $0x25d8] sm:$0xff]  ;;  %v78_v1 = vld [vmem:[%s7539_s1 + $0x1e8] sm:$0xff] }
 0x1a7   :  { %2394 = vmatprep.subr.mxu1 %v1057_v2  ;;  %2324 = vmatpush2.msra.mxu0 %v768_v4  ;;  %v1227_v2 = vld [vmem:[%s7539_s1 + $0x25d0] sm:$0xff]  ;;  %v77_v4 = vld [vmem:[%s7539_s1 + $0x1e0] sm:$0xff] }
 0x1a8   :  { %2395 = vmatpush2.msra.mxu1 %v1056_v5  ;;  %2325 = vmatprep.subr.mxu0 %v760_v6  ;;  %v1219_v5 = vld [vmem:[%s7539_s1 + $0x2590] sm:$0xff]  ;;  %v69_v6 = vld [vmem:[%s7539_s1 + $0x1a0] sm:$0xff] }
 0x1a9   :  { %2396 = vmatprep.subr.mxu1 %v1048_v7  ;;  %2326 = vmatpush2.msra.mxu0 %v759_v9  ;;  %v1218_v7 = vld [vmem:[%s7539_s1 + $0x2588] sm:$0xff]  ;;  %v68_v9 = vld [vmem:[%s7539_s1 + $0x198] sm:$0xff] }
 0x1aa   :  { %2397 = vmatpush2.msra.mxu1 %v1047_v10  ;;  %2327 = vmatprep.subr.mxu0 %v751_v12  ;;  %v1210_v10 = vld [vmem:[%s7539_s1 + $0x2548] sm:$0xff]  ;;  %v60_v12 = vld [vmem:[%s7539_s1 + $0x158] sm:$0xff] }
 0x1ab   :  { %2398 = vmatprep.subr.mxu1 %v1039_v13  ;;  %2328 = vmatpush2.msra.mxu0 %v750_v14  ;;  %v1209_v13 = vld [vmem:[%s7539_s1 + $0x2540] sm:$0xff]  ;;  %v59_v14 = vld [vmem:[%s7539_s1 + $0x150] sm:$0xff] }
 0x1ac   :  { %2399 = vmatpush2.msra.mxu1 %v1038_v15  ;;  %2329 = vmatprep.subr.mxu0 %v742_v17  ;;  %v1201_v15 = vld [vmem:[%s7539_s1 + $0x2500] sm:$0xff]  ;;  %v51_v17 = vld [vmem:[%s7539_s1 + $0x110] sm:$0xff] }
 0x1ad   :  { %2400 = vmatprep.subr.mxu1 %v1030_v18  ;;  %2330 = vmatpush2.msra.mxu0 %v741_v19  ;;  %v1200_v18 = vld [vmem:[%s7539_s1 + $0x24f8] sm:$0xff]  ;;  %v50_v19 = vld [vmem:[%s7539_s1 + $0x108] sm:$0xff] }
 0x1ae   :  { %2331 = vmatprep.mubr.f32.mxu0 %v4280_v26  ;;  %2401 = vmatpush2.msra.mxu1 %v1029_v20  ;;  %v1192_v20 = vld [vmem:[%s7539_s1 + $0x24b8] sm:$0xff] }
 0x1af   :  { %2332 = vmatmul.mubr.f32.vlgmr.msra.gmra.mxu0 %v4249_v16  ;;  %2402 = vmatprep.mubr.f32.mxu1 %v4290_v29 }
 0x1b0   :  { %2409 = vmatprep.subr.mxu0 %v1309_v22  ;;  %2480 = vmatprep.subr.mxu1 %v159_v23  ;;  %v42_v22 = vld [vmem:[%s7539_s1 + $0xc8] sm:$0xff]  ;;  %v1191_v23 = vld [vmem:[%s7539_s1 + $0x24b0] sm:$0xff] }
 0x1b1   :  { %2403 = vmatmul.mubr.f32.vlgmr.msra.gmra.mxu1 %v4264_v21  ;;  %2410 = vmatpush1.msra.mxu0 %v1308_v24  ;;  %v41_v24 = vld [vmem:[%s7539_s1 + $0xc0] sm:$0xff] }
 0x1b2   :  { %2481 = vmatpush1.msra.mxu1 %v158_v25  ;;  %2411 = vmatprep.subr.mxu0 %v1300_v27  ;;  %v1183_v25 = vld [vmem:[%s7539_s1 + $0x2470] sm:$0xff]  ;;  %v33_v27 = vld [vmem:[%s7539_s1 + $0x80] sm:$0xff] }
 0x1b3   :  { %2482 = vmatprep.subr.mxu1 %v150_v28  ;;  %2412 = vmatpush1.msra.mxu0 %v1299_v30  ;;  %v1182_v28 = vld [vmem:[%s7539_s1 + $0x2468] sm:$0xff]  ;;  %v32_v30 = vld [vmem:[%s7539_s1 + $0x78] sm:$0xff] }
 0x1b4   :  { %2483 = vmatpush1.msra.mxu1 %v149_v31  ;;  %2413 = vmatprep.subr.mxu0 %v1291_v32  ;;  %v1174_v31 = vld [vmem:[%s7539_s1 + $0x2428] sm:$0xff]  ;;  %v24_v32 = vld [vmem:[%s7539_s1 + $0x38] sm:$0xff] }
 0x1b5   :  { %2484 = vmatprep.subr.mxu1 %v141_v33  ;;  %2414 = vmatpush1.msra.mxu0 %v1290_v34  ;;  %v1173_v33 = vld [vmem:[%s7539_s1 + $0x2420] sm:$0xff]  ;;  %v23_v34 = vld [vmem:[%s7539_s1 + $0x30] sm:$0xff] }
 0x1b6   :  { %2485 = vmatpush1.msra.mxu1 %v140_v35  ;;  %2415 = vmatprep.subr.mxu0 %v1282_v36  ;;  %v303_v35 = vld [vmem:[%s7539_s1 + $0x8f0] sm:$0xff] }
 0x1b7   :  { %2486 = vmatprep.subr.mxu1 %v132_v37  ;;  %2416 = vmatpush1.msra.mxu0 %v1281_v38  ;;  %v447_v36 = vld [vmem:[%s7539_s1 + $0xd70] sm:$0xff]  ;;  %v302_v37 = vld [vmem:[%s7539_s1 + $0x8e8] sm:$0xff] }
 0x1b8   :  { %2487 = vmatpush1.msra.mxu1 %v131_v39  ;;  %2417 = vmatprep.subr.mxu0 %v1273_v40  ;;  %v446_v38 = vld [vmem:[%s7539_s1 + $0xd68] sm:$0xff]  ;;  %v6253_v39 = vpop.f32.mrf.mxu0  ;;  %v3455_v40 = vld.sshfl [vmem:[%s7540_s0 + $0x10] sm:$0x3 pattern:$0x76325410] }
 0x1b9   :  { %2488 = vmatprep.subr.mxu1 %v123_v42  ;;  %2418 = vmatpush1.msra.mxu0 %v1272_v43  ;;  %v294_v42 = vld [vmem:[%s7539_s1 + $0x8a8] sm:$0xff] }
 0x1ba   :  { %2489 = vmatpush1.msra.mxu1 %v122_v45  ;;  %2419 = vmatprep.subr.mxu0 %v1264_v46  ;;  %v438_v43 = vld [vmem:[%s7539_s1 + $0xd28] sm:$0xff]  ;;  %v293_v45 = vld [vmem:[%s7539_s1 + $0x8a0] sm:$0xff] }
 0x1bb   :  { %2490 = vmatprep.subr.mxu1 %v114_v47  ;;  %2420 = vmatpush1.msra.mxu0 %v1263_v48  ;;  %v437_v46 = vld [vmem:[%s7539_s1 + $0xd20] sm:$0xff]  ;;  %v6270_v47 = vpop.f32.mrf.mxu1 }
 0x1bc   :  { %2491 = vmatpush1.msra.mxu1 %v113_v49  ;;  %2421 = vmatprep.subr.mxu0 %v1255_v50  ;;  %v285_v48 = vld [vmem:[%s7539_s1 + $0x860] sm:$0xff]  ;;  %v284_v50 = vld [vmem:[%s7539_s1 + $0x858] sm:$0xff] }
 0x1bd   :  { %2492 = vmatprep.subr.mxu1 %v105_v51  ;;  %2422 = vmatpush1.msra.mxu0 %v1254_v53  ;;  %v429_v49 = vld [vmem:[%s7539_s1 + $0xce0] sm:$0xff]  ;;  %v428_v51 = vld [vmem:[%s7539_s1 + $0xcd8] sm:$0xff]  ;;  %v1483_v53 = vpop.f32.mrf.mxu0 }
 0x1be   :  { %2493 = vmatpush1.msra.mxu1 %v104_v54  ;;  %2423 = vmatprep.subr.mxu0 %v1246_v55  ;;  %v276_v54 = vld [vmem:[%s7539_s1 + $0x818] sm:$0xff] }
 0x1bf   :  { %2494 = vmatprep.subr.mxu1 %v96_v56  ;;  %2424 = vmatpush1.msra.mxu0 %v1245_v57  ;;  %v420_v55 = vld [vmem:[%s7539_s1 + $0xc98] sm:$0xff]  ;;  %v1323_v56 = vsub.s32 1, %v3787_v41  ;;  %v275_v57 = vld [vmem:[%s7539_s1 + $0x810] sm:$0xff] }
 0x1c0   :  { %2495 = vmatpush1.msra.mxu1 %v95_v58  ;;  %2425 = vmatprep.subr.mxu0 %v1237_v59  ;;  %v419_v58 = vld [vmem:[%s7539_s1 + $0xc90] sm:$0xff]  ;;  %v6300_v59 = vld [vmem:[%s7541_s2] sm:$0xff] }
 0x1c1   :  { %2496 = vmatprep.subr.mxu1 %v87_v60  ;;  %2426 = vmatpush1.msra.mxu0 %v1236_v61  ;;  %v1319_v60 = vsub.s32 0, %v3787_v41  ;;  %v1554_v61 = vpop.f32.mrf.mxu1 }
 0x1c2   :  { %2497 = vmatpush1.msra.mxu1 %v86_v63  ;;  %2427 = vmatprep.subr.mxu0 %v1228_v0  ;;  %v6303_v63 = vpop.f32.mrf.mxu0  ;;  %v267_v0 = vld [vmem:[%s7539_s1 + $0x7d0] sm:$0xff] }
 0x1c3   :  { %2498 = vmatprep.subr.mxu1 %v78_v1  ;;  %2428 = vmatpush1.msra.mxu0 %v1227_v2  ;;  %v411_v1 = vld [vmem:[%s7539_s1 + $0xc50] sm:$0xff]  ;;  %v266_v2 = vld [vmem:[%s7539_s1 + $0x7c8] sm:$0xff] }
 0x1c4   :  { %2499 = vmatpush1.msra.mxu1 %v77_v4  ;;  %2429 = vmatprep.subr.mxu0 %v1219_v5  ;;  %v410_v4 = vld [vmem:[%s7539_s1 + $0xc48] sm:$0xff]  ;;  %v6317_v5 = vpop.f32.mrf.mxu1 }
 0x1c5   :  { %2500 = vmatprep.subr.mxu1 %v69_v6  ;;  %2430 = vmatpush1.msra.mxu0 %v1218_v7  ;;  %v258_v6 = vld [vmem:[%s7539_s1 + $0x788] sm:$0xff] }
 0x1c6   :  { %2501 = vmatpush1.msra.mxu1 %v68_v9  ;;  %2431 = vmatprep.subr.mxu0 %v1210_v10  ;;  %v402_v7 = vld [vmem:[%s7539_s1 + $0xc08] sm:$0xff]  ;;  %v1324_v9 = vrot.slane %v6300_v59, %v1323_v56  ;;  %v257_v10 = vld [vmem:[%s7539_s1 + $0x780] sm:$0xff]  ;;  %v356_v56 = vld [vmem:[%s7539_s1 + $0xa98] sm:$0xff] }
 0x1c7   :  { %2502 = vmatprep.subr.mxu1 %v60_v12  ;;  %2432 = vmatpush1.msra.mxu0 %v1209_v13  ;;  %v401_v12 = vld [vmem:[%s7539_s1 + $0xc00] sm:$0xff]  ;;  %v1320_v13 = vrot.slane %v6300_v59, %v1319_v60  ;;  %v204_v60 = vld [vmem:[%s7539_s1 + $0x5d8] sm:$0xff] }
 0x1c8   :  { %2503 = vmatpush1.msra.mxu1 %v59_v14  ;;  %2433 = vmatprep.subr.mxu0 %v1201_v15  ;;  %v1625_v14 = vpop.f32.mrf.mxu0  ;;  %v249_v15 = vld [vmem:[%s7539_s1 + $0x740] sm:$0xff] }
 0x1c9   :  { %2504 = vmatprep.subr.mxu1 %v51_v17  ;;  %2434 = vmatpush1.msra.mxu0 %v1200_v18  ;;  %v393_v17 = vld [vmem:[%s7539_s1 + $0xbc0] sm:$0xff]  ;;  %v248_v18 = vld [vmem:[%s7539_s1 + $0x738] sm:$0xff] }
 0x1ca   :  { %2505 = vmatpush1.msra.mxu1 %v50_v19  ;;  %2435 = vmatprep.subr.mxu0 %v1192_v20  ;;  %v392_v19 = vld [vmem:[%s7539_s1 + $0xbb8] sm:$0xff]  ;;  %v6345_v20 = vpop.f32.mrf.mxu1 }
 0x1cb   :  { %2506 = vmatprep.subr.mxu1 %v42_v22  ;;  %2436 = vmatpush1.msra.mxu0 %v1191_v23  ;;  %v6347_v22 = vpop.f32.mrf.mxu0  ;;  %v240_v23 = vld [vmem:[%s7539_s1 + $0x6f8] sm:$0xff] }
 0x1cc   :  { %2507 = vmatpush1.msra.mxu1 %v41_v24  ;;  %2437 = vmatprep.subr.mxu0 %v1183_v25  ;;  %v384_v24 = vld [vmem:[%s7539_s1 + $0xb78] sm:$0xff]  ;;  %v1484_v25 = vadd.f32 %v1483_v53, %v1324_v9  ;;  %v357_v53 = vld [vmem:[%s7539_s1 + $0xaa0] sm:$0xff] }
 0x1cd   :  { %2508 = vmatprep.subr.mxu1 %v33_v27  ;;  %2438 = vmatpush1.msra.mxu0 %v1182_v28  ;;  %v1327_v27 = vsub.s32 2, %v3787_v41  ;;  %v239_v28 = vld [vmem:[%s7539_s1 + $0x6f0] sm:$0xff] }
 0x1ce   :  { %2509 = vmatpush1.msra.mxu1 %v32_v30  ;;  %2439 = vmatprep.subr.mxu0 %v1174_v31  ;;  %v383_v30 = vld [vmem:[%s7539_s1 + $0xb70] sm:$0xff]  ;;  %v1482_v31 = vadd.f32 %v6253_v39, %v1320_v13  ;;  %v222_v39 = vld [vmem:[%s7539_s1 + $0x668] sm:$0xff] }
 0x1cf   :  { %2510 = vmatprep.subr.mxu1 %v24_v32  ;;  %2440 = vmatpush1.msra.mxu0 %v1173_v33  ;;  %v1836_v32 = vpop.f32.mrf.mxu1  ;;  %v231_v33 = vld [vmem:[%s7539_s1 + $0x6b0] sm:$0xff] }
 0x1d0   :  { %2473 = vmatprep.mubr.f32.mxu0 %v3459_v44  ;;  %2511 = vmatpush1.msra.mxu1 %v23_v34  ;;  %v375_v34 = vld [vmem:[%s7539_s1 + $0xb30] sm:$0xff] }
 0x1d1   :  { %2474 = vmatmul.mubr.f32.vlgmr.msra.gmra.mxu0 %v3455_v40  ;;  %2512 = vmatprep.subr.mxu1 %v303_v35  ;;  %v1331_v35 = vsub.s32 3, %v3787_v41  ;;  %v366_v40 = vld [vmem:[%s7539_s1 + $0xae8] sm:$0xff] }
 0x1d2   :  { %2551 = vmatprep.subr.mxu0 %v447_v36  ;;  %2513 = vmatpush2.msra.mxu1 %v302_v37  ;;  %v230_v36 = vld [vmem:[%s7539_s1 + $0x6a8] sm:$0xff] }
 0x1d3   :  { %2552 = vmatpush1.msra.mxu0 %v446_v38  ;;  %2514 = vmatprep.subr.mxu1 %v294_v42  ;;  %v374_v37 = vld [vmem:[%s7539_s1 + $0xb28] sm:$0xff]  ;;  %v1767_v38 = vpop.f32.mrf.mxu0  ;;  %v1555_v42 = vadd.f32 %v1554_v61, %v1484_v25  ;;  %v321_v25 = vld [vmem:[%s7539_s1 + $0x980] sm:$0xff] }
 0x1d4   :  { %2553 = vmatprep.subr.mxu0 %v438_v43  ;;  %2515 = vmatpush2.msra.mxu1 %v293_v45  ;;  %v1328_v43 = vrot.slane %v6300_v59, %v1327_v27  ;;  %v221_v45 = vld [vmem:[%s7539_s1 + $0x660] sm:$0xff] }
 0x1d5   :  { %2554 = vmatpush1.msra.mxu0 %v437_v46  ;;  %2516 = vmatprep.subr.mxu1 %v285_v48  ;;  %v365_v46 = vld [vmem:[%s7539_s1 + $0xae0] sm:$0xff]  ;;  %v1553_v48 = vadd.f32 %v6270_v47, %v1482_v31  ;;  %v212_v47 = vld [vmem:[%s7539_s1 + $0x618] sm:$0xff] }
 0x1d6   :  { %2555 = vmatprep.subr.mxu0 %v429_v49  ;;  %2517 = vmatpush2.msra.mxu1 %v284_v50  ;;  %v1838_v49 = vpop.f32.mrf.mxu1  ;;  %v1907_v50 = vpop.f32.mrf.mxu0  ;;  %v1837_v61 = vadd.f32 %v1836_v32, %v1328_v43  ;;  %v176_v31 = vld [vmem:[%s7539_s1 + $0x4f8] sm:$0xff]  ;;  %v591_v43 = vld [vmem:[%s7539_s1 + $0x11f0] sm:$0xff] }
 0x1d7   :  { %2556 = vmatpush1.msra.mxu0 %v428_v51  ;;  %2518 = vmatprep.subr.mxu1 %v276_v54  ;;  %v213_v51 = vld [vmem:[%s7539_s1 + $0x620] sm:$0xff]  ;;  %v1626_v54 = vadd.f32 %v1625_v14, %v1555_v42  ;;  %v320_v32 = vld [vmem:[%s7539_s1 + $0x978] sm:$0xff] }
 0x1d8   :  { %2557 = vmatprep.subr.mxu0 %v420_v55  ;;  %2519 = vmatpush2.msra.mxu1 %v275_v57  ;;  %v1332_v55 = vrot.slane %v6300_v59, %v1331_v35  ;;  %v1624_v57 = vadd.f32 %v6303_v63, %v1553_v48  ;;  %v348_v59 = vld [vmem:[%s7539_s1 + $0xa58] sm:$0xff]  ;;  %v347_v63 = vld [vmem:[%s7539_s1 + $0xa50] sm:$0xff]  ;;  %v1908_v9 = vadd.f32 %v1907_v50, %v1837_v61  ;;  %v590_v50 = vld [vmem:[%s7539_s1 + $0x11e8] sm:$0xff] }
 0x1d9   :  { %2558 = vmatpush1.msra.mxu0 %v419_v58  ;;  %2520 = vmatprep.subr.mxu1 %v267_v0  ;;  %v1978_v58 = vpop.f32.mrf.mxu1  ;;  %v203_v0 = vld [vmem:[%s7539_s1 + $0x5d0] sm:$0xff]  ;;  %v717_v61 = vld [vmem:[%s7539_s1 + $0x15e0] sm:$0xff] }
 0x1da   :  { %2559 = vmatprep.subr.mxu0 %v411_v1  ;;  %2521 = vmatpush2.msra.mxu1 %v266_v2  ;;  %v1909_v1 = vpop.f32.mrf.mxu0  ;;  %v195_v2 = vld [vmem:[%s7539_s1 + $0x590] sm:$0xff]  ;;  %v1695_v13 = vadd.f32 %v6317_v5, %v1624_v57  ;;  %v185_v5 = vld [vmem:[%s7539_s1 + $0x540] sm:$0xff] }
 0x1db   :  { %2560 = vmatpush1.msra.mxu0 %v410_v4  ;;  %2522 = vmatprep.subr.mxu1 %v258_v6  ;;  %v339_v4 = vld [vmem:[%s7539_s1 + $0xa10] sm:$0xff]  ;;  %v1697_v6 = vadd.f32 %v6345_v20, %v1626_v54  ;;  %v1980_v14 = vpop.f32.mrf.mxu1  ;;  %v1979_v20 = vadd.f32 %v1978_v58, %v1908_v9  ;;  %v581_v57 = vld [vmem:[%s7539_s1 + $0x11a0] sm:$0xff] }
 0x1dc   :  { %2561 = vmatprep.subr.mxu0 %v402_v7  ;;  %2523 = vmatpush2.msra.mxu1 %v257_v10  ;;  %v1839_v7 = vadd.f32 %v1838_v49, %v1332_v55  ;;  %v194_v10 = vld [vmem:[%s7539_s1 + $0x588] sm:$0xff]  ;;  %v735_v48 = vld [vmem:[%s7539_s1 + $0x1670] sm:$0xff]  ;;  %v725_v58 = vld [vmem:[%s7539_s1 + $0x1620] sm:$0xff] }
 0x1dd   :  { %2562 = vmatpush1.msra.mxu0 %v401_v12  ;;  %2524 = vmatprep.subr.mxu1 %v249_v15  ;;  %v338_v12 = vld [vmem:[%s7539_s1 + $0xa08] sm:$0xff]  ;;  %v707_v9 = vld [vmem:[%s7539_s1 + $0x1590] sm:$0xff] }
 0x1de   :  { %2563 = vmatprep.subr.mxu0 %v393_v17  ;;  %2525 = vmatpush2.msra.mxu1 %v248_v18  ;;  %v186_v15 = vld [vmem:[%s7539_s1 + $0x548] sm:$0xff]  ;;  %v1768_v18 = vadd.f32 %v1767_v38, %v1697_v6  ;;  %v167_v38 = vld [vmem:[%s7539_s1 + $0x4b0] sm:$0xff]  ;;  %v708_v6 = vld [vmem:[%s7539_s1 + $0x1598] sm:$0xff] }
 0x1df   :  { %2564 = vmatpush1.msra.mxu0 %v392_v19  ;;  %2526 = vmatprep.subr.mxu1 %v240_v23  ;;  %v330_v17 = vld [vmem:[%s7539_s1 + $0x9c8] sm:$0xff]  ;;  %v1910_v19 = vadd.f32 %v1909_v1, %v1839_v7  ;;  %v329_v23 = vld [vmem:[%s7539_s1 + $0x9c0] sm:$0xff]  ;;  %v563_v7 = vld [vmem:[%s7539_s1 + $0x1110] sm:$0xff] }
 0x1e0   :  { %2565 = vmatprep.subr.mxu0 %v384_v24  ;;  %2527 = vmatpush2.msra.mxu1 %v239_v28  ;;  %v177_v24 = vld [vmem:[%s7539_s1 + $0x500] sm:$0xff]  ;;  %v1766_v28 = vadd.f32 %v6347_v22, %v1695_v13  ;;  %v312_v22 = vld [vmem:[%s7539_s1 + $0x938] sm:$0xff]  ;;  %v582_v55 = vld [vmem:[%s7539_s1 + $0x11a8] sm:$0xff] }
 0x1e1   :  { %2566 = vmatpush1.msra.mxu0 %v383_v30  ;;  %2528 = vmatprep.subr.mxu1 %v231_v33  ;;  %v1981_v30 = vadd.f32 %v1980_v14, %v1910_v19  ;;  %v699_v13 = vld [vmem:[%s7539_s1 + $0x1550] sm:$0xff]  ;;  %v554_v14 = vld [vmem:[%s7539_s1 + $0x10c8] sm:$0xff]  ;;  %v545_v19 = vld [vmem:[%s7539_s1 + $0x1080] sm:$0xff] }
 0x1e2   :  { %2567 = vmatprep.subr.mxu0 %v375_v34  ;;  %2529 = vmatpush2.msra.mxu1 %v230_v36  ;;  %v168_v34 = vld [vmem:[%s7539_s1 + $0x4b8] sm:$0xff] }
 0x1e3   :  { %2568 = vmatpush1.msra.mxu0 %v374_v37  ;;  %2530 = vmatprep.subr.mxu1 %v222_v39  ;;  %v3186_v37 = vmax.f32 %v1768_v18, 0.0  ;;  %v311_v39 = vld [vmem:[%s7539_s1 + $0x930] sm:$0xff]  ;;  %v690_v18 = vld [vmem:[%s7539_s1 + $0x1508] sm:$0xff] }
 0x1e4   :  { %2569 = vmatprep.subr.mxu0 %v366_v40  ;;  %2531 = vmatpush2.msra.mxu1 %v221_v45 }
 0x1e5   :  { %2570 = vmatpush1.msra.mxu0 %v365_v46  ;;  %2532 = vmatprep.subr.mxu1 %v213_v51  ;;  %v3185_v46 = vmax.f32 %v1766_v28, 0.0  ;;  %v734_v51 = vld [vmem:[%s7539_s1 + $0x1668] sm:$0xff]  ;;  %v672_v28 = vld [vmem:[%s7539_s1 + $0x1478] sm:$0xff] }
 0x1e6   :  { %2571 = vmatprep.subr.mxu0 %v357_v53  ;;  %2533 = vmatpush2.msra.mxu1 %v212_v47  ;;  %v726_v47 = vld [vmem:[%s7539_s1 + $0x1628] sm:$0xff] }
 0x1e7   :  { %2572 = vmatpush1.msra.mxu0 %v356_v56  ;;  %2534 = vmatprep.subr.mxu1 %v204_v60  ;;  %v3203_v53 = vcombine.low %v3185_v46, %v3186_v37  ;;  %v509_v37 = vld [vmem:[%s7539_s1 + $0xf60] sm:$0xff]  ;;  %v636_v46 = vld [vmem:[%s7539_s1 + $0x1358] sm:$0xff] }
 0x1e8   :  { %2573 = vmatprep.subr.mxu0 %v348_v59  ;;  %2535 = vmatpush2.msra.mxu1 %v203_v0  ;;  %v573_v59 = vld [vmem:[%s7539_s1 + $0x1160] sm:$0xff]  ;;  %v572_v0 = vld [vmem:[%s7539_s1 + $0x1158] sm:$0xff] }
 0x1e9   :  { %2574 = vmatpush1.msra.mxu0 %v347_v63  ;;  %2536 = vmatprep.subr.mxu1 %v195_v2  ;;  %v716_v63 = vld [vmem:[%s7539_s1 + $0x15d8] sm:$0xff]  ;;  %v3211_v1 = vrot.slane %v3203_v53, %v3817_v52  ;;  %v482_v53 = vld [vmem:[%s7539_s1 + $0xe88] sm:$0xff] }
 0x1ea   :  { %2575 = vmatprep.subr.mxu0 %v339_v4  ;;  %2537 = vmatpush2.msra.mxu1 %v194_v10  ;;  %v564_v4 = vld [vmem:[%s7539_s1 + $0x1118] sm:$0xff] }
 0x1eb   :  { %2576 = vmatpush1.msra.mxu0 %v338_v12  ;;  %v2049_v27 = vpop.f32.mrf.mxu0  ;;  %2538 = vmatprep.subr.mxu1 %v186_v15  ;;  %v555_v12 = vld [vmem:[%s7539_s1 + $0x10d0] sm:$0xff]  ;;  %v698_v15 = vld [vmem:[%s7539_s1 + $0x1548] sm:$0xff] }
 0x1ec   :  { %2577 = vmatprep.subr.mxu0 %v330_v17  ;;  %v2050_v33 = vadd.f32 %v2049_v27, %v1979_v20  ;;  %2539 = vmatpush2.msra.mxu1 %v185_v5  ;;  %v546_v17 = vld [vmem:[%s7539_s1 + $0x1088] sm:$0xff]  ;;  %v689_v20 = vld [vmem:[%s7539_s1 + $0x1500] sm:$0xff]  ;;  %v528_v27 = vld [vmem:[%s7539_s1 + $0xff8] sm:$0xff] }
 0x1ed   :  { %2578 = vmatpush1.msra.mxu0 %v329_v23  ;;  %v2051_v35 = vpop.f32.mrf.mxu0  ;;  %v2120_v36 = vpop.f32.mrf.mxu1  ;;  %2540 = vmatprep.subr.mxu1 %v177_v24  ;;  %v537_v5 = vld [vmem:[%s7539_s1 + $0x1040] sm:$0xff]  ;;  %v536_v24 = vld [vmem:[%s7539_s1 + $0x1038] sm:$0xff] }
 0x1ee   :  { %2579 = vmatprep.subr.mxu0 %v321_v25  ;;  %v2052_v40 = vadd.f32 %v2051_v35, %v1981_v30  ;;  %v2121_v42 = vadd.f32 %v2120_v36, %v2050_v33  ;;  %2541 = vmatpush2.msra.mxu1 %v176_v31  ;;  %v681_v23 = vld [vmem:[%s7539_s1 + $0x14c0] sm:$0xff]  ;;  %v680_v25 = vld [vmem:[%s7539_s1 + $0x14b8] sm:$0xff]  ;;  %v527_v30 = vld [vmem:[%s7539_s1 + $0xff0] sm:$0xff] }
 0x1ef   :  { %2580 = vmatpush1.msra.mxu0 %v320_v32  ;;  %v2122_v45 = vpop.f32.mrf.mxu1  ;;  %2542 = vmatprep.subr.mxu1 %v168_v34  ;;  %v671_v31 = vld [vmem:[%s7539_s1 + $0x1470] sm:$0xff]  ;;  %v518_v34 = vld [vmem:[%s7539_s1 + $0xfa8] sm:$0xff] }
 0x1f0   :  { %2581 = vmatprep.subr.mxu0 %v312_v22  ;;  %v2123_v49 = vadd.f32 %v2122_v45, %v2052_v40  ;;  %2543 = vmatpush2.msra.mxu1 %v167_v38  ;;  %v3187_v54 = vmax.f32 %v2121_v42, 0.0  ;;  %v519_v32 = vld [vmem:[%s7539_s1 + $0xfb0] sm:$0xff]  ;;  %v662_v22 = vld [vmem:[%s7539_s1 + $0x1428] sm:$0xff]  ;;  %v653_v38 = vld [vmem:[%s7539_s1 + $0x13e0] sm:$0xff] }
 0x1f1   :  { %2582 = vmatpush1.msra.mxu0 %v311_v39  ;;  %2544 = vmatprep.mubr.f32.mxu1 %v3875_v8  ;;  %v663_v33 = vld [vmem:[%s7539_s1 + $0x1430] sm:$0xff]  ;;  %v510_v35 = vld [vmem:[%s7539_s1 + $0xf68] sm:$0xff]  ;;  %v501_v39 = vld [vmem:[%s7539_s1 + $0xf20] sm:$0xff] }
 0x1f2   :  { %2583 = vmatprep.subr.mxu0 %v591_v43  ;;  %v3188_v56 = vmax.f32 %v2123_v49, 0.0  ;;  %2622 = vmatprep.subr.mxu1 %v735_v48  ;;  %v654_v36 = vld [vmem:[%s7539_s1 + $0x13e8] sm:$0xff]  ;;  %v645_v40 = vld [vmem:[%s7539_s1 + $0x13a0] sm:$0xff]  ;;  %v500_v42 = vld [vmem:[%s7539_s1 + $0xf18] sm:$0xff] }
 0x1f3   :  { %2545 = vmatmul.mubr.f32.vlgmr.msra.gmra.mxu1 %v3844_v62  ;;  %2584 = vmatpush2.msra.mxu0 %v590_v50  ;;  %v644_v43 = vld [vmem:[%s7539_s1 + $0x1398] sm:$0xff]  ;;  %v491_v48 = vld [vmem:[%s7539_s1 + $0xed0] sm:$0xff] }
 0x1f4   :  { %2623 = vmatpush1.msra.mxu1 %v734_v51  ;;  %v3204_v60 = vcombine.low %v3187_v54, %v3188_v56  ;;  %2585 = vmatprep.subr.mxu0 %v582_v55  ;;  %v492_v45 = vld [vmem:[%s7539_s1 + $0xed8] sm:$0xff]  ;;  %v635_v49 = vld [vmem:[%s7539_s1 + $0x1350] sm:$0xff]  ;;  %v626_v54 = vld [vmem:[%s7539_s1 + $0x1308] sm:$0xff] }
 0x1f5   :  { %2624 = vmatprep.subr.mxu1 %v726_v47  ;;  %2586 = vmatpush2.msra.mxu0 %v581_v57  ;;  %v483_v50 = vld [vmem:[%s7539_s1 + $0xe90] sm:$0xff]  ;;  %v474_v55 = vld [vmem:[%s7539_s1 + $0xe48] sm:$0xff]  ;;  %v473_v56 = vld [vmem:[%s7539_s1 + $0xe40] sm:$0xff] }
 0x1f6   :  { %2625 = vmatpush1.msra.mxu1 %v725_v58  ;;  %v3218_v2 = vrot.slane %v3204_v60, %v3817_v52  ;;  %2587 = vmatprep.subr.mxu0 %v573_v59  ;;  %v627_v51 = vld [vmem:[%s7539_s1 + $0x1310] sm:$0xff]  ;;  %v618_v47 = vld [vmem:[%s7539_s1 + $0x12c8] sm:$0xff]  ;;  %v617_v57 = vld [vmem:[%s7539_s1 + $0x12c0] sm:$0xff] }
 0x1f7   :  { %2626 = vmatprep.subr.mxu1 %v717_v61  ;;  %2588 = vmatpush2.msra.mxu0 %v572_v0  ;;  %v465_v58 = vld [vmem:[%s7539_s1 + $0xe00] sm:$0xff]  ;;  %v464_v59 = vld [vmem:[%s7539_s1 + $0xdf8] sm:$0xff] }
 0x1f8   :  { %v3219_v10 = vcombine.low %v3211_v1, %v3218_v2  ;;  %2627 = vmatpush1.msra.mxu1 %v716_v63  ;;  %2589 = vmatprep.subr.mxu0 %v564_v4  ;;  %v609_v60 = vld [vmem:[%s7539_s1 + $0x1280] sm:$0xff]  ;;  %v608_v61 = vld [vmem:[%s7539_s1 + $0x1278] sm:$0xff]  ;;  %v455_v1 = vld [vmem:[%s7539_s1 + $0xdb0] sm:$0xff] }
 0x1f9   :  { %2628 = vmatprep.subr.mxu1 %v708_v6  ;;  %2590 = vmatpush2.msra.mxu0 %v563_v7  ;;  %v456_v0 = vld [vmem:[%s7539_s1 + $0xdb8] sm:$0xff]  ;;  %v599_v2 = vld [vmem:[%s7539_s1 + $0x1230] sm:$0xff]  ;;  %v878_v7 = vld [vmem:[%s7539_s1 + $0x1ae8] sm:$0xff] }
 0x1fa   :  { %2629 = vmatpush1.msra.mxu1 %v707_v9  ;;  %3247 = vst [vmem:[%s7542_s3] sm:$0xff] %v3219_v10  ;;  %2591 = vmatprep.subr.mxu0 %v555_v12  ;;  %v600_v63 = vld [vmem:[%s7539_s1 + $0x1238] sm:$0xff]  ;;  %v879_v4 = vld [vmem:[%s7539_s1 + $0x1af0] sm:$0xff]  ;;  %v1022_v9 = vld [vmem:[%s7539_s1 + $0x1f68] sm:$0xff] }
 0x1fb   :  { %2630 = vmatprep.subr.mxu1 %v699_v13  ;;  %2592 = vmatpush2.msra.mxu0 %v554_v14  ;;  %v1023_v6 = vld [vmem:[%s7539_s1 + $0x1f70] sm:$0xff]  ;;  %v870_v10 = vld [vmem:[%s7539_s1 + $0x1aa8] sm:$0xff]  ;;  %v869_v13 = vld [vmem:[%s7539_s1 + $0x1aa0] sm:$0xff] }
 0x1fc   :  { %2631 = vmatpush1.msra.mxu1 %v698_v15  ;;  %2593 = vmatprep.subr.mxu0 %v546_v17  ;;  %v1014_v12 = vld [vmem:[%s7539_s1 + $0x1f28] sm:$0xff]  ;;  %v1013_v14 = vld [vmem:[%s7539_s1 + $0x1f20] sm:$0xff] }
 0x1fd   :  { %2632 = vmatprep.subr.mxu1 %v690_v18  ;;  %2594 = vmatpush2.msra.mxu0 %v545_v19  ;;  %v861_v15 = vld [vmem:[%s7539_s1 + $0x1a60] sm:$0xff]  ;;  %v860_v18 = vld [vmem:[%s7539_s1 + $0x1a58] sm:$0xff] }
 0x1fe   :  { %2633 = vmatpush1.msra.mxu1 %v689_v20  ;;  %2595 = vmatprep.subr.mxu0 %v537_v5  ;;  %v1005_v17 = vld [vmem:[%s7539_s1 + $0x1ee0] sm:$0xff]  ;;  %v1004_v19 = vld [vmem:[%s7539_s1 + $0x1ed8] sm:$0xff] }
 0x1ff   :  { %2634 = vmatprep.subr.mxu1 %v681_v23  ;;  %2596 = vmatpush2.msra.mxu0 %v536_v24  ;;  %v852_v20 = vld [vmem:[%s7539_s1 + $0x1a18] sm:$0xff]  ;;  %v851_v23 = vld [vmem:[%s7539_s1 + $0x1a10] sm:$0xff] }
 0x200   :  { %2635 = vmatpush1.msra.mxu1 %v680_v25  ;;  %2597 = vmatprep.subr.mxu0 %v528_v27  ;;  %v996_v5 = vld [vmem:[%s7539_s1 + $0x1e98] sm:$0xff]  ;;  %v995_v24 = vld [vmem:[%s7539_s1 + $0x1e90] sm:$0xff] }
 0x201   :  { %2636 = vmatprep.subr.mxu1 %v672_v28  ;;  %2598 = vmatpush2.msra.mxu0 %v527_v30  ;;  %v843_v25 = vld [vmem:[%s7539_s1 + $0x19d0] sm:$0xff]  ;;  %v842_v28 = vld [vmem:[%s7539_s1 + $0x19c8] sm:$0xff] }
 0x202   :  { %2637 = vmatpush1.msra.mxu1 %v671_v31  ;;  %2599 = vmatprep.subr.mxu0 %v519_v32  ;;  %v987_v27 = vld [vmem:[%s7539_s1 + $0x1e50] sm:$0xff]  ;;  %v986_v30 = vld [vmem:[%s7539_s1 + $0x1e48] sm:$0xff] }
 0x203   :  { %2638 = vmatprep.subr.mxu1 %v663_v33  ;;  %2600 = vmatpush2.msra.mxu0 %v518_v34  ;;  %v834_v31 = vld [vmem:[%s7539_s1 + $0x1988] sm:$0xff]  ;;  %v833_v33 = vld [vmem:[%s7539_s1 + $0x1980] sm:$0xff] }
 0x204   :  { %2639 = vmatpush1.msra.mxu1 %v662_v22  ;;  %2601 = vmatprep.subr.mxu0 %v510_v35  ;;  %v978_v32 = vld [vmem:[%s7539_s1 + $0x1e08] sm:$0xff]  ;;  %v977_v34 = vld [vmem:[%s7539_s1 + $0x1e00] sm:$0xff] }
 0x205   :  { %2640 = vmatprep.subr.mxu1 %v654_v36  ;;  %2602 = vmatpush2.msra.mxu0 %v509_v37  ;;  %v825_v22 = vld [vmem:[%s7539_s1 + $0x1940] sm:$0xff]  ;;  %v824_v36 = vld [vmem:[%s7539_s1 + $0x1938] sm:$0xff] }
 0x206   :  { %2641 = vmatpush1.msra.mxu1 %v653_v38  ;;  %2603 = vmatprep.subr.mxu0 %v501_v39  ;;  %v969_v35 = vld [vmem:[%s7539_s1 + $0x1dc0] sm:$0xff]  ;;  %v968_v37 = vld [vmem:[%s7539_s1 + $0x1db8] sm:$0xff] }
 0x207   :  { %2642 = vmatprep.subr.mxu1 %v645_v40  ;;  %2604 = vmatpush2.msra.mxu0 %v500_v42  ;;  %v816_v38 = vld [vmem:[%s7539_s1 + $0x18f8] sm:$0xff]  ;;  %v815_v40 = vld [vmem:[%s7539_s1 + $0x18f0] sm:$0xff] }
 0x208   :  { %2643 = vmatpush1.msra.mxu1 %v644_v43  ;;  %2605 = vmatprep.subr.mxu0 %v492_v45  ;;  %v960_v39 = vld [vmem:[%s7539_s1 + $0x1d78] sm:$0xff]  ;;  %v959_v42 = vld [vmem:[%s7539_s1 + $0x1d70] sm:$0xff] }
 0x209   :  { %2644 = vmatprep.subr.mxu1 %v636_v46  ;;  %2606 = vmatpush2.msra.mxu0 %v491_v48  ;;  %v807_v43 = vld [vmem:[%s7539_s1 + $0x18b0] sm:$0xff]  ;;  %v806_v46 = vld [vmem:[%s7539_s1 + $0x18a8] sm:$0xff] }
 0x20a   :  { %2645 = vmatpush1.msra.mxu1 %v635_v49  ;;  %2607 = vmatprep.subr.mxu0 %v483_v50  ;;  %v951_v45 = vld [vmem:[%s7539_s1 + $0x1d30] sm:$0xff]  ;;  %v950_v48 = vld [vmem:[%s7539_s1 + $0x1d28] sm:$0xff] }
 0x20b   :  { %2646 = vmatprep.subr.mxu1 %v627_v51  ;;  %2608 = vmatpush2.msra.mxu0 %v482_v53  ;;  %v798_v49 = vld [vmem:[%s7539_s1 + $0x1868] sm:$0xff]  ;;  %v797_v51 = vld [vmem:[%s7539_s1 + $0x1860] sm:$0xff] }
 0x20c   :  { %2647 = vmatpush1.msra.mxu1 %v626_v54  ;;  %2609 = vmatprep.subr.mxu0 %v474_v55  ;;  %v942_v50 = vld [vmem:[%s7539_s1 + $0x1ce8] sm:$0xff]  ;;  %v941_v53 = vld [vmem:[%s7539_s1 + $0x1ce0] sm:$0xff] }
 0x20d   :  { %2648 = vmatprep.subr.mxu1 %v618_v47  ;;  %2610 = vmatpush2.msra.mxu0 %v473_v56  ;;  %v789_v54 = vld [vmem:[%s7539_s1 + $0x1820] sm:$0xff]  ;;  %v788_v47 = vld [vmem:[%s7539_s1 + $0x1818] sm:$0xff] }
 0x20e   :  { %2649 = vmatpush1.msra.mxu1 %v617_v57  ;;  %2611 = vmatprep.subr.mxu0 %v465_v58  ;;  %v933_v55 = vld [vmem:[%s7539_s1 + $0x1ca0] sm:$0xff]  ;;  %v932_v56 = vld [vmem:[%s7539_s1 + $0x1c98] sm:$0xff] }
 0x20f   :  { %2650 = vmatprep.subr.mxu1 %v609_v60  ;;  %2612 = vmatpush2.msra.mxu0 %v464_v59  ;;  %v780_v57 = vld [vmem:[%s7539_s1 + $0x17d8] sm:$0xff]  ;;  %v779_v60 = vld [vmem:[%s7539_s1 + $0x17d0] sm:$0xff] }
 0x210   :  { %2651 = vmatpush1.msra.mxu1 %v608_v61  ;;  %2613 = vmatprep.subr.mxu0 %v456_v0  ;;  %v924_v58 = vld [vmem:[%s7539_s1 + $0x1c58] sm:$0xff]  ;;  %v923_v59 = vld [vmem:[%s7539_s1 + $0x1c50] sm:$0xff] }
 0x211   :  { %2652 = vmatprep.subr.mxu1 %v600_v63  ;;  %2614 = vmatpush2.msra.mxu0 %v455_v1  ;;  %v771_v61 = vld [vmem:[%s7539_s1 + $0x1790] sm:$0xff]  ;;  %v770_v63 = vld [vmem:[%s7539_s1 + $0x1788] sm:$0xff] }
 0x212   :  { %2615 = vmatprep.mubr.f32.mxu0 %v3885_v11  ;;  %2653 = vmatpush1.msra.mxu1 %v599_v2  ;;  %v915_v0 = vld [vmem:[%s7539_s1 + $0x1c10] sm:$0xff]  ;;  %v914_v1 = vld [vmem:[%s7539_s1 + $0x1c08] sm:$0xff] }
 0x213   :  { %2616 = vmatmul.mubr.f32.vlgmr.msra.gmra.mxu0 %v3859_v3  ;;  %2654 = vmatprep.subr.mxu1 %v879_v4  ;;  %v762_v2 = vld [vmem:[%s7539_s1 + $0x1748] sm:$0xff] }
 0x214   :  { %2693 = vmatprep.subr.mxu0 %v1023_v6  ;;  %2655 = vmatpush2.msra.mxu1 %v878_v7  ;;  %v906_v4 = vld [vmem:[%s7539_s1 + $0x1bc8] sm:$0xff]  ;;  %v761_v6 = vld [vmem:[%s7539_s1 + $0x1740] sm:$0xff] }
 0x215   :  { %2694 = vmatpush1.msra.mxu0 %v1022_v9  ;;  %2656 = vmatprep.subr.mxu1 %v870_v10  ;;  %v905_v7 = vld [vmem:[%s7539_s1 + $0x1bc0] sm:$0xff] }
 0x216   :  { %2695 = vmatprep.subr.mxu0 %v1014_v12  ;;  %2657 = vmatpush2.msra.mxu1 %v869_v13  ;;  %v753_v9 = vld [vmem:[%s7539_s1 + $0x1700] sm:$0xff]  ;;  %v752_v12 = vld [vmem:[%s7539_s1 + $0x16f8] sm:$0xff] }
 0x217   :  { %2696 = vmatpush1.msra.mxu0 %v1013_v14  ;;  %2658 = vmatprep.subr.mxu1 %v861_v15  ;;  %v897_v10 = vld [vmem:[%s7539_s1 + $0x1b80] sm:$0xff]  ;;  %v896_v13 = vld [vmem:[%s7539_s1 + $0x1b78] sm:$0xff] }
 0x218   :  { %2697 = vmatprep.subr.mxu0 %v1005_v17  ;;  %2659 = vmatpush2.msra.mxu1 %v860_v18  ;;  %v744_v14 = vld [vmem:[%s7539_s1 + $0x16b8] sm:$0xff]  ;;  %v743_v17 = vld [vmem:[%s7539_s1 + $0x16b0] sm:$0xff] }
 0x219   :  { %2698 = vmatpush1.msra.mxu0 %v1004_v19  ;;  %2660 = vmatprep.subr.mxu1 %v852_v20  ;;  %v888_v15 = vld [vmem:[%s7539_s1 + $0x1b38] sm:$0xff]  ;;  %v887_v18 = vld [vmem:[%s7539_s1 + $0x1b30] sm:$0xff] }
 0x21a   :  { %2699 = vmatprep.subr.mxu0 %v996_v5  ;;  %2661 = vmatpush2.msra.mxu1 %v851_v23  ;;  %v1167_v19 = vld [vmem:[%s7539_s1 + $0x23f0] sm:$0xff]  ;;  %v1166_v5 = vld [vmem:[%s7539_s1 + $0x23e8] sm:$0xff] }
 0x21b   :  { %2700 = vmatpush1.msra.mxu0 %v995_v24  ;;  %2662 = vmatprep.subr.mxu1 %v843_v25  ;;  %v1311_v20 = vld [vmem:[%s7539_s1 + $0x2870] sm:$0xff]  ;;  %v1310_v23 = vld [vmem:[%s7539_s1 + $0x2868] sm:$0xff] }
 0x21c   :  { %2701 = vmatprep.subr.mxu0 %v987_v27  ;;  %2663 = vmatpush2.msra.mxu1 %v842_v28  ;;  %v1158_v24 = vld [vmem:[%s7539_s1 + $0x23a8] sm:$0xff]  ;;  %v1157_v27 = vld [vmem:[%s7539_s1 + $0x23a0] sm:$0xff] }
 0x21d   :  { %2702 = vmatpush1.msra.mxu0 %v986_v30  ;;  %2664 = vmatprep.subr.mxu1 %v834_v31  ;;  %v1302_v25 = vld [vmem:[%s7539_s1 + $0x2828] sm:$0xff]  ;;  %v1301_v28 = vld [vmem:[%s7539_s1 + $0x2820] sm:$0xff] }
 0x21e   :  { %2703 = vmatprep.subr.mxu0 %v978_v32  ;;  %2665 = vmatpush2.msra.mxu1 %v833_v33  ;;  %v1149_v30 = vld [vmem:[%s7539_s1 + $0x2360] sm:$0xff]  ;;  %v1148_v32 = vld [vmem:[%s7539_s1 + $0x2358] sm:$0xff] }
 0x21f   :  { %2704 = vmatpush1.msra.mxu0 %v977_v34  ;;  %2666 = vmatprep.subr.mxu1 %v825_v22  ;;  %v1293_v31 = vld [vmem:[%s7539_s1 + $0x27e0] sm:$0xff]  ;;  %v1292_v33 = vld [vmem:[%s7539_s1 + $0x27d8] sm:$0xff] }
 0x220   :  { %2705 = vmatprep.subr.mxu0 %v969_v35  ;;  %2667 = vmatpush2.msra.mxu1 %v824_v36  ;;  %v1140_v34 = vld [vmem:[%s7539_s1 + $0x2318] sm:$0xff]  ;;  %v1139_v35 = vld [vmem:[%s7539_s1 + $0x2310] sm:$0xff] }
 0x221   :  { %2706 = vmatpush1.msra.mxu0 %v968_v37  ;;  %2668 = vmatprep.subr.mxu1 %v816_v38  ;;  %v1284_v22 = vld [vmem:[%s7539_s1 + $0x2798] sm:$0xff]  ;;  %v1283_v36 = vld [vmem:[%s7539_s1 + $0x2790] sm:$0xff] }
 0x222   :  { %2707 = vmatprep.subr.mxu0 %v960_v39  ;;  %2669 = vmatpush2.msra.mxu1 %v815_v40  ;;  %v1131_v37 = vld [vmem:[%s7539_s1 + $0x22d0] sm:$0xff]  ;;  %v1130_v39 = vld [vmem:[%s7539_s1 + $0x22c8] sm:$0xff] }
 0x223   :  { %2708 = vmatpush1.msra.mxu0 %v959_v42  ;;  %2670 = vmatprep.subr.mxu1 %v807_v43  ;;  %v1275_v38 = vld [vmem:[%s7539_s1 + $0x2750] sm:$0xff]  ;;  %v1274_v40 = vld [vmem:[%s7539_s1 + $0x2748] sm:$0xff] }
 0x224   :  { %2709 = vmatprep.subr.mxu0 %v951_v45  ;;  %2671 = vmatpush2.msra.mxu1 %v806_v46  ;;  %v1122_v42 = vld [vmem:[%s7539_s1 + $0x2288] sm:$0xff]  ;;  %v1121_v45 = vld [vmem:[%s7539_s1 + $0x2280] sm:$0xff] }
 0x225   :  { %2710 = vmatpush1.msra.mxu0 %v950_v48  ;;  %2672 = vmatprep.subr.mxu1 %v798_v49  ;;  %v1266_v43 = vld [vmem:[%s7539_s1 + $0x2708] sm:$0xff]  ;;  %v1265_v46 = vld [vmem:[%s7539_s1 + $0x2700] sm:$0xff] }
 0x226   :  { %2711 = vmatprep.subr.mxu0 %v942_v50  ;;  %2673 = vmatpush2.msra.mxu1 %v797_v51  ;;  %v1113_v48 = vld [vmem:[%s7539_s1 + $0x2240] sm:$0xff]  ;;  %v1112_v50 = vld [vmem:[%s7539_s1 + $0x2238] sm:$0xff] }
 0x227   :  { %2712 = vmatpush1.msra.mxu0 %v941_v53  ;;  %2674 = vmatprep.subr.mxu1 %v789_v54  ;;  %v1257_v49 = vld [vmem:[%s7539_s1 + $0x26c0] sm:$0xff]  ;;  %v1256_v51 = vld [vmem:[%s7539_s1 + $0x26b8] sm:$0xff] }
 0x228   :  { %2713 = vmatprep.subr.mxu0 %v933_v55  ;;  %2675 = vmatpush2.msra.mxu1 %v788_v47  ;;  %v1104_v53 = vld [vmem:[%s7539_s1 + $0x21f8] sm:$0xff]  ;;  %v1103_v55 = vld [vmem:[%s7539_s1 + $0x21f0] sm:$0xff] }
 0x229   :  { %2714 = vmatpush1.msra.mxu0 %v932_v56  ;;  %2676 = vmatprep.subr.mxu1 %v780_v57  ;;  %v1248_v54 = vld [vmem:[%s7539_s1 + $0x2678] sm:$0xff]  ;;  %v1247_v47 = vld [vmem:[%s7539_s1 + $0x2670] sm:$0xff] }
 0x22a   :  { %2715 = vmatprep.subr.mxu0 %v924_v58  ;;  %2677 = vmatpush2.msra.mxu1 %v779_v60  ;;  %v1095_v56 = vld [vmem:[%s7539_s1 + $0x21b0] sm:$0xff]  ;;  %v1094_v58 = vld [vmem:[%s7539_s1 + $0x21a8] sm:$0xff] }
 0x22b   :  { %2716 = vmatpush1.msra.mxu0 %v923_v59  ;;  %2678 = vmatprep.subr.mxu1 %v771_v61  ;;  %v1239_v57 = vld [vmem:[%s7539_s1 + $0x2630] sm:$0xff]  ;;  %v1238_v60 = vld [vmem:[%s7539_s1 + $0x2628] sm:$0xff] }
 0x22c   :  { %2717 = vmatprep.subr.mxu0 %v915_v0  ;;  %2679 = vmatpush2.msra.mxu1 %v770_v63  ;;  %v1086_v59 = vld [vmem:[%s7539_s1 + $0x2168] sm:$0xff]  ;;  %v1085_v0 = vld [vmem:[%s7539_s1 + $0x2160] sm:$0xff] }
 0x22d   :  { %2718 = vmatpush1.msra.mxu0 %v914_v1  ;;  %2680 = vmatprep.subr.mxu1 %v762_v2  ;;  %v1230_v61 = vld [vmem:[%s7539_s1 + $0x25e8] sm:$0xff]  ;;  %v1229_v63 = vld [vmem:[%s7539_s1 + $0x25e0] sm:$0xff] }
 0x22e   :  { %2719 = vmatprep.subr.mxu0 %v906_v4  ;;  %2681 = vmatpush2.msra.mxu1 %v761_v6  ;;  %v1077_v1 = vld [vmem:[%s7539_s1 + $0x2120] sm:$0xff]  ;;  %v1076_v4 = vld [vmem:[%s7539_s1 + $0x2118] sm:$0xff] }
 0x22f   :  { %2720 = vmatpush1.msra.mxu0 %v905_v7  ;;  %2682 = vmatprep.subr.mxu1 %v753_v9  ;;  %v1221_v2 = vld [vmem:[%s7539_s1 + $0x25a0] sm:$0xff]  ;;  %v1220_v6 = vld [vmem:[%s7539_s1 + $0x2598] sm:$0xff] }
 0x230   :  { %2721 = vmatprep.subr.mxu0 %v897_v10  ;;  %2683 = vmatpush2.msra.mxu1 %v752_v12  ;;  %v1068_v7 = vld [vmem:[%s7539_s1 + $0x20d8] sm:$0xff]  ;;  %v1067_v10 = vld [vmem:[%s7539_s1 + $0x20d0] sm:$0xff] }
 0x231   :  { %2722 = vmatpush1.msra.mxu0 %v896_v13  ;;  %2684 = vmatprep.subr.mxu1 %v744_v14  ;;  %v1212_v9 = vld [vmem:[%s7539_s1 + $0x2558] sm:$0xff]  ;;  %v1211_v12 = vld [vmem:[%s7539_s1 + $0x2550] sm:$0xff] }
 0x232   :  { %2723 = vmatprep.subr.mxu0 %v888_v15  ;;  %2685 = vmatpush2.msra.mxu1 %v743_v17  ;;  %v1059_v13 = vld [vmem:[%s7539_s1 + $0x2090] sm:$0xff]  ;;  %v1058_v15 = vld [vmem:[%s7539_s1 + $0x2088] sm:$0xff] }
 0x233   :  { %2686 = vmatprep.mubr.f32.mxu1 %v4280_v26  ;;  %2724 = vmatpush1.msra.mxu0 %v887_v18  ;;  %v1203_v14 = vld [vmem:[%s7539_s1 + $0x2510] sm:$0xff]  ;;  %v1202_v17 = vld [vmem:[%s7539_s1 + $0x2508] sm:$0xff] }
 0x234   :  { %2687 = vmatmul.mubr.f32.vlgmr.msra.gmra.mxu1 %v4249_v16  ;;  %2725 = vmatprep.subr.mxu0 %v1167_v19  ;;  %v1050_v18 = vld [vmem:[%s7539_s1 + $0x2048] sm:$0xff] }
 0x235   :  { %2764 = vmatprep.subr.mxu1 %v1311_v20  ;;  %2726 = vmatpush2.msra.mxu0 %v1166_v5  ;;  %v1194_v19 = vld [vmem:[%s7539_s1 + $0x24c8] sm:$0xff]  ;;  %v1049_v20 = vld [vmem:[%s7539_s1 + $0x2040] sm:$0xff] }
 0x236   :  { %2765 = vmatpush1.msra.mxu1 %v1310_v23  ;;  %2727 = vmatprep.subr.mxu0 %v1158_v24  ;;  %v1193_v5 = vld [vmem:[%s7539_s1 + $0x24c0] sm:$0xff] }
 0x237   :  { %2766 = vmatprep.subr.mxu1 %v1302_v25  ;;  %2728 = vmatpush2.msra.mxu0 %v1157_v27  ;;  %v1041_v23 = vld [vmem:[%s7539_s1 + $0x2000] sm:$0xff]  ;;  %v1040_v25 = vld [vmem:[%s7539_s1 + $0x1ff8] sm:$0xff] }
 0x238   :  { %2767 = vmatpush1.msra.mxu1 %v1301_v28  ;;  %2729 = vmatprep.subr.mxu0 %v1149_v30  ;;  %v1185_v24 = vld [vmem:[%s7539_s1 + $0x2480] sm:$0xff]  ;;  %v1032_v27 = vld [vmem:[%s7539_s1 + $0x1fb8] sm:$0xff]  ;;  %v1031_v30 = vld [vmem:[%s7539_s1 + $0x1fb0] sm:$0xff] }
 0x239   :  { %2768 = vmatprep.subr.mxu1 %v1293_v31  ;;  %2730 = vmatpush2.msra.mxu0 %v1148_v32  ;;  %v1184_v28 = vld [vmem:[%s7539_s1 + $0x2478] sm:$0xff] }
 0x23a   :  { %2769 = vmatpush1.msra.mxu1 %v1292_v33  ;;  %2731 = vmatprep.subr.mxu0 %v1140_v34  ;;  %v1176_v31 = vld [vmem:[%s7539_s1 + $0x2438] sm:$0xff]  ;;  %v1175_v33 = vld [vmem:[%s7539_s1 + $0x2430] sm:$0xff] }
 0x23b   :  { %2770 = vmatprep.subr.mxu1 %v1284_v22  ;;  %2732 = vmatpush2.msra.mxu0 %v1139_v35  ;;  %v304_v32 = vld [vmem:[%s7539_s1 + $0x8f8] sm:$0xff]  ;;  %v295_v22 = vld [vmem:[%s7539_s1 + $0x8b0] sm:$0xff] }
 0x23c   :  { %2771 = vmatpush1.msra.mxu1 %v1283_v36  ;;  %2733 = vmatprep.subr.mxu0 %v1131_v37  ;;  %v160_v34 = vld [vmem:[%s7539_s1 + $0x478] sm:$0xff]  ;;  %v151_v36 = vld [vmem:[%s7539_s1 + $0x430] sm:$0xff] }
 0x23d   :  { %2772 = vmatprep.subr.mxu1 %v1275_v38  ;;  %2734 = vmatpush2.msra.mxu0 %v1130_v39  ;;  %v592_v35 = vld [vmem:[%s7539_s1 + $0x11f8] sm:$0xff]  ;;  %v7078_v38 = vld.sshfl [vmem:[%s7540_s0 + $0x10] sm:$0x3 pattern:$0x76325410]  ;;  %v286_v39 = vld [vmem:[%s7539_s1 + $0x868] sm:$0xff] }
 0x23e   :  { %2773 = vmatpush1.msra.mxu1 %v1274_v40  ;;  %2735 = vmatprep.subr.mxu0 %v1122_v42  ;;  %v448_v37 = vld [vmem:[%s7539_s1 + $0xd78] sm:$0xff]  ;;  %v583_v40 = vld [vmem:[%s7539_s1 + $0x11b0] sm:$0xff]  ;;  %v142_v42 = vld [vmem:[%s7539_s1 + $0x3e8] sm:$0xff] }
 0x23f   :  { %2774 = vmatprep.subr.mxu1 %v1266_v43  ;;  %2736 = vmatpush2.msra.mxu0 %v1121_v45  ;;  %v439_v43 = vld [vmem:[%s7539_s1 + $0xd30] sm:$0xff]  ;;  %v277_v45 = vld [vmem:[%s7539_s1 + $0x820] sm:$0xff] }
 0x240   :  { %2775 = vmatpush1.msra.mxu1 %v1265_v46  ;;  %2737 = vmatprep.subr.mxu0 %v1113_v48  ;;  %v574_v46 = vld [vmem:[%s7539_s1 + $0x1168] sm:$0xff]  ;;  %v133_v48 = vld [vmem:[%s7539_s1 + $0x3a0] sm:$0xff] }
 0x241   :  { %2776 = vmatprep.subr.mxu1 %v1257_v49  ;;  %2738 = vmatpush2.msra.mxu0 %v1112_v50  ;;  %v430_v49 = vld [vmem:[%s7539_s1 + $0xce8] sm:$0xff]  ;;  %v268_v50 = vld [vmem:[%s7539_s1 + $0x7d8] sm:$0xff] }
 0x242   :  { %2777 = vmatpush1.msra.mxu1 %v1256_v51  ;;  %2739 = vmatprep.subr.mxu0 %v1104_v53  ;;  %v565_v51 = vld [vmem:[%s7539_s1 + $0x1120] sm:$0xff]  ;;  %v124_v53 = vld [vmem:[%s7539_s1 + $0x358] sm:$0xff] }
 0x243   :  { %2778 = vmatprep.subr.mxu1 %v1248_v54  ;;  %2740 = vmatpush2.msra.mxu0 %v1103_v55  ;;  %v421_v54 = vld [vmem:[%s7539_s1 + $0xca0] sm:$0xff]  ;;  %v259_v55 = vld [vmem:[%s7539_s1 + $0x790] sm:$0xff] }
 0x244   :  { %2779 = vmatpush1.msra.mxu1 %v1247_v47  ;;  %2741 = vmatprep.subr.mxu0 %v1095_v56  ;;  %v556_v47 = vld [vmem:[%s7539_s1 + $0x10d8] sm:$0xff]  ;;  %v115_v56 = vld [vmem:[%s7539_s1 + $0x310] sm:$0xff] }
 0x245   :  { %2780 = vmatprep.subr.mxu1 %v1239_v57  ;;  %2742 = vmatpush2.msra.mxu0 %v1094_v58  ;;  %v412_v57 = vld [vmem:[%s7539_s1 + $0xc58] sm:$0xff]  ;;  %v250_v58 = vld [vmem:[%s7539_s1 + $0x748] sm:$0xff] }
 0x246   :  { %2781 = vmatpush1.msra.mxu1 %v1238_v60  ;;  %2743 = vmatprep.subr.mxu0 %v1086_v59  ;;  %v547_v60 = vld [vmem:[%s7539_s1 + $0x1090] sm:$0xff]  ;;  %v106_v59 = vld [vmem:[%s7539_s1 + $0x2c8] sm:$0xff] }
 0x247   :  { %2782 = vmatprep.subr.mxu1 %v1230_v61  ;;  %2744 = vmatpush2.msra.mxu0 %v1085_v0  ;;  %v403_v61 = vld [vmem:[%s7539_s1 + $0xc10] sm:$0xff]  ;;  %v241_v0 = vld [vmem:[%s7539_s1 + $0x700] sm:$0xff] }
 0x248   :  { %2783 = vmatpush1.msra.mxu1 %v1229_v63  ;;  %2745 = vmatprep.subr.mxu0 %v1077_v1  ;;  %v538_v63 = vld [vmem:[%s7539_s1 + $0x1048] sm:$0xff]  ;;  %v97_v1 = vld [vmem:[%s7539_s1 + $0x280] sm:$0xff] }
 0x249   :  { %2784 = vmatprep.subr.mxu1 %v1221_v2  ;;  %2746 = vmatpush2.msra.mxu0 %v1076_v4  ;;  %v394_v2 = vld [vmem:[%s7539_s1 + $0xbc8] sm:$0xff]  ;;  %v232_v4 = vld [vmem:[%s7539_s1 + $0x6b8] sm:$0xff] }
 0x24a   :  { %2785 = vmatpush1.msra.mxu1 %v1220_v6  ;;  %2747 = vmatprep.subr.mxu0 %v1068_v7  ;;  %v529_v6 = vld [vmem:[%s7539_s1 + $0x1000] sm:$0xff]  ;;  %v88_v7 = vld [vmem:[%s7539_s1 + $0x238] sm:$0xff] }
 0x24b   :  { %2786 = vmatprep.subr.mxu1 %v1212_v9  ;;  %2748 = vmatpush2.msra.mxu0 %v1067_v10  ;;  %v385_v9 = vld [vmem:[%s7539_s1 + $0xb80] sm:$0xff]  ;;  %v223_v10 = vld [vmem:[%s7539_s1 + $0x670] sm:$0xff] }
 0x24c   :  { %2787 = vmatpush1.msra.mxu1 %v1211_v12  ;;  %2749 = vmatprep.subr.mxu0 %v1059_v13  ;;  %v520_v12 = vld [vmem:[%s7539_s1 + $0xfb8] sm:$0xff]  ;;  %v79_v13 = vld [vmem:[%s7539_s1 + $0x1f0] sm:$0xff] }
 0x24d   :  { %2788 = vmatprep.subr.mxu1 %v1203_v14  ;;  %2750 = vmatpush2.msra.mxu0 %v1058_v15  ;;  %v376_v14 = vld [vmem:[%s7539_s1 + $0xb38] sm:$0xff]  ;;  %v214_v15 = vld [vmem:[%s7539_s1 + $0x628] sm:$0xff] }
 0x24e   :  { %2789 = vmatpush1.msra.mxu1 %v1202_v17  ;;  %2751 = vmatprep.subr.mxu0 %v1050_v18  ;;  %v511_v17 = vld [vmem:[%s7539_s1 + $0xf70] sm:$0xff]  ;;  %v70_v18 = vld [vmem:[%s7539_s1 + $0x1a8] sm:$0xff] }
 0x24f   :  { %2790 = vmatprep.subr.mxu1 %v1194_v19  ;;  %2752 = vmatpush2.msra.mxu0 %v1049_v20  ;;  %v367_v19 = vld [vmem:[%s7539_s1 + $0xaf0] sm:$0xff]  ;;  %v205_v20 = vld [vmem:[%s7539_s1 + $0x5e0] sm:$0xff] }
 0x250   :  { %2791 = vmatpush1.msra.mxu1 %v1193_v5  ;;  %2753 = vmatprep.subr.mxu0 %v1041_v23  ;;  %v502_v5 = vld [vmem:[%s7539_s1 + $0xf28] sm:$0xff]  ;;  %v61_v23 = vld [vmem:[%s7539_s1 + $0x160] sm:$0xff] }
 0x251   :  { %2792 = vmatprep.subr.mxu1 %v1185_v24  ;;  %2754 = vmatpush2.msra.mxu0 %v1040_v25  ;;  %v358_v24 = vld [vmem:[%s7539_s1 + $0xaa8] sm:$0xff]  ;;  %v196_v25 = vld [vmem:[%s7539_s1 + $0x598] sm:$0xff] }
 0x252   :  { %2757 = vmatprep.mubr.f32.mxu0 %v4290_v29  ;;  %2755 = vmatprep.subr.mxu0 %v1032_v27  ;;  %v493_v27 = vld [vmem:[%s7539_s1 + $0xee0] sm:$0xff] }
 0x253   :  { %2793 = vmatpush1.msra.mxu1 %v1184_v28  ;;  %2756 = vmatpush2.msra.mxu0 %v1031_v30  ;;  %v52_v28 = vld [vmem:[%s7539_s1 + $0x118] sm:$0xff]  ;;  %v349_v30 = vld [vmem:[%s7539_s1 + $0xa60] sm:$0xff] }
 0x254   :  { %2794 = vmatprep.subr.mxu1 %v1176_v31  ;;  %2758 = vmatmul.mubr.f32.vlgmr.msra.gmra.mxu0 %v4264_v21  ;;  %v187_v31 = vld [vmem:[%s7539_s1 + $0x550] sm:$0xff] }
 0x255   :  { %3257 = vmatprep.subr.mxu0 %v304_v32  ;;  %2795 = vmatpush1.msra.mxu1 %v1175_v33  ;;  %v484_v32 = vld [vmem:[%s7539_s1 + $0xe98] sm:$0xff]  ;;  %v43_v33 = vld [vmem:[%s7539_s1 + $0xd0] sm:$0xff] }
 0x256   :  { %2828 = vmatprep.mubr.f32.mxu1 %v3459_v44  ;;  %3258 = vmatpush3.msra.mxu0 %v160_v34  ;;  %v340_v34 = vld [vmem:[%s7539_s1 + $0xa18] sm:$0xff] }
 0x257   :  { %2829 = vmatmul.mubr.f32.vlgmr.msra.gmra.mxu1 %v7078_v38  ;;  %3259 = vmatprep.subr.mxu0 %v295_v22  ;;  %v178_v22 = vld [vmem:[%s7539_s1 + $0x508] sm:$0xff] }
 0x258   :  { %3292 = vmatprep.subr.mxu1 %v592_v35  ;;  %3260 = vmatpush3.msra.mxu0 %v151_v36  ;;  %v475_v35 = vld [vmem:[%s7539_s1 + $0xe50] sm:$0xff]  ;;  %v34_v36 = vld [vmem:[%s7539_s1 + $0x88] sm:$0xff] }
 0x259   :  { %3293 = vmatpush3.msra.mxu1 %v448_v37  ;;  %3261 = vmatprep.subr.mxu0 %v286_v39  ;;  %v331_v37 = vld [vmem:[%s7539_s1 + $0x9d0] sm:$0xff]  ;;  %v169_v39 = vld [vmem:[%s7539_s1 + $0x4c0] sm:$0xff] }
 0x25a   :  { %3294 = vmatprep.subr.mxu1 %v583_v40  ;;  %3262 = vmatpush3.msra.mxu0 %v142_v42  ;;  %v466_v40 = vld [vmem:[%s7539_s1 + $0xe08] sm:$0xff]  ;;  %v25_v42 = vld [vmem:[%s7539_s1 + $0x40] sm:$0xff] }
 0x25b   :  { %3295 = vmatpush3.msra.mxu1 %v439_v43  ;;  %3263 = vmatprep.subr.mxu0 %v277_v45  ;;  %v322_v43 = vld [vmem:[%s7539_s1 + $0x988] sm:$0xff]  ;;  %v457_v45 = vld [vmem:[%s7539_s1 + $0xdc0] sm:$0xff] }
 0x25c   :  { %3296 = vmatprep.subr.mxu1 %v574_v46  ;;  %3264 = vmatpush3.msra.mxu0 %v133_v48  ;;  %v880_v46 = vld [vmem:[%s7539_s1 + $0x1af8] sm:$0xff]  ;;  %v313_v48 = vld [vmem:[%s7539_s1 + $0x940] sm:$0xff] }
 0x25d   :  { %3297 = vmatpush3.msra.mxu1 %v430_v49  ;;  %3265 = vmatprep.subr.mxu0 %v268_v50  ;;  %v736_v49 = vld [vmem:[%s7539_s1 + $0x1678] sm:$0xff]  ;;  %v871_v50 = vld [vmem:[%s7539_s1 + $0x1ab0] sm:$0xff] }
 0x25e   :  { %3298 = vmatprep.subr.mxu1 %v565_v51  ;;  %3266 = vmatpush3.msra.mxu0 %v124_v53  ;;  %v1024_v51 = vld [vmem:[%s7539_s1 + $0x1f78] sm:$0xff]  ;;  %v862_v53 = vld [vmem:[%s7539_s1 + $0x1a68] sm:$0xff] }
 0x25f   :  { %3299 = vmatpush3.msra.mxu1 %v421_v54  ;;  %3267 = vmatprep.subr.mxu0 %v259_v55  ;;  %v1159_v54 = vld [vmem:[%s7539_s1 + $0x23b0] sm:$0xff] }
 0x260   :  { %3300 = vmatprep.subr.mxu1 %v556_v47  ;;  %3268 = vmatpush3.msra.mxu0 %v115_v56  ;;  %v1015_v55 = vld [vmem:[%s7539_s1 + $0x1f30] sm:$0xff]  ;;  %v1150_v47 = vld [vmem:[%s7539_s1 + $0x2368] sm:$0xff]  ;;  %v709_v56 = vld [vmem:[%s7539_s1 + $0x15a0] sm:$0xff] }
 0x261   :  { %3301 = vmatpush3.msra.mxu1 %v412_v57  ;;  %3269 = vmatprep.subr.mxu0 %v250_v58  ;;  %v1006_v57 = vld [vmem:[%s7539_s1 + $0x1ee8] sm:$0xff]  ;;  %v844_v58 = vld [vmem:[%s7539_s1 + $0x19d8] sm:$0xff] }
 0x262   :  { %3302 = vmatprep.subr.mxu1 %v547_v60  ;;  %3270 = vmatpush3.msra.mxu0 %v106_v59  ;;  %v1141_v60 = vld [vmem:[%s7539_s1 + $0x2320] sm:$0xff]  ;;  %v700_v59 = vld [vmem:[%s7539_s1 + $0x1558] sm:$0xff] }
 0x263   :  { %3303 = vmatpush3.msra.mxu1 %v403_v61  ;;  %3271 = vmatprep.subr.mxu0 %v241_v0  ;;  %v997_v61 = vld [vmem:[%s7539_s1 + $0x1ea0] sm:$0xff]  ;;  %v835_v0 = vld [vmem:[%s7539_s1 + $0x1990] sm:$0xff] }
 0x264   :  { %3304 = vmatprep.subr.mxu1 %v538_v63  ;;  %3272 = vmatpush3.msra.mxu0 %v97_v1  ;;  %v1132_v63 = vld [vmem:[%s7539_s1 + $0x22d8] sm:$0xff]  ;;  %v691_v1 = vld [vmem:[%s7539_s1 + $0x1510] sm:$0xff] }
 0x265   :  { %3305 = vmatpush3.msra.mxu1 %v394_v2  ;;  %3273 = vmatprep.subr.mxu0 %v232_v4  ;;  %v988_v2 = vld [vmem:[%s7539_s1 + $0x1e58] sm:$0xff]  ;;  %v826_v4 = vld [vmem:[%s7539_s1 + $0x1948] sm:$0xff] }
 0x266   :  { %3306 = vmatprep.subr.mxu1 %v529_v6  ;;  %3274 = vmatpush3.msra.mxu0 %v88_v7  ;;  %v1123_v6 = vld [vmem:[%s7539_s1 + $0x2290] sm:$0xff]  ;;  %v682_v7 = vld [vmem:[%s7539_s1 + $0x14c8] sm:$0xff] }
 0x267   :  { %3307 = vmatpush3.msra.mxu1 %v385_v9  ;;  %3275 = vmatprep.subr.mxu0 %v223_v10  ;;  %v979_v9 = vld [vmem:[%s7539_s1 + $0x1e10] sm:$0xff]  ;;  %v817_v10 = vld [vmem:[%s7539_s1 + $0x1900] sm:$0xff] }
 0x268   :  { %3308 = vmatprep.subr.mxu1 %v520_v12  ;;  %3276 = vmatpush3.msra.mxu0 %v79_v13  ;;  %v1114_v12 = vld [vmem:[%s7539_s1 + $0x2248] sm:$0xff]  ;;  %v673_v13 = vld [vmem:[%s7539_s1 + $0x1480] sm:$0xff] }
 0x269   :  { %3309 = vmatpush3.msra.mxu1 %v376_v14  ;;  %3277 = vmatprep.subr.mxu0 %v214_v15  ;;  %v970_v14 = vld [vmem:[%s7539_s1 + $0x1dc8] sm:$0xff]  ;;  %v808_v15 = vld [vmem:[%s7539_s1 + $0x18b8] sm:$0xff] }
 0x26a   :  { %3310 = vmatprep.subr.mxu1 %v511_v17  ;;  %3278 = vmatpush3.msra.mxu0 %v70_v18  ;;  %v1105_v17 = vld [vmem:[%s7539_s1 + $0x2200] sm:$0xff]  ;;  %v664_v18 = vld [vmem:[%s7539_s1 + $0x1438] sm:$0xff] }
 0x26b   :  { %3311 = vmatpush3.msra.mxu1 %v367_v19  ;;  %3279 = vmatprep.subr.mxu0 %v205_v20  ;;  %v961_v19 = vld [vmem:[%s7539_s1 + $0x1d80] sm:$0xff]  ;;  %v799_v20 = vld [vmem:[%s7539_s1 + $0x1870] sm:$0xff] }
 0x26c   :  { %3312 = vmatprep.subr.mxu1 %v502_v5  ;;  %3280 = vmatpush3.msra.mxu0 %v61_v23  ;;  %v1096_v5 = vld [vmem:[%s7539_s1 + $0x21b8] sm:$0xff]  ;;  %v655_v23 = vld [vmem:[%s7539_s1 + $0x13f0] sm:$0xff] }
 0x26d   :  { %3313 = vmatpush3.msra.mxu1 %v358_v24  ;;  %3281 = vmatprep.subr.mxu0 %v196_v25  ;;  %v952_v24 = vld [vmem:[%s7539_s1 + $0x1d38] sm:$0xff]  ;;  %v790_v25 = vld [vmem:[%s7539_s1 + $0x1828] sm:$0xff] }
 0x26e   :  { %3314 = vmatprep.subr.mxu1 %v493_v27  ;;  %3282 = vmatpush3.msra.mxu0 %v52_v28  ;;  %v1087_v27 = vld [vmem:[%s7539_s1 + $0x2170] sm:$0xff]  ;;  %v646_v28 = vld [vmem:[%s7539_s1 + $0x13a8] sm:$0xff] }
 0x26f   :  { %3315 = vmatpush3.msra.mxu1 %v349_v30  ;;  %3283 = vmatprep.subr.mxu0 %v187_v31  ;;  %v943_v30 = vld [vmem:[%s7539_s1 + $0x1cf0] sm:$0xff]  ;;  %v781_v31 = vld [vmem:[%s7539_s1 + $0x17e0] sm:$0xff] }
 0x270   :  { %3316 = vmatprep.subr.mxu1 %v484_v32  ;;  %3284 = vmatpush3.msra.mxu0 %v43_v33  ;;  %v1078_v32 = vld [vmem:[%s7539_s1 + $0x2128] sm:$0xff]  ;;  %v637_v33 = vld [vmem:[%s7539_s1 + $0x1360] sm:$0xff] }
 0x271   :  { %3317 = vmatpush3.msra.mxu1 %v340_v34  ;;  %3285 = vmatprep.subr.mxu0 %v178_v22  ;;  %v934_v34 = vld [vmem:[%s7539_s1 + $0x1ca8] sm:$0xff]  ;;  %v772_v22 = vld [vmem:[%s7539_s1 + $0x1798] sm:$0xff] }
 0x272   :  { %3318 = vmatprep.subr.mxu1 %v475_v35  ;;  %3286 = vmatpush3.msra.mxu0 %v34_v36  ;;  %v1069_v35 = vld [vmem:[%s7539_s1 + $0x20e0] sm:$0xff]  ;;  %v628_v36 = vld [vmem:[%s7539_s1 + $0x1318] sm:$0xff] }
 0x273   :  { %3319 = vmatpush3.msra.mxu1 %v331_v37  ;;  %3287 = vmatprep.subr.mxu0 %v169_v39  ;;  %v925_v37 = vld [vmem:[%s7539_s1 + $0x1c60] sm:$0xff]  ;;  %v763_v39 = vld [vmem:[%s7539_s1 + $0x1750] sm:$0xff] }
 0x274   :  { %3320 = vmatprep.subr.mxu1 %v466_v40  ;;  %3288 = vmatpush3.msra.mxu0 %v25_v42  ;;  %v1060_v40 = vld [vmem:[%s7539_s1 + $0x2098] sm:$0xff]  ;;  %v619_v42 = vld [vmem:[%s7539_s1 + $0x12d0] sm:$0xff] }
 0x275   :  { %2899 = vmatprep.mubr.f32.mxu0 %v3875_v8  ;;  %3321 = vmatpush3.msra.mxu1 %v322_v43  ;;  %v1168_v8 = vld [vmem:[%s7539_s1 + $0x23f8] sm:$0xff] }
 0x276   :  { %2900 = vmatmul.mubr.f32.vlgmr.msra.gmra.mxu0 %v3844_v62  ;;  %3322 = vmatprep.subr.mxu1 %v457_v45  ;;  %v727_v62 = vld [vmem:[%s7539_s1 + $0x1630] sm:$0xff]  ;;  %v916_v43 = vld [vmem:[%s7539_s1 + $0x1c18] sm:$0xff]  ;;  %v754_v45 = vld [vmem:[%s7539_s1 + $0x1708] sm:$0xff] }
 0x277   :  { %3327 = vmatprep.subr.mxu0 %v880_v46  ;;  %3323 = vmatpush3.msra.mxu1 %v313_v48  ;;  %v1051_v46 = vld [vmem:[%s7539_s1 + $0x2050] sm:$0xff]  ;;  %v610_v48 = vld [vmem:[%s7539_s1 + $0x1288] sm:$0xff] }
 0x278   :  { %2969 = vmatprep.mubr.f32.mxu1 %v3885_v11  ;;  %3328 = vmatpush3.msra.mxu0 %v736_v49  ;;  %v718_v11 = vld [vmem:[%s7539_s1 + $0x15e8] sm:$0xff]  ;;  %v907_v49 = vld [vmem:[%s7539_s1 + $0x1bd0] sm:$0xff] }
 0x279   :  { %2970 = vmatmul.mubr.f32.vlgmr.msra.gmra.mxu1 %v3859_v3  ;;  %3329 = vmatprep.subr.mxu0 %v871_v50  ;;  %v853_v3 = vld [vmem:[%s7539_s1 + $0x1a20] sm:$0xff] }
 0x27a   :  { %3362 = vmatprep.subr.mxu1 %v1168_v8  ;;  %3330 = vmatpush3.msra.mxu0 %v727_v62  ;;  %v745_v50 = vld [vmem:[%s7539_s1 + $0x16c0] sm:$0xff]  ;;  %v1042_v8 = vld [vmem:[%s7539_s1 + $0x2008] sm:$0xff] }
 0x27b   :  { %3363 = vmatpush3.msra.mxu1 %v1024_v51  ;;  %3331 = vmatprep.subr.mxu0 %v862_v53  ;;  %v601_v62 = vld [vmem:[%s7539_s1 + $0x1240] sm:$0xff]  ;;  %v898_v51 = vld [vmem:[%s7539_s1 + $0x1b88] sm:$0xff] }
 0x27c   :  { %3364 = vmatprep.subr.mxu1 %v1159_v54  ;;  %3332 = vmatpush3.msra.mxu0 %v718_v11  ;;  %v1033_v53 = vld [vmem:[%s7539_s1 + $0x1fc0] sm:$0xff]  ;;  %v1312_v11 = vld [vmem:[%s7539_s1 + $0x2878] sm:$0xff] }
 0x27d   :  { %3365 = vmatpush3.msra.mxu1 %v1015_v55  ;;  %3333 = vmatprep.subr.mxu0 %v853_v3  ;;  %v889_v54 = vld [vmem:[%s7539_s1 + $0x1b40] sm:$0xff]  ;;  %v1267_v55 = vld [vmem:[%s7539_s1 + $0x2710] sm:$0xff]  ;;  %v1258_v3 = vld [vmem:[%s7539_s1 + $0x26c8] sm:$0xff] }
 0x27e   :  { %3366 = vmatprep.subr.mxu1 %v1150_v47  ;;  %3334 = vmatpush3.msra.mxu0 %v709_v56  ;;  %v1249_v47 = vld [vmem:[%s7539_s1 + $0x2680] sm:$0xff]  ;;  %v1240_v56 = vld [vmem:[%s7539_s1 + $0x2638] sm:$0xff] }
 0x27f   :  { %3367 = vmatpush3.msra.mxu1 %v1006_v57  ;;  %3335 = vmatprep.subr.mxu0 %v844_v58  ;;  %v1231_v57 = vld [vmem:[%s7539_s1 + $0x25f0] sm:$0xff]  ;;  %v1222_v58 = vld [vmem:[%s7539_s1 + $0x25a8] sm:$0xff] }
 0x280   :  { %3368 = vmatprep.subr.mxu1 %v1141_v60  ;;  %3336 = vmatpush3.msra.mxu0 %v700_v59  ;;  %v1213_v60 = vld [vmem:[%s7539_s1 + $0x2560] sm:$0xff]  ;;  %v1204_v59 = vld [vmem:[%s7539_s1 + $0x2518] sm:$0xff] }
 0x281   :  { %3369 = vmatpush3.msra.mxu1 %v997_v61  ;;  %3337 = vmatprep.subr.mxu0 %v835_v0  ;;  %v1195_v61 = vld [vmem:[%s7539_s1 + $0x24d0] sm:$0xff]  ;;  %v1186_v0 = vld [vmem:[%s7539_s1 + $0x2488] sm:$0xff] }
 0x282   :  { %3370 = vmatprep.subr.mxu1 %v1132_v63  ;;  %3338 = vmatpush3.msra.mxu0 %v691_v1  ;;  %v1177_v63 = vld [vmem:[%s7539_s1 + $0x2440] sm:$0xff]  ;;  %v2191_v1 = vpop.f32.mrf.mxu0 }
 0x283   :  { %3371 = vmatpush3.msra.mxu1 %v988_v2  ;;  %3339 = vmatprep.subr.mxu0 %v826_v4  ;;  %v2262_v2 = vpop.f32.mrf.mxu1 }
 0x284   :  { %3372 = vmatprep.subr.mxu1 %v1123_v6  ;;  %3340 = vmatpush3.msra.mxu0 %v682_v7  ;;  %v2193_v4 = vpop.f32.mrf.mxu0  ;;  %v1339_v6 = vsub.s32 5, %v3787_v41 }
 0x285   :  { %3373 = vmatpush3.msra.mxu1 %v979_v9  ;;  %3341 = vmatprep.subr.mxu0 %v817_v10  ;;  %v2264_v7 = vpop.f32.mrf.mxu1  ;;  %v1335_v10 = vsub.s32 4, %v3787_v41 }
 0x286   :  { %3374 = vmatprep.subr.mxu1 %v1114_v12  ;;  %3342 = vmatpush3.msra.mxu0 %v673_v13  ;;  %v2333_v9 = vpop.f32.mrf.mxu0  ;;  %v3457_v13 = vld [vmem:[%s7541_s2] sm:$0xff] }
 0x287   :  { %3375 = vmatpush3.msra.mxu1 %v970_v14  ;;  %3343 = vmatprep.subr.mxu0 %v808_v15  ;;  %v2404_v12 = vpop.f32.mrf.mxu1  ;;  %v1340_v14 = vrot.slane %v3457_v13, %v1339_v6 }
 0x288   :  { %3376 = vmatprep.subr.mxu1 %v1105_v17  ;;  %3344 = vmatpush3.msra.mxu0 %v664_v18  ;;  %v2335_v15 = vpop.f32.mrf.mxu0 }
 0x289   :  { %3377 = vmatpush3.msra.mxu1 %v961_v19  ;;  %3345 = vmatprep.subr.mxu0 %v799_v20  ;;  %v2406_v17 = vpop.f32.mrf.mxu1  ;;  %v1343_v19 = vsub.s32 6, %v3787_v41 }
 0x28a   :  { %3378 = vmatprep.subr.mxu1 %v1096_v5  ;;  %3346 = vmatpush3.msra.mxu0 %v655_v23  ;;  %v1347_v23 = vsub.s32 7, %v3787_v41 }
 0x28b   :  { %3379 = vmatpush3.msra.mxu1 %v952_v24  ;;  %3347 = vmatprep.subr.mxu0 %v790_v25 }
 0x28c   :  { %3380 = vmatprep.subr.mxu1 %v1087_v27  ;;  %3348 = vmatpush3.msra.mxu0 %v646_v28  ;;  %v1344_v27 = vrot.slane %v3457_v13, %v1343_v19 }
 0x28d   :  { %3381 = vmatpush3.msra.mxu1 %v943_v30  ;;  %3349 = vmatprep.subr.mxu0 %v781_v31 }
 0x28e   :  { %3382 = vmatprep.subr.mxu1 %v1078_v32  ;;  %3350 = vmatpush3.msra.mxu0 %v637_v33  ;;  %v1348_v33 = vrot.slane %v3457_v13, %v1347_v23 }
 0x28f   :  { %3383 = vmatpush3.msra.mxu1 %v934_v34  ;;  %3351 = vmatprep.subr.mxu0 %v772_v22 }
 0x290   :  { %3384 = vmatprep.subr.mxu1 %v1069_v35  ;;  %3352 = vmatpush3.msra.mxu0 %v628_v36 }
 0x291   :  { %3385 = vmatpush3.msra.mxu1 %v925_v37  ;;  %3353 = vmatprep.subr.mxu0 %v763_v39  ;;  %v2475_v18 = vpop.f32.mrf.mxu0 }
 0x292   :  { %3386 = vmatprep.subr.mxu1 %v1060_v40  ;;  %3354 = vmatpush3.msra.mxu0 %v619_v42 }
 0x293   :  { %3387 = vmatpush3.msra.mxu1 %v916_v43  ;;  %3355 = vmatprep.subr.mxu0 %v754_v45  ;;  %v2477_v24 = vpop.f32.mrf.mxu0 }
 0x294   :  { %3388 = vmatprep.subr.mxu1 %v1051_v46  ;;  %3356 = vmatpush3.msra.mxu0 %v610_v48 }
 0x295   :  { %3389 = vmatpush3.msra.mxu1 %v907_v49  ;;  %3357 = vmatprep.subr.mxu0 %v745_v50 }
 0x296   :  { %3390 = vmatprep.subr.mxu1 %v1042_v8  ;;  %3358 = vmatpush3.msra.mxu0 %v601_v62 }
 0x297   :  { %3039 = vmatprep.mubr.f32.mxu0 %v4280_v26  ;;  %3391 = vmatpush3.msra.mxu1 %v898_v51  ;;  %v1303_v26 = vld [vmem:[%s7539_s1 + $0x2830] sm:$0xff] }
 0x298   :  { %3040 = vmatmul.mubr.f32.vlgmr.msra.gmra.mxu0 %v4249_v16  ;;  %3392 = vmatprep.subr.mxu1 %v1033_v53  ;;  %v1294_v16 = vld [vmem:[%s7539_s1 + $0x27e8] sm:$0xff] }
 0x299   :  { %3414 = vmatprep.subr.mxu0 %v3459_v44  ;;  %3393 = vmatpush3.msra.mxu1 %v889_v54 }
 0x29a   :  { %3109 = vmatprep.mubr.f32.mxu1 %v4290_v29  ;;  %3415 = vmatpush3.msra.mxu0 %v1312_v11  ;;  %v1285_v29 = vld [vmem:[%s7539_s1 + $0x27a0] sm:$0xff] }
 0x29b   :  { %3110 = vmatmul.mubr.f32.vlgmr.msra.gmra.mxu1 %v4264_v21  ;;  %3416 = vmatprep.subr.mxu0 %v3459_v44  ;;  %v1276_v21 = vld [vmem:[%s7539_s1 + $0x2758] sm:$0xff] }
 0x29c   :  { %3446 = vmatprep.mubr.msk.f32.mxu0 %vm3460_vm0, %v3459_v44  ;;  %3417 = vmatpush3.msra.mxu0 %v1303_v26 }
 0x29d   :  { %3418 = vmatprep.subr.mxu0 %v3459_v44 }
 0x29e   :  { %3419 = vmatpush3.msra.mxu0 %v1294_v16 }
 0x29f   :  { %3420 = vmatprep.subr.mxu0 %v3459_v44 }
 0x2a0   :  { %3421 = vmatpush3.msra.mxu0 %v1285_v29 }
 0x2a1   :  { %3422 = vmatprep.subr.mxu0 %v3459_v44 }
 0x2a2   :  { %3423 = vmatpush3.msra.mxu0 %v1276_v21 }
 0x2a3   :  { %3424 = vmatprep.subr.mxu0 %v3459_v44 }
 0x2a4   :  { %3425 = vmatpush3.msra.mxu0 %v1267_v55 }
 0x2a5   :  { %3426 = vmatprep.subr.mxu0 %v3459_v44 }
 0x2a6   :  { %3427 = vmatpush3.msra.mxu0 %v1258_v3 }
 0x2a7   :  { %3428 = vmatprep.subr.mxu0 %v3459_v44 }
 0x2a8   :  { %3429 = vmatpush3.msra.mxu0 %v1249_v47 }
 0x2a9   :  { %3430 = vmatprep.subr.mxu0 %v3459_v44 }
 0x2aa   :  { %3431 = vmatpush3.msra.mxu0 %v1240_v56 }
 0x2ab   :  { %3432 = vmatprep.subr.mxu0 %v3459_v44 }
 0x2ac   :  { %3433 = vmatpush3.msra.mxu0 %v1231_v57 }
 0x2ad   :  { %3434 = vmatprep.subr.mxu0 %v3459_v44 }
 0x2ae   :  { %3435 = vmatpush3.msra.mxu0 %v1222_v58 }
 0x2af   :  { %3436 = vmatprep.subr.mxu0 %v3459_v44 }
 0x2b0   :  { %3437 = vmatpush3.msra.mxu0 %v1213_v60 }
 0x2b1   :  { %3438 = vmatprep.subr.mxu0 %v3459_v44 }
 0x2b2   :  { %3439 = vmatpush3.msra.mxu0 %v1204_v59 }
 0x2b3   :  { %3440 = vmatprep.subr.mxu0 %v3459_v44  ;;  %v2546_v20 = vpop.f32.mrf.mxu1 }
 0x2b4   :  { %3441 = vmatpush3.msra.mxu0 %v1195_v61  ;;  %v2547_v35 = vadd.f32 %v2546_v20, %v1344_v27 }
 0x2b5   :  { %3442 = vmatprep.subr.mxu0 %v3459_v44  ;;  %v2548_v28 = vpop.f32.mrf.mxu1 }
 0x2b6   :  { %3443 = vmatpush3.msra.mxu0 %v1186_v0  ;;  %v2549_v39 = vadd.f32 %v2548_v28, %v1348_v33 }
 0x2b7   :  { %3444 = vmatprep.subr.mxu0 %v3459_v44  ;;  %v1336_v44 = vrot.slane %v3457_v13, %v1335_v10 }
 0x2b8   :  { %3445 = vmatpush3.msra.mxu0 %v1177_v63 }
 0x2b9   :  { %3447 = vmatmul.mubr.f32.vlgmr.msra.gmra.mxu0 %v7078_v38  ;;  %v2194_v38 = vadd.f32 %v2193_v4, %v1340_v14  ;;  %v2192_v5 = vadd.f32 %v2191_v1, %v1336_v44  ;;  %v3254_v1 = vld [vmem:[%s7541_s2 + $0x8] ss:$0 sm:$0xff] }
 0x2bb   :  { %v2265_v25 = vadd.f32 %v2264_v7, %v2194_v38  ;;  %v2263_v31 = vadd.f32 %v2262_v2, %v2192_v5 }
 0x2bd   :  { %v2336_v32 = vadd.f32 %v2335_v15, %v2265_v25  ;;  %v2334_v22 = vadd.f32 %v2333_v9, %v2263_v31 }
 0x2bf   :  { %v2407_v37 = vadd.f32 %v2406_v17, %v2336_v32  ;;  %v2405_v43 = vadd.f32 %v2404_v12, %v2334_v22 }
 0x2c1   :  { %v2478_v45 = vadd.f32 %v2477_v24, %v2407_v37  ;;  %v2476_v49 = vadd.f32 %v2475_v18, %v2405_v43 }
 0x2c3   :  { %v3190_v53 = vmax.f32 %v2478_v45, 0.0  ;;  %v3189_v16 = vmax.f32 %v2476_v49, 0.0 }
 0x2c5   :  { %v3220_v21 = vcombine.low %v3189_v16, %v3190_v53 }
 0x2c7   :  { %v3228_v56 = vrot.slane %v3220_v21, %v3817_v52 }
 0x2d3   :  { %v2617_v30 = vpop.f32.mrf.mxu0 }
 0x2d4   :  { %v2618_v40 = vadd.f32 %v2617_v30, %v2547_v35 }
 0x2d5   :  { %v2619_v36 = vpop.f32.mrf.mxu0 }
 0x2d6   :  { %v2620_v46 = vadd.f32 %v2619_v36, %v2549_v39 }
 0x2f4   :  { %v2688_v34 = vpop.f32.mrf.mxu1 }
 0x2f5   :  { %v2689_v41 = vadd.f32 %v2688_v34, %v2618_v40 }
 0x2f6   :  { %v2690_v42 = vpop.f32.mrf.mxu1 }
 0x2f7   :  { %v2691_v50 = vadd.f32 %v2690_v42, %v2620_v46 }
 0x314   :  { %v2759_v48 = vpop.f32.mrf.mxu0 }
 0x315   :  { %v2760_v8 = vadd.f32 %v2759_v48, %v2689_v41 }
 0x316   :  { %v2761_v62 = vpop.f32.mrf.mxu0 }
 0x317   :  { %v2830_v51 = vpop.f32.mrf.mxu1  ;;  %v2762_v54 = vadd.f32 %v2761_v62, %v2691_v50 }
 0x318   :  { %v2831_v11 = vadd.f32 %v2830_v51, %v2760_v8 }
 0x319   :  { %v2832_v26 = vpop.f32.mrf.mxu1 }
 0x31a   :  { %v2833_v29 = vadd.f32 %v2832_v26, %v2762_v54  ;;  %v3191_v55 = vmax.f32 %v2831_v11, 0.0 }
 0x31c   :  { %v3192_v3 = vmax.f32 %v2833_v29, 0.0 }
 0x31e   :  { %v3221_v47 = vcombine.low %v3191_v55, %v3192_v3 }
 0x320   :  { %v3235_v57 = vrot.slane %v3221_v47, %v3817_v52 }
 0x322   :  { %v3236_v58 = vcombine.low %v3228_v56, %v3235_v57 }
 0x324   :  { %3248 = vst [vmem:[%s7542_s3 + $0x8] sm:$0xff] %v3236_v58 }
 0x336   :  { %v3289_v60 = vpop.f32.mrf.mxu0 }
 0x338   :  { %v3290_v59 = vpop.f32.mrf.mxu0 }
 0x339   :  { %v3324_v61 = vpop.f32.mrf.mxu1  ;;  %v3291_v63 = vadd.f32 %v3290_v59, %v3289_v60 }
 0x33b   :  { %v3325_v2 = vpop.f32.mrf.mxu1  ;;  %v2902_v7 = vadd.f32 %v3291_v63, %v3254_v1 }
 0x33c   :  { %v3326_v9 = vadd.f32 %v3325_v2, %v3324_v61 }
 0x33e   :  { %v2972_v12 = vadd.f32 %v3326_v9, %v2902_v7 }
 0x358   :  { %v3359_v0 = vpop.f32.mrf.mxu0 }
 0x35a   :  { %v3360_v4 = vpop.f32.mrf.mxu0 }
 0x35b   :  { %v3394_v6 = vpop.f32.mrf.mxu1  ;;  %v3361_v52 = vadd.f32 %v3360_v4, %v3359_v0 }
 0x35d   :  { %v3395_v10 = vpop.f32.mrf.mxu1  ;;  %v3042_v13 = vadd.f32 %v3361_v52, %v2972_v12 }
 0x35e   :  { %v3396_v14 = vadd.f32 %v3395_v10, %v3394_v6 }
 0x360   :  { %v3112_v15 = vadd.f32 %v3396_v14, %v3042_v13 }
 0x379   :  { %v3181_v44 = vpop.f32.mrf.mxu0 }
 0x37a   :  { %v3182_v17 = vadd.f32 %v3181_v44, %v3112_v15 }
 0x37b   :  { %v3448_v18 = vpop.f32.mrf.mxu0 }
 0x37c   :  { %v3193_v38 = vmax.f32 %v3182_v17, 0.0 }
 0x37e   :  { %3256 = vst.sshfl [vmem:[%s7542_s3 + $0x10] sm:$0x3 pattern:$0x76325410] %v3193_v38 }

// kernel: conv_model_forward.12
= control target key start
LH: loop header
LB: loop body
LE: loop exit
PB: predicated region body
PF: predicated region fallthrough
CT: control target
= control target key end

     0   :  { %v444_v3 = vmov 0.0   ;;  %vm63_vm0 = vcmask 523264   ;;  %v53_v38 = vlaneseq  ;;  %s793_s1 = inlined_call_operand.vmem [shape: f32[64,256], index: 1, kind: input, shape index: {}]   ;;  %s794_s0 = inlined_call_operand.vmem [shape: f32[162,64], index: 0, kind: input, shape index: {}]   ;;  %s795_s2 = inlined_call_operand.vmem [shape: f32[1,256], index: 2, kind: input, shape index: {}]   ;;  %s796_s3 = inlined_call_operand.vmem [shape: f32[162,256], index: 3, kind: output, shape index: {}]  }
   0x1   :  { %v50_v0 = vld [vmem:[%s793_s1 + $0x78] sm:$0xff]  ;;  %v49_v1 = vld [vmem:[%s793_s1 + $0x70] sm:$0xff]  ;;  %v48_v2 = vld [vmem:[%s793_s1 + $0x68] sm:$0xff]  ;;  %191 = vmatprep.mubr.f32.mxu0 %v444_v3  ;;  %257 = vmatprep.mubr.f32.mxu1 %v444_v3 }
   0x2   :  { %143 = vmatprep.subr.mxu0 %v50_v0  ;;  %427 = vmatprep.subr.mxu1 %v50_v0  ;;  %v47_v4 = vld [vmem:[%s793_s1 + $0x60] sm:$0xff]  ;;  %v46_v5 = vld [vmem:[%s793_s1 + $0x58] sm:$0xff]  ;;  %v45_v6 = vld [vmem:[%s793_s1 + $0x50] sm:$0xff]  ;;  %v54_v39 = vshrl.u32 %v53_v38, 7 }
   0x3   :  { %144 = vmatpush1.msra.mxu0 %v49_v1  ;;  %435 = vmatpush1.msra.mxu1 %v49_v1  ;;  %v44_v7 = vld [vmem:[%s793_s1 + $0x48] sm:$0xff]  ;;  %v43_v8 = vld [vmem:[%s793_s1 + $0x40] sm:$0xff]  ;;  %v42_v9 = vld [vmem:[%s793_s1 + $0x38] sm:$0xff] }
   0x4   :  { %145 = vmatprep.subr.mxu0 %v48_v2  ;;  %428 = vmatprep.subr.mxu1 %v48_v2  ;;  %v41_v10 = vld [vmem:[%s793_s1 + $0x30] sm:$0xff]  ;;  %v40_v11 = vld [vmem:[%s793_s1 + $0x28] sm:$0xff]  ;;  %v39_v12 = vld [vmem:[%s793_s1 + $0x20] sm:$0xff]  ;;  %v55_v40 = vsub.s32 0, %v54_v39  ;;  %v59_v42 = vsub.s32 1, %v54_v39 }
   0x5   :  { %146 = vmatpush1.msra.mxu0 %v47_v4  ;;  %436 = vmatpush1.msra.mxu1 %v47_v4  ;;  %v38_v13 = vld [vmem:[%s793_s1 + $0x18] sm:$0xff]  ;;  %v37_v14 = vld [vmem:[%s793_s1 + $0x10] sm:$0xff]  ;;  %v36_v15 = vld [vmem:[%s793_s1 + $0x8] sm:$0xff] }
   0x6   :  { %147 = vmatprep.subr.mxu0 %v46_v5  ;;  %429 = vmatprep.subr.mxu1 %v46_v5  ;;  %v35_v16 = vld [vmem:[%s793_s1] sm:$0xff]  ;;  %v25_v18 = vld [vmem:[%s794_s0 + $0x58] sm:$0xff]  ;;  %v15_v19 = vld [vmem:[%s794_s0 + $0x8] sm:$0xff] }
   0x7   :  { %148 = vmatpush1.msra.mxu0 %v45_v6  ;;  %437 = vmatpush1.msra.mxu1 %v45_v6  ;;  %v14_v17 = vld [vmem:[%s794_s0] sm:$0xff]  ;;  %v16_v21 = vld [vmem:[%s794_s0 + $0x10] sm:$0xff]  ;;  %v27_v22 = vld [vmem:[%s794_s0 + $0x68] sm:$0xff] }
   0x8   :  { %149 = vmatprep.subr.mxu0 %v44_v7  ;;  %430 = vmatprep.subr.mxu1 %v44_v7  ;;  %v26_v20 = vld [vmem:[%s794_s0 + $0x60] sm:$0xff]  ;;  %v17_v23 = vld [vmem:[%s794_s0 + $0x18] sm:$0xff]  ;;  %v28_v24 = vld [vmem:[%s794_s0 + $0x70] sm:$0xff] }
   0x9   :  { %150 = vmatpush1.msra.mxu0 %v43_v8  ;;  %438 = vmatpush1.msra.mxu1 %v43_v8  ;;  %v18_v25 = vld [vmem:[%s794_s0 + $0x20] sm:$0xff]  ;;  %v29_v26 = vld [vmem:[%s794_s0 + $0x78] sm:$0xff]  ;;  %v19_v27 = vld [vmem:[%s794_s0 + $0x28] sm:$0xff] }
   0xa   :  { %151 = vmatprep.subr.mxu0 %v42_v9  ;;  %431 = vmatprep.subr.mxu1 %v42_v9  ;;  %v30_v28 = vld [vmem:[%s794_s0 + $0x80] sm:$0xff]  ;;  %v20_v29 = vld [vmem:[%s794_s0 + $0x30] sm:$0xff]  ;;  %v31_v30 = vld [vmem:[%s794_s0 + $0x88] sm:$0xff] }
   0xb   :  { %152 = vmatpush1.msra.mxu0 %v41_v10  ;;  %439 = vmatpush1.msra.mxu1 %v41_v10  ;;  %v21_v31 = vld [vmem:[%s794_s0 + $0x38] sm:$0xff]  ;;  %v32_v32 = vld [vmem:[%s794_s0 + $0x90] sm:$0xff]  ;;  %v22_v33 = vld [vmem:[%s794_s0 + $0x40] sm:$0xff] }
   0xc   :  { %153 = vmatprep.subr.mxu0 %v40_v11  ;;  %432 = vmatprep.subr.mxu1 %v40_v11  ;;  %v33_v34 = vld [vmem:[%s794_s0 + $0x98] sm:$0xff]  ;;  %v23_v35 = vld [vmem:[%s794_s0 + $0x48] sm:$0xff]  ;;  %v34_v36 = vld [vmem:[%s794_s0 + $0xa0] sm:$0x3] }
   0xd   :  { %154 = vmatpush1.msra.mxu0 %v39_v12  ;;  %440 = vmatpush1.msra.mxu1 %v39_v12  ;;  %v24_v37 = vld [vmem:[%s794_s0 + $0x50] sm:$0xff]  ;;  %v51_v41 = vld [vmem:[%s795_s2] sm:$0x3] }
   0xe   :  { %155 = vmatprep.subr.mxu0 %v38_v13  ;;  %433 = vmatprep.subr.mxu1 %v38_v13  ;;  %v621_v43 = vrot.slane %v51_v41, %v55_v40  ;;  %v623_v44 = vrot.slane %v51_v41, %v59_v42 }
   0xf   :  { %156 = vmatpush1.msra.mxu0 %v37_v14  ;;  %441 = vmatpush1.msra.mxu1 %v37_v14 }
  0x10   :  { %157 = vmatprep.subr.mxu0 %v36_v15  ;;  %434 = vmatprep.subr.mxu1 %v36_v15 }
  0x11   :  { %158 = vmatpush1.msra.mxu0 %v35_v16  ;;  %442 = vmatpush1.msra.mxu1 %v35_v16 }
  0x12   :  { %406 = vmatmul.mubr.msk.f32.vlgmr.msra.gmra.mxu0 %vm63_vm0, %v14_v17  ;;  %417 = vmatmul.mubr.msk.f32.vlgmr.msra.gmra.mxu1 %vm63_vm0, %v25_v18 }
  0x13   :  { %197 = vmatprep.mubr.f32.mxu0 %v444_v3  ;;  %263 = vmatprep.mubr.f32.mxu1 %v444_v3 }
  0x16   :  { %407 = vmatmul.mubr.msk.f32.gmra.mxu0 %vm63_vm0, %v15_v19  ;;  %418 = vmatmul.mubr.msk.f32.gmra.mxu1 %vm63_vm0, %v26_v20 }
  0x17   :  { %203 = vmatprep.mubr.f32.mxu0 %v444_v3  ;;  %269 = vmatprep.mubr.f32.mxu1 %v444_v3 }
  0x1a   :  { %408 = vmatmul.mubr.msk.f32.gmra.mxu0 %vm63_vm0, %v16_v21  ;;  %419 = vmatmul.mubr.msk.f32.gmra.mxu1 %vm63_vm0, %v27_v22 }
  0x1b   :  { %209 = vmatprep.mubr.f32.mxu0 %v444_v3  ;;  %275 = vmatprep.mubr.f32.mxu1 %v444_v3 }
  0x1e   :  { %409 = vmatmul.mubr.msk.f32.gmra.mxu0 %vm63_vm0, %v17_v23  ;;  %420 = vmatmul.mubr.msk.f32.gmra.mxu1 %vm63_vm0, %v28_v24 }
  0x1f   :  { %215 = vmatprep.mubr.f32.mxu0 %v444_v3  ;;  %281 = vmatprep.mubr.f32.mxu1 %v444_v3 }
  0x22   :  { %410 = vmatmul.mubr.msk.f32.gmra.mxu0 %vm63_vm0, %v18_v25  ;;  %421 = vmatmul.mubr.msk.f32.gmra.mxu1 %vm63_vm0, %v29_v26 }
  0x23   :  { %221 = vmatprep.mubr.f32.mxu0 %v444_v3  ;;  %287 = vmatprep.mubr.f32.mxu1 %v444_v3 }
  0x26   :  { %411 = vmatmul.mubr.msk.f32.gmra.mxu0 %vm63_vm0, %v19_v27  ;;  %422 = vmatmul.mubr.msk.f32.gmra.mxu1 %vm63_vm0, %v30_v28 }
  0x27   :  { %227 = vmatprep.mubr.f32.mxu0 %v444_v3  ;;  %293 = vmatprep.mubr.f32.mxu1 %v444_v3 }
  0x2a   :  { %412 = vmatmul.mubr.msk.f32.gmra.mxu0 %vm63_vm0, %v20_v29  ;;  %423 = vmatmul.mubr.msk.f32.gmra.mxu1 %vm63_vm0, %v31_v30 }
  0x2b   :  { %233 = vmatprep.mubr.f32.mxu0 %v444_v3  ;;  %299 = vmatprep.mubr.f32.mxu1 %v444_v3 }
  0x2e   :  { %413 = vmatmul.mubr.msk.f32.gmra.mxu0 %vm63_vm0, %v21_v31  ;;  %424 = vmatmul.mubr.msk.f32.gmra.mxu1 %vm63_vm0, %v32_v32 }
  0x2f   :  { %239 = vmatprep.mubr.f32.mxu0 %v444_v3  ;;  %305 = vmatprep.mubr.f32.mxu1 %v444_v3 }
  0x32   :  { %414 = vmatmul.mubr.msk.f32.gmra.mxu0 %vm63_vm0, %v22_v33  ;;  %425 = vmatmul.mubr.msk.f32.gmra.mxu1 %vm63_vm0, %v33_v34 }
  0x33   :  { %245 = vmatprep.mubr.f32.mxu0 %v444_v3  ;;  %311 = vmatprep.mubr.f32.mxu1 %v444_v3 }
  0x36   :  { %415 = vmatmul.mubr.msk.f32.gmra.mxu0 %vm63_vm0, %v23_v35  ;;  %426 = vmatmul.mubr.msk.f32.gmra.mxu1 %vm63_vm0, %v34_v36 }
  0x37   :  { %251 = vmatprep.mubr.f32.mxu0 %v444_v3 }
  0x3a   :  { %416 = vmatmul.mubr.msk.f32.gmra.mxu0 %vm63_vm0, %v24_v37 }
  0xd2   :  { %v193_v45 = vpop.f32.mrf.mxu0  ;;  %v259_v46 = vpop.f32.mrf.mxu1 }
  0xd3   :  { %v194_v47 = vadd.f32 %v193_v45, %v621_v43  ;;  %v260_v48 = vadd.f32 %v259_v46, %v621_v43 }
  0xd4   :  { %v195_v49 = vpop.f32.mrf.mxu0  ;;  %v261_v50 = vpop.f32.mrf.mxu1 }
  0xd5   :  { %v318_v51 = vmax.f32 %v194_v47, 0.0  ;;  %v196_v52 = vadd.f32 %v195_v49, %v623_v44  ;;  %v340_v53 = vmax.f32 %v260_v48, 0.0  ;;  %v262_v54 = vadd.f32 %v261_v50, %v623_v44 }
  0xd6   :  { %v199_v55 = vpop.f32.mrf.mxu0  ;;  %v265_v56 = vpop.f32.mrf.mxu1 }
  0xd7   :  { %360 = vst [vmem:[%s796_s3] sm:$0xff] %v318_v51  ;;  %v319_v57 = vmax.f32 %v196_v52, 0.0  ;;  %382 = vst [vmem:[%s796_s3 + $0xb0] sm:$0xff] %v340_v53  ;;  %v200_v58 = vadd.f32 %v199_v55, %v621_v43  ;;  %v341_v59 = vmax.f32 %v262_v54, 0.0  ;;  %v266_v60 = vadd.f32 %v265_v56, %v621_v43 }
  0xd8   :  { %v201_v61 = vpop.f32.mrf.mxu0  ;;  %v267_v62 = vpop.f32.mrf.mxu1 }
  0xd9   :  { %361 = vst [vmem:[%s796_s3 + $0x8] sm:$0xff] %v319_v57  ;;  %v320_v63 = vmax.f32 %v200_v58, 0.0  ;;  %383 = vst [vmem:[%s796_s3 + $0xb8] sm:$0xff] %v341_v59  ;;  %v202_v0 = vadd.f32 %v201_v61, %v623_v44  ;;  %v342_v1 = vmax.f32 %v266_v60, 0.0  ;;  %v268_v2 = vadd.f32 %v267_v62, %v623_v44 }
  0xda   :  { %v205_v3 = vpop.f32.mrf.mxu0  ;;  %v271_v4 = vpop.f32.mrf.mxu1 }
  0xdb   :  { %362 = vst [vmem:[%s796_s3 + $0x10] sm:$0xff] %v320_v63  ;;  %v321_v5 = vmax.f32 %v202_v0, 0.0  ;;  %384 = vst [vmem:[%s796_s3 + $0xc0] sm:$0xff] %v342_v1  ;;  %v206_v6 = vadd.f32 %v205_v3, %v621_v43  ;;  %v343_v7 = vmax.f32 %v268_v2, 0.0  ;;  %v272_v8 = vadd.f32 %v271_v4, %v621_v43 }
  0xdc   :  { %v207_v9 = vpop.f32.mrf.mxu0  ;;  %v273_v10 = vpop.f32.mrf.mxu1 }
  0xdd   :  { %363 = vst [vmem:[%s796_s3 + $0x18] sm:$0xff] %v321_v5  ;;  %v322_v11 = vmax.f32 %v206_v6, 0.0  ;;  %385 = vst [vmem:[%s796_s3 + $0xc8] sm:$0xff] %v343_v7  ;;  %v208_v12 = vadd.f32 %v207_v9, %v623_v44  ;;  %v344_v13 = vmax.f32 %v272_v8, 0.0  ;;  %v274_v14 = vadd.f32 %v273_v10, %v623_v44 }
  0xde   :  { %v211_v15 = vpop.f32.mrf.mxu0  ;;  %v277_v16 = vpop.f32.mrf.mxu1 }
  0xdf   :  { %364 = vst [vmem:[%s796_s3 + $0x20] sm:$0xff] %v322_v11  ;;  %v323_v17 = vmax.f32 %v208_v12, 0.0  ;;  %386 = vst [vmem:[%s796_s3 + $0xd0] sm:$0xff] %v344_v13  ;;  %v212_v18 = vadd.f32 %v211_v15, %v621_v43  ;;  %v345_v19 = vmax.f32 %v274_v14, 0.0  ;;  %v278_v20 = vadd.f32 %v277_v16, %v621_v43 }
  0xe0   :  { %v213_v21 = vpop.f32.mrf.mxu0  ;;  %v279_v22 = vpop.f32.mrf.mxu1 }
  0xe1   :  { %365 = vst [vmem:[%s796_s3 + $0x28] sm:$0xff] %v323_v17  ;;  %v324_v23 = vmax.f32 %v212_v18, 0.0  ;;  %387 = vst [vmem:[%s796_s3 + $0xd8] sm:$0xff] %v345_v19  ;;  %v214_v24 = vadd.f32 %v213_v21, %v623_v44  ;;  %v346_v25 = vmax.f32 %v278_v20, 0.0  ;;  %v280_v26 = vadd.f32 %v279_v22, %v623_v44 }
  0xe2   :  { %v217_v27 = vpop.f32.mrf.mxu0  ;;  %v283_v28 = vpop.f32.mrf.mxu1 }
  0xe3   :  { %366 = vst [vmem:[%s796_s3 + $0x30] sm:$0xff] %v324_v23  ;;  %v325_v29 = vmax.f32 %v214_v24, 0.0  ;;  %388 = vst [vmem:[%s796_s3 + $0xe0] sm:$0xff] %v346_v25  ;;  %v218_v30 = vadd.f32 %v217_v27, %v621_v43  ;;  %v347_v31 = vmax.f32 %v280_v26, 0.0  ;;  %v284_v32 = vadd.f32 %v283_v28, %v621_v43 }
  0xe4   :  { %v219_v33 = vpop.f32.mrf.mxu0  ;;  %v285_v34 = vpop.f32.mrf.mxu1 }
  0xe5   :  { %367 = vst [vmem:[%s796_s3 + $0x38] sm:$0xff] %v325_v29  ;;  %v326_v35 = vmax.f32 %v218_v30, 0.0  ;;  %389 = vst [vmem:[%s796_s3 + $0xe8] sm:$0xff] %v347_v31  ;;  %v220_v36 = vadd.f32 %v219_v33, %v623_v44  ;;  %v348_v37 = vmax.f32 %v284_v32, 0.0  ;;  %v286_v38 = vadd.f32 %v285_v34, %v623_v44 }
  0xe6   :  { %v223_v39 = vpop.f32.mrf.mxu0  ;;  %v289_v40 = vpop.f32.mrf.mxu1 }
  0xe7   :  { %368 = vst [vmem:[%s796_s3 + $0x40] sm:$0xff] %v326_v35  ;;  %v327_v41 = vmax.f32 %v220_v36, 0.0  ;;  %390 = vst [vmem:[%s796_s3 + $0xf0] sm:$0xff] %v348_v37  ;;  %v224_v42 = vadd.f32 %v223_v39, %v621_v43  ;;  %v349_v45 = vmax.f32 %v286_v38, 0.0  ;;  %v290_v46 = vadd.f32 %v289_v40, %v621_v43 }
  0xe8   :  { %v225_v47 = vpop.f32.mrf.mxu0  ;;  %v291_v48 = vpop.f32.mrf.mxu1 }
  0xe9   :  { %369 = vst [vmem:[%s796_s3 + $0x48] sm:$0xff] %v327_v41  ;;  %v328_v49 = vmax.f32 %v224_v42, 0.0  ;;  %391 = vst [vmem:[%s796_s3 + $0xf8] sm:$0xff] %v349_v45  ;;  %v226_v50 = vadd.f32 %v225_v47, %v623_v44  ;;  %v350_v51 = vmax.f32 %v290_v46, 0.0  ;;  %v292_v52 = vadd.f32 %v291_v48, %v623_v44 }
  0xea   :  { %v229_v53 = vpop.f32.mrf.mxu0  ;;  %v295_v54 = vpop.f32.mrf.mxu1 }
  0xeb   :  { %370 = vst [vmem:[%s796_s3 + $0x50] sm:$0xff] %v328_v49  ;;  %v329_v55 = vmax.f32 %v226_v50, 0.0  ;;  %392 = vst [vmem:[%s796_s3 + $0x100] sm:$0xff] %v350_v51  ;;  %v230_v56 = vadd.f32 %v229_v53, %v621_v43  ;;  %v351_v57 = vmax.f32 %v292_v52, 0.0  ;;  %v296_v58 = vadd.f32 %v295_v54, %v621_v43 }
  0xec   :  { %v231_v59 = vpop.f32.mrf.mxu0  ;;  %v297_v60 = vpop.f32.mrf.mxu1 }
  0xed   :  { %371 = vst [vmem:[%s796_s3 + $0x58] sm:$0xff] %v329_v55  ;;  %v330_v61 = vmax.f32 %v230_v56, 0.0  ;;  %393 = vst [vmem:[%s796_s3 + $0x108] sm:$0xff] %v351_v57  ;;  %v232_v62 = vadd.f32 %v231_v59, %v623_v44  ;;  %v352_v63 = vmax.f32 %v296_v58, 0.0  ;;  %v298_v0 = vadd.f32 %v297_v60, %v623_v44 }
  0xee   :  { %v235_v1 = vpop.f32.mrf.mxu0  ;;  %v301_v2 = vpop.f32.mrf.mxu1 }
  0xef   :  { %372 = vst [vmem:[%s796_s3 + $0x60] sm:$0xff] %v330_v61  ;;  %v331_v3 = vmax.f32 %v232_v62, 0.0  ;;  %394 = vst [vmem:[%s796_s3 + $0x110] sm:$0xff] %v352_v63  ;;  %v236_v4 = vadd.f32 %v235_v1, %v621_v43  ;;  %v353_v5 = vmax.f32 %v298_v0, 0.0  ;;  %v302_v6 = vadd.f32 %v301_v2, %v621_v43 }
  0xf0   :  { %v237_v7 = vpop.f32.mrf.mxu0  ;;  %v303_v8 = vpop.f32.mrf.mxu1 }
  0xf1   :  { %373 = vst [vmem:[%s796_s3 + $0x68] sm:$0xff] %v331_v3  ;;  %v332_v9 = vmax.f32 %v236_v4, 0.0  ;;  %395 = vst [vmem:[%s796_s3 + $0x118] sm:$0xff] %v353_v5  ;;  %v238_v10 = vadd.f32 %v237_v7, %v623_v44  ;;  %v354_v11 = vmax.f32 %v302_v6, 0.0  ;;  %v304_v12 = vadd.f32 %v303_v8, %v623_v44 }
  0xf2   :  { %v241_v13 = vpop.f32.mrf.mxu0  ;;  %v307_v14 = vpop.f32.mrf.mxu1 }
  0xf3   :  { %374 = vst [vmem:[%s796_s3 + $0x70] sm:$0xff] %v332_v9  ;;  %v333_v15 = vmax.f32 %v238_v10, 0.0  ;;  %396 = vst [vmem:[%s796_s3 + $0x120] sm:$0xff] %v354_v11  ;;  %v242_v16 = vadd.f32 %v241_v13, %v621_v43  ;;  %v355_v17 = vmax.f32 %v304_v12, 0.0  ;;  %v308_v18 = vadd.f32 %v307_v14, %v621_v43 }
  0xf4   :  { %v243_v19 = vpop.f32.mrf.mxu0  ;;  %v309_v20 = vpop.f32.mrf.mxu1 }
  0xf5   :  { %375 = vst [vmem:[%s796_s3 + $0x78] sm:$0xff] %v333_v15  ;;  %v334_v21 = vmax.f32 %v242_v16, 0.0  ;;  %397 = vst [vmem:[%s796_s3 + $0x128] sm:$0xff] %v355_v17  ;;  %v244_v22 = vadd.f32 %v243_v19, %v623_v44  ;;  %v356_v23 = vmax.f32 %v308_v18, 0.0  ;;  %v310_v24 = vadd.f32 %v309_v20, %v623_v44 }
  0xf6   :  { %v247_v25 = vpop.f32.mrf.mxu0  ;;  %v313_v26 = vpop.f32.mrf.mxu1 }
  0xf7   :  { %376 = vst [vmem:[%s796_s3 + $0x80] sm:$0xff] %v334_v21  ;;  %v335_v27 = vmax.f32 %v244_v22, 0.0  ;;  %398 = vst [vmem:[%s796_s3 + $0x130] sm:$0xff] %v356_v23  ;;  %v248_v28 = vadd.f32 %v247_v25, %v621_v43  ;;  %v357_v29 = vmax.f32 %v310_v24, 0.0  ;;  %v314_v30 = vadd.f32 %v313_v26, %v621_v43 }
  0xf8   :  { %v249_v31 = vpop.f32.mrf.mxu0  ;;  %v315_v32 = vpop.f32.mrf.mxu1 }
  0xf9   :  { %377 = vst [vmem:[%s796_s3 + $0x88] sm:$0xff] %v335_v27  ;;  %v336_v33 = vmax.f32 %v248_v28, 0.0  ;;  %399 = vst [vmem:[%s796_s3 + $0x138] sm:$0xff] %v357_v29  ;;  %v250_v34 = vadd.f32 %v249_v31, %v623_v44  ;;  %v358_v35 = vmax.f32 %v314_v30, 0.0  ;;  %v316_v36 = vadd.f32 %v315_v32, %v623_v44 }
  0xfa   :  { %v253_v37 = vpop.f32.mrf.mxu0 }
  0xfb   :  { %378 = vst [vmem:[%s796_s3 + $0x90] sm:$0xff] %v336_v33  ;;  %v337_v38 = vmax.f32 %v250_v34, 0.0  ;;  %400 = vst [vmem:[%s796_s3 + $0x140] sm:$0x3] %v358_v35  ;;  %v254_v39 = vadd.f32 %v253_v37, %v621_v43  ;;  %v359_v40 = vmax.f32 %v316_v36, 0.0 }
  0xfc   :  { %v255_v41 = vpop.f32.mrf.mxu0 }
  0xfd   :  { %379 = vst [vmem:[%s796_s3 + $0x98] sm:$0xff] %v337_v38  ;;  %v338_v42 = vmax.f32 %v254_v39, 0.0  ;;  %401 = vst [vmem:[%s796_s3 + $0x148] sm:$0x3] %v359_v40  ;;  %v256_v45 = vadd.f32 %v255_v41, %v623_v44 }
  0xff   :  { %380 = vst [vmem:[%s796_s3 + $0xa0] sm:$0xff] %v338_v42  ;;  %v339_v46 = vmax.f32 %v256_v45, 0.0 }
 0x101   :  { %381 = vst [vmem:[%s796_s3 + $0xa8] sm:$0xff] %v339_v46 }

// kernel: conv_model_forward.13
= control target key start
LH: loop header
LB: loop body
LE: loop exit
PB: predicated region body
PF: predicated region fallthrough
CT: control target
= control target key end

     0   :  { %s2560_s12 = smov 0   ;;  %s2562_s13 = smov 0   ;;  %s3548_s0 = inlined_call_operand.vmem [shape: f32[5000,144], index: 0, kind: input, shape index: {}]   ;;  %s3549_s1 = inlined_call_operand.vmem [shape: f32[144,128], index: 1, kind: input, shape index: {}]   ;;  %s3550_s2 = inlined_call_operand.vmem [shape: f32[1,128], index: 2, kind: input, shape index: {}]   ;;  %s3551_s3 = inlined_call_operand.vmem [shape: f32[5000,128], index: 3, kind: output, shape index: {}]  }
   0x1   :  { %s2564_s14 = smov 0  }
   0x2 LB: > { %s2573_s15 = sadd.s32 4294967295, %s2505_s14   ;;  %s2575_s16 = sadd.s32 1, %s2505_s14   ;;  %s2505_s14 = sphi %s2564_s14, %s3560_s14   ;;  %s2501_s13 = sphi %s2562_s13, %s3559_s13   ;;  %s2497_s12 = sphi %s2560_s12, %s3558_s12  }
   0x3   : > { %s85_s17 = ssub.s32 %s2505_s14, %s2575_s16  ;;  %s88_s18 = sadd.s32 1, %s2501_s13 }
   0x4   : > { %p86_p0 = scmp.eq.s32.totalorder %s85_s17, 0  ;;  %p98_p1 = scmp.ne.s32.totalorder %s2501_s13, %s2497_s12 }
   0x5   : > { %p99_p2 = scmp.eq.s32.totalorder %s2573_s15, 4  ;;  %p2170_p3 = scmp.ge.s32.totalorder %s2505_s14, 1 }
   0x6   : > { %s2583_s19 = scalar_select %p86_p0, %s2501_s13, %s88_s18  }
   0x7   : > { %p2585_p4 = por %p99_p2, %p98_p1  ;;  %p149_p5 = scmp.lt.s32.totalorder %s2505_s14, 6 }
   0x9   : > { %p150_p6 = pnand %p2170_p3, %p149_p5 }
   0xa   : > { %s2638_s18 = sshll.u32 (!%p150_p6), %s2573_s15, 7  ;;  %s175_s22 = sand.u32 (!%p150_p6), 1, %s2497_s12  }
   0xb   : > { %153 = sbr.rel (%p150_p6) target bundleno = 566 (0x236), region = 32  ;;  %p184_p7 = scmp.lt.s32.totalorder (!%p150_p6), %s2638_s18, 624 }
   0xc   : > { %s2171_s23 = sshll.u32 (!%p150_p6), %s175_s22, 10 }
   0xd   : > { %s2999_s12 = scalar_lea.vmem (!%p150_p6), [#allocation2], %s2171_s23  }
  0x10   : > { %v471_v0 = vld [vmem:[%s3549_s1 + $0x78] sm:$0xff]  ;;  %v2539_v1 = vmov 0.0   ;;  %v470_v2 = vld [vmem:[%s3549_s1 + $0x70] sm:$0xff]  ;;  %v469_v3 = vld [vmem:[%s3549_s1 + $0x68] sm:$0xff]  ;;  %s185_s27 = scalar_select %p184_p7, %s2638_s18, 624  ;;  %vm481_vm0 = vcmask 130048  }
  0x11   : > { %866 = vmatprep.subr.mxu0 %v2539_v1  ;;  %2325 = vmatprep.subr.mxu1 %v2539_v1  ;;  %v468_v4 = vld [vmem:[%s3549_s1 + $0x60] sm:$0xff]  ;;  %v467_v5 = vld [vmem:[%s3549_s1 + $0x58] sm:$0xff]  ;;  %v466_v6 = vld [vmem:[%s3549_s1 + $0x50] sm:$0xff]  ;;  %s1707_s28 = ssub.s32 (%p2585_p4), 625, %s2638_s18  ;;  %s2322_s29 = sshll.u32 (%p2585_p4), %s2573_s15, 10 }
  0x12   : > { %867 = vmatpush1.msra.mxu0 %v471_v0  ;;  %2343 = vmatpush1.msra.mxu1 %v471_v0  ;;  %v465_v7 = vld [vmem:[%s3549_s1 + $0x48] sm:$0xff]  ;;  %v464_v8 = vld [vmem:[%s3549_s1 + $0x40] sm:$0xff]  ;;  %v463_v9 = vld [vmem:[%s3549_s1 + $0x38] sm:$0xff]  ;;  %s2321_s5 = sshll.u32 %s185_s27, 4  ;;  %p1708_p8 = scmp.lt.s32.totalorder (%p2585_p4), %s1707_s28, 128 }
  0x13   : > { %868 = vmatprep.subr.mxu0 %v2539_v1  ;;  %2326 = vmatprep.subr.mxu1 %v2539_v1  ;;  %v462_v10 = vld [vmem:[%s3549_s1 + $0x30] sm:$0xff]  ;;  %v461_v11 = vld [vmem:[%s3549_s1 + $0x28] sm:$0xff]  ;;  %v460_v12 = vld [vmem:[%s3549_s1 + $0x20] sm:$0xff]  ;;  %s2680_s14 = scalar_lea.vmem %s3548_s0, %s2321_s5  ;;  %s3349_s5 = scalar_lea.vmem (%p2585_p4), %s3551_s3, %s2322_s29  }
  0x14   : > { %869 = vmatpush1.msra.mxu0 %v470_v2  ;;  %2344 = vmatpush1.msra.mxu1 %v470_v2  ;;  %v459_v13 = vld [vmem:[%s3549_s1 + $0x18] sm:$0xff]  ;;  %v458_v14 = vld [vmem:[%s3549_s1 + $0x10] sm:$0xff]  ;;  %v457_v15 = vld [vmem:[%s3549_s1 + $0x8] sm:$0xff] }
  0x15   : > { %870 = vmatprep.subr.mxu0 %v2539_v1  ;;  %2327 = vmatprep.subr.mxu1 %v2539_v1  ;;  %v456_v16 = vld [vmem:[%s3549_s1] sm:$0xff]  ;;  %v473_v17 = vld [vmem:[%s3549_s1 + $0x88] sm:$0xff]  ;;  %v203_v23 = vld [vmem:[%s2680_s14 + $0x18] sm:$0xff] }
  0x16   : > { %871 = vmatpush1.msra.mxu0 %v469_v3  ;;  %2345 = vmatpush1.msra.mxu1 %v469_v3  ;;  %v472_v18 = vld [vmem:[%s3549_s1 + $0x80] sm:$0xff]  ;;  %v201_v19 = vld [vmem:[%s2680_s14 + $0x8] sm:$0xff]  ;;  %v331_v24 = vld [vmem:[%s2680_s14 + $0x418] sm:$0xff] }
  0x17   : > { %872 = vmatprep.subr.mxu0 %v2539_v1  ;;  %2328 = vmatprep.subr.mxu1 %v2539_v1  ;;  %v329_v20 = vld [vmem:[%s2680_s14 + $0x408] sm:$0xff]  ;;  %v200_v21 = vld [vmem:[%s2680_s14] sm:$0xff]  ;;  %v202_v25 = vld [vmem:[%s2680_s14 + $0x10] sm:$0xff] }
  0x18   : > { %873 = vmatpush1.msra.mxu0 %v468_v4  ;;  %2346 = vmatpush1.msra.mxu1 %v468_v4  ;;  %v328_v22 = vld [vmem:[%s2680_s14 + $0x400] sm:$0xff]  ;;  %v330_v26 = vld [vmem:[%s2680_s14 + $0x410] sm:$0xff]  ;;  %v205_v27 = vld [vmem:[%s2680_s14 + $0x28] sm:$0xff] }
  0x19   : > { %874 = vmatprep.subr.mxu0 %v2539_v1  ;;  %2329 = vmatprep.subr.mxu1 %v2539_v1  ;;  %v333_v28 = vld [vmem:[%s2680_s14 + $0x428] sm:$0xff]  ;;  %v204_v29 = vld [vmem:[%s2680_s14 + $0x20] sm:$0xff]  ;;  %v207_v31 = vld [vmem:[%s2680_s14 + $0x38] sm:$0xff] }
  0x1a   : > { %875 = vmatpush1.msra.mxu0 %v467_v5  ;;  %2347 = vmatpush1.msra.mxu1 %v467_v5  ;;  %v332_v30 = vld [vmem:[%s2680_s14 + $0x420] sm:$0xff]  ;;  %v335_v32 = vld [vmem:[%s2680_s14 + $0x438] sm:$0xff]  ;;  %v206_v33 = vld [vmem:[%s2680_s14 + $0x30] sm:$0xff] }
  0x1b   : > { %876 = vmatprep.subr.mxu0 %v2539_v1  ;;  %2330 = vmatprep.subr.mxu1 %v2539_v1  ;;  %v334_v34 = vld [vmem:[%s2680_s14 + $0x430] sm:$0xff]  ;;  %v209_v35 = vld [vmem:[%s2680_s14 + $0x48] sm:$0xff]  ;;  %v208_v37 = vld [vmem:[%s2680_s14 + $0x40] sm:$0xff] }
  0x1c   : > { %877 = vmatpush1.msra.mxu0 %v466_v6  ;;  %2348 = vmatpush1.msra.mxu1 %v466_v6  ;;  %v337_v36 = vld [vmem:[%s2680_s14 + $0x448] sm:$0xff]  ;;  %v336_v38 = vld [vmem:[%s2680_s14 + $0x440] sm:$0xff]  ;;  %v211_v39 = vld [vmem:[%s2680_s14 + $0x58] sm:$0xff] }
  0x1d   : > { %878 = vmatprep.subr.mxu0 %v2539_v1  ;;  %2331 = vmatprep.subr.mxu1 %v2539_v1  ;;  %v339_v40 = vld [vmem:[%s2680_s14 + $0x458] sm:$0xff]  ;;  %v210_v41 = vld [vmem:[%s2680_s14 + $0x50] sm:$0xff]  ;;  %v213_v43 = vld [vmem:[%s2680_s14 + $0x68] sm:$0xff] }
  0x1e   : > { %879 = vmatpush1.msra.mxu0 %v465_v7  ;;  %2349 = vmatpush1.msra.mxu1 %v465_v7  ;;  %v338_v42 = vld [vmem:[%s2680_s14 + $0x450] sm:$0xff]  ;;  %v341_v44 = vld [vmem:[%s2680_s14 + $0x468] sm:$0xff]  ;;  %v212_v45 = vld [vmem:[%s2680_s14 + $0x60] sm:$0xff] }
  0x1f   : > { %880 = vmatprep.subr.mxu0 %v2539_v1  ;;  %2332 = vmatprep.subr.mxu1 %v2539_v1  ;;  %v340_v46 = vld [vmem:[%s2680_s14 + $0x460] sm:$0xff]  ;;  %v215_v47 = vld [vmem:[%s2680_s14 + $0x78] sm:$0xff]  ;;  %v214_v49 = vld [vmem:[%s2680_s14 + $0x70] sm:$0xff] }
  0x20   : > { %881 = vmatpush1.msra.mxu0 %v464_v8  ;;  %2350 = vmatpush1.msra.mxu1 %v464_v8  ;;  %v343_v48 = vld [vmem:[%s2680_s14 + $0x478] sm:$0xff]  ;;  %v342_v50 = vld [vmem:[%s2680_s14 + $0x470] sm:$0xff]  ;;  %v217_v51 = vld [vmem:[%s2680_s14 + $0x88] sm:$0xff] }
  0x21   : > { %882 = vmatprep.subr.mxu0 %v2539_v1  ;;  %2333 = vmatprep.subr.mxu1 %v2539_v1  ;;  %v345_v52 = vld [vmem:[%s2680_s14 + $0x488] sm:$0xff]  ;;  %v216_v53 = vld [vmem:[%s2680_s14 + $0x80] sm:$0xff]  ;;  %v219_v55 = vld [vmem:[%s2680_s14 + $0x98] sm:$0xff] }
  0x22   : > { %883 = vmatpush1.msra.mxu0 %v463_v9  ;;  %2351 = vmatpush1.msra.mxu1 %v463_v9  ;;  %v344_v54 = vld [vmem:[%s2680_s14 + $0x480] sm:$0xff]  ;;  %v347_v56 = vld [vmem:[%s2680_s14 + $0x498] sm:$0xff]  ;;  %v218_v57 = vld [vmem:[%s2680_s14 + $0x90] sm:$0xff] }
  0x23   : > { %884 = vmatprep.subr.mxu0 %v2539_v1  ;;  %2334 = vmatprep.subr.mxu1 %v2539_v1  ;;  %v346_v58 = vld [vmem:[%s2680_s14 + $0x490] sm:$0xff]  ;;  %v221_v59 = vld [vmem:[%s2680_s14 + $0xa8] sm:$0xff]  ;;  %v220_v61 = vld [vmem:[%s2680_s14 + $0xa0] sm:$0xff] }
  0x24   : > { %885 = vmatpush1.msra.mxu0 %v462_v10  ;;  %2352 = vmatpush1.msra.mxu1 %v462_v10  ;;  %v349_v60 = vld [vmem:[%s2680_s14 + $0x4a8] sm:$0xff]  ;;  %v348_v62 = vld [vmem:[%s2680_s14 + $0x4a0] sm:$0xff]  ;;  %v223_v63 = vld [vmem:[%s2680_s14 + $0xb8] sm:$0xff] }
  0x25   : > { %886 = vmatprep.subr.mxu0 %v2539_v1  ;;  %2335 = vmatprep.subr.mxu1 %v2539_v1  ;;  %v351_v0 = vld [vmem:[%s2680_s14 + $0x4b8] sm:$0xff]  ;;  %v350_v2 = vld [vmem:[%s2680_s14 + $0x4b0] sm:$0xff]  ;;  %v225_v3 = vld [vmem:[%s2680_s14 + $0xc8] sm:$0xff] }
  0x26   : > { %887 = vmatpush1.msra.mxu0 %v461_v11  ;;  %2353 = vmatpush1.msra.mxu1 %v461_v11  ;;  %v353_v4 = vld [vmem:[%s2680_s14 + $0x4c8] sm:$0xff]  ;;  %v224_v5 = vld [vmem:[%s2680_s14 + $0xc0] sm:$0xff]  ;;  %v227_v7 = vld [vmem:[%s2680_s14 + $0xd8] sm:$0xff] }
  0x27   : > { %888 = vmatprep.subr.mxu0 %v2539_v1  ;;  %2336 = vmatprep.subr.mxu1 %v2539_v1  ;;  %v352_v6 = vld [vmem:[%s2680_s14 + $0x4c0] sm:$0xff]  ;;  %v355_v8 = vld [vmem:[%s2680_s14 + $0x4d8] sm:$0xff]  ;;  %v226_v9 = vld [vmem:[%s2680_s14 + $0xd0] sm:$0xff] }
  0x28   : > { %889 = vmatpush1.msra.mxu0 %v460_v12  ;;  %2354 = vmatpush1.msra.mxu1 %v460_v12  ;;  %v354_v10 = vld [vmem:[%s2680_s14 + $0x4d0] sm:$0xff]  ;;  %v229_v11 = vld [vmem:[%s2680_s14 + $0xe8] sm:$0xff] }
  0x29   : > { %890 = vmatprep.subr.mxu0 %v2539_v1  ;;  %2337 = vmatprep.subr.mxu1 %v2539_v1  ;;  %v357_v12 = vld [vmem:[%s2680_s14 + $0x4e8] sm:$0xff] }
  0x2a   : > { %891 = vmatpush1.msra.mxu0 %v459_v13  ;;  %2355 = vmatpush1.msra.mxu1 %v459_v13  ;;  %v228_v13 = vld [vmem:[%s2680_s14 + $0xe0] sm:$0xff] }
  0x2b   : > { %892 = vmatprep.subr.mxu0 %v2539_v1  ;;  %2338 = vmatprep.subr.mxu1 %v2539_v1 }
  0x2c   : > { %893 = vmatpush1.msra.mxu0 %v458_v14  ;;  %2356 = vmatpush1.msra.mxu1 %v458_v14  ;;  %v356_v14 = vld [vmem:[%s2680_s14 + $0x4e0] sm:$0xff] }
  0x2d   : > { %894 = vmatprep.subr.mxu0 %v2539_v1  ;;  %2339 = vmatprep.subr.mxu1 %v2539_v1 }
  0x2e   : > { %895 = vmatpush1.msra.mxu0 %v457_v15  ;;  %2357 = vmatpush1.msra.mxu1 %v457_v15  ;;  %v231_v15 = vld [vmem:[%s2680_s14 + $0xf8] sm:$0xff] }
  0x2f   : > { %896 = vmatprep.subr.mxu0 %v2539_v1  ;;  %2340 = vmatprep.subr.mxu1 %v2539_v1 }
  0x30   : > { %897 = vmatpush1.msra.mxu0 %v456_v16  ;;  %2358 = vmatpush1.msra.mxu1 %v456_v16  ;;  %v359_v16 = vld [vmem:[%s2680_s14 + $0x4f8] sm:$0xff] }
  0x31   : > { %926 = vmatprep.subr.mxu0 %v2539_v1  ;;  %2341 = vmatprep.subr.mxu1 %v2539_v1 }
  0x32   : > { %927 = vmatpush2.msra.mxu0 %v473_v17  ;;  %2359 = vmatpush2.msra.mxu1 %v473_v17  ;;  %v230_v17 = vld [vmem:[%s2680_s14 + $0xf0] sm:$0xff] }
  0x33   : > { %928 = vmatprep.subr.mxu0 %v2539_v1  ;;  %2342 = vmatprep.subr.mxu1 %v2539_v1  ;;  %v222_v1 = vld [vmem:[%s2680_s14 + $0xb0] sm:$0xff] }
  0x34   : > { %929 = vmatpush2.msra.mxu0 %v472_v18  ;;  %2360 = vmatpush2.msra.mxu1 %v472_v18  ;;  %v358_v18 = vld [vmem:[%s2680_s14 + $0x4f0] sm:$0xff] }
  0x35   : > { %2176 = vmatprep.mubr.msk.f32.mxu0 %vm481_vm0, %v201_v19  ;;  %2240 = vmatprep.mubr.msk.f32.mxu1 %vm481_vm0, %v329_v20  ;;  %v233_v19 = vld [vmem:[%s2680_s14 + $0x108] sm:$0xff] }
  0x36   : > { %931 = vmatmul.mubr.f32.vlgmr.msra.gmra.mxu0 %v200_v21  ;;  %1251 = vmatmul.mubr.f32.vlgmr.msra.gmra.mxu1 %v328_v22  ;;  %v361_v20 = vld [vmem:[%s2680_s14 + $0x508] sm:$0xff]  ;;  %v232_v21 = vld [vmem:[%s2680_s14 + $0x100] sm:$0xff] }
  0x37   : > { %2177 = vmatprep.mubr.msk.f32.mxu0 %vm481_vm0, %v203_v23  ;;  %2241 = vmatprep.mubr.msk.f32.mxu1 %vm481_vm0, %v331_v24  ;;  %v360_v22 = vld [vmem:[%s2680_s14 + $0x500] sm:$0xff]  ;;  %v235_v23 = vld [vmem:[%s2680_s14 + $0x118] sm:$0xff] }
  0x38   : > { %v363_v24 = vld [vmem:[%s2680_s14 + $0x518] sm:$0xff] }
  0x3a   : > { %936 = vmatmul.mubr.f32.gmra.mxu0 %v202_v25  ;;  %1256 = vmatmul.mubr.f32.gmra.mxu1 %v330_v26  ;;  %v234_v25 = vld [vmem:[%s2680_s14 + $0x110] sm:$0xff] }
  0x3b   : > { %2178 = vmatprep.mubr.msk.f32.mxu0 %vm481_vm0, %v205_v27  ;;  %2242 = vmatprep.mubr.msk.f32.mxu1 %vm481_vm0, %v333_v28  ;;  %v362_v26 = vld [vmem:[%s2680_s14 + $0x510] sm:$0xff]  ;;  %v237_v27 = vld [vmem:[%s2680_s14 + $0x128] sm:$0xff] }
  0x3c   : > { %v365_v28 = vld [vmem:[%s2680_s14 + $0x528] sm:$0xff] }
  0x3e   : > { %941 = vmatmul.mubr.f32.gmra.mxu0 %v204_v29  ;;  %1261 = vmatmul.mubr.f32.gmra.mxu1 %v332_v30  ;;  %v236_v29 = vld [vmem:[%s2680_s14 + $0x120] sm:$0xff] }
  0x3f   : > { %2179 = vmatprep.mubr.msk.f32.mxu0 %vm481_vm0, %v207_v31  ;;  %2243 = vmatprep.mubr.msk.f32.mxu1 %vm481_vm0, %v335_v32  ;;  %v364_v30 = vld [vmem:[%s2680_s14 + $0x520] sm:$0xff]  ;;  %v239_v31 = vld [vmem:[%s2680_s14 + $0x138] sm:$0xff] }
  0x40   : > { %v367_v32 = vld [vmem:[%s2680_s14 + $0x538] sm:$0xff] }
  0x42   : > { %946 = vmatmul.mubr.f32.gmra.mxu0 %v206_v33  ;;  %1266 = vmatmul.mubr.f32.gmra.mxu1 %v334_v34  ;;  %v238_v33 = vld [vmem:[%s2680_s14 + $0x130] sm:$0xff] }
  0x43   : > { %2180 = vmatprep.mubr.msk.f32.mxu0 %vm481_vm0, %v209_v35  ;;  %2244 = vmatprep.mubr.msk.f32.mxu1 %vm481_vm0, %v337_v36  ;;  %v366_v34 = vld [vmem:[%s2680_s14 + $0x530] sm:$0xff]  ;;  %v241_v35 = vld [vmem:[%s2680_s14 + $0x148] sm:$0xff] }
  0x44   : > { %v369_v36 = vld [vmem:[%s2680_s14 + $0x548] sm:$0xff] }
  0x46   : > { %951 = vmatmul.mubr.f32.gmra.mxu0 %v208_v37  ;;  %1271 = vmatmul.mubr.f32.gmra.mxu1 %v336_v38  ;;  %v240_v37 = vld [vmem:[%s2680_s14 + $0x140] sm:$0xff] }
  0x47   : > { %2181 = vmatprep.mubr.msk.f32.mxu0 %vm481_vm0, %v211_v39  ;;  %2245 = vmatprep.mubr.msk.f32.mxu1 %vm481_vm0, %v339_v40  ;;  %v368_v38 = vld [vmem:[%s2680_s14 + $0x540] sm:$0xff]  ;;  %v243_v39 = vld [vmem:[%s2680_s14 + $0x158] sm:$0xff] }
  0x48   : > { %v371_v40 = vld [vmem:[%s2680_s14 + $0x558] sm:$0xff] }
  0x4a   : > { %956 = vmatmul.mubr.f32.gmra.mxu0 %v210_v41  ;;  %1276 = vmatmul.mubr.f32.gmra.mxu1 %v338_v42  ;;  %v242_v41 = vld [vmem:[%s2680_s14 + $0x150] sm:$0xff] }
  0x4b   : > { %2182 = vmatprep.mubr.msk.f32.mxu0 %vm481_vm0, %v213_v43  ;;  %2246 = vmatprep.mubr.msk.f32.mxu1 %vm481_vm0, %v341_v44  ;;  %v370_v42 = vld [vmem:[%s2680_s14 + $0x550] sm:$0xff]  ;;  %v245_v43 = vld [vmem:[%s2680_s14 + $0x168] sm:$0xff] }
  0x4c   : > { %v373_v44 = vld [vmem:[%s2680_s14 + $0x568] sm:$0xff] }
  0x4e   : > { %961 = vmatmul.mubr.f32.gmra.mxu0 %v212_v45  ;;  %1281 = vmatmul.mubr.f32.gmra.mxu1 %v340_v46  ;;  %v244_v45 = vld [vmem:[%s2680_s14 + $0x160] sm:$0xff] }
  0x4f   : > { %2183 = vmatprep.mubr.msk.f32.mxu0 %vm481_vm0, %v215_v47  ;;  %2247 = vmatprep.mubr.msk.f32.mxu1 %vm481_vm0, %v343_v48  ;;  %v372_v46 = vld [vmem:[%s2680_s14 + $0x560] sm:$0xff]  ;;  %v247_v47 = vld [vmem:[%s2680_s14 + $0x178] sm:$0xff] }
  0x50   : > { %v375_v48 = vld [vmem:[%s2680_s14 + $0x578] sm:$0xff] }
  0x52   : > { %966 = vmatmul.mubr.f32.gmra.mxu0 %v214_v49  ;;  %1286 = vmatmul.mubr.f32.gmra.mxu1 %v342_v50  ;;  %v246_v49 = vld [vmem:[%s2680_s14 + $0x170] sm:$0xff] }
  0x53   : > { %2184 = vmatprep.mubr.msk.f32.mxu0 %vm481_vm0, %v217_v51  ;;  %2248 = vmatprep.mubr.msk.f32.mxu1 %vm481_vm0, %v345_v52  ;;  %v374_v50 = vld [vmem:[%s2680_s14 + $0x570] sm:$0xff]  ;;  %v249_v51 = vld [vmem:[%s2680_s14 + $0x188] sm:$0xff] }
  0x54   : > { %v377_v52 = vld [vmem:[%s2680_s14 + $0x588] sm:$0xff] }
  0x56   : > { %971 = vmatmul.mubr.f32.gmra.mxu0 %v216_v53  ;;  %1291 = vmatmul.mubr.f32.gmra.mxu1 %v344_v54  ;;  %v248_v53 = vld [vmem:[%s2680_s14 + $0x180] sm:$0xff] }
  0x57   : > { %2185 = vmatprep.mubr.msk.f32.mxu0 %vm481_vm0, %v219_v55  ;;  %2249 = vmatprep.mubr.msk.f32.mxu1 %vm481_vm0, %v347_v56  ;;  %v376_v54 = vld [vmem:[%s2680_s14 + $0x580] sm:$0xff]  ;;  %v251_v55 = vld [vmem:[%s2680_s14 + $0x198] sm:$0xff] }
  0x58   : > { %v379_v56 = vld [vmem:[%s2680_s14 + $0x598] sm:$0xff] }
  0x5a   : > { %976 = vmatmul.mubr.f32.gmra.mxu0 %v218_v57  ;;  %1296 = vmatmul.mubr.f32.gmra.mxu1 %v346_v58  ;;  %v250_v57 = vld [vmem:[%s2680_s14 + $0x190] sm:$0xff] }
  0x5b   : > { %2186 = vmatprep.mubr.msk.f32.mxu0 %vm481_vm0, %v221_v59  ;;  %2250 = vmatprep.mubr.msk.f32.mxu1 %vm481_vm0, %v349_v60  ;;  %v378_v58 = vld [vmem:[%s2680_s14 + $0x590] sm:$0xff]  ;;  %v253_v59 = vld [vmem:[%s2680_s14 + $0x1a8] sm:$0xff] }
  0x5c   : > { %v381_v60 = vld [vmem:[%s2680_s14 + $0x5a8] sm:$0xff] }
  0x5e   : > { %981 = vmatmul.mubr.f32.gmra.mxu0 %v220_v61  ;;  %1301 = vmatmul.mubr.f32.gmra.mxu1 %v348_v62  ;;  %v252_v61 = vld [vmem:[%s2680_s14 + $0x1a0] sm:$0xff] }
  0x5f   : > { %2187 = vmatprep.mubr.msk.f32.mxu0 %vm481_vm0, %v223_v63  ;;  %2251 = vmatprep.mubr.msk.f32.mxu1 %vm481_vm0, %v351_v0  ;;  %v380_v62 = vld [vmem:[%s2680_s14 + $0x5a0] sm:$0xff]  ;;  %v255_v63 = vld [vmem:[%s2680_s14 + $0x1b8] sm:$0xff] }
  0x60   : > { %v383_v0 = vld [vmem:[%s2680_s14 + $0x5b8] sm:$0xff] }
  0x62   : > { %986 = vmatmul.mubr.f32.gmra.mxu0 %v222_v1  ;;  %1306 = vmatmul.mubr.f32.gmra.mxu1 %v350_v2  ;;  %v254_v1 = vld [vmem:[%s2680_s14 + $0x1b0] sm:$0xff] }
  0x63   : > { %2188 = vmatprep.mubr.msk.f32.mxu0 %vm481_vm0, %v225_v3  ;;  %2252 = vmatprep.mubr.msk.f32.mxu1 %vm481_vm0, %v353_v4  ;;  %v382_v2 = vld [vmem:[%s2680_s14 + $0x5b0] sm:$0xff]  ;;  %v257_v3 = vld [vmem:[%s2680_s14 + $0x1c8] sm:$0xff] }
  0x64   : > { %v385_v4 = vld [vmem:[%s2680_s14 + $0x5c8] sm:$0xff] }
  0x66   : > { %991 = vmatmul.mubr.f32.gmra.mxu0 %v224_v5  ;;  %1311 = vmatmul.mubr.f32.gmra.mxu1 %v352_v6  ;;  %v256_v5 = vld [vmem:[%s2680_s14 + $0x1c0] sm:$0xff] }
  0x67   : > { %2189 = vmatprep.mubr.msk.f32.mxu0 %vm481_vm0, %v227_v7  ;;  %2253 = vmatprep.mubr.msk.f32.mxu1 %vm481_vm0, %v355_v8  ;;  %v384_v6 = vld [vmem:[%s2680_s14 + $0x5c0] sm:$0xff]  ;;  %v259_v7 = vld [vmem:[%s2680_s14 + $0x1d8] sm:$0xff] }
  0x68   : > { %v387_v8 = vld [vmem:[%s2680_s14 + $0x5d8] sm:$0xff] }
  0x6a   : > { %996 = vmatmul.mubr.f32.gmra.mxu0 %v226_v9  ;;  %1316 = vmatmul.mubr.f32.gmra.mxu1 %v354_v10  ;;  %v258_v9 = vld [vmem:[%s2680_s14 + $0x1d0] sm:$0xff] }
  0x6b   : > { %2190 = vmatprep.mubr.msk.f32.mxu0 %vm481_vm0, %v229_v11  ;;  %2254 = vmatprep.mubr.msk.f32.mxu1 %vm481_vm0, %v357_v12  ;;  %v386_v10 = vld [vmem:[%s2680_s14 + $0x5d0] sm:$0xff]  ;;  %v261_v11 = vld [vmem:[%s2680_s14 + $0x1e8] sm:$0xff] }
  0x6c   : > { %v389_v12 = vld [vmem:[%s2680_s14 + $0x5e8] sm:$0xff] }
  0x6e   : > { %1001 = vmatmul.mubr.f32.gmra.mxu0 %v228_v13  ;;  %1321 = vmatmul.mubr.f32.gmra.mxu1 %v356_v14  ;;  %v260_v13 = vld [vmem:[%s2680_s14 + $0x1e0] sm:$0xff] }
  0x6f   : > { %2191 = vmatprep.mubr.msk.f32.mxu0 %vm481_vm0, %v231_v15  ;;  %2255 = vmatprep.mubr.msk.f32.mxu1 %vm481_vm0, %v359_v16  ;;  %v388_v14 = vld [vmem:[%s2680_s14 + $0x5e0] sm:$0xff]  ;;  %v263_v15 = vld [vmem:[%s2680_s14 + $0x1f8] sm:$0xff] }
  0x70   : > { %v391_v16 = vld [vmem:[%s2680_s14 + $0x5f8] sm:$0xff] }
  0x72   : > { %1006 = vmatmul.mubr.f32.gmra.mxu0 %v230_v17  ;;  %1326 = vmatmul.mubr.f32.gmra.mxu1 %v358_v18  ;;  %v262_v17 = vld [vmem:[%s2680_s14 + $0x1f0] sm:$0xff] }
  0x73   : > { %2192 = vmatprep.mubr.msk.f32.mxu0 %vm481_vm0, %v233_v19  ;;  %2256 = vmatprep.mubr.msk.f32.mxu1 %vm481_vm0, %v361_v20  ;;  %v390_v18 = vld [vmem:[%s2680_s14 + $0x5f0] sm:$0xff]  ;;  %v265_v19 = vld [vmem:[%s2680_s14 + $0x208] sm:$0xff] }
  0x74   : > { %v393_v20 = vld [vmem:[%s2680_s14 + $0x608] sm:$0xff] }
  0x76   : > { %1011 = vmatmul.mubr.f32.gmra.mxu0 %v232_v21  ;;  %1331 = vmatmul.mubr.f32.gmra.mxu1 %v360_v22  ;;  %v264_v21 = vld [vmem:[%s2680_s14 + $0x200] sm:$0xff] }
  0x77   : > { %2193 = vmatprep.mubr.msk.f32.mxu0 %vm481_vm0, %v235_v23  ;;  %2257 = vmatprep.mubr.msk.f32.mxu1 %vm481_vm0, %v363_v24  ;;  %v392_v22 = vld [vmem:[%s2680_s14 + $0x600] sm:$0xff]  ;;  %v267_v23 = vld [vmem:[%s2680_s14 + $0x218] sm:$0xff] }
  0x78   : > { %v395_v24 = vld [vmem:[%s2680_s14 + $0x618] sm:$0xff] }
  0x7a   : > { %1016 = vmatmul.mubr.f32.gmra.mxu0 %v234_v25  ;;  %1336 = vmatmul.mubr.f32.gmra.mxu1 %v362_v26  ;;  %v266_v25 = vld [vmem:[%s2680_s14 + $0x210] sm:$0xff] }
  0x7b   : > { %2194 = vmatprep.mubr.msk.f32.mxu0 %vm481_vm0, %v237_v27  ;;  %2258 = vmatprep.mubr.msk.f32.mxu1 %vm481_vm0, %v365_v28  ;;  %v394_v26 = vld [vmem:[%s2680_s14 + $0x610] sm:$0xff]  ;;  %v269_v27 = vld [vmem:[%s2680_s14 + $0x228] sm:$0xff] }
  0x7c   : > { %v397_v28 = vld [vmem:[%s2680_s14 + $0x628] sm:$0xff] }
  0x7e   : > { %1021 = vmatmul.mubr.f32.gmra.mxu0 %v236_v29  ;;  %1341 = vmatmul.mubr.f32.gmra.mxu1 %v364_v30  ;;  %v268_v29 = vld [vmem:[%s2680_s14 + $0x220] sm:$0xff] }
  0x7f   : > { %2195 = vmatprep.mubr.msk.f32.mxu0 %vm481_vm0, %v239_v31  ;;  %2259 = vmatprep.mubr.msk.f32.mxu1 %vm481_vm0, %v367_v32  ;;  %v396_v30 = vld [vmem:[%s2680_s14 + $0x620] sm:$0xff]  ;;  %v271_v31 = vld [vmem:[%s2680_s14 + $0x238] sm:$0xff] }
  0x80   : > { %v399_v32 = vld [vmem:[%s2680_s14 + $0x638] sm:$0xff] }
  0x82   : > { %1026 = vmatmul.mubr.f32.gmra.mxu0 %v238_v33  ;;  %1346 = vmatmul.mubr.f32.gmra.mxu1 %v366_v34  ;;  %v270_v33 = vld [vmem:[%s2680_s14 + $0x230] sm:$0xff] }
  0x83   : > { %2196 = vmatprep.mubr.msk.f32.mxu0 %vm481_vm0, %v241_v35  ;;  %2260 = vmatprep.mubr.msk.f32.mxu1 %vm481_vm0, %v369_v36  ;;  %v398_v34 = vld [vmem:[%s2680_s14 + $0x630] sm:$0xff]  ;;  %v273_v35 = vld [vmem:[%s2680_s14 + $0x248] sm:$0xff] }
  0x84   : > { %v401_v36 = vld [vmem:[%s2680_s14 + $0x648] sm:$0xff] }
  0x86   : > { %1031 = vmatmul.mubr.f32.gmra.mxu0 %v240_v37  ;;  %1351 = vmatmul.mubr.f32.gmra.mxu1 %v368_v38  ;;  %v272_v37 = vld [vmem:[%s2680_s14 + $0x240] sm:$0xff] }
  0x87   : > { %2197 = vmatprep.mubr.msk.f32.mxu0 %vm481_vm0, %v243_v39  ;;  %2261 = vmatprep.mubr.msk.f32.mxu1 %vm481_vm0, %v371_v40  ;;  %v400_v38 = vld [vmem:[%s2680_s14 + $0x640] sm:$0xff]  ;;  %v275_v39 = vld [vmem:[%s2680_s14 + $0x258] sm:$0xff] }
  0x88   : > { %v403_v40 = vld [vmem:[%s2680_s14 + $0x658] sm:$0xff] }
  0x8a   : > { %1036 = vmatmul.mubr.f32.gmra.mxu0 %v242_v41  ;;  %1356 = vmatmul.mubr.f32.gmra.mxu1 %v370_v42  ;;  %v274_v41 = vld [vmem:[%s2680_s14 + $0x250] sm:$0xff] }
  0x8b   : > { %2198 = vmatprep.mubr.msk.f32.mxu0 %vm481_vm0, %v245_v43  ;;  %2262 = vmatprep.mubr.msk.f32.mxu1 %vm481_vm0, %v373_v44  ;;  %v402_v42 = vld [vmem:[%s2680_s14 + $0x650] sm:$0xff]  ;;  %v277_v43 = vld [vmem:[%s2680_s14 + $0x268] sm:$0xff] }
  0x8c   : > { %v405_v44 = vld [vmem:[%s2680_s14 + $0x668] sm:$0xff] }
  0x8e   : > { %1041 = vmatmul.mubr.f32.gmra.mxu0 %v244_v45  ;;  %1361 = vmatmul.mubr.f32.gmra.mxu1 %v372_v46  ;;  %v276_v45 = vld [vmem:[%s2680_s14 + $0x260] sm:$0xff] }
  0x8f   : > { %2199 = vmatprep.mubr.msk.f32.mxu0 %vm481_vm0, %v247_v47  ;;  %2263 = vmatprep.mubr.msk.f32.mxu1 %vm481_vm0, %v375_v48  ;;  %v404_v46 = vld [vmem:[%s2680_s14 + $0x660] sm:$0xff]  ;;  %v279_v47 = vld [vmem:[%s2680_s14 + $0x278] sm:$0xff] }
  0x90   : > { %v407_v48 = vld [vmem:[%s2680_s14 + $0x678] sm:$0xff] }
  0x92   : > { %1046 = vmatmul.mubr.f32.gmra.mxu0 %v246_v49  ;;  %1366 = vmatmul.mubr.f32.gmra.mxu1 %v374_v50  ;;  %v278_v49 = vld [vmem:[%s2680_s14 + $0x270] sm:$0xff] }
  0x93   : > { %2200 = vmatprep.mubr.msk.f32.mxu0 %vm481_vm0, %v249_v51  ;;  %2264 = vmatprep.mubr.msk.f32.mxu1 %vm481_vm0, %v377_v52  ;;  %v406_v50 = vld [vmem:[%s2680_s14 + $0x670] sm:$0xff]  ;;  %v281_v51 = vld [vmem:[%s2680_s14 + $0x288] sm:$0xff] }
  0x94   : > { %v409_v52 = vld [vmem:[%s2680_s14 + $0x688] sm:$0xff] }
  0x96   : > { %1051 = vmatmul.mubr.f32.gmra.mxu0 %v248_v53  ;;  %1371 = vmatmul.mubr.f32.gmra.mxu1 %v376_v54  ;;  %v280_v53 = vld [vmem:[%s2680_s14 + $0x280] sm:$0xff] }
  0x97   : > { %2201 = vmatprep.mubr.msk.f32.mxu0 %vm481_vm0, %v251_v55  ;;  %2265 = vmatprep.mubr.msk.f32.mxu1 %vm481_vm0, %v379_v56  ;;  %v408_v54 = vld [vmem:[%s2680_s14 + $0x680] sm:$0xff]  ;;  %v283_v55 = vld [vmem:[%s2680_s14 + $0x298] sm:$0xff] }
  0x98   : > { %v411_v56 = vld [vmem:[%s2680_s14 + $0x698] sm:$0xff] }
  0x9a   : > { %1056 = vmatmul.mubr.f32.gmra.mxu0 %v250_v57  ;;  %1376 = vmatmul.mubr.f32.gmra.mxu1 %v378_v58  ;;  %v282_v57 = vld [vmem:[%s2680_s14 + $0x290] sm:$0xff] }
  0x9b   : > { %2202 = vmatprep.mubr.msk.f32.mxu0 %vm481_vm0, %v253_v59  ;;  %2266 = vmatprep.mubr.msk.f32.mxu1 %vm481_vm0, %v381_v60  ;;  %v410_v58 = vld [vmem:[%s2680_s14 + $0x690] sm:$0xff]  ;;  %v285_v59 = vld [vmem:[%s2680_s14 + $0x2a8] sm:$0xff] }
  0x9c   : > { %v413_v60 = vld [vmem:[%s2680_s14 + $0x6a8] sm:$0xff] }
  0x9e   : > { %1061 = vmatmul.mubr.f32.gmra.mxu0 %v252_v61  ;;  %1381 = vmatmul.mubr.f32.gmra.mxu1 %v380_v62  ;;  %v284_v61 = vld [vmem:[%s2680_s14 + $0x2a0] sm:$0xff] }
  0x9f   : > { %2203 = vmatprep.mubr.msk.f32.mxu0 %vm481_vm0, %v255_v63  ;;  %2267 = vmatprep.mubr.msk.f32.mxu1 %vm481_vm0, %v383_v0  ;;  %v412_v62 = vld [vmem:[%s2680_s14 + $0x6a0] sm:$0xff]  ;;  %v287_v63 = vld [vmem:[%s2680_s14 + $0x2b8] sm:$0xff] }
  0xa0   : > { %v415_v0 = vld [vmem:[%s2680_s14 + $0x6b8] sm:$0xff] }
  0xa2   : > { %1066 = vmatmul.mubr.f32.gmra.mxu0 %v254_v1  ;;  %1386 = vmatmul.mubr.f32.gmra.mxu1 %v382_v2  ;;  %v286_v1 = vld [vmem:[%s2680_s14 + $0x2b0] sm:$0xff] }
  0xa3   : > { %2204 = vmatprep.mubr.msk.f32.mxu0 %vm481_vm0, %v257_v3  ;;  %2268 = vmatprep.mubr.msk.f32.mxu1 %vm481_vm0, %v385_v4  ;;  %v414_v2 = vld [vmem:[%s2680_s14 + $0x6b0] sm:$0xff]  ;;  %v289_v3 = vld [vmem:[%s2680_s14 + $0x2c8] sm:$0xff] }
  0xa4   : > { %v417_v4 = vld [vmem:[%s2680_s14 + $0x6c8] sm:$0xff] }
  0xa6   : > { %1071 = vmatmul.mubr.f32.gmra.mxu0 %v256_v5  ;;  %1391 = vmatmul.mubr.f32.gmra.mxu1 %v384_v6  ;;  %v288_v5 = vld [vmem:[%s2680_s14 + $0x2c0] sm:$0xff] }
  0xa7   : > { %2205 = vmatprep.mubr.msk.f32.mxu0 %vm481_vm0, %v259_v7  ;;  %2269 = vmatprep.mubr.msk.f32.mxu1 %vm481_vm0, %v387_v8  ;;  %v416_v6 = vld [vmem:[%s2680_s14 + $0x6c0] sm:$0xff]  ;;  %v291_v7 = vld [vmem:[%s2680_s14 + $0x2d8] sm:$0xff] }
  0xa8   : > { %v419_v8 = vld [vmem:[%s2680_s14 + $0x6d8] sm:$0xff] }
  0xaa   : > { %1076 = vmatmul.mubr.f32.gmra.mxu0 %v258_v9  ;;  %1396 = vmatmul.mubr.f32.gmra.mxu1 %v386_v10  ;;  %v290_v9 = vld [vmem:[%s2680_s14 + $0x2d0] sm:$0xff] }
  0xab   : > { %2206 = vmatprep.mubr.msk.f32.mxu0 %vm481_vm0, %v261_v11  ;;  %2270 = vmatprep.mubr.msk.f32.mxu1 %vm481_vm0, %v389_v12  ;;  %v418_v10 = vld [vmem:[%s2680_s14 + $0x6d0] sm:$0xff]  ;;  %v293_v11 = vld [vmem:[%s2680_s14 + $0x2e8] sm:$0xff] }
  0xac   : > { %v421_v12 = vld [vmem:[%s2680_s14 + $0x6e8] sm:$0xff] }
  0xae   : > { %1081 = vmatmul.mubr.f32.gmra.mxu0 %v260_v13  ;;  %1401 = vmatmul.mubr.f32.gmra.mxu1 %v388_v14  ;;  %v292_v13 = vld [vmem:[%s2680_s14 + $0x2e0] sm:$0xff] }
  0xaf   : > { %2207 = vmatprep.mubr.msk.f32.mxu0 %vm481_vm0, %v263_v15  ;;  %2271 = vmatprep.mubr.msk.f32.mxu1 %vm481_vm0, %v391_v16  ;;  %v420_v14 = vld [vmem:[%s2680_s14 + $0x6e0] sm:$0xff]  ;;  %v295_v15 = vld [vmem:[%s2680_s14 + $0x2f8] sm:$0xff] }
  0xb0   : > { %v423_v16 = vld [vmem:[%s2680_s14 + $0x6f8] sm:$0xff] }
  0xb2   : > { %1086 = vmatmul.mubr.f32.gmra.mxu0 %v262_v17  ;;  %1406 = vmatmul.mubr.f32.gmra.mxu1 %v390_v18  ;;  %v294_v17 = vld [vmem:[%s2680_s14 + $0x2f0] sm:$0xff] }
  0xb3   : > { %2208 = vmatprep.mubr.msk.f32.mxu0 %vm481_vm0, %v265_v19  ;;  %2272 = vmatprep.mubr.msk.f32.mxu1 %vm481_vm0, %v393_v20  ;;  %v422_v18 = vld [vmem:[%s2680_s14 + $0x6f0] sm:$0xff]  ;;  %v297_v19 = vld [vmem:[%s2680_s14 + $0x308] sm:$0xff] }
  0xb4   : > { %v425_v20 = vld [vmem:[%s2680_s14 + $0x708] sm:$0xff] }
  0xb6   : > { %1091 = vmatmul.mubr.f32.gmra.mxu0 %v264_v21  ;;  %1411 = vmatmul.mubr.f32.gmra.mxu1 %v392_v22  ;;  %v296_v21 = vld [vmem:[%s2680_s14 + $0x300] sm:$0xff] }
  0xb7   : > { %2209 = vmatprep.mubr.msk.f32.mxu0 %vm481_vm0, %v267_v23  ;;  %2273 = vmatprep.mubr.msk.f32.mxu1 %vm481_vm0, %v395_v24  ;;  %v424_v22 = vld [vmem:[%s2680_s14 + $0x700] sm:$0xff]  ;;  %v299_v24 = vld [vmem:[%s2680_s14 + $0x318] sm:$0xff] }
  0xb8   : > { %v2987_v23 = vld [vmem:[%s3550_s2] ss:$0 sm:$0xff] }
  0xba   : > { %1096 = vmatmul.mubr.f32.gmra.mxu0 %v266_v25  ;;  %1416 = vmatmul.mubr.f32.gmra.mxu1 %v394_v26  ;;  %v427_v25 = vld [vmem:[%s2680_s14 + $0x718] sm:$0xff] }
  0xbb   : > { %2210 = vmatprep.mubr.msk.f32.mxu0 %vm481_vm0, %v269_v27  ;;  %2274 = vmatprep.mubr.msk.f32.mxu1 %vm481_vm0, %v397_v28 }
  0xbe   : > { %1101 = vmatmul.mubr.f32.gmra.mxu0 %v268_v29  ;;  %1421 = vmatmul.mubr.f32.gmra.mxu1 %v396_v30  ;;  %v298_v30 = vld [vmem:[%s2680_s14 + $0x310] sm:$0xff] }
  0xbf   : > { %2211 = vmatprep.mubr.msk.f32.mxu0 %vm481_vm0, %v271_v31  ;;  %2275 = vmatprep.mubr.msk.f32.mxu1 %vm481_vm0, %v399_v32  ;;  %v426_v31 = vld [vmem:[%s2680_s14 + $0x710] sm:$0xff] }
  0xc2   : > { %1106 = vmatmul.mubr.f32.gmra.mxu0 %v270_v33  ;;  %1426 = vmatmul.mubr.f32.gmra.mxu1 %v398_v34  ;;  %v301_v34 = vld [vmem:[%s2680_s14 + $0x328] sm:$0xff] }
  0xc3   : > { %2212 = vmatprep.mubr.msk.f32.mxu0 %vm481_vm0, %v273_v35  ;;  %2276 = vmatprep.mubr.msk.f32.mxu1 %vm481_vm0, %v401_v36  ;;  %v429_v35 = vld [vmem:[%s2680_s14 + $0x728] sm:$0xff] }
  0xc6   : > { %1111 = vmatmul.mubr.f32.gmra.mxu0 %v272_v37  ;;  %1431 = vmatmul.mubr.f32.gmra.mxu1 %v400_v38 }
  0xc7   : > { %2213 = vmatprep.mubr.msk.f32.mxu0 %vm481_vm0, %v275_v39  ;;  %2277 = vmatprep.mubr.msk.f32.mxu1 %vm481_vm0, %v403_v40  ;;  %v300_v40 = vld [vmem:[%s2680_s14 + $0x320] sm:$0xff] }
  0xca   : > { %1116 = vmatmul.mubr.f32.gmra.mxu0 %v274_v41  ;;  %1436 = vmatmul.mubr.f32.gmra.mxu1 %v402_v42  ;;  %v428_v41 = vld [vmem:[%s2680_s14 + $0x720] sm:$0xff] }
  0xcb   : > { %2214 = vmatprep.mubr.msk.f32.mxu0 %vm481_vm0, %v277_v43  ;;  %2278 = vmatprep.mubr.msk.f32.mxu1 %vm481_vm0, %v405_v44  ;;  %v303_v44 = vld [vmem:[%s2680_s14 + $0x338] sm:$0xff] }
  0xce   : > { %1121 = vmatmul.mubr.f32.gmra.mxu0 %v276_v45  ;;  %1441 = vmatmul.mubr.f32.gmra.mxu1 %v404_v46  ;;  %v431_v45 = vld [vmem:[%s2680_s14 + $0x738] sm:$0xff] }
  0xcf   : > { %2215 = vmatprep.mubr.msk.f32.mxu0 %vm481_vm0, %v279_v47  ;;  %2279 = vmatprep.mubr.msk.f32.mxu1 %vm481_vm0, %v407_v48 }
  0xd2   : > { %1126 = vmatmul.mubr.f32.gmra.mxu0 %v278_v49  ;;  %1446 = vmatmul.mubr.f32.gmra.mxu1 %v406_v50  ;;  %v302_v50 = vld [vmem:[%s2680_s14 + $0x330] sm:$0xff] }
  0xd3   : > { %2216 = vmatprep.mubr.msk.f32.mxu0 %vm481_vm0, %v281_v51  ;;  %2280 = vmatprep.mubr.msk.f32.mxu1 %vm481_vm0, %v409_v52  ;;  %v430_v51 = vld [vmem:[%s2680_s14 + $0x730] sm:$0xff] }
  0xd6   : > { %1131 = vmatmul.mubr.f32.gmra.mxu0 %v280_v53  ;;  %1451 = vmatmul.mubr.f32.gmra.mxu1 %v408_v54  ;;  %v305_v54 = vld [vmem:[%s2680_s14 + $0x348] sm:$0xff] }
  0xd7   : > { %2217 = vmatprep.mubr.msk.f32.mxu0 %vm481_vm0, %v283_v55  ;;  %2281 = vmatprep.mubr.msk.f32.mxu1 %vm481_vm0, %v411_v56  ;;  %v433_v55 = vld [vmem:[%s2680_s14 + $0x748] sm:$0xff] }
  0xda   : > { %1136 = vmatmul.mubr.f32.gmra.mxu0 %v282_v57  ;;  %1456 = vmatmul.mubr.f32.gmra.mxu1 %v410_v58 }
  0xdb   : > { %2218 = vmatprep.mubr.msk.f32.mxu0 %vm481_vm0, %v285_v59  ;;  %2282 = vmatprep.mubr.msk.f32.mxu1 %vm481_vm0, %v413_v60  ;;  %v304_v60 = vld [vmem:[%s2680_s14 + $0x340] sm:$0xff] }
  0xde   : > { %1141 = vmatmul.mubr.f32.gmra.mxu0 %v284_v61  ;;  %1461 = vmatmul.mubr.f32.gmra.mxu1 %v412_v62  ;;  %v432_v61 = vld [vmem:[%s2680_s14 + $0x740] sm:$0xff] }
  0xdf   : > { %2219 = vmatprep.mubr.msk.f32.mxu0 %vm481_vm0, %v287_v63  ;;  %2283 = vmatprep.mubr.msk.f32.mxu1 %vm481_vm0, %v415_v0  ;;  %v307_v0 = vld [vmem:[%s2680_s14 + $0x358] sm:$0xff] }
  0xe2   : > { %1146 = vmatmul.mubr.f32.gmra.mxu0 %v286_v1  ;;  %1466 = vmatmul.mubr.f32.gmra.mxu1 %v414_v2  ;;  %v435_v1 = vld [vmem:[%s2680_s14 + $0x758] sm:$0xff] }
  0xe3   : > { %2220 = vmatprep.mubr.msk.f32.mxu0 %vm481_vm0, %v289_v3  ;;  %2284 = vmatprep.mubr.msk.f32.mxu1 %vm481_vm0, %v417_v4 }
  0xe6   : > { %1151 = vmatmul.mubr.f32.gmra.mxu0 %v288_v5  ;;  %1471 = vmatmul.mubr.f32.gmra.mxu1 %v416_v6  ;;  %v306_v6 = vld [vmem:[%s2680_s14 + $0x350] sm:$0xff] }
  0xe7   : > { %2221 = vmatprep.mubr.msk.f32.mxu0 %vm481_vm0, %v291_v7  ;;  %2285 = vmatprep.mubr.msk.f32.mxu1 %vm481_vm0, %v419_v8  ;;  %v434_v7 = vld [vmem:[%s2680_s14 + $0x750] sm:$0xff] }
  0xea   : > { %1156 = vmatmul.mubr.f32.gmra.mxu0 %v290_v9  ;;  %1476 = vmatmul.mubr.f32.gmra.mxu1 %v418_v10  ;;  %v309_v10 = vld [vmem:[%s2680_s14 + $0x368] sm:$0xff] }
  0xeb   : > { %2222 = vmatprep.mubr.msk.f32.mxu0 %vm481_vm0, %v293_v11  ;;  %2286 = vmatprep.mubr.msk.f32.mxu1 %vm481_vm0, %v421_v12  ;;  %v437_v11 = vld [vmem:[%s2680_s14 + $0x768] sm:$0xff] }
  0xee   : > { %1161 = vmatmul.mubr.f32.gmra.mxu0 %v292_v13  ;;  %1481 = vmatmul.mubr.f32.gmra.mxu1 %v420_v14 }
  0xef   : > { %2223 = vmatprep.mubr.msk.f32.mxu0 %vm481_vm0, %v295_v15  ;;  %2287 = vmatprep.mubr.msk.f32.mxu1 %vm481_vm0, %v423_v16  ;;  %v308_v16 = vld [vmem:[%s2680_s14 + $0x360] sm:$0xff] }
  0xf2   : > { %1166 = vmatmul.mubr.f32.gmra.mxu0 %v294_v17  ;;  %1486 = vmatmul.mubr.f32.gmra.mxu1 %v422_v18  ;;  %v436_v17 = vld [vmem:[%s2680_s14 + $0x760] sm:$0xff] }
  0xf3   : > { %2224 = vmatprep.mubr.msk.f32.mxu0 %vm481_vm0, %v297_v19  ;;  %2288 = vmatprep.mubr.msk.f32.mxu1 %vm481_vm0, %v425_v20  ;;  %v311_v20 = vld [vmem:[%s2680_s14 + $0x378] sm:$0xff] }
  0xf6   : > { %v932_v26 = vpop.f32.mrf.mxu0  ;;  %1171 = vmatmul.mubr.f32.gmra.mxu0 %v296_v21  ;;  %v1252_v27 = vpop.f32.mrf.mxu1  ;;  %1491 = vmatmul.mubr.f32.gmra.mxu1 %v424_v22  ;;  %v439_v21 = vld [vmem:[%s2680_s14 + $0x778] sm:$0xff] }
  0xf7   : > { %v933_v28 = vadd.f32 %v2987_v23, %v932_v26  ;;  %v1253_v29 = vadd.f32 %v2987_v23, %v1252_v27  ;;  %2225 = vmatprep.mubr.msk.f32.mxu0 %vm481_vm0, %v299_v24  ;;  %2289 = vmatprep.mubr.msk.f32.mxu1 %vm481_vm0, %v427_v25  ;;  %v310_v27 = vld [vmem:[%s2680_s14 + $0x370] sm:$0xff] }
  0xf8   : > { %v934_v32 = vpop.f32.mrf.mxu0  ;;  %v1254_v33 = vpop.f32.mrf.mxu1 }
  0xf9   : > { %1571 = vst [vmem:[%s2999_s12] sm:$0xff] %v933_v28  ;;  %1635 = vst [vmem:[%s2999_s12 + $0x200] sm:$0xff] %v1253_v29  ;;  %v438_v28 = vld [vmem:[%s2680_s14 + $0x770] sm:$0xff]  ;;  %v441_v32 = vld [vmem:[%s2680_s14 + $0x788] sm:$0xff] }
  0xfa   : > { %v937_v36 = vpop.f32.mrf.mxu0  ;;  %1176 = vmatmul.mubr.f32.gmra.mxu0 %v298_v30  ;;  %v1257_v37 = vpop.f32.mrf.mxu1  ;;  %1496 = vmatmul.mubr.f32.gmra.mxu1 %v426_v31  ;;  %v313_v31 = vld [vmem:[%s2680_s14 + $0x388] sm:$0xff] }
  0xfb   : > { %v938_v38 = vadd.f32 %v2987_v23, %v937_v36  ;;  %v1258_v39 = vadd.f32 %v2987_v23, %v1257_v37  ;;  %2226 = vmatprep.mubr.msk.f32.mxu0 %vm481_vm0, %v301_v34  ;;  %2290 = vmatprep.mubr.msk.f32.mxu1 %vm481_vm0, %v429_v35  ;;  %v312_v37 = vld [vmem:[%s2680_s14 + $0x380] sm:$0xff] }
  0xfc   : > { %v939_v42 = vpop.f32.mrf.mxu0  ;;  %v1259_v43 = vpop.f32.mrf.mxu1 }
  0xfd   : > { %1572 = vst [vmem:[%s2999_s12 + $0x8] sm:$0xff] %v938_v38  ;;  %1636 = vst [vmem:[%s2999_s12 + $0x208] sm:$0xff] %v1258_v39  ;;  %v440_v38 = vld [vmem:[%s2680_s14 + $0x780] sm:$0xff]  ;;  %v443_v42 = vld [vmem:[%s2680_s14 + $0x798] sm:$0xff] }
  0xfe   : > { %v942_v46 = vpop.f32.mrf.mxu0  ;;  %1181 = vmatmul.mubr.f32.gmra.mxu0 %v300_v40  ;;  %v1262_v47 = vpop.f32.mrf.mxu1  ;;  %1501 = vmatmul.mubr.f32.gmra.mxu1 %v428_v41  ;;  %v315_v41 = vld [vmem:[%s2680_s14 + $0x398] sm:$0xff] }
  0xff   : > { %v943_v48 = vadd.f32 %v2987_v23, %v942_v46  ;;  %v1263_v49 = vadd.f32 %v2987_v23, %v1262_v47  ;;  %2227 = vmatprep.mubr.msk.f32.mxu0 %vm481_vm0, %v303_v44  ;;  %2291 = vmatprep.mubr.msk.f32.mxu1 %vm481_vm0, %v431_v45  ;;  %v314_v47 = vld [vmem:[%s2680_s14 + $0x390] sm:$0xff] }
 0x100   : > { %v944_v52 = vpop.f32.mrf.mxu0  ;;  %v1264_v53 = vpop.f32.mrf.mxu1 }
 0x101   : > { %1573 = vst [vmem:[%s2999_s12 + $0x10] sm:$0xff] %v943_v48  ;;  %1637 = vst [vmem:[%s2999_s12 + $0x210] sm:$0xff] %v1263_v49  ;;  %v442_v48 = vld [vmem:[%s2680_s14 + $0x790] sm:$0xff]  ;;  %v445_v52 = vld [vmem:[%s2680_s14 + $0x7a8] sm:$0xff] }
 0x102   : > { %v947_v56 = vpop.f32.mrf.mxu0  ;;  %1186 = vmatmul.mubr.f32.gmra.mxu0 %v302_v50  ;;  %v1267_v57 = vpop.f32.mrf.mxu1  ;;  %1506 = vmatmul.mubr.f32.gmra.mxu1 %v430_v51  ;;  %v317_v51 = vld [vmem:[%s2680_s14 + $0x3a8] sm:$0xff] }
 0x103   : > { %v948_v58 = vadd.f32 %v2987_v23, %v947_v56  ;;  %v1268_v59 = vadd.f32 %v2987_v23, %v1267_v57  ;;  %2228 = vmatprep.mubr.msk.f32.mxu0 %vm481_vm0, %v305_v54  ;;  %2292 = vmatprep.mubr.msk.f32.mxu1 %vm481_vm0, %v433_v55  ;;  %v316_v57 = vld [vmem:[%s2680_s14 + $0x3a0] sm:$0xff] }
 0x104   : > { %v949_v62 = vpop.f32.mrf.mxu0  ;;  %v1269_v63 = vpop.f32.mrf.mxu1 }
 0x105   : > { %1574 = vst [vmem:[%s2999_s12 + $0x18] sm:$0xff] %v948_v58  ;;  %1638 = vst [vmem:[%s2999_s12 + $0x218] sm:$0xff] %v1268_v59  ;;  %v444_v58 = vld [vmem:[%s2680_s14 + $0x7a0] sm:$0xff]  ;;  %v447_v62 = vld [vmem:[%s2680_s14 + $0x7b8] sm:$0xff] }
 0x106   : > { %v952_v2 = vpop.f32.mrf.mxu0  ;;  %1191 = vmatmul.mubr.f32.gmra.mxu0 %v304_v60  ;;  %v1272_v3 = vpop.f32.mrf.mxu1  ;;  %1511 = vmatmul.mubr.f32.gmra.mxu1 %v432_v61  ;;  %v319_v61 = vld [vmem:[%s2680_s14 + $0x3b8] sm:$0xff] }
 0x107   : > { %v953_v4 = vadd.f32 %v2987_v23, %v952_v2  ;;  %v1273_v5 = vadd.f32 %v2987_v23, %v1272_v3  ;;  %2229 = vmatprep.mubr.msk.f32.mxu0 %vm481_vm0, %v307_v0  ;;  %2293 = vmatprep.mubr.msk.f32.mxu1 %vm481_vm0, %v435_v1  ;;  %v318_v3 = vld [vmem:[%s2680_s14 + $0x3b0] sm:$0xff] }
 0x108   : > { %v954_v8 = vpop.f32.mrf.mxu0  ;;  %v1274_v9 = vpop.f32.mrf.mxu1 }
 0x109   : > { %1575 = vst [vmem:[%s2999_s12 + $0x20] sm:$0xff] %v953_v4  ;;  %1639 = vst [vmem:[%s2999_s12 + $0x220] sm:$0xff] %v1273_v5  ;;  %v446_v4 = vld [vmem:[%s2680_s14 + $0x7b0] sm:$0xff]  ;;  %v449_v8 = vld [vmem:[%s2680_s14 + $0x7c8] sm:$0xff] }
 0x10a   : > { %v957_v12 = vpop.f32.mrf.mxu0  ;;  %1196 = vmatmul.mubr.f32.gmra.mxu0 %v306_v6  ;;  %v1277_v13 = vpop.f32.mrf.mxu1  ;;  %1516 = vmatmul.mubr.f32.gmra.mxu1 %v434_v7  ;;  %v321_v7 = vld [vmem:[%s2680_s14 + $0x3c8] sm:$0xff] }
 0x10b   : > { %v958_v14 = vadd.f32 %v2987_v23, %v957_v12  ;;  %v1278_v15 = vadd.f32 %v2987_v23, %v1277_v13  ;;  %2230 = vmatprep.mubr.msk.f32.mxu0 %vm481_vm0, %v309_v10  ;;  %2294 = vmatprep.mubr.msk.f32.mxu1 %vm481_vm0, %v437_v11  ;;  %v320_v13 = vld [vmem:[%s2680_s14 + $0x3c0] sm:$0xff] }
 0x10c   : > { %v959_v18 = vpop.f32.mrf.mxu0  ;;  %v1279_v19 = vpop.f32.mrf.mxu1 }
 0x10d   : > { %1576 = vst [vmem:[%s2999_s12 + $0x28] sm:$0xff] %v958_v14  ;;  %1640 = vst [vmem:[%s2999_s12 + $0x228] sm:$0xff] %v1278_v15  ;;  %v448_v14 = vld [vmem:[%s2680_s14 + $0x7c0] sm:$0xff]  ;;  %v451_v18 = vld [vmem:[%s2680_s14 + $0x7d8] sm:$0xff] }
 0x10e   : > { %v962_v22 = vpop.f32.mrf.mxu0  ;;  %1201 = vmatmul.mubr.f32.gmra.mxu0 %v308_v16  ;;  %v1282_v24 = vpop.f32.mrf.mxu1  ;;  %1521 = vmatmul.mubr.f32.gmra.mxu1 %v436_v17  ;;  %v323_v17 = vld [vmem:[%s2680_s14 + $0x3d8] sm:$0xff] }
 0x10f   : > { %v963_v25 = vadd.f32 %v2987_v23, %v962_v22  ;;  %v1283_v26 = vadd.f32 %v2987_v23, %v1282_v24  ;;  %2231 = vmatprep.mubr.msk.f32.mxu0 %vm481_vm0, %v311_v20  ;;  %2295 = vmatprep.mubr.msk.f32.mxu1 %vm481_vm0, %v439_v21  ;;  %v322_v24 = vld [vmem:[%s2680_s14 + $0x3d0] sm:$0xff] }
 0x110   : > { %v964_v29 = vpop.f32.mrf.mxu0  ;;  %v1284_v30 = vpop.f32.mrf.mxu1 }
 0x111   : > { %1577 = vst [vmem:[%s2999_s12 + $0x30] sm:$0xff] %v963_v25  ;;  %1641 = vst [vmem:[%s2999_s12 + $0x230] sm:$0xff] %v1283_v26  ;;  %v450_v25 = vld [vmem:[%s2680_s14 + $0x7d0] sm:$0xff]  ;;  %v453_v29 = vld [vmem:[%s2680_s14 + $0x7e8] sm:$0xff] }
 0x112   : > { %v967_v33 = vpop.f32.mrf.mxu0  ;;  %1206 = vmatmul.mubr.f32.gmra.mxu0 %v310_v27  ;;  %v1287_v34 = vpop.f32.mrf.mxu1  ;;  %1526 = vmatmul.mubr.f32.gmra.mxu1 %v438_v28  ;;  %v325_v28 = vld [vmem:[%s2680_s14 + $0x3e8] sm:$0xff] }
 0x113   : > { %v968_v35 = vadd.f32 %v2987_v23, %v967_v33  ;;  %v1288_v36 = vadd.f32 %v2987_v23, %v1287_v34  ;;  %2232 = vmatprep.mubr.msk.f32.mxu0 %vm481_vm0, %v313_v31  ;;  %2296 = vmatprep.mubr.msk.f32.mxu1 %vm481_vm0, %v441_v32  ;;  %v324_v34 = vld [vmem:[%s2680_s14 + $0x3e0] sm:$0xff] }
 0x114   : > { %v969_v39 = vpop.f32.mrf.mxu0  ;;  %v1289_v40 = vpop.f32.mrf.mxu1 }
 0x115   : > { %1578 = vst [vmem:[%s2999_s12 + $0x38] sm:$0xff] %v968_v35  ;;  %1642 = vst [vmem:[%s2999_s12 + $0x238] sm:$0xff] %v1288_v36  ;;  %v452_v35 = vld [vmem:[%s2680_s14 + $0x7e0] sm:$0xff]  ;;  %v455_v39 = vld [vmem:[%s2680_s14 + $0x7f8] sm:$0xff] }
 0x116   : > { %v972_v43 = vpop.f32.mrf.mxu0  ;;  %1211 = vmatmul.mubr.f32.gmra.mxu0 %v312_v37  ;;  %v1292_v44 = vpop.f32.mrf.mxu1  ;;  %1531 = vmatmul.mubr.f32.gmra.mxu1 %v440_v38  ;;  %v327_v38 = vld [vmem:[%s2680_s14 + $0x3f8] sm:$0xff] }
 0x117   : > { %v973_v45 = vadd.f32 %v2987_v23, %v972_v43  ;;  %v1293_v46 = vadd.f32 %v2987_v23, %v1292_v44  ;;  %2233 = vmatprep.mubr.msk.f32.mxu0 %vm481_vm0, %v315_v41  ;;  %2297 = vmatprep.mubr.msk.f32.mxu1 %vm481_vm0, %v443_v42  ;;  %v326_v44 = vld [vmem:[%s2680_s14 + $0x3f0] sm:$0xff] }
 0x118   : > { %v974_v49 = vpop.f32.mrf.mxu0  ;;  %v1294_v50 = vpop.f32.mrf.mxu1 }
 0x119   : > { %1579 = vst [vmem:[%s2999_s12 + $0x40] sm:$0xff] %v973_v45  ;;  %1643 = vst [vmem:[%s2999_s12 + $0x240] sm:$0xff] %v1293_v46  ;;  %v454_v45 = vld [vmem:[%s2680_s14 + $0x7f0] sm:$0xff] }
 0x11a   : > { %v977_v53 = vpop.f32.mrf.mxu0  ;;  %1216 = vmatmul.mubr.f32.gmra.mxu0 %v314_v47  ;;  %v1297_v54 = vpop.f32.mrf.mxu1  ;;  %1536 = vmatmul.mubr.f32.gmra.mxu1 %v442_v48 }
 0x11b   : > { %v978_v55 = vadd.f32 %v2987_v23, %v977_v53  ;;  %v1298_v56 = vadd.f32 %v2987_v23, %v1297_v54  ;;  %2234 = vmatprep.mubr.msk.f32.mxu0 %vm481_vm0, %v317_v51  ;;  %2298 = vmatprep.mubr.msk.f32.mxu1 %vm481_vm0, %v445_v52 }
 0x11c   : > { %v979_v59 = vpop.f32.mrf.mxu0  ;;  %v1299_v60 = vpop.f32.mrf.mxu1 }
 0x11d   : > { %1580 = vst [vmem:[%s2999_s12 + $0x48] sm:$0xff] %v978_v55  ;;  %1644 = vst [vmem:[%s2999_s12 + $0x248] sm:$0xff] %v1298_v56 }
 0x11e   : > { %v982_v63 = vpop.f32.mrf.mxu0  ;;  %1221 = vmatmul.mubr.f32.gmra.mxu0 %v316_v57  ;;  %v1302_v0 = vpop.f32.mrf.mxu1  ;;  %1541 = vmatmul.mubr.f32.gmra.mxu1 %v444_v58 }
 0x11f   : > { %v983_v1 = vadd.f32 %v2987_v23, %v982_v63  ;;  %v1303_v2 = vadd.f32 %v2987_v23, %v1302_v0  ;;  %2235 = vmatprep.mubr.msk.f32.mxu0 %vm481_vm0, %v319_v61  ;;  %2299 = vmatprep.mubr.msk.f32.mxu1 %vm481_vm0, %v447_v62 }
 0x120   : > { %v984_v5 = vpop.f32.mrf.mxu0  ;;  %v1304_v6 = vpop.f32.mrf.mxu1 }
 0x121   : > { %1581 = vst [vmem:[%s2999_s12 + $0x50] sm:$0xff] %v983_v1  ;;  %1645 = vst [vmem:[%s2999_s12 + $0x250] sm:$0xff] %v1303_v2 }
 0x122   : > { %v987_v9 = vpop.f32.mrf.mxu0  ;;  %1226 = vmatmul.mubr.f32.gmra.mxu0 %v318_v3  ;;  %v1307_v10 = vpop.f32.mrf.mxu1  ;;  %1546 = vmatmul.mubr.f32.gmra.mxu1 %v446_v4 }
 0x123   : > { %v988_v11 = vadd.f32 %v2987_v23, %v987_v9  ;;  %v1308_v12 = vadd.f32 %v2987_v23, %v1307_v10  ;;  %2236 = vmatprep.mubr.msk.f32.mxu0 %vm481_vm0, %v321_v7  ;;  %2300 = vmatprep.mubr.msk.f32.mxu1 %vm481_vm0, %v449_v8 }
 0x124   : > { %v989_v15 = vpop.f32.mrf.mxu0  ;;  %v1309_v16 = vpop.f32.mrf.mxu1 }
 0x125   : > { %1582 = vst [vmem:[%s2999_s12 + $0x58] sm:$0xff] %v988_v11  ;;  %1646 = vst [vmem:[%s2999_s12 + $0x258] sm:$0xff] %v1308_v12 }
 0x126   : > { %v992_v19 = vpop.f32.mrf.mxu0  ;;  %1231 = vmatmul.mubr.f32.gmra.mxu0 %v320_v13  ;;  %v1312_v20 = vpop.f32.mrf.mxu1  ;;  %1551 = vmatmul.mubr.f32.gmra.mxu1 %v448_v14 }
 0x127   : > { %v993_v21 = vadd.f32 %v2987_v23, %v992_v19  ;;  %v1313_v22 = vadd.f32 %v2987_v23, %v1312_v20  ;;  %2237 = vmatprep.mubr.msk.f32.mxu0 %vm481_vm0, %v323_v17  ;;  %2301 = vmatprep.mubr.msk.f32.mxu1 %vm481_vm0, %v451_v18 }
 0x128   : > { %v994_v26 = vpop.f32.mrf.mxu0  ;;  %v1314_v27 = vpop.f32.mrf.mxu1 }
 0x129   : > { %1583 = vst [vmem:[%s2999_s12 + $0x60] sm:$0xff] %v993_v21  ;;  %1647 = vst [vmem:[%s2999_s12 + $0x260] sm:$0xff] %v1313_v22 }
 0x12a   : > { %v997_v30 = vpop.f32.mrf.mxu0  ;;  %1236 = vmatmul.mubr.f32.gmra.mxu0 %v322_v24  ;;  %v1317_v31 = vpop.f32.mrf.mxu1  ;;  %1556 = vmatmul.mubr.f32.gmra.mxu1 %v450_v25 }
 0x12b   : > { %v998_v32 = vadd.f32 %v2987_v23, %v997_v30  ;;  %v1318_v33 = vadd.f32 %v2987_v23, %v1317_v31  ;;  %2238 = vmatprep.mubr.msk.f32.mxu0 %vm481_vm0, %v325_v28  ;;  %2302 = vmatprep.mubr.msk.f32.mxu1 %vm481_vm0, %v453_v29 }
 0x12c   : > { %v999_v36 = vpop.f32.mrf.mxu0  ;;  %v1319_v37 = vpop.f32.mrf.mxu1 }
 0x12d   : > { %1584 = vst [vmem:[%s2999_s12 + $0x68] sm:$0xff] %v998_v32  ;;  %1648 = vst [vmem:[%s2999_s12 + $0x268] sm:$0xff] %v1318_v33 }
 0x12e   : > { %v1002_v40 = vpop.f32.mrf.mxu0  ;;  %1241 = vmatmul.mubr.f32.gmra.mxu0 %v324_v34  ;;  %v1322_v41 = vpop.f32.mrf.mxu1  ;;  %1561 = vmatmul.mubr.f32.gmra.mxu1 %v452_v35 }
 0x12f   : > { %v1003_v42 = vadd.f32 %v2987_v23, %v1002_v40  ;;  %v1323_v43 = vadd.f32 %v2987_v23, %v1322_v41  ;;  %2239 = vmatprep.mubr.msk.f32.mxu0 %vm481_vm0, %v327_v38  ;;  %2303 = vmatprep.mubr.msk.f32.mxu1 %vm481_vm0, %v455_v39 }
 0x130   : > { %v1004_v46 = vpop.f32.mrf.mxu0  ;;  %v1324_v47 = vpop.f32.mrf.mxu1 }
 0x131   : > { %1585 = vst [vmem:[%s2999_s12 + $0x70] sm:$0xff] %v1003_v42  ;;  %1649 = vst [vmem:[%s2999_s12 + $0x270] sm:$0xff] %v1323_v43 }
 0x132   : > { %v1007_v48 = vpop.f32.mrf.mxu0  ;;  %1246 = vmatmul.mubr.f32.gmra.mxu0 %v326_v44  ;;  %v1327_v49 = vpop.f32.mrf.mxu1  ;;  %1566 = vmatmul.mubr.f32.gmra.mxu1 %v454_v45 }
 0x133   : > { %v1008_v50 = vadd.f32 %v2987_v23, %v1007_v48  ;;  %v1328_v51 = vadd.f32 %v2987_v23, %v1327_v49 }
 0x134   : > { %v1009_v52 = vpop.f32.mrf.mxu0  ;;  %v1329_v53 = vpop.f32.mrf.mxu1 }
 0x135   : > { %1586 = vst [vmem:[%s2999_s12 + $0x78] sm:$0xff] %v1008_v50  ;;  %1650 = vst [vmem:[%s2999_s12 + $0x278] sm:$0xff] %v1328_v51 }
 0x136   : > { %v1012_v54 = vpop.f32.mrf.mxu0  ;;  %v1332_v55 = vpop.f32.mrf.mxu1 }
 0x137   : > { %v1013_v56 = vadd.f32 %v2987_v23, %v1012_v54  ;;  %v1333_v57 = vadd.f32 %v2987_v23, %v1332_v55 }
 0x138   : > { %v1014_v58 = vpop.f32.mrf.mxu0  ;;  %v1334_v59 = vpop.f32.mrf.mxu1 }
 0x139   : > { %1587 = vst [vmem:[%s2999_s12 + $0x80] sm:$0xff] %v1013_v56  ;;  %1651 = vst [vmem:[%s2999_s12 + $0x280] sm:$0xff] %v1333_v57 }
 0x13a   : > { %v1017_v60 = vpop.f32.mrf.mxu0  ;;  %v1337_v61 = vpop.f32.mrf.mxu1 }
 0x13b   : > { %v1018_v62 = vadd.f32 %v2987_v23, %v1017_v60  ;;  %v1338_v63 = vadd.f32 %v2987_v23, %v1337_v61 }
 0x13c   : > { %v1019_v0 = vpop.f32.mrf.mxu0  ;;  %v1339_v1 = vpop.f32.mrf.mxu1 }
 0x13d   : > { %1588 = vst [vmem:[%s2999_s12 + $0x88] sm:$0xff] %v1018_v62  ;;  %1652 = vst [vmem:[%s2999_s12 + $0x288] sm:$0xff] %v1338_v63 }
 0x13e   : > { %v1022_v2 = vpop.f32.mrf.mxu0  ;;  %v1342_v3 = vpop.f32.mrf.mxu1 }
 0x13f   : > { %v1023_v4 = vadd.f32 %v2987_v23, %v1022_v2  ;;  %v1343_v5 = vadd.f32 %v2987_v23, %v1342_v3 }
 0x140   : > { %v1024_v6 = vpop.f32.mrf.mxu0  ;;  %v1344_v7 = vpop.f32.mrf.mxu1 }
 0x141   : > { %1589 = vst [vmem:[%s2999_s12 + $0x90] sm:$0xff] %v1023_v4  ;;  %1653 = vst [vmem:[%s2999_s12 + $0x290] sm:$0xff] %v1343_v5 }
 0x142   : > { %v1027_v8 = vpop.f32.mrf.mxu0  ;;  %v1347_v9 = vpop.f32.mrf.mxu1 }
 0x143   : > { %v1028_v10 = vadd.f32 %v2987_v23, %v1027_v8  ;;  %v1348_v11 = vadd.f32 %v2987_v23, %v1347_v9 }
 0x144   : > { %v1029_v12 = vpop.f32.mrf.mxu0  ;;  %v1349_v13 = vpop.f32.mrf.mxu1 }
 0x145   : > { %1590 = vst [vmem:[%s2999_s12 + $0x98] sm:$0xff] %v1028_v10  ;;  %1654 = vst [vmem:[%s2999_s12 + $0x298] sm:$0xff] %v1348_v11 }
 0x146   : > { %v1032_v14 = vpop.f32.mrf.mxu0  ;;  %v1352_v15 = vpop.f32.mrf.mxu1 }
 0x147   : > { %v1033_v16 = vadd.f32 %v2987_v23, %v1032_v14  ;;  %v1353_v17 = vadd.f32 %v2987_v23, %v1352_v15 }
 0x148   : > { %v1034_v18 = vpop.f32.mrf.mxu0  ;;  %v1354_v19 = vpop.f32.mrf.mxu1 }
 0x149   : > { %1591 = vst [vmem:[%s2999_s12 + $0xa0] sm:$0xff] %v1033_v16  ;;  %1655 = vst [vmem:[%s2999_s12 + $0x2a0] sm:$0xff] %v1353_v17 }
 0x14a   : > { %v1037_v20 = vpop.f32.mrf.mxu0  ;;  %v1357_v21 = vpop.f32.mrf.mxu1 }
 0x14b   : > { %v1038_v22 = vadd.f32 %v2987_v23, %v1037_v20  ;;  %v1358_v24 = vadd.f32 %v2987_v23, %v1357_v21 }
 0x14c   : > { %v1039_v25 = vpop.f32.mrf.mxu0  ;;  %v1359_v26 = vpop.f32.mrf.mxu1 }
 0x14d   : > { %1592 = vst [vmem:[%s2999_s12 + $0xa8] sm:$0xff] %v1038_v22  ;;  %1656 = vst [vmem:[%s2999_s12 + $0x2a8] sm:$0xff] %v1358_v24 }
 0x14e   : > { %v1042_v27 = vpop.f32.mrf.mxu0  ;;  %v1362_v28 = vpop.f32.mrf.mxu1 }
 0x14f   : > { %v1043_v29 = vadd.f32 %v2987_v23, %v1042_v27  ;;  %v1363_v30 = vadd.f32 %v2987_v23, %v1362_v28 }
 0x150   : > { %v1044_v31 = vpop.f32.mrf.mxu0  ;;  %v1364_v32 = vpop.f32.mrf.mxu1 }
 0x151   : > { %1593 = vst [vmem:[%s2999_s12 + $0xb0] sm:$0xff] %v1043_v29  ;;  %1657 = vst [vmem:[%s2999_s12 + $0x2b0] sm:$0xff] %v1363_v30 }
 0x152   : > { %v1047_v33 = vpop.f32.mrf.mxu0  ;;  %v1367_v34 = vpop.f32.mrf.mxu1 }
 0x153   : > { %v1048_v35 = vadd.f32 %v2987_v23, %v1047_v33  ;;  %v1368_v36 = vadd.f32 %v2987_v23, %v1367_v34 }
 0x154   : > { %v1049_v37 = vpop.f32.mrf.mxu0  ;;  %v1369_v38 = vpop.f32.mrf.mxu1 }
 0x155   : > { %1594 = vst [vmem:[%s2999_s12 + $0xb8] sm:$0xff] %v1048_v35  ;;  %1658 = vst [vmem:[%s2999_s12 + $0x2b8] sm:$0xff] %v1368_v36 }
 0x156   : > { %v1052_v39 = vpop.f32.mrf.mxu0  ;;  %v1372_v40 = vpop.f32.mrf.mxu1 }
 0x157   : > { %v1053_v41 = vadd.f32 %v2987_v23, %v1052_v39  ;;  %v1373_v42 = vadd.f32 %v2987_v23, %v1372_v40 }
 0x158   : > { %v1054_v43 = vpop.f32.mrf.mxu0  ;;  %v1374_v44 = vpop.f32.mrf.mxu1 }
 0x159   : > { %1595 = vst [vmem:[%s2999_s12 + $0xc0] sm:$0xff] %v1053_v41  ;;  %1659 = vst [vmem:[%s2999_s12 + $0x2c0] sm:$0xff] %v1373_v42 }
 0x15a   : > { %v1057_v45 = vpop.f32.mrf.mxu0  ;;  %v1377_v46 = vpop.f32.mrf.mxu1 }
 0x15b   : > { %v1058_v47 = vadd.f32 %v2987_v23, %v1057_v45  ;;  %v1378_v48 = vadd.f32 %v2987_v23, %v1377_v46 }
 0x15c   : > { %v1059_v49 = vpop.f32.mrf.mxu0  ;;  %v1379_v50 = vpop.f32.mrf.mxu1 }
 0x15d   : > { %1596 = vst [vmem:[%s2999_s12 + $0xc8] sm:$0xff] %v1058_v47  ;;  %1660 = vst [vmem:[%s2999_s12 + $0x2c8] sm:$0xff] %v1378_v48 }
 0x15e   : > { %v1062_v51 = vpop.f32.mrf.mxu0  ;;  %v1382_v52 = vpop.f32.mrf.mxu1 }
 0x15f   : > { %v1063_v53 = vadd.f32 %v2987_v23, %v1062_v51  ;;  %v1383_v54 = vadd.f32 %v2987_v23, %v1382_v52 }
 0x160   : > { %v1064_v55 = vpop.f32.mrf.mxu0  ;;  %v1384_v56 = vpop.f32.mrf.mxu1 }
 0x161   : > { %1597 = vst [vmem:[%s2999_s12 + $0xd0] sm:$0xff] %v1063_v53  ;;  %1661 = vst [vmem:[%s2999_s12 + $0x2d0] sm:$0xff] %v1383_v54 }
 0x162   : > { %v1067_v57 = vpop.f32.mrf.mxu0  ;;  %v1387_v58 = vpop.f32.mrf.mxu1 }
 0x163   : > { %v1068_v59 = vadd.f32 %v2987_v23, %v1067_v57  ;;  %v1388_v60 = vadd.f32 %v2987_v23, %v1387_v58 }
 0x164   : > { %v1069_v61 = vpop.f32.mrf.mxu0  ;;  %v1389_v62 = vpop.f32.mrf.mxu1 }
 0x165   : > { %1598 = vst [vmem:[%s2999_s12 + $0xd8] sm:$0xff] %v1068_v59  ;;  %1662 = vst [vmem:[%s2999_s12 + $0x2d8] sm:$0xff] %v1388_v60 }
 0x166   : > { %v1072_v63 = vpop.f32.mrf.mxu0  ;;  %v1392_v0 = vpop.f32.mrf.mxu1 }
 0x167   : > { %v1073_v1 = vadd.f32 %v2987_v23, %v1072_v63  ;;  %v1393_v2 = vadd.f32 %v2987_v23, %v1392_v0 }
 0x168   : > { %v1074_v3 = vpop.f32.mrf.mxu0  ;;  %v1394_v4 = vpop.f32.mrf.mxu1 }
 0x169   : > { %1599 = vst [vmem:[%s2999_s12 + $0xe0] sm:$0xff] %v1073_v1  ;;  %1663 = vst [vmem:[%s2999_s12 + $0x2e0] sm:$0xff] %v1393_v2 }
 0x16a   : > { %v1077_v5 = vpop.f32.mrf.mxu0  ;;  %v1397_v6 = vpop.f32.mrf.mxu1 }
 0x16b   : > { %v1078_v7 = vadd.f32 %v2987_v23, %v1077_v5  ;;  %v1398_v8 = vadd.f32 %v2987_v23, %v1397_v6 }
 0x16c   : > { %v1079_v9 = vpop.f32.mrf.mxu0  ;;  %v1399_v10 = vpop.f32.mrf.mxu1 }
 0x16d   : > { %1600 = vst [vmem:[%s2999_s12 + $0xe8] sm:$0xff] %v1078_v7  ;;  %1664 = vst [vmem:[%s2999_s12 + $0x2e8] sm:$0xff] %v1398_v8 }
 0x16e   : > { %v1082_v11 = vpop.f32.mrf.mxu0  ;;  %v1402_v12 = vpop.f32.mrf.mxu1 }
 0x16f   : > { %v1083_v13 = vadd.f32 %v2987_v23, %v1082_v11  ;;  %v1403_v14 = vadd.f32 %v2987_v23, %v1402_v12 }
 0x170   : > { %v1084_v15 = vpop.f32.mrf.mxu0  ;;  %v1404_v16 = vpop.f32.mrf.mxu1 }
 0x171   : > { %1601 = vst [vmem:[%s2999_s12 + $0xf0] sm:$0xff] %v1083_v13  ;;  %1665 = vst [vmem:[%s2999_s12 + $0x2f0] sm:$0xff] %v1403_v14 }
 0x172   : > { %v1087_v17 = vpop.f32.mrf.mxu0  ;;  %v1407_v18 = vpop.f32.mrf.mxu1 }
 0x173   : > { %v1088_v19 = vadd.f32 %v2987_v23, %v1087_v17  ;;  %v1408_v20 = vadd.f32 %v2987_v23, %v1407_v18 }
 0x174   : > { %v1089_v21 = vpop.f32.mrf.mxu0  ;;  %v1409_v22 = vpop.f32.mrf.mxu1 }
 0x175   : > { %1602 = vst [vmem:[%s2999_s12 + $0xf8] sm:$0xff] %v1088_v19  ;;  %1666 = vst [vmem:[%s2999_s12 + $0x2f8] sm:$0xff] %v1408_v20 }
 0x176   : > { %v1092_v24 = vpop.f32.mrf.mxu0  ;;  %v1412_v25 = vpop.f32.mrf.mxu1 }
 0x177   : > { %v1093_v26 = vadd.f32 %v2987_v23, %v1092_v24  ;;  %v1413_v27 = vadd.f32 %v2987_v23, %v1412_v25 }
 0x178   : > { %v1094_v28 = vpop.f32.mrf.mxu0  ;;  %v1414_v29 = vpop.f32.mrf.mxu1 }
 0x179   : > { %1603 = vst [vmem:[%s2999_s12 + $0x100] sm:$0xff] %v1093_v26  ;;  %1667 = vst [vmem:[%s2999_s12 + $0x300] sm:$0xff] %v1413_v27 }
 0x17a   : > { %v1097_v30 = vpop.f32.mrf.mxu0  ;;  %v1417_v31 = vpop.f32.mrf.mxu1 }
 0x17b   : > { %v1098_v32 = vadd.f32 %v2987_v23, %v1097_v30  ;;  %v1418_v33 = vadd.f32 %v2987_v23, %v1417_v31 }
 0x17c   : > { %v1099_v34 = vpop.f32.mrf.mxu0  ;;  %v1419_v35 = vpop.f32.mrf.mxu1 }
 0x17d   : > { %1604 = vst [vmem:[%s2999_s12 + $0x108] sm:$0xff] %v1098_v32  ;;  %1668 = vst [vmem:[%s2999_s12 + $0x308] sm:$0xff] %v1418_v33 }
 0x17e   : > { %v1102_v36 = vpop.f32.mrf.mxu0  ;;  %v1422_v37 = vpop.f32.mrf.mxu1 }
 0x17f   : > { %v1103_v38 = vadd.f32 %v2987_v23, %v1102_v36  ;;  %v1423_v39 = vadd.f32 %v2987_v23, %v1422_v37 }
 0x180   : > { %v1104_v40 = vpop.f32.mrf.mxu0  ;;  %v1424_v41 = vpop.f32.mrf.mxu1 }
 0x181   : > { %1605 = vst [vmem:[%s2999_s12 + $0x110] sm:$0xff] %v1103_v38  ;;  %1669 = vst [vmem:[%s2999_s12 + $0x310] sm:$0xff] %v1423_v39 }
 0x182   : > { %v1107_v42 = vpop.f32.mrf.mxu0  ;;  %v1427_v43 = vpop.f32.mrf.mxu1 }
 0x183   : > { %v1108_v44 = vadd.f32 %v2987_v23, %v1107_v42  ;;  %v1428_v45 = vadd.f32 %v2987_v23, %v1427_v43 }
 0x184   : > { %v1109_v46 = vpop.f32.mrf.mxu0  ;;  %v1429_v47 = vpop.f32.mrf.mxu1 }
 0x185   : > { %1606 = vst [vmem:[%s2999_s12 + $0x118] sm:$0xff] %v1108_v44  ;;  %1670 = vst [vmem:[%s2999_s12 + $0x318] sm:$0xff] %v1428_v45 }
 0x186   : > { %v1112_v48 = vpop.f32.mrf.mxu0  ;;  %v1432_v49 = vpop.f32.mrf.mxu1 }
 0x187   : > { %v1113_v50 = vadd.f32 %v2987_v23, %v1112_v48  ;;  %v1433_v51 = vadd.f32 %v2987_v23, %v1432_v49 }
 0x188   : > { %v1114_v52 = vpop.f32.mrf.mxu0  ;;  %v1434_v53 = vpop.f32.mrf.mxu1 }
 0x189   : > { %1607 = vst [vmem:[%s2999_s12 + $0x120] sm:$0xff] %v1113_v50  ;;  %1671 = vst [vmem:[%s2999_s12 + $0x320] sm:$0xff] %v1433_v51 }
 0x18a   : > { %v1117_v54 = vpop.f32.mrf.mxu0  ;;  %v1437_v55 = vpop.f32.mrf.mxu1 }
 0x18b   : > { %v1118_v56 = vadd.f32 %v2987_v23, %v1117_v54  ;;  %v1438_v57 = vadd.f32 %v2987_v23, %v1437_v55 }
 0x18c   : > { %v1119_v58 = vpop.f32.mrf.mxu0  ;;  %v1439_v59 = vpop.f32.mrf.mxu1 }
 0x18d   : > { %1608 = vst [vmem:[%s2999_s12 + $0x128] sm:$0xff] %v1118_v56  ;;  %1672 = vst [vmem:[%s2999_s12 + $0x328] sm:$0xff] %v1438_v57 }
 0x18e   : > { %v1122_v60 = vpop.f32.mrf.mxu0  ;;  %v1442_v61 = vpop.f32.mrf.mxu1 }
 0x18f   : > { %v1123_v62 = vadd.f32 %v2987_v23, %v1122_v60  ;;  %v1443_v63 = vadd.f32 %v2987_v23, %v1442_v61 }
 0x190   : > { %v1124_v0 = vpop.f32.mrf.mxu0  ;;  %v1444_v1 = vpop.f32.mrf.mxu1 }
 0x191   : > { %1609 = vst [vmem:[%s2999_s12 + $0x130] sm:$0xff] %v1123_v62  ;;  %1673 = vst [vmem:[%s2999_s12 + $0x330] sm:$0xff] %v1443_v63  ;;  %v3280_v1 = vld [vmem:[%s3550_s2] ss:$0 sm:$0xff] }
 0x192   : > { %v1127_v2 = vpop.f32.mrf.mxu0  ;;  %v1447_v3 = vpop.f32.mrf.mxu1 }
 0x193   : > { %v1128_v4 = vadd.f32 %v2987_v23, %v1127_v2  ;;  %v1448_v5 = vadd.f32 %v2987_v23, %v1447_v3 }
 0x194   : > { %v1129_v6 = vpop.f32.mrf.mxu0  ;;  %v1449_v7 = vpop.f32.mrf.mxu1 }
 0x195   : > { %1610 = vst [vmem:[%s2999_s12 + $0x138] sm:$0xff] %v1128_v4  ;;  %1674 = vst [vmem:[%s2999_s12 + $0x338] sm:$0xff] %v1448_v5 }
 0x196   : > { %v1132_v8 = vpop.f32.mrf.mxu0  ;;  %v1452_v9 = vpop.f32.mrf.mxu1 }
 0x197   : > { %v1133_v10 = vadd.f32 %v2987_v23, %v1132_v8  ;;  %v1453_v11 = vadd.f32 %v2987_v23, %v1452_v9 }
 0x198   : > { %v1134_v12 = vpop.f32.mrf.mxu0  ;;  %v1454_v13 = vpop.f32.mrf.mxu1 }
 0x199   : > { %1611 = vst [vmem:[%s2999_s12 + $0x140] sm:$0xff] %v1133_v10  ;;  %1675 = vst [vmem:[%s2999_s12 + $0x340] sm:$0xff] %v1453_v11 }
 0x19a   : > { %v1137_v14 = vpop.f32.mrf.mxu0  ;;  %v1457_v15 = vpop.f32.mrf.mxu1 }
 0x19b   : > { %v1138_v16 = vadd.f32 %v2987_v23, %v1137_v14  ;;  %v1458_v17 = vadd.f32 %v2987_v23, %v1457_v15 }
 0x19c   : > { %v1139_v18 = vpop.f32.mrf.mxu0  ;;  %v1459_v19 = vpop.f32.mrf.mxu1 }
 0x19d   : > { %1612 = vst [vmem:[%s2999_s12 + $0x148] sm:$0xff] %v1138_v16  ;;  %1676 = vst [vmem:[%s2999_s12 + $0x348] sm:$0xff] %v1458_v17 }
 0x19e   : > { %v1142_v20 = vpop.f32.mrf.mxu0  ;;  %v1462_v21 = vpop.f32.mrf.mxu1 }
 0x19f   : > { %v1143_v22 = vadd.f32 %v2987_v23, %v1142_v20  ;;  %v1463_v24 = vadd.f32 %v2987_v23, %v1462_v21 }
 0x1a0   : > { %v1144_v25 = vpop.f32.mrf.mxu0  ;;  %v1464_v26 = vpop.f32.mrf.mxu1 }
 0x1a1   : > { %1613 = vst [vmem:[%s2999_s12 + $0x150] sm:$0xff] %v1143_v22  ;;  %1677 = vst [vmem:[%s2999_s12 + $0x350] sm:$0xff] %v1463_v24 }
 0x1a2   : > { %v1147_v27 = vpop.f32.mrf.mxu0  ;;  %v1467_v28 = vpop.f32.mrf.mxu1 }
 0x1a3   : > { %v1148_v29 = vadd.f32 %v2987_v23, %v1147_v27  ;;  %v1468_v30 = vadd.f32 %v2987_v23, %v1467_v28 }
 0x1a4   : > { %v1149_v31 = vpop.f32.mrf.mxu0  ;;  %v1469_v32 = vpop.f32.mrf.mxu1 }
 0x1a5   : > { %1614 = vst [vmem:[%s2999_s12 + $0x158] sm:$0xff] %v1148_v29  ;;  %1678 = vst [vmem:[%s2999_s12 + $0x358] sm:$0xff] %v1468_v30 }
 0x1a6   : > { %v1152_v33 = vpop.f32.mrf.mxu0  ;;  %v1472_v34 = vpop.f32.mrf.mxu1 }
 0x1a7   : > { %v1153_v35 = vadd.f32 %v2987_v23, %v1152_v33  ;;  %v1473_v36 = vadd.f32 %v2987_v23, %v1472_v34 }
 0x1a8   : > { %v1154_v37 = vpop.f32.mrf.mxu0  ;;  %v1474_v38 = vpop.f32.mrf.mxu1 }
 0x1a9   : > { %1615 = vst [vmem:[%s2999_s12 + $0x160] sm:$0xff] %v1153_v35  ;;  %1679 = vst [vmem:[%s2999_s12 + $0x360] sm:$0xff] %v1473_v36 }
 0x1aa   : > { %v1157_v39 = vpop.f32.mrf.mxu0  ;;  %v1477_v40 = vpop.f32.mrf.mxu1 }
 0x1ab   : > { %v1158_v41 = vadd.f32 %v2987_v23, %v1157_v39  ;;  %v1478_v42 = vadd.f32 %v2987_v23, %v1477_v40 }
 0x1ac   : > { %v1159_v43 = vpop.f32.mrf.mxu0  ;;  %v1479_v44 = vpop.f32.mrf.mxu1 }
 0x1ad   : > { %1616 = vst [vmem:[%s2999_s12 + $0x168] sm:$0xff] %v1158_v41  ;;  %1680 = vst [vmem:[%s2999_s12 + $0x368] sm:$0xff] %v1478_v42 }
 0x1ae   : > { %v1162_v45 = vpop.f32.mrf.mxu0  ;;  %v1482_v46 = vpop.f32.mrf.mxu1 }
 0x1af   : > { %v1163_v47 = vadd.f32 %v2987_v23, %v1162_v45  ;;  %v1483_v48 = vadd.f32 %v2987_v23, %v1482_v46 }
 0x1b0   : > { %v1164_v49 = vpop.f32.mrf.mxu0  ;;  %v1484_v50 = vpop.f32.mrf.mxu1 }
 0x1b1   : > { %1617 = vst [vmem:[%s2999_s12 + $0x170] sm:$0xff] %v1163_v47  ;;  %1681 = vst [vmem:[%s2999_s12 + $0x370] sm:$0xff] %v1483_v48 }
 0x1b2   : > { %v1167_v51 = vpop.f32.mrf.mxu0  ;;  %v1487_v52 = vpop.f32.mrf.mxu1 }
 0x1b3   : > { %v1168_v53 = vadd.f32 %v2987_v23, %v1167_v51  ;;  %v1488_v54 = vadd.f32 %v2987_v23, %v1487_v52 }
 0x1b4   : > { %v1169_v55 = vpop.f32.mrf.mxu0  ;;  %v1489_v56 = vpop.f32.mrf.mxu1 }
 0x1b5   : > { %1618 = vst [vmem:[%s2999_s12 + $0x178] sm:$0xff] %v1168_v53  ;;  %1682 = vst [vmem:[%s2999_s12 + $0x378] sm:$0xff] %v1488_v54 }
 0x1b6   : > { %v1172_v57 = vpop.f32.mrf.mxu0  ;;  %v1492_v58 = vpop.f32.mrf.mxu1 }
 0x1b7   : > { %v1173_v59 = vadd.f32 %v2987_v23, %v1172_v57  ;;  %v1493_v60 = vadd.f32 %v2987_v23, %v1492_v58 }
 0x1b8   : > { %v1174_v61 = vpop.f32.mrf.mxu0  ;;  %v1494_v62 = vpop.f32.mrf.mxu1 }
 0x1b9   : > { %1619 = vst [vmem:[%s2999_s12 + $0x180] sm:$0xff] %v1173_v59  ;;  %1683 = vst [vmem:[%s2999_s12 + $0x380] sm:$0xff] %v1493_v60 }
 0x1ba   : > { %v1177_v63 = vpop.f32.mrf.mxu0  ;;  %v1497_v0 = vpop.f32.mrf.mxu1 }
 0x1bb   : > { %v1178_v2 = vadd.f32 %v3280_v1, %v1177_v63  ;;  %v1498_v3 = vadd.f32 %v3280_v1, %v1497_v0 }
 0x1bc   : > { %v1179_v4 = vpop.f32.mrf.mxu0  ;;  %v1499_v5 = vpop.f32.mrf.mxu1 }
 0x1bd   : > { %1620 = vst [vmem:[%s2999_s12 + $0x188] sm:$0xff] %v1178_v2  ;;  %1684 = vst [vmem:[%s2999_s12 + $0x388] sm:$0xff] %v1498_v3 }
 0x1be   : > { %v1182_v23 = vpop.f32.mrf.mxu0  ;;  %v1502_v6 = vpop.f32.mrf.mxu1 }
 0x1bf   : > { %v1183_v7 = vadd.f32 %v3280_v1, %v1182_v23  ;;  %v1503_v8 = vadd.f32 %v3280_v1, %v1502_v6 }
 0x1c0   : > { %v1184_v9 = vpop.f32.mrf.mxu0  ;;  %v1504_v10 = vpop.f32.mrf.mxu1 }
 0x1c1   : > { %1621 = vst [vmem:[%s2999_s12 + $0x190] sm:$0xff] %v1183_v7  ;;  %1685 = vst [vmem:[%s2999_s12 + $0x390] sm:$0xff] %v1503_v8 }
 0x1c2   : > { %v1187_v11 = vpop.f32.mrf.mxu0  ;;  %v1507_v12 = vpop.f32.mrf.mxu1 }
 0x1c3   : > { %v1188_v13 = vadd.f32 %v3280_v1, %v1187_v11  ;;  %v1508_v14 = vadd.f32 %v3280_v1, %v1507_v12 }
 0x1c4   : > { %v1189_v15 = vpop.f32.mrf.mxu0  ;;  %v1509_v16 = vpop.f32.mrf.mxu1 }
 0x1c5   : > { %1622 = vst [vmem:[%s2999_s12 + $0x198] sm:$0xff] %v1188_v13  ;;  %1686 = vst [vmem:[%s2999_s12 + $0x398] sm:$0xff] %v1508_v14 }
 0x1c6   : > { %v1192_v17 = vpop.f32.mrf.mxu0  ;;  %v1512_v18 = vpop.f32.mrf.mxu1 }
 0x1c7   : > { %v1193_v19 = vadd.f32 %v3280_v1, %v1192_v17  ;;  %v1513_v20 = vadd.f32 %v3280_v1, %v1512_v18 }
 0x1c8   : > { %v1194_v21 = vpop.f32.mrf.mxu0  ;;  %v1514_v22 = vpop.f32.mrf.mxu1 }
 0x1c9   : > { %1623 = vst [vmem:[%s2999_s12 + $0x1a0] sm:$0xff] %v1193_v19  ;;  %1687 = vst [vmem:[%s2999_s12 + $0x3a0] sm:$0xff] %v1513_v20 }
 0x1ca   : > { %v1197_v24 = vpop.f32.mrf.mxu0  ;;  %v1517_v25 = vpop.f32.mrf.mxu1 }
 0x1cb   : > { %v1198_v26 = vadd.f32 %v3280_v1, %v1197_v24  ;;  %v1518_v27 = vadd.f32 %v3280_v1, %v1517_v25 }
 0x1cc   : > { %v1199_v28 = vpop.f32.mrf.mxu0  ;;  %v1519_v29 = vpop.f32.mrf.mxu1 }
 0x1cd   : > { %1624 = vst [vmem:[%s2999_s12 + $0x1a8] sm:$0xff] %v1198_v26  ;;  %1688 = vst [vmem:[%s2999_s12 + $0x3a8] sm:$0xff] %v1518_v27 }
 0x1ce   : > { %v1202_v30 = vpop.f32.mrf.mxu0  ;;  %v1522_v31 = vpop.f32.mrf.mxu1 }
 0x1cf   : > { %v1203_v32 = vadd.f32 %v3280_v1, %v1202_v30  ;;  %v1523_v33 = vadd.f32 %v3280_v1, %v1522_v31 }
 0x1d0   : > { %v1204_v34 = vpop.f32.mrf.mxu0  ;;  %v1524_v35 = vpop.f32.mrf.mxu1 }
 0x1d1   : > { %1625 = vst [vmem:[%s2999_s12 + $0x1b0] sm:$0xff] %v1203_v32  ;;  %1689 = vst [vmem:[%s2999_s12 + $0x3b0] sm:$0xff] %v1523_v33 }
 0x1d2   : > { %v1207_v36 = vpop.f32.mrf.mxu0  ;;  %v1527_v37 = vpop.f32.mrf.mxu1 }
 0x1d3   : > { %v1208_v38 = vadd.f32 %v3280_v1, %v1207_v36  ;;  %v1528_v39 = vadd.f32 %v3280_v1, %v1527_v37 }
 0x1d4   : > { %v1209_v40 = vpop.f32.mrf.mxu0  ;;  %v1529_v41 = vpop.f32.mrf.mxu1 }
 0x1d5   : > { %1626 = vst [vmem:[%s2999_s12 + $0x1b8] sm:$0xff] %v1208_v38  ;;  %1690 = vst [vmem:[%s2999_s12 + $0x3b8] sm:$0xff] %v1528_v39 }
 0x1d6   : > { %v1212_v42 = vpop.f32.mrf.mxu0  ;;  %v1532_v43 = vpop.f32.mrf.mxu1 }
 0x1d7   : > { %v1213_v44 = vadd.f32 %v3280_v1, %v1212_v42  ;;  %v1533_v45 = vadd.f32 %v3280_v1, %v1532_v43 }
 0x1d8   : > { %v1214_v46 = vpop.f32.mrf.mxu0  ;;  %v1534_v47 = vpop.f32.mrf.mxu1 }
 0x1d9   : > { %1627 = vst [vmem:[%s2999_s12 + $0x1c0] sm:$0xff] %v1213_v44  ;;  %1691 = vst [vmem:[%s2999_s12 + $0x3c0] sm:$0xff] %v1533_v45 }
 0x1da   : > { %v1217_v48 = vpop.f32.mrf.mxu0  ;;  %v1537_v49 = vpop.f32.mrf.mxu1 }
 0x1db   : > { %v1218_v50 = vadd.f32 %v3280_v1, %v1217_v48  ;;  %v1538_v51 = vadd.f32 %v3280_v1, %v1537_v49 }
 0x1dc   : > { %v1219_v52 = vpop.f32.mrf.mxu0  ;;  %v1539_v53 = vpop.f32.mrf.mxu1 }
 0x1dd   : > { %1628 = vst [vmem:[%s2999_s12 + $0x1c8] sm:$0xff] %v1218_v50  ;;  %1692 = vst [vmem:[%s2999_s12 + $0x3c8] sm:$0xff] %v1538_v51 }
 0x1de   : > { %v1222_v54 = vpop.f32.mrf.mxu0  ;;  %v1542_v55 = vpop.f32.mrf.mxu1 }
 0x1df   : > { %v1223_v56 = vadd.f32 %v3280_v1, %v1222_v54  ;;  %v1543_v57 = vadd.f32 %v3280_v1, %v1542_v55 }
 0x1e0   : > { %v1224_v58 = vpop.f32.mrf.mxu0  ;;  %v1544_v59 = vpop.f32.mrf.mxu1 }
 0x1e1   : > { %1629 = vst [vmem:[%s2999_s12 + $0x1d0] sm:$0xff] %v1223_v56  ;;  %1693 = vst [vmem:[%s2999_s12 + $0x3d0] sm:$0xff] %v1543_v57 }
 0x1e2   : > { %v1227_v60 = vpop.f32.mrf.mxu0  ;;  %v1547_v61 = vpop.f32.mrf.mxu1 }
 0x1e3   : > { %v1228_v62 = vadd.f32 %v3280_v1, %v1227_v60  ;;  %v1548_v63 = vadd.f32 %v3280_v1, %v1547_v61 }
 0x1e4   : > { %v1229_v0 = vpop.f32.mrf.mxu0  ;;  %v1549_v2 = vpop.f32.mrf.mxu1 }
 0x1e5   : > { %1630 = vst [vmem:[%s2999_s12 + $0x1d8] sm:$0xff] %v1228_v62  ;;  %1694 = vst [vmem:[%s2999_s12 + $0x3d8] sm:$0xff] %v1548_v63 }
 0x1e6   : > { %v1232_v3 = vpop.f32.mrf.mxu0  ;;  %v1552_v4 = vpop.f32.mrf.mxu1 }
 0x1e7   : > { %v1233_v5 = vadd.f32 %v3280_v1, %v1232_v3  ;;  %v1553_v23 = vadd.f32 %v3280_v1, %v1552_v4 }
 0x1e8   : > { %v1234_v6 = vpop.f32.mrf.mxu0  ;;  %v1554_v7 = vpop.f32.mrf.mxu1 }
 0x1e9   : > { %1631 = vst [vmem:[%s2999_s12 + $0x1e0] sm:$0xff] %v1233_v5  ;;  %1695 = vst [vmem:[%s2999_s12 + $0x3e0] sm:$0xff] %v1553_v23 }
 0x1ea   : > { %v1237_v8 = vpop.f32.mrf.mxu0  ;;  %v1557_v9 = vpop.f32.mrf.mxu1 }
 0x1eb   : > { %v1238_v10 = vadd.f32 %v3280_v1, %v1237_v8  ;;  %v1558_v11 = vadd.f32 %v3280_v1, %v1557_v9 }
 0x1ec   : > { %v1239_v12 = vpop.f32.mrf.mxu0  ;;  %v1559_v13 = vpop.f32.mrf.mxu1 }
 0x1ed   : > { %1632 = vst [vmem:[%s2999_s12 + $0x1e8] sm:$0xff] %v1238_v10  ;;  %1696 = vst [vmem:[%s2999_s12 + $0x3e8] sm:$0xff] %v1558_v11 }
 0x1ee   : > { %v1242_v14 = vpop.f32.mrf.mxu0  ;;  %v1562_v15 = vpop.f32.mrf.mxu1 }
 0x1ef   : > { %v1243_v16 = vadd.f32 %v3280_v1, %v1242_v14  ;;  %v1563_v17 = vadd.f32 %v3280_v1, %v1562_v15 }
 0x1f0   : > { %v1244_v18 = vpop.f32.mrf.mxu0  ;;  %v1564_v19 = vpop.f32.mrf.mxu1 }
 0x1f1   : > { %1633 = vst [vmem:[%s2999_s12 + $0x1f0] sm:$0xff] %v1243_v16  ;;  %1697 = vst [vmem:[%s2999_s12 + $0x3f0] sm:$0xff] %v1563_v17  ;;  %1705 = sbr.rel (!%p2585_p4) target bundleno = 566 (0x236), region = 36 }
 0x1f2   : > { %v1247_v20 = vpop.f32.mrf.mxu0  ;;  %v1567_v21 = vpop.f32.mrf.mxu1 }
 0x1f3   : > { %v1248_v22 = vadd.f32 %v3280_v1, %v1247_v20  ;;  %v1568_v24 = vadd.f32 %v3280_v1, %v1567_v21 }
 0x1f4   : > { %v1249_v25 = vpop.f32.mrf.mxu0  ;;  %v1569_v26 = vpop.f32.mrf.mxu1 }
 0x1f5   : > { %1634 = vst [vmem:[%s2999_s12 + $0x1f8] sm:$0xff] %v1248_v22  ;;  %1698 = vst [vmem:[%s2999_s12 + $0x3f8] sm:$0xff] %v1568_v24 }
 0x1f6   : > { %s3562_s28 = smov (!%p1708_p8, %s1707_s28), 128 }
 0x1f7   : > { %s2306_s6 = sshll.u32 %s3562_s28, 7 }
 0x1f8   : > { %p2309_p9 = scmp.eq.s32.totalorder %s2306_s6, 0 }
 0x1f9   : > { %s3355_s7 = sshrl.u32 (!%p2309_p9), %s3562_s28, 6 }
 0x1fa   : > { %1716 = sbr.rel (%p2309_p9) target bundleno = 566 (0x236), region = 40  ;;  %p2310_p10 = scmp.le.s32.totalorder (!%p2309_p9), %s3355_s7, 0 }
 0x1ff   : > { %2123 = sbr.rel (%p2310_p10) target bundleno = 549 (0x225), region = 116  ;;  %s3553_s15 = smov (!%p2310_p10), %s3349_s5 }
 0x200   : > { %s3554_s20 = smov (!%p2310_p10), %s2999_s12  ;;  %s3364_s18 = smov (!%p2310_p10), 0  }
 0x201   : > { %s3366_s8 = smov (!%p2310_p10), 0  }
 0x204 LB: >> { %v1905_v1 = vld [vmem:[%s2513_s20] sm:$0xff]  ;;  %v1907_v27 = vld [vmem:[%s2513_s20 + $0x8] sm:$0xff]  ;;  %v1909_v28 = vld [vmem:[%s2513_s20 + $0x10] sm:$0xff]  ;;  %s2033_s9 = sadd.s32 1, %s2517_s18  ;;  %s1899_s8 = sadd.s32 1, %s2521_s8   ;;  %s2521_s8 = sphi %s3366_s8, %s1899_s8   ;;  %s2517_s18 = sphi %s3364_s18, %s3557_s18   ;;  %s2513_s20 = sphi %s3554_s20, %s3556_s20   ;;  %s2509_s15 = sphi %s3553_s15, %s3555_s15  }
 0x205   : >> { %1906 = vst [vmem:[%s2509_s15] sm:$0xff] %v1905_v1  ;;  %1908 = vst [vmem:[%s2509_s15 + $0x8] sm:$0xff] %v1907_v27  ;;  %v1911_v29 = vld [vmem:[%s2513_s20 + $0x18] sm:$0xff]  ;;  %v1913_v30 = vld [vmem:[%s2513_s20 + $0x20] sm:$0xff]  ;;  %p2034_p11 = scmp.ge.s32.totalorder %s2033_s9, %s3355_s7  ;;  %p1898_p12 = scmp.ge.s32.totalorder %s1899_s8, %s3355_s7 }
 0x206   : >> { %1910 = vst [vmem:[%s2509_s15 + $0x10] sm:$0xff] %v1909_v28  ;;  %v1915_v31 = vld [vmem:[%s2513_s20 + $0x28] sm:$0xff]  ;;  %1912 = vst [vmem:[%s2509_s15 + $0x18] sm:$0xff] %v1911_v29  ;;  %v1917_v32 = vld [vmem:[%s2513_s20 + $0x30] sm:$0xff] }
 0x207   : >> { %1914 = vst [vmem:[%s2509_s15 + $0x20] sm:$0xff] %v1913_v30  ;;  %1916 = vst [vmem:[%s2509_s15 + $0x28] sm:$0xff] %v1915_v31  ;;  %v1919_v33 = vld [vmem:[%s2513_s20 + $0x38] sm:$0xff]  ;;  %v1921_v34 = vld [vmem:[%s2513_s20 + $0x40] sm:$0xff]  ;;  %s3564_s9 = smov (%p2034_p11, %s2033_s9), 0 }
 0x208   : >> { %1918 = vst [vmem:[%s2509_s15 + $0x30] sm:$0xff] %v1917_v32  ;;  %1920 = vst [vmem:[%s2509_s15 + $0x38] sm:$0xff] %v1919_v33  ;;  %v1923_v35 = vld [vmem:[%s2513_s20 + $0x48] sm:$0xff]  ;;  %v1925_v36 = vld [vmem:[%s2513_s20 + $0x50] sm:$0xff]  ;;  %s2311_s10 = sshll.u32 %s3564_s9, 9  ;;  %s3557_s18 = smov %s3564_s9 }
 0x209   : >> { %1922 = vst [vmem:[%s2509_s15 + $0x40] sm:$0xff] %v1921_v34  ;;  %v1927_v37 = vld [vmem:[%s2513_s20 + $0x58] sm:$0xff]  ;;  %1924 = vst [vmem:[%s2509_s15 + $0x48] sm:$0xff] %v1923_v35  ;;  %v1929_v38 = vld [vmem:[%s2513_s20 + $0x60] sm:$0xff]  ;;  %s3422_s11 = scalar_lea.vmem %s2999_s12, %s2311_s10 [#allocation2]   ;;  %s3425_s14 = scalar_lea.vmem %s3349_s5, %s2311_s10  }
 0x20a   : >> { %1926 = vst [vmem:[%s2509_s15 + $0x50] sm:$0xff] %v1925_v36  ;;  %1928 = vst [vmem:[%s2509_s15 + $0x58] sm:$0xff] %v1927_v37  ;;  %v1931_v39 = vld [vmem:[%s2513_s20 + $0x68] sm:$0xff]  ;;  %v1933_v40 = vld [vmem:[%s2513_s20 + $0x70] sm:$0xff] }
 0x20b   : >> { %1930 = vst [vmem:[%s2509_s15 + $0x60] sm:$0xff] %v1929_v38  ;;  %1932 = vst [vmem:[%s2509_s15 + $0x68] sm:$0xff] %v1931_v39  ;;  %v1935_v41 = vld [vmem:[%s2513_s20 + $0x78] sm:$0xff]  ;;  %v1937_v42 = vld [vmem:[%s2513_s20 + $0x80] sm:$0xff] }
 0x20c   : >> { %1934 = vst [vmem:[%s2509_s15 + $0x70] sm:$0xff] %v1933_v40  ;;  %v1939_v43 = vld [vmem:[%s2513_s20 + $0x88] sm:$0xff]  ;;  %1936 = vst [vmem:[%s2509_s15 + $0x78] sm:$0xff] %v1935_v41  ;;  %v1941_v44 = vld [vmem:[%s2513_s20 + $0x90] sm:$0xff] }
 0x20d   : >> { %1938 = vst [vmem:[%s2509_s15 + $0x80] sm:$0xff] %v1937_v42  ;;  %1940 = vst [vmem:[%s2509_s15 + $0x88] sm:$0xff] %v1939_v43  ;;  %v1943_v45 = vld [vmem:[%s2513_s20 + $0x98] sm:$0xff]  ;;  %v1945_v46 = vld [vmem:[%s2513_s20 + $0xa0] sm:$0xff] }
 0x20e   : >> { %1942 = vst [vmem:[%s2509_s15 + $0x90] sm:$0xff] %v1941_v44  ;;  %1944 = vst [vmem:[%s2509_s15 + $0x98] sm:$0xff] %v1943_v45  ;;  %v1947_v47 = vld [vmem:[%s2513_s20 + $0xa8] sm:$0xff]  ;;  %v1949_v48 = vld [vmem:[%s2513_s20 + $0xb0] sm:$0xff] }
 0x20f   : >> { %1946 = vst [vmem:[%s2509_s15 + $0xa0] sm:$0xff] %v1945_v46  ;;  %v1951_v49 = vld [vmem:[%s2513_s20 + $0xb8] sm:$0xff]  ;;  %1948 = vst [vmem:[%s2509_s15 + $0xa8] sm:$0xff] %v1947_v47  ;;  %v1953_v50 = vld [vmem:[%s2513_s20 + $0xc0] sm:$0xff] }
 0x210   : >> { %1950 = vst [vmem:[%s2509_s15 + $0xb0] sm:$0xff] %v1949_v48  ;;  %1952 = vst [vmem:[%s2509_s15 + $0xb8] sm:$0xff] %v1951_v49  ;;  %v1955_v51 = vld [vmem:[%s2513_s20 + $0xc8] sm:$0xff]  ;;  %v1957_v52 = vld [vmem:[%s2513_s20 + $0xd0] sm:$0xff] }
 0x211   : >> { %1954 = vst [vmem:[%s2509_s15 + $0xc0] sm:$0xff] %v1953_v50  ;;  %1956 = vst [vmem:[%s2509_s15 + $0xc8] sm:$0xff] %v1955_v51  ;;  %v1959_v53 = vld [vmem:[%s2513_s20 + $0xd8] sm:$0xff]  ;;  %v1961_v54 = vld [vmem:[%s2513_s20 + $0xe0] sm:$0xff] }
 0x212   : >> { %1958 = vst [vmem:[%s2509_s15 + $0xd0] sm:$0xff] %v1957_v52  ;;  %v1963_v55 = vld [vmem:[%s2513_s20 + $0xe8] sm:$0xff]  ;;  %1960 = vst [vmem:[%s2509_s15 + $0xd8] sm:$0xff] %v1959_v53  ;;  %v1965_v56 = vld [vmem:[%s2513_s20 + $0xf0] sm:$0xff] }
 0x213   : >> { %1962 = vst [vmem:[%s2509_s15 + $0xe0] sm:$0xff] %v1961_v54  ;;  %1964 = vst [vmem:[%s2509_s15 + $0xe8] sm:$0xff] %v1963_v55  ;;  %v1967_v57 = vld [vmem:[%s2513_s20 + $0xf8] sm:$0xff]  ;;  %v1969_v58 = vld [vmem:[%s2513_s20 + $0x100] sm:$0xff] }
 0x214   : >> { %1966 = vst [vmem:[%s2509_s15 + $0xf0] sm:$0xff] %v1965_v56  ;;  %1968 = vst [vmem:[%s2509_s15 + $0xf8] sm:$0xff] %v1967_v57  ;;  %v1971_v59 = vld [vmem:[%s2513_s20 + $0x108] sm:$0xff]  ;;  %v1973_v60 = vld [vmem:[%s2513_s20 + $0x110] sm:$0xff] }
 0x215   : >> { %1970 = vst [vmem:[%s2509_s15 + $0x100] sm:$0xff] %v1969_v58  ;;  %v1975_v61 = vld [vmem:[%s2513_s20 + $0x118] sm:$0xff]  ;;  %1972 = vst [vmem:[%s2509_s15 + $0x108] sm:$0xff] %v1971_v59  ;;  %v1977_v62 = vld [vmem:[%s2513_s20 + $0x120] sm:$0xff] }
 0x216   : >> { %1974 = vst [vmem:[%s2509_s15 + $0x110] sm:$0xff] %v1973_v60  ;;  %1976 = vst [vmem:[%s2509_s15 + $0x118] sm:$0xff] %v1975_v61  ;;  %v1979_v63 = vld [vmem:[%s2513_s20 + $0x128] sm:$0xff]  ;;  %v1981_v0 = vld [vmem:[%s2513_s20 + $0x130] sm:$0xff] }
 0x217   : >> { %1978 = vst [vmem:[%s2509_s15 + $0x120] sm:$0xff] %v1977_v62  ;;  %1980 = vst [vmem:[%s2509_s15 + $0x128] sm:$0xff] %v1979_v63  ;;  %v1983_v2 = vld [vmem:[%s2513_s20 + $0x138] sm:$0xff]  ;;  %v1985_v3 = vld [vmem:[%s2513_s20 + $0x140] sm:$0xff] }
 0x218   : >> { %1982 = vst [vmem:[%s2509_s15 + $0x130] sm:$0xff] %v1981_v0  ;;  %v1987_v4 = vld [vmem:[%s2513_s20 + $0x148] sm:$0xff]  ;;  %1984 = vst [vmem:[%s2509_s15 + $0x138] sm:$0xff] %v1983_v2  ;;  %v1989_v5 = vld [vmem:[%s2513_s20 + $0x150] sm:$0xff] }
 0x219   : >> { %1986 = vst [vmem:[%s2509_s15 + $0x140] sm:$0xff] %v1985_v3  ;;  %1988 = vst [vmem:[%s2509_s15 + $0x148] sm:$0xff] %v1987_v4  ;;  %v1991_v23 = vld [vmem:[%s2513_s20 + $0x158] sm:$0xff]  ;;  %v1993_v6 = vld [vmem:[%s2513_s20 + $0x160] sm:$0xff] }
 0x21a   : >> { %1990 = vst [vmem:[%s2509_s15 + $0x150] sm:$0xff] %v1989_v5  ;;  %1992 = vst [vmem:[%s2509_s15 + $0x158] sm:$0xff] %v1991_v23  ;;  %v1995_v7 = vld [vmem:[%s2513_s20 + $0x168] sm:$0xff]  ;;  %v1997_v8 = vld [vmem:[%s2513_s20 + $0x170] sm:$0xff] }
 0x21b   : >> { %1994 = vst [vmem:[%s2509_s15 + $0x160] sm:$0xff] %v1993_v6  ;;  %v1999_v9 = vld [vmem:[%s2513_s20 + $0x178] sm:$0xff]  ;;  %1996 = vst [vmem:[%s2509_s15 + $0x168] sm:$0xff] %v1995_v7  ;;  %v2001_v10 = vld [vmem:[%s2513_s20 + $0x180] sm:$0xff] }
 0x21c   : >> { %1998 = vst [vmem:[%s2509_s15 + $0x170] sm:$0xff] %v1997_v8  ;;  %2000 = vst [vmem:[%s2509_s15 + $0x178] sm:$0xff] %v1999_v9  ;;  %v2003_v11 = vld [vmem:[%s2513_s20 + $0x188] sm:$0xff]  ;;  %v2005_v12 = vld [vmem:[%s2513_s20 + $0x190] sm:$0xff] }
 0x21d   : >> { %2002 = vst [vmem:[%s2509_s15 + $0x180] sm:$0xff] %v2001_v10  ;;  %2004 = vst [vmem:[%s2509_s15 + $0x188] sm:$0xff] %v2003_v11  ;;  %v2007_v13 = vld [vmem:[%s2513_s20 + $0x198] sm:$0xff]  ;;  %v2009_v14 = vld [vmem:[%s2513_s20 + $0x1a0] sm:$0xff] }
 0x21e   : >> { %2006 = vst [vmem:[%s2509_s15 + $0x190] sm:$0xff] %v2005_v12  ;;  %v2011_v15 = vld [vmem:[%s2513_s20 + $0x1a8] sm:$0xff]  ;;  %2008 = vst [vmem:[%s2509_s15 + $0x198] sm:$0xff] %v2007_v13  ;;  %v2013_v16 = vld [vmem:[%s2513_s20 + $0x1b0] sm:$0xff] }
 0x21f   : >> { %2010 = vst [vmem:[%s2509_s15 + $0x1a0] sm:$0xff] %v2009_v14  ;;  %2012 = vst [vmem:[%s2509_s15 + $0x1a8] sm:$0xff] %v2011_v15  ;;  %v2015_v17 = vld [vmem:[%s2513_s20 + $0x1b8] sm:$0xff]  ;;  %v2017_v18 = vld [vmem:[%s2513_s20 + $0x1c0] sm:$0xff] }
 0x220   : >> { %2014 = vst [vmem:[%s2509_s15 + $0x1b0] sm:$0xff] %v2013_v16  ;;  %2016 = vst [vmem:[%s2509_s15 + $0x1b8] sm:$0xff] %v2015_v17  ;;  %v2019_v19 = vld [vmem:[%s2513_s20 + $0x1c8] sm:$0xff]  ;;  %v2021_v20 = vld [vmem:[%s2513_s20 + $0x1d0] sm:$0xff]  ;;  %1901 = sbr.rel (!%p1898_p12) target bundleno = 516 (0x204), region = 122 }
 0x221   : >> { %2018 = vst [vmem:[%s2509_s15 + $0x1c0] sm:$0xff] %v2017_v18  ;;  %v2023_v21 = vld [vmem:[%s2513_s20 + $0x1d8] sm:$0xff]  ;;  %2020 = vst [vmem:[%s2509_s15 + $0x1c8] sm:$0xff] %v2019_v19  ;;  %v2025_v22 = vld [vmem:[%s2513_s20 + $0x1e0] sm:$0xff] }
 0x222   : >> { %2022 = vst [vmem:[%s2509_s15 + $0x1d0] sm:$0xff] %v2021_v20  ;;  %2024 = vst [vmem:[%s2509_s15 + $0x1d8] sm:$0xff] %v2023_v21  ;;  %v2027_v24 = vld [vmem:[%s2513_s20 + $0x1e8] sm:$0xff]  ;;  %v2029_v25 = vld [vmem:[%s2513_s20 + $0x1f0] sm:$0xff] }
 0x223   : >> { %2026 = vst [vmem:[%s2509_s15 + $0x1e0] sm:$0xff] %v2025_v22  ;;  %2028 = vst [vmem:[%s2509_s15 + $0x1e8] sm:$0xff] %v2027_v24  ;;  %v2031_v26 = vld [vmem:[%s2513_s20 + $0x1f8] sm:$0xff]  ;;  %s3556_s20 = smov %s3422_s11 }
 0x224   : >> { %2030 = vst [vmem:[%s2509_s15 + $0x1f0] sm:$0xff] %v2029_v25  ;;  %2032 = vst [vmem:[%s2509_s15 + $0x1f8] sm:$0xff] %v2031_v26  ;;  %s3555_s15 = smov %s3425_s14 }
 0x225 PF: > { %s3530_s17 = sand.u32 63, %s3562_s28   ;;  %s2323_s21 = sshll.u32 %s3355_s7, 9 }
 0x226   : > { %s2044_s22 = scalar_lea.vmem %s2999_s12, %s2323_s21 [#allocation2]   ;;  %s2046_s23 = scalar_lea.vmem %s3349_s5, %s2323_s21  }
 0x227   : > { %p2316_p13 = scmp.le.s32.totalorder %s3530_s17, 0 }
 0x228   : > { %s2523_s24 = smov (!%p2316_p13), %s2046_s23   ;;  %s2527_s25 = smov (!%p2316_p13), %s2044_s22  }
 0x229   : > { %2137 = sbr.rel (%p2316_p13) target bundleno = 566 (0x236), region = 127  ;;  %s2531_s26 = smov (!%p2316_p13), 0  }
 0x22a   : > { %s2535_s27 = smov (!%p2316_p13), 0  }
 0x22e LB: >> { %v2056_v1 = vld [vmem:[%s2529_s25] sm:$0xff]  ;;  %s2058_s28 = sadd.s32 1, %s2533_s26  ;;  %s2050_s27 = sadd.s32 1, %s2537_s27   ;;  %s2537_s27 = sphi %s2535_s27, %s2050_s27   ;;  %s2533_s26 = sphi %s2531_s26, %s2532_s26   ;;  %s2529_s25 = sphi %s2527_s25, %s2063_s25   ;;  %s2525_s24 = sphi %s2523_s24, %s2064_s24  }
 0x22f   : >> { %2057 = vst [vmem:[%s2525_s24] sm:$0xff] %v2056_v1  ;;  %p2059_p0 = scmp.ge.s32.totalorder %s2058_s28, %s3530_s17  ;;  %p2049_p1 = scmp.ge.s32.totalorder %s2050_s27, %s3530_s17 }
 0x231   : >> { %s3566_s28 = smov (%p2059_p0, %s2058_s28), 0  ;;  %2052 = sbr.rel (!%p2049_p1) target bundleno = 558 (0x22e), region = 133 }
 0x232   : >> { %s2317_s12 = sshll.u32 %s3566_s28, 3  ;;  %s2532_s26 = smov %s3566_s28  }
 0x233   : >> { %s2063_s25 = scalar_lea.vmem %s2044_s22, %s2317_s12 [#allocation2]   ;;  %s2064_s24 = scalar_lea.vmem %s2046_s23, %s2317_s12  }
 0x236 PF: > { %p10_p2 = scmp.ge.s32.totalorder %s2575_s16, 7   ;;  %s3558_s12 = smov %s2501_s13 }
 0x237   : > { %s3559_s13 = smov %s2583_s19  ;;  %s3560_s14 = smov %s2575_s16 }
 0x238   :  { %12 = sbr.rel (!%p10_p2) target bundleno = 2 (0x2), region = 144 }

</bundles_post_ra>
